<compile_context>
chip_gen: v5e
topology: v5e:2x2
jax: 0.10.0
libtpu: 0.0.40
codegen_flags: <defaults>
</compile_context>

<pallas_src>
import math
import functools

import jax
import jax.numpy as jnp
from jax.experimental import pallas as pl
from jax.experimental.pallas import tpu as pltpu


def _round_up(x, m):
    return ((x + m - 1) // m) * m


# ----------------------------------------------------------------------------
# Pallas kernel 1: tiled matmul + fused bias (bf16 MXU inputs, f32 accumulate)
# ----------------------------------------------------------------------------

_TM_MAX = 1024   # M tile cap (review: per-step overhead dominated at TM=256)
_TN_MAX = 256    # N tile cap (N pre-padded to a multiple of 128 at build time)
_TK_MAX = 1024   # above this the contraction dim is tiled with an accumulator


def _matmul_bias_kernel(a_ref, b_ref, bias_ref, o_ref):
    # fast path: whole K in one block -> no scratch accumulator needed
    o_ref[...] = (jnp.dot(a_ref[...], b_ref[...],
                          preferred_element_type=jnp.float32)
                  + bias_ref[...]).astype(o_ref.dtype)


def _matmul_bias_acc_kernel(a_ref, b_ref, bias_ref, o_ref, acc_ref):
    @pl.when(pl.program_id(2) == 0)
    def _():
        acc_ref[...] = jnp.zeros_like(acc_ref)

    acc_ref[...] += jnp.dot(a_ref[...], b_ref[...],
                            preferred_element_type=jnp.float32)

    @pl.when(pl.program_id(2) == pl.num_programs(2) - 1)
    def _():
        o_ref[...] = (acc_ref[...] + bias_ref[...]).astype(o_ref.dtype)


@functools.lru_cache(maxsize=None)
def _matmul_fn(Mp, Kp, Np, TM, TN, TK, out_dtype):
    nk = Kp // TK
    out_bytes = jnp.dtype(out_dtype).itemsize
    # double-buffered inputs/outputs + optional f32 scratch, sized per tiles
    est = (2 * 2 * (TM * TK + TK * TN) + 2 * 4 * TN
           + 2 * out_bytes * TM * TN + (4 * TM * TN if nk > 1 else 0))
    vmem = int(min(48 * 1024 * 1024, max(8 * 1024 * 1024, 3 * est)))
    cost = pl.CostEstimate(
        flops=2 * Mp * Np * Kp,
        transcendentals=0,
        bytes_accessed=2 * (Mp * Kp + Kp * Np) + 4 * Np + out_bytes * Mp * Np,
    )
    if nk == 1:
        call = pl.pallas_call(
            _matmul_bias_kernel,
            out_shape=jax.ShapeDtypeStruct((Mp, Np), out_dtype),
            grid_spec=pltpu.PrefetchScalarGridSpec(
                num_scalar_prefetch=0,
                grid=(Mp // TM, Np // TN),
                in_specs=[
                    pl.BlockSpec((TM, TK), lambda i, j: (i, 0)),
                    pl.BlockSpec((TK, TN), lambda i, j: (0, j)),
                    pl.BlockSpec((1, TN), lambda i, j: (0, j)),
                ],
                out_specs=pl.BlockSpec((TM, TN), lambda i, j: (i, j)),
            ),
            compiler_params=pltpu.CompilerParams(
                dimension_semantics=("parallel", "parallel"),
                vmem_limit_bytes=vmem,
            ),
            cost_estimate=cost,
        )
    else:
        call = pl.pallas_call(
            _matmul_bias_acc_kernel,
            out_shape=jax.ShapeDtypeStruct((Mp, Np), out_dtype),
            grid_spec=pltpu.PrefetchScalarGridSpec(
                num_scalar_prefetch=0,
                grid=(Mp // TM, Np // TN, nk),
                in_specs=[
                    pl.BlockSpec((TM, TK), lambda i, j, k: (i, k)),
                    pl.BlockSpec((TK, TN), lambda i, j, k: (k, j)),
                    pl.BlockSpec((1, TN), lambda i, j, k: (0, j)),
                ],
                out_specs=pl.BlockSpec((TM, TN), lambda i, j, k: (i, j)),
                scratch_shapes=[pltpu.VMEM((TM, TN), jnp.float32)],
            ),
            compiler_params=pltpu.CompilerParams(
                dimension_semantics=("parallel", "parallel", "arbitrary"),
                vmem_limit_bytes=vmem,
            ),
            cost_estimate=cost,
        )
    return jax.jit(call)


def pallas_matmul_bias(a_bf16, w_bf16, bias_f32, n_out, out_dtype=jnp.bfloat16):
    """(M, K) bf16 @ (K, Np) bf16 + bias -> (M, n_out) via the MXU."""
    M, K = a_bf16.shape
    Kw, Np = w_bf16.shape
    assert Kw == K and Np % 128 == 0

    TM = min(_TM_MAX, _round_up(M, 8))
    if M >= 64:
        # keep >= 2 blocks on the parallel M axis (dual-TC on v7x)
        TM = min(TM, _round_up((M + 1) // 2, 8))
    Mp = _round_up(M, TM)
    if Mp != M:
        a_bf16 = jnp.pad(a_bf16, ((0, Mp - M), (0, 0)))

    TN = Np if Np <= _TN_MAX else 128

    if K <= _TK_MAX:
        TK, Kp = K, K                 # single K block -> no-acc fast path
    else:
        TK = 512
        Kp = _round_up(K, TK)
        a_bf16 = jnp.pad(a_bf16, ((0, 0), (0, Kp - K)))
        w_bf16 = jnp.pad(w_bf16, ((0, Kp - K), (0, 0)))

    out = _matmul_fn(Mp, Kp, Np, TM, TN, TK, out_dtype)(a_bf16, w_bf16, bias_f32)
    if Mp != M or n_out != Np:
        out = out[:M, :n_out]
    return out


# ----------------------------------------------------------------------------
# Pallas kernel 2: direct 3x3 conv (9-tap in-VMEM accumulation, no im2col)
# ----------------------------------------------------------------------------

def _conv3x3_kernel(x_ref, w_ref, b_ref, o_ref, acc_ref, *, H, W, Cin):
    """x_ref: ((H+2)*(W+2)+8, Cin) bf16 flattened zero-padded image (1 batch)
       w_ref: (9*Cin, Np) bf16, tap-major rows; b_ref: (1, Np) f32
       o_ref: (H*(W+2), Np); row r = h*(W+2)+w (only w < W columns are valid)
       acc_ref: (H*(W+2), Np) f32 VMEM scratch accumulator."""
    Wp = W + 2
    rows = H * Wp
    for t in range(9):
        dh, dw = divmod(t, 3)
        off = dh * Wp + dw
        patch = x_ref[off:off + rows, :]                       # (rows, Cin)
        tap = jnp.dot(patch, w_ref[t * Cin:(t + 1) * Cin, :],
                      preferred_element_type=jnp.float32)
        if t == 0:
            acc_ref[...] = tap
        else:
            acc_ref[...] += tap
    o_ref[...] = (acc_ref[...] + b_ref[...]).astype(o_ref.dtype)


@functools.lru_cache(maxsize=None)
def _conv3x3_fn(B, H, W, Cin, Np, out_dtype):
    Wp = W + 2
    rows_in = (H + 2) * Wp + 8
    rows_out = H * Wp
    out_bytes = jnp.dtype(out_dtype).itemsize
    est = (2 * 2 * rows_in * Cin + 2 * 2 * 9 * Cin * Np + 2 * 4 * Np
           + 2 * out_bytes * rows_out * Np + 4 * rows_out * Np
           + 4 * rows_out * Cin)
    vmem = int(min(48 * 1024 * 1024, max(8 * 1024 * 1024, 3 * est)))
    kern = functools.partial(_conv3x3_kernel, H=H, W=W, Cin=Cin)
    cost = pl.CostEstimate(
        flops=2 * B * rows_out * 9 * Cin * Np,
        transcendentals=0,
        bytes_accessed=2 * B * rows_in * Cin + 2 * 9 * Cin * Np
        + out_bytes * B * rows_out * Np,
    )
    call = pl.pallas_call(
        kern,
        out_shape=jax.ShapeDtypeStruct((B, rows_out, Np), out_dtype),
        grid_spec=pltpu.PrefetchScalarGridSpec(
            num_scalar_prefetch=0,
            grid=(B,),
            in_specs=[
                pl.BlockSpec((None, rows_in, Cin), lambda b: (b, 0, 0)),
                pl.BlockSpec((9 * Cin, Np), lambda b: (0, 0)),
                pl.BlockSpec((1, Np), lambda b: (0, 0)),
            ],
            out_specs=pl.BlockSpec((None, rows_out, Np), lambda b: (b, 0, 0)),
            scratch_shapes=[pltpu.VMEM((rows_out, Np), jnp.float32)],
        ),
        compiler_params=pltpu.CompilerParams(
            dimension_semantics=("parallel",),
            vmem_limit_bytes=vmem,
        ),
        cost_estimate=cost,
    )
    return jax.jit(call)


def conv3x3_nhwc(x, cp, out_dtype=jnp.bfloat16):
    """3x3 conv, stride 1, pad 1: padded activation read once, 9 taps
    accumulated inside the kernel (no im2col HBM materialization)."""
    B, H, W, Cin = x.shape
    assert Cin == cp["cin"]
    cin_p = cp["cin_p"]
    Wp = W + 2
    xp = jnp.pad(x.astype(jnp.bfloat16),
                 ((0, 0), (1, 1), (1, 1), (0, cin_p - Cin)))
    x_flat = xp.reshape(B, (H + 2) * Wp, cin_p)
    x_flat = jnp.pad(x_flat, ((0, 0), (0, 8), (0, 0)))  # slack for the last tap
    out = _conv3x3_fn(B, H, W, cin_p, cp["np"], out_dtype)(x_flat, cp["w"], cp["b"])
    return out.reshape(B, H, Wp, cp["np"])[:, :, :W, :cp["n"]]


def dense_nhwc(x, dp, out_dtype=jnp.bfloat16):
    """1x1 conv / NIN with fused bias."""
    B, H, W, Cin = x.shape
    a = x.reshape(B * H * W, Cin).astype(jnp.bfloat16)
    out = pallas_matmul_bias(a, dp["w"], dp["b"], dp["n"], out_dtype=out_dtype)
    return out.reshape(B, H, W, dp["n"])


# ----------------------------------------------------------------------------
# Pallas kernel 3: fused attention (QK^T -> softmax -> PV -> proj NIN)
# ----------------------------------------------------------------------------

def _attn_kernel(qkv_ref, wp_ref, bp_ref, o_ref, *, scale):
    qkv = qkv_ref[...]                       # (S, 384) bf16, lane-padded q|k|v
    q = qkv[:, 0:128]
    k = qkv[:, 128:256]
    v = qkv[:, 256:384]
    # q @ k^T without any HBM transpose (padded channels are zero -> no effect)
    s = jax.lax.dot_general(q, k, (((1,), (1,)), ((), ())),
                            preferred_element_type=jnp.float32) * scale
    m = jnp.max(s, axis=-1, keepdims=True)
    p = jnp.exp(s - m)
    p = p * pl.reciprocal(jnp.sum(p, axis=-1, keepdims=True), approx=True)
    o = jnp.dot(p.astype(jnp.bfloat16), v,
                preferred_element_type=jnp.float32)            # (S, 128)
    # fused output-projection NIN (weight rows/cols beyond C are zero)
    o_ref[...] = (jnp.dot(o.astype(jnp.bfloat16), wp_ref[...],
                          preferred_element_type=jnp.float32)
                  + bp_ref[...]).astype(o_ref.dtype)


@functools.lru_cache(maxsize=None)
def _attn_fn(B, S, C):
    kern = functools.partial(_attn_kernel, scale=1.0 / math.sqrt(C))
    cost = pl.CostEstimate(
        flops=2 * B * S * S * 256 + 2 * B * S * 128 * 128,
        transcendentals=B * S * S,
        bytes_accessed=2 * B * S * (384 + 128) + 2 * 128 * 128,
    )
    call = pl.pallas_call(
        kern,
        out_shape=jax.ShapeDtypeStruct((B, S, 128), jnp.bfloat16),
        grid_spec=pltpu.PrefetchScalarGridSpec(
            num_scalar_prefetch=0,
            grid=(B,),
            in_specs=[
                pl.BlockSpec((None, S, 384), lambda b: (b, 0, 0)),
                pl.BlockSpec((128, 128), lambda b: (0, 0)),
                pl.BlockSpec((1, 128), lambda b: (0, 0)),
            ],
            out_specs=pl.BlockSpec((None, S, 128), lambda b: (b, 0, 0)),
        ),
        compiler_params=pltpu.CompilerParams(
            dimension_semantics=("parallel",),
            vmem_limit_bytes=32 * 1024 * 1024,
        ),
        cost_estimate=cost,
    )
    return jax.jit(call)


# ----------------------------------------------------------------------------
# Glue ops (NHWC) — fused by XLA under the outer jit
# ----------------------------------------------------------------------------

def act_fn(x):  # swish / SiLU
    return x * jax.nn.sigmoid(x)


def group_norm(x, gamma, beta, num_groups, eps=1e-6):
    # TODO(synk): lane-sparse (group size 4) reduction kept in XLA glue.
    B, H, W, C = x.shape
    G = int(num_groups)
    xf = x.astype(jnp.float32).reshape(B, H * W, G, C // G)
    mean = xf.mean(axis=(1, 3), keepdims=True)
    var = ((xf - mean) ** 2).mean(axis=(1, 3), keepdims=True)
    xn = ((xf - mean) * jax.lax.rsqrt(var + eps)).reshape(B, H, W, C)
    return xn * gamma + beta


def avg_pool2(x):
    B, H, W, C = x.shape
    return x.reshape(B, H // 2, 2, W // 2, 2, C).mean(axis=(2, 4))


def upsample2(x):  # nearest neighbour
    return jnp.repeat(jnp.repeat(x, 2, axis=1), 2, axis=2)


# ----------------------------------------------------------------------------
# Deterministic parameter construction (mirrors NCSNpp.__init__)
# weights are pre-cast to bf16 and pre-padded to lane-dense shapes at build.
# ----------------------------------------------------------------------------

def _prep_dense(w, b, n_out):
    K, N = w.shape
    Np = _round_up(N, 128)
    wp = jnp.zeros((K, Np), jnp.bfloat16).at[:, :N].set(w.astype(jnp.bfloat16))
    bp = jnp.zeros((1, Np), jnp.float32).at[:, :N].set(b.astype(jnp.float32))
    return dict(w=wp, b=bp, n=n_out)


def _make_conv3(key, cin, cout, init_scale=1.0):
    s = (init_scale if init_scale > 0 else 0.1) / math.sqrt(9 * cin)
    w = jax.random.normal(key, (3, 3, cin, cout), jnp.float32) * s
    cin_p = _round_up(cin, 8)          # sublane-aligned tap row blocks
    np_ = _round_up(cout, 128)
    wp = jnp.zeros((3, 3, cin_p, np_), jnp.bfloat16)
    wp = wp.at[:, :, :cin, :cout].set(w.astype(jnp.bfloat16))
    return dict(w=wp.reshape(9 * cin_p, np_),
                b=jnp.zeros((1, np_), jnp.float32),
                n=cout, cin=cin, cin_p=cin_p, np=np_)


def _make_nin(key, cin, cout, init_scale=1.0):
    s = (init_scale if init_scale > 0 else 0.1) / math.sqrt(cin)
    w = jax.random.normal(key, (cin, cout), jnp.float32) * s
    return _prep_dense(w, jnp.zeros((cout,), jnp.float32), cout)


def _make_gn(c):
    return dict(gamma=jnp.ones((c,), jnp.float32),
                beta=jnp.zeros((c,), jnp.float32),
                groups=min(c // 4, 32))


def _make_resblock(key, cin, cout, sample):
    k0, k1, k2 = jax.random.split(key, 3)
    p = dict(kind="res", sample=sample, cin=cin, cout=cout,
             gn0=_make_gn(cin), conv0=_make_conv3(k0, cin, cout),
             gn1=_make_gn(cout),
             conv1=_make_conv3(k1, cout, cout, init_scale=0.0))
    if cin != cout or sample is not None:
        p["skip"] = _make_nin(k2, cin, cout)
    return p


def _make_attn(key, c):
    assert c <= 128
    kq, kk, kv, kp = jax.random.split(key, 4)
    s = 1.0 / math.sqrt(c)
    wq = jax.random.normal(kq, (c, c), jnp.float32) * s
    wk = jax.random.normal(kk, (c, c), jnp.float32) * s
    wv = jax.random.normal(kv, (c, c), jnp.float32) * s
    wp = jax.random.normal(kp, (c, c), jnp.float32) * (0.1 / math.sqrt(c))
    # fused q|k|v weight: each projection in its own lane-padded 128 slab
    qkv_w = jnp.zeros((c, 384), jnp.bfloat16)
    qkv_w = qkv_w.at[:, 0:c].set(wq.astype(jnp.bfloat16))
    qkv_w = qkv_w.at[:, 128:128 + c].set(wk.astype(jnp.bfloat16))
    qkv_w = qkv_w.at[:, 256:256 + c].set(wv.astype(jnp.bfloat16))
    qkv_b = jnp.zeros((1, 384), jnp.float32)
    # output projection, K padded to 128 (padded rows/cols are zero)
    proj_w = jnp.zeros((128, 128), jnp.bfloat16).at[:c, :c].set(
        wp.astype(jnp.bfloat16))
    proj_b = jnp.zeros((1, 128), jnp.float32)
    return dict(kind="attn", c=c, gn=_make_gn(c),
                qkv=dict(w=qkv_w, b=qkv_b, n=384),
                proj=dict(w=proj_w, b=proj_b, n=c))


def build_ncsnpp(key, in_ch, nf):
    num_res_blocks = 4
    ch_mult = [1, 2, 2, 2]
    attn_resolutions = [16]
    num_resolutions = len(ch_mult)
    all_resolutions = [32 // 2 ** i for i in range(num_resolutions)]

    ki = iter(list(jax.random.split(key, 256)))

    layers = []
    layers.append(dict(kind="gfp",
                       W=jax.random.normal(next(ki), (nf,), jnp.float32) * 16.0))
    layers.append(dict(kind="conv3x3", **_make_conv3(next(ki), in_ch, nf)))

    hs_c = [nf]
    cur = nf
    input_pyramid_ch = in_ch
    for level in range(num_resolutions):
        for block in range(num_res_blocks):
            out_ch = nf * ch_mult[level]
            layers.append(_make_resblock(next(ki), cur, out_ch, None))
            cur = out_ch
            if all_resolutions[level] in attn_resolutions:
                layers.append(_make_attn(next(ki), cur))
            hs_c.append(cur)
        if level != num_resolutions - 1:
            layers.append(_make_resblock(next(ki), cur, cur, "down"))
            layers.append(dict(kind="down",
                               **_make_conv3(next(ki), input_pyramid_ch, cur)))
            input_pyramid_ch = cur
            hs_c.append(cur)

    cur = hs_c[-1]
    layers.append(_make_resblock(next(ki), cur, cur, None))
    layers.append(_make_attn(next(ki), cur))
    layers.append(_make_resblock(next(ki), cur, cur, None))

    for level in reversed(range(num_resolutions)):
        for block in range(num_res_blocks + 1):
            out_ch = nf * ch_mult[level]
            ic = cur + hs_c.pop()
            layers.append(_make_resblock(next(ki), ic, out_ch, None))
            cur = out_ch
        if all_resolutions[level] in attn_resolutions:
            layers.append(_make_attn(next(ki), cur))
        if level != 0:
            layers.append(_make_resblock(next(ki), cur, cur, "up"))
    assert not hs_c

    layers.append(dict(kind="gn", **_make_gn(cur)))
    layers.append(dict(kind="conv3x3",
                       **_make_conv3(next(ki), cur, in_ch, init_scale=0.0)))
    return layers


# ----------------------------------------------------------------------------
# Layer application
# ----------------------------------------------------------------------------

def apply_gfp(p, x):
    xp = x[:, None] * p["W"][None, :] * 2.0 * math.pi
    return jnp.concatenate([jnp.sin(xp), jnp.cos(xp)], axis=-1)


def apply_resblock(p, x):
    h = act_fn(group_norm(x, p["gn0"]["gamma"], p["gn0"]["beta"],
                          p["gn0"]["groups"]))
    if p["sample"] == "down":
        h, x = avg_pool2(h), avg_pool2(x)
    elif p["sample"] == "up":
        h, x = upsample2(h), upsample2(x)
    h = conv3x3_nhwc(h, p["conv0"])
    h = act_fn(group_norm(h, p["gn1"]["gamma"], p["gn1"]["beta"],
                          p["gn1"]["groups"]))
    # dropout(0.1): eval-mode identity
    h = conv3x3_nhwc(h, p["conv1"])
    if "skip" in p:
        x = dense_nhwc(x, p["skip"])
    return ((x + h) / math.sqrt(2.0)).astype(jnp.bfloat16)


def apply_attn(p, x):
    B, H, W, C = x.shape
    hn = group_norm(x, p["gn"]["gamma"], p["gn"]["beta"], p["gn"]["groups"])
    a = hn.reshape(B * H * W, C).astype(jnp.bfloat16)
    # one fused matmul for q|k|v (lane-padded 3x128 slab), no slicing
    qkv = pallas_matmul_bias(a, p["qkv"]["w"], p["qkv"]["b"],
                             p["qkv"]["w"].shape[1], out_dtype=jnp.bfloat16)
    qkv = qkv.reshape(B, H * W, 384)
    o = _attn_fn(B, H * W, C)(qkv, p["proj"]["w"], p["proj"]["b"])
    proj = o.reshape(B, H, W, 128)[..., :C]
    return ((x + proj) / math.sqrt(2.0)).astype(jnp.bfloat16)


def apply_downsample_block(p, x):
    # TODO(synk): DownsampleBlock definition not provided; standard
    #             avg-pool(2x2) followed by conv3x3 channel combiner is used.
    return conv3x3_nhwc(avg_pool2(x), p)


# ----------------------------------------------------------------------------
# Full forward pass (mirrors NCSNpp.forward); jit-wrapped at the call site
# ----------------------------------------------------------------------------

def ncsnpp_forward(layers, x_nchw, t):
    num_resolutions = 4
    num_res_blocks = 4
    attn_resolutions = (16,)

    x = jnp.transpose(x_nchw.astype(jnp.float32), (0, 2, 3, 1))  # -> NHWC
    m = 0
    used_sigmas = t.astype(jnp.float32)

    temb = apply_gfp(layers[m], jnp.log(used_sigmas)); m += 1  # noqa: F841 (unused, as in reference forward)

    input_pyramid = x
    hs = [conv3x3_nhwc(x, layers[m])]; m += 1

    for level in range(num_resolutions):
        for block in range(num_res_blocks):
            h = apply_resblock(layers[m], hs[-1]); m += 1
            if h.shape[2] in attn_resolutions:   # spatial width (NCHW shape[-1])
                h = apply_attn(layers[m], h); m += 1
            hs.append(h)
        if level != num_resolutions - 1:
            h = apply_resblock(layers[m], hs[-1]); m += 1
            input_pyramid = apply_downsample_block(layers[m], input_pyramid); m += 1
            input_pyramid = ((input_pyramid + h) / math.sqrt(2.0)).astype(jnp.bfloat16)
            h = input_pyramid
            hs.append(h)

    h = hs[-1]
    h = apply_resblock(layers[m], h); m += 1
    h = apply_attn(layers[m], h); m += 1
    h = apply_resblock(layers[m], h); m += 1

    for level in reversed(range(num_resolutions)):
        for block in range(num_res_blocks + 1):
            p = hs.pop()
            h = apply_resblock(layers[m], jnp.concatenate([h, p], axis=-1)); m += 1
        if h.shape[2] in attn_resolutions:
            h = apply_attn(layers[m], h); m += 1
        if level != 0:
            h = apply_resblock(layers[m], h); m += 1
    assert not hs

    gn = layers[m]; m += 1
    h = act_fn(group_norm(h, gn["gamma"], gn["beta"], gn["groups"]))
    h = conv3x3_nhwc(h, layers[m], out_dtype=jnp.float32); m += 1
    assert m == len(layers)

    used_sigmas = used_sigmas.reshape((x.shape[0], 1, 1, 1))
    h = h / used_sigmas
    return jnp.transpose(h, (0, 3, 1, 2))  # back to NCHW


# ----------------------------------------------------------------------------
# Main
# ----------------------------------------------------------------------------

if __name__ == "__main__":
    IN_CH = 3
    NF = 8
    B = 2
    RES = 32  # the module hardcodes all_resolutions based on 32

    key = jax.random.PRNGKey(0)
    k_params, k_x, k_t = jax.random.split(key, 3)

    layers = build_ncsnpp(k_params, IN_CH, NF)

    x = jax.random.normal(k_x, (B, IN_CH, RES, RES), jnp.float32)
    t = jax.random.uniform(k_t, (B,), jnp.float32, minval=0.1, maxval=1.0)

    # single jitted graph around the whole forward (layers closed over)
    fwd = jax.jit(functools.partial(ncsnpp_forward, layers))
    out = jax.block_until_ready(fwd(x, t))

    assert out.shape == (B, IN_CH, RES, RES), out.shape
    assert bool(jnp.all(jnp.isfinite(out)))
    print("KERNEL_OK")
</pallas_src>

<mosaic_0001>
module attributes {stable_mosaic.version = 11 : i64} {
  func.func @_conv3x3_kernel(%arg0: i32, %arg1: memref<1x1164x8xbf16, #tpu.memory_space<vmem>>, %arg2: memref<72x128xbf16, #tpu.memory_space<vmem>>, %arg3: memref<1x128xf32, #tpu.memory_space<vmem>>, %arg4: memref<1x1088x128xbf16, #tpu.memory_space<vmem>>, %arg5: memref<1088x128xf32, #tpu.memory_space<vmem>>) attributes {dimension_semantics = [#tpu.dimension_semantics<parallel>], iteration_bounds = array<i64: 2>, scalar_prefetch = 0 : i64, scratch_operands = 1 : i64, tpu.core_type = #tpu.core_type<tc>, window_params = [{transform_indices = @transform_0, window_bounds = array<i64: 1, 1164, 8>}, {pipeline_mode = #tpu.pipeline_mode<synchronous>, transform_indices = @transform_1, window_bounds = array<i64: 72, 128>}, {pipeline_mode = #tpu.pipeline_mode<synchronous>, transform_indices = @transform_2, window_bounds = array<i64: 1, 128>}, {transform_indices = @transform_3, window_bounds = array<i64: 1, 1088, 128>}]} {
    %c0 = arith.constant 0 : index
    %c0_0 = arith.constant 0 : index
    %c0_1 = arith.constant 0 : index
    %0 = vector.load %arg1[%c0, %c0_0, %c0_1] : memref<1x1164x8xbf16, #tpu.memory_space<vmem>>, vector<1x1088x8xbf16>
    %1 = vector.shape_cast %0 : vector<1x1088x8xbf16> to vector<1088x8xbf16>
    %c0_2 = arith.constant 0 : index
    %c0_3 = arith.constant 0 : index
    %2 = vector.load %arg2[%c0_2, %c0_3] : memref<72x128xbf16, #tpu.memory_space<vmem>>, vector<8x128xbf16>
    %cst = arith.constant dense<0.000000e+00> : vector<1088x128xf32>
    %3 = tpu.matmul %1, %2, %cst {dimension_numbers = #tpu.dot_dimension_numbers<[1], [0], [0], [1], [0, 0, 1, 1], [], []>} : vector<1088x8xbf16>, vector<8x128xbf16>, vector<1088x128xf32> -> vector<1088x128xf32>
    %c0_4 = arith.constant 0 : index
    %c0_5 = arith.constant 0 : index
    %4 = vector.load %arg5[%c0_4, %c0_5] : memref<1088x128xf32, #tpu.memory_space<vmem>>, vector<1088x128xf32>
    tpu.vector_store %arg5[%c0_4, %c0_5], %3 {strides = array<i32>} : memref<1088x128xf32, #tpu.memory_space<vmem>>, vector<1088x128xf32>,
    %c0_6 = arith.constant 0 : index
    %c1 = arith.constant 1 : index
    %c0_7 = arith.constant 0 : index
    %5 = vector.load %arg1[%c0_6, %c1, %c0_7] : memref<1x1164x8xbf16, #tpu.memory_space<vmem>>, vector<1x1088x8xbf16>
    %6 = vector.shape_cast %5 : vector<1x1088x8xbf16> to vector<1088x8xbf16>
    %c8 = arith.constant 8 : index
    %c0_8 = arith.constant 0 : index
    %7 = vector.load %arg2[%c8, %c0_8] : memref<72x128xbf16, #tpu.memory_space<vmem>>, vector<8x128xbf16>
    %cst_9 = arith.constant dense<0.000000e+00> : vector<1088x128xf32>
    %8 = tpu.matmul %6, %7, %cst_9 {dimension_numbers = #tpu.dot_dimension_numbers<[1], [0], [0], [1], [0, 0, 1, 1], [], []>} : vector<1088x8xbf16>, vector<8x128xbf16>, vector<1088x128xf32> -> vector<1088x128xf32>
    %c0_10 = arith.constant 0 : index
    %c0_11 = arith.constant 0 : index
    %9 = vector.load %arg5[%c0_10, %c0_11] : memref<1088x128xf32, #tpu.memory_space<vmem>>, vector<1088x128xf32>
    %10 = arith.addf %9, %8 : vector<1088x128xf32>
    %c0_12 = arith.constant 0 : index
    %c0_13 = arith.constant 0 : index
    %11 = vector.load %arg5[%c0_12, %c0_13] : memref<1088x128xf32, #tpu.memory_space<vmem>>, vector<1088x128xf32>
    tpu.vector_store %arg5[%c0_12, %c0_13], %10 {strides = array<i32>} : memref<1088x128xf32, #tpu.memory_space<vmem>>, vector<1088x128xf32>,
    %c0_14 = arith.constant 0 : index
    %c2 = arith.constant 2 : index
    %c0_15 = arith.constant 0 : index
    %12 = vector.load %arg1[%c0_14, %c2, %c0_15] : memref<1x1164x8xbf16, #tpu.memory_space<vmem>>, vector<1x1088x8xbf16>
    %13 = vector.shape_cast %12 : vector<1x1088x8xbf16> to vector<1088x8xbf16>
    %c16 = arith.constant 16 : index
    %c0_16 = arith.constant 0 : index
    %14 = vector.load %arg2[%c16, %c0_16] : memref<72x128xbf16, #tpu.memory_space<vmem>>, vector<8x128xbf16>
    %cst_17 = arith.constant dense<0.000000e+00> : vector<1088x128xf32>
    %15 = tpu.matmul %13, %14, %cst_17 {dimension_numbers = #tpu.dot_dimension_numbers<[1], [0], [0], [1], [0, 0, 1, 1], [], []>} : vector<1088x8xbf16>, vector<8x128xbf16>, vector<1088x128xf32> -> vector<1088x128xf32>
    %c0_18 = arith.constant 0 : index
    %c0_19 = arith.constant 0 : index
    %16 = vector.load %arg5[%c0_18, %c0_19] : memref<1088x128xf32, #tpu.memory_space<vmem>>, vector<1088x128xf32>
    %17 = arith.addf %16, %15 : vector<1088x128xf32>
    %c0_20 = arith.constant 0 : index
    %c0_21 = arith.constant 0 : index
    %18 = vector.load %arg5[%c0_20, %c0_21] : memref<1088x128xf32, #tpu.memory_space<vmem>>, vector<1088x128xf32>
    tpu.vector_store %arg5[%c0_20, %c0_21], %17 {strides = array<i32>} : memref<1088x128xf32, #tpu.memory_space<vmem>>, vector<1088x128xf32>,
    %c0_22 = arith.constant 0 : index
    %c34 = arith.constant 34 : index
    %c0_23 = arith.constant 0 : index
    %19 = vector.load %arg1[%c0_22, %c34, %c0_23] : memref<1x1164x8xbf16, #tpu.memory_space<vmem>>, vector<1x1088x8xbf16>
    %20 = vector.shape_cast %19 : vector<1x1088x8xbf16> to vector<1088x8xbf16>
    %c24 = arith.constant 24 : index
    %c0_24 = arith.constant 0 : index
    %21 = vector.load %arg2[%c24, %c0_24] : memref<72x128xbf16, #tpu.memory_space<vmem>>, vector<8x128xbf16>
    %cst_25 = arith.constant dense<0.000000e+00> : vector<1088x128xf32>
    %22 = tpu.matmul %20, %21, %cst_25 {dimension_numbers = #tpu.dot_dimension_numbers<[1], [0], [0], [1], [0, 0, 1, 1], [], []>} : vector<1088x8xbf16>, vector<8x128xbf16>, vector<1088x128xf32> -> vector<1088x128xf32>
    %c0_26 = arith.constant 0 : index
    %c0_27 = arith.constant 0 : index
    %23 = vector.load %arg5[%c0_26, %c0_27] : memref<1088x128xf32, #tpu.memory_space<vmem>>, vector<1088x128xf32>
    %24 = arith.addf %23, %22 : vector<1088x128xf32>
    %c0_28 = arith.constant 0 : index
    %c0_29 = arith.constant 0 : index
    %25 = vector.load %arg5[%c0_28, %c0_29] : memref<1088x128xf32, #tpu.memory_space<vmem>>, vector<1088x128xf32>
    tpu.vector_store %arg5[%c0_28, %c0_29], %24 {strides = array<i32>} : memref<1088x128xf32, #tpu.memory_space<vmem>>, vector<1088x128xf32>,
    %c0_30 = arith.constant 0 : index
    %c35 = arith.constant 35 : index
    %c0_31 = arith.constant 0 : index
    %26 = vector.load %arg1[%c0_30, %c35, %c0_31] : memref<1x1164x8xbf16, #tpu.memory_space<vmem>>, vector<1x1088x8xbf16>
    %27 = vector.shape_cast %26 : vector<1x1088x8xbf16> to vector<1088x8xbf16>
    %c32 = arith.constant 32 : index
    %c0_32 = arith.constant 0 : index
    %28 = vector.load %arg2[%c32, %c0_32] : memref<72x128xbf16, #tpu.memory_space<vmem>>, vector<8x128xbf16>
    %cst_33 = arith.constant dense<0.000000e+00> : vector<1088x128xf32>
    %29 = tpu.matmul %27, %28, %cst_33 {dimension_numbers = #tpu.dot_dimension_numbers<[1], [0], [0], [1], [0, 0, 1, 1], [], []>} : vector<1088x8xbf16>, vector<8x128xbf16>, vector<1088x128xf32> -> vector<1088x128xf32>
    %c0_34 = arith.constant 0 : index
    %c0_35 = arith.constant 0 : index
    %30 = vector.load %arg5[%c0_34, %c0_35] : memref<1088x128xf32, #tpu.memory_space<vmem>>, vector<1088x128xf32>
    %31 = arith.addf %30, %29 : vector<1088x128xf32>
    %c0_36 = arith.constant 0 : index
    %c0_37 = arith.constant 0 : index
    %32 = vector.load %arg5[%c0_36, %c0_37] : memref<1088x128xf32, #tpu.memory_space<vmem>>, vector<1088x128xf32>
    tpu.vector_store %arg5[%c0_36, %c0_37], %31 {strides = array<i32>} : memref<1088x128xf32, #tpu.memory_space<vmem>>, vector<1088x128xf32>,
    %c0_38 = arith.constant 0 : index
    %c36 = arith.constant 36 : index
    %c0_39 = arith.constant 0 : index
    %33 = vector.load %arg1[%c0_38, %c36, %c0_39] : memref<1x1164x8xbf16, #tpu.memory_space<vmem>>, vector<1x1088x8xbf16>
    %34 = vector.shape_cast %33 : vector<1x1088x8xbf16> to vector<1088x8xbf16>
    %c40 = arith.constant 40 : index
    %c0_40 = arith.constant 0 : index
    %35 = vector.load %arg2[%c40, %c0_40] : memref<72x128xbf16, #tpu.memory_space<vmem>>, vector<8x128xbf16>
    %cst_41 = arith.constant dense<0.000000e+00> : vector<1088x128xf32>
    %36 = tpu.matmul %34, %35, %cst_41 {dimension_numbers = #tpu.dot_dimension_numbers<[1], [0], [0], [1], [0, 0, 1, 1], [], []>} : vector<1088x8xbf16>, vector<8x128xbf16>, vector<1088x128xf32> -> vector<1088x128xf32>
    %c0_42 = arith.constant 0 : index
    %c0_43 = arith.constant 0 : index
    %37 = vector.load %arg5[%c0_42, %c0_43] : memref<1088x128xf32, #tpu.memory_space<vmem>>, vector<1088x128xf32>
    %38 = arith.addf %37, %36 : vector<1088x128xf32>
    %c0_44 = arith.constant 0 : index
    %c0_45 = arith.constant 0 : index
    %39 = vector.load %arg5[%c0_44, %c0_45] : memref<1088x128xf32, #tpu.memory_space<vmem>>, vector<1088x128xf32>
    tpu.vector_store %arg5[%c0_44, %c0_45], %38 {strides = array<i32>} : memref<1088x128xf32, #tpu.memory_space<vmem>>, vector<1088x128xf32>,
    %c0_46 = arith.constant 0 : index
    %c68 = arith.constant 68 : index
    %c0_47 = arith.constant 0 : index
    %40 = vector.load %arg1[%c0_46, %c68, %c0_47] : memref<1x1164x8xbf16, #tpu.memory_space<vmem>>, vector<1x1088x8xbf16>
    %41 = vector.shape_cast %40 : vector<1x1088x8xbf16> to vector<1088x8xbf16>
    %c48 = arith.constant 48 : index
    %c0_48 = arith.constant 0 : index
    %42 = vector.load %arg2[%c48, %c0_48] : memref<72x128xbf16, #tpu.memory_space<vmem>>, vector<8x128xbf16>
    %cst_49 = arith.constant dense<0.000000e+00> : vector<1088x128xf32>
    %43 = tpu.matmul %41, %42, %cst_49 {dimension_numbers = #tpu.dot_dimension_numbers<[1], [0], [0], [1], [0, 0, 1, 1], [], []>} : vector<1088x8xbf16>, vector<8x128xbf16>, vector<1088x128xf32> -> vector<1088x128xf32>
    %c0_50 = arith.constant 0 : index
    %c0_51 = arith.constant 0 : index
    %44 = vector.load %arg5[%c0_50, %c0_51] : memref<1088x128xf32, #tpu.memory_space<vmem>>, vector<1088x128xf32>
    %45 = arith.addf %44, %43 : vector<1088x128xf32>
    %c0_52 = arith.constant 0 : index
    %c0_53 = arith.constant 0 : index
    %46 = vector.load %arg5[%c0_52, %c0_53] : memref<1088x128xf32, #tpu.memory_space<vmem>>, vector<1088x128xf32>
    tpu.vector_store %arg5[%c0_52, %c0_53], %45 {strides = array<i32>} : memref<1088x128xf32, #tpu.memory_space<vmem>>, vector<1088x128xf32>,
    %c0_54 = arith.constant 0 : index
    %c69 = arith.constant 69 : index
    %c0_55 = arith.constant 0 : index
    %47 = vector.load %arg1[%c0_54, %c69, %c0_55] : memref<1x1164x8xbf16, #tpu.memory_space<vmem>>, vector<1x1088x8xbf16>
    %48 = vector.shape_cast %47 : vector<1x1088x8xbf16> to vector<1088x8xbf16>
    %c56 = arith.constant 56 : index
    %c0_56 = arith.constant 0 : index
    %49 = vector.load %arg2[%c56, %c0_56] : memref<72x128xbf16, #tpu.memory_space<vmem>>, vector<8x128xbf16>
    %cst_57 = arith.constant dense<0.000000e+00> : vector<1088x128xf32>
    %50 = tpu.matmul %48, %49, %cst_57 {dimension_numbers = #tpu.dot_dimension_numbers<[1], [0], [0], [1], [0, 0, 1, 1], [], []>} : vector<1088x8xbf16>, vector<8x128xbf16>, vector<1088x128xf32> -> vector<1088x128xf32>
    %c0_58 = arith.constant 0 : index
    %c0_59 = arith.constant 0 : index
    %51 = vector.load %arg5[%c0_58, %c0_59] : memref<1088x128xf32, #tpu.memory_space<vmem>>, vector<1088x128xf32>
    %52 = arith.addf %51, %50 : vector<1088x128xf32>
    %c0_60 = arith.constant 0 : index
    %c0_61 = arith.constant 0 : index
    %53 = vector.load %arg5[%c0_60, %c0_61] : memref<1088x128xf32, #tpu.memory_space<vmem>>, vector<1088x128xf32>
    tpu.vector_store %arg5[%c0_60, %c0_61], %52 {strides = array<i32>} : memref<1088x128xf32, #tpu.memory_space<vmem>>, vector<1088x128xf32>,
    %c0_62 = arith.constant 0 : index
    %c70 = arith.constant 70 : index
    %c0_63 = arith.constant 0 : index
    %54 = vector.load %arg1[%c0_62, %c70, %c0_63] : memref<1x1164x8xbf16, #tpu.memory_space<vmem>>, vector<1x1088x8xbf16>
    %55 = vector.shape_cast %54 : vector<1x1088x8xbf16> to vector<1088x8xbf16>
    %c64 = arith.constant 64 : index
    %c0_64 = arith.constant 0 : index
    %56 = vector.load %arg2[%c64, %c0_64] : memref<72x128xbf16, #tpu.memory_space<vmem>>, vector<8x128xbf16>
    %cst_65 = arith.constant dense<0.000000e+00> : vector<1088x128xf32>
    %57 = tpu.matmul %55, %56, %cst_65 {dimension_numbers = #tpu.dot_dimension_numbers<[1], [0], [0], [1], [0, 0, 1, 1], [], []>} : vector<1088x8xbf16>, vector<8x128xbf16>, vector<1088x128xf32> -> vector<1088x128xf32>
    %c0_66 = arith.constant 0 : index
    %c0_67 = arith.constant 0 : index
    %58 = vector.load %arg5[%c0_66, %c0_67] : memref<1088x128xf32, #tpu.memory_space<vmem>>, vector<1088x128xf32>
    %59 = arith.addf %58, %57 : vector<1088x128xf32>
    %c0_68 = arith.constant 0 : index
    %c0_69 = arith.constant 0 : index
    %60 = vector.load %arg5[%c0_68, %c0_69] : memref<1088x128xf32, #tpu.memory_space<vmem>>, vector<1088x128xf32>
    tpu.vector_store %arg5[%c0_68, %c0_69], %59 {strides = array<i32>} : memref<1088x128xf32, #tpu.memory_space<vmem>>, vector<1088x128xf32>,
    %c0_70 = arith.constant 0 : index
    %c0_71 = arith.constant 0 : index
    %61 = vector.load %arg5[%c0_70, %c0_71] : memref<1088x128xf32, #tpu.memory_space<vmem>>, vector<1088x128xf32>
    %c0_72 = arith.constant 0 : index
    %c0_73 = arith.constant 0 : index
    %62 = vector.load %arg3[%c0_72, %c0_73] : memref<1x128xf32, #tpu.memory_space<vmem>>, vector<1x128xf32>
    %63 = vector.broadcast %62 : vector<1x128xf32> to vector<1088x128xf32>
    %64 = arith.addf %61, %63 : vector<1088x128xf32>
    %65 = arith.truncf %64 : vector<1088x128xf32> to vector<1088x128xbf16>
    %c0_74 = arith.constant 0 : index
    %c0_75 = arith.constant 0 : index
    %c0_76 = arith.constant 0 : index
    %66 = vector.load %arg4[%c0_74, %c0_75, %c0_76] : memref<1x1088x128xbf16, #tpu.memory_space<vmem>>, vector<1x1088x128xbf16>
    %67 = vector.shape_cast %66 : vector<1x1088x128xbf16> to vector<1088x128xbf16>
    %68 = vector.shape_cast %65 : vector<1088x128xbf16> to vector<1x1088x128xbf16>
    tpu.vector_store %arg4[%c0_74, %c0_75, %c0_76], %68 {strides = array<i32>} : memref<1x1088x128xbf16, #tpu.memory_space<vmem>>, vector<1x1088x128xbf16>,
    return
  }
  func.func @transform_0(%arg0: i32) -> (i32, i32, i32) {
    %c0_i32 = arith.constant 0 : i32
    %c0_i32_0 = arith.constant 0 : i32
    %c0_i32_1 = arith.constant 0 : i32
    return %arg0, %c0_i32, %c0_i32_0 : i32, i32, i32
  }
  func.func @transform_1(%arg0: i32) -> (i32, i32) {
    %c0_i32 = arith.constant 0 : i32
    %c0_i32_0 = arith.constant 0 : i32
    %c0_i32_1 = arith.constant 0 : i32
    return %c0_i32, %c0_i32_0 : i32, i32
  }
  func.func @transform_2(%arg0: i32) -> (i32, i32) {
    %c0_i32 = arith.constant 0 : i32
    %c0_i32_0 = arith.constant 0 : i32
    %c0_i32_1 = arith.constant 0 : i32
    return %c0_i32, %c0_i32_0 : i32, i32
  }
  func.func @transform_3(%arg0: i32) -> (i32, i32, i32) {
    %c0_i32 = arith.constant 0 : i32
    %c0_i32_0 = arith.constant 0 : i32
    %c0_i32_1 = arith.constant 0 : i32
    return %arg0, %c0_i32, %c0_i32_0 : i32, i32, i32
  }
}

</mosaic_0001>

<bundles_post_ra>
// kernel: tpu_custom_call.1
= control target key start
LH: loop header
LB: loop body
LE: loop exit
PB: predicated region body
PF: predicated region fallthrough
CT: control target
= control target key end

     0   :  { %8 = vsyncpa [#allocation4], 0  ;;  %s23230_s0 = inlined_call_operand.vmem [shape: bf16[2,1164,8], index: 0, kind: input, shape index: {}]   ;;  %s23231_s1 = inlined_call_operand.vmem [shape: bf16[72,128], index: 1, kind: input, shape index: {}]   ;;  %s23232_s2 = inlined_call_operand.vmem [shape: f32[1,128], index: 2, kind: input, shape index: {}]   ;;  %s23233_s3 = inlined_call_operand.hbm [shape: bf16[2,1088,128], index: 3, kind: output, shape index: {}]  }
   0x1   :  { %10 = vsyncpa [#allocation4 + $0x1], 0  ;;  %s20231_s12 = smov 0   ;;  %s20233_s13 = smov 0  }
   0x2   :  { %s20235_s14 = smov 0   ;;  %s20237_s15 = smov 0  }
   0x3 LB: > { %s20252_s16 = sadd.s32 4294967295, %s20207_s15   ;;  %s16006_s17 = sadd.s32 4294967294, %s20207_s15   ;;  %s20207_s15 = sphi %s20237_s15, %s23641_s15   ;;  %s20203_s14 = sphi %s20235_s14, %s23640_s14   ;;  %s20199_s13 = sphi %s20233_s13, %s23639_s13   ;;  %s20195_s12 = sphi %s20231_s12, %s23638_s12  }
   0x4   : > { %s20256_s18 = sadd.s32 1, %s20207_s15   ;;  %s91_s19 = sadd.s32 1, %s20203_s14 }
   0x5   : > { %s88_s20 = ssub.s32 %s20207_s15, %s20256_s18  ;;  %p101_p0 = scmp.ne.s32.totalorder %s20203_s14, %s20199_s13 }
   0x6   : > { %p89_p1 = scmp.eq.s32.totalorder %s88_s20, 0  ;;  %p102_p2 = scmp.eq.s32.totalorder %s20252_s16, 1 }
   0x7   : > { %p107_p3 = scmp.ne.s32.totalorder %s20199_s13, %s20195_s12  ;;  %p108_p4 = scmp.eq.s32.totalorder %s16006_s17, 1 }
   0x8   : > { %s20267_s21 = scalar_select %p89_p1, %s20203_s14, %s91_s19  }
   0x9   : > { %p20269_p5 = por %p102_p2, %p101_p0  ;;  %p20273_p6 = por %p108_p4, %p107_p3 }
   0xa   : > { %p16009_p7 = scmp.ge.s32.totalorder %s20207_s15, 1  ;;  %p140_p8 = scmp.lt.s32.totalorder %s20207_s15, 3 }
   0xc   : > { %p141_p9 = pnand %p16009_p7, %p140_p8 }
   0xe   : > { %144 = sbr.rel (%p141_p9) target bundleno = 2613 (0xa35), region = 32 }
  0x13   : > { %v306_v0 = vld [vmem:[%s23231_s1] sm:$0xf]  ;;  %vm852_vm0 = vcmask 1043456   ;;  %p164_p10 = scmp.lt.s32.totalorder %s20252_s16, 1  ;;  %v3472_v2 = vld [vmem:[%s23231_s1 + $0x8] sm:$0xf] }
  0x14   : > { %v854_v1 = vsel %vm852_vm0, %v306_v0, 0  ;;  %v5055_v3 = vld [vmem:[%s23231_s1 + $0xc] sm:$0xf]  ;;  %v4159_v4 = vsel %vm852_vm0, %v3472_v2, 0  ;;  %v1478_v6 = vld [vmem:[%s23231_s1 + $0x4] sm:$0xf] }
  0x15   : > { %20093 = vmatpush.bf16.msra.mxu1 %v854_v1  ;;  %20094 = vmatpush.bf16.msra.mxu2 %v854_v1  ;;  %s165_s30 = scalar_select %p164_p10, %s20252_s16, 1  ;;  %v5741_v5 = vsel %vm852_vm0, %v5055_v3, 0  ;;  %v2576_v7 = vsel %vm852_vm0, %v1478_v6, 0  ;;  %v6637_v8 = vld [vmem:[%s23231_s1 + $0x10] sm:$0xf]  ;;  %vm647_vm1 = vcmask 64512  }
  0x16   : > { %20095 = vmatpush.bf16.msra.mxu3 %v854_v1  ;;  %863 = vmatpush.bf16.msra.mxu0 %v854_v1  ;;  %v7807_v9 = vsel %vm852_vm0, %v6637_v8, 0  ;;  %vm1822_vm2 = vsmask.f32 7424  ;;  %vm3816_vm3 = vcmask 1046528   ;;  %vm6981_vm4 = vsmask.f32 6400 }
  0x17   : > { %s20097_s8 = smul.u32 584, %s165_s30  ;;  %vm9047_vm5 = vcmask 1045504   ;;  %vm12212_vm6 = vsmask.f32 5376  ;;  %vm14278_vm7 = vcmask 1044480   ;;  %s161_s29 = sand.u32 1, %s20199_s13  }
  0x18   : > { %s20096_s5 = smul.u32 544, %s161_s29  ;;  %s20165_s9 = scalar_lea.hbm %s23233_s3, 1088 }
  0x19   : > { %4168 = vmatpush.bf16.msrb.mxu2 %v4159_v4  ;;  %2585 = vmatpush.bf16.msrb.mxu1 %v2576_v7  ;;  %s20304_s11 = scalar_lea.vmem %s23230_s0, %s20097_s8 }
  0x1a   : > { %5750 = vmatpush.bf16.msrb.mxu3 %v5741_v5  ;;  %7816 = vmatpush.bf16.msrb.mxu0 %v7807_v9  ;;  %v19091_v10 = vld [vmem:[%s20304_s11 + $0x88] sm:$0xff]  ;;  %v19108_v11 = vld [vmem:[%s20304_s11 + $0x110] sm:$0xff]  ;;  %v19125_v12 = vld [vmem:[%s20304_s11 + $0x198] sm:$0xff]  ;;  %s22137_s6 = scalar_lea.vmem [#allocation3], %s20096_s5 }
  0x1b   : > { %v19074_v13 = vld [vmem:[%s20304_s11] sm:$0xff]  ;;  %16300 = vmatmul.msk.bf16.vlgmr.msra.gmra.mxu1 %vm647_vm1, %v19091_v10  ;;  %16317 = vmatmul.msk.bf16.vlgmr.msra.gmra.mxu2 %vm647_vm1, %v19108_v11  ;;  %v19092_v14 = vld [vmem:[%s20304_s11 + $0x90] sm:$0xff]  ;;  %v19109_v15 = vld [vmem:[%s20304_s11 + $0x118] sm:$0xff]  ;;  %s15941_s28 = sshll.u32 %s22137_s6, 4  ;;  %s15942_s28 = int_to_ptr.vmem [resolvable:$true] %s15941_s28 }
  0x1c   : > { %16334 = vmatmul.msk.bf16.vlgmr.msra.gmra.mxu3 %vm647_vm1, %v19125_v12  ;;  %16283 = vmatmul.msk.bf16.vlgmr.msra.gmra.mxu0 %vm647_vm1, %v19074_v13  ;;  %v19126_v16 = vld [vmem:[%s20304_s11 + $0x1a0] sm:$0xff]  ;;  %v19075_v17 = vld [vmem:[%s20304_s11 + $0x8] sm:$0xff]  ;;  %v19093_v18 = vld [vmem:[%s20304_s11 + $0x98] sm:$0xff] }
  0x1d   : > { %v19110_v19 = vld [vmem:[%s20304_s11 + $0x120] sm:$0xff]  ;;  %v19127_v20 = vld [vmem:[%s20304_s11 + $0x1a8] sm:$0xff]  ;;  %v19076_v21 = vld [vmem:[%s20304_s11 + $0x10] sm:$0xff] }
  0x1e   : > { %v19094_v22 = vld [vmem:[%s20304_s11 + $0xa0] sm:$0xff]  ;;  %v19111_v23 = vld [vmem:[%s20304_s11 + $0x128] sm:$0xff]  ;;  %v19128_v24 = vld [vmem:[%s20304_s11 + $0x1b0] sm:$0xff] }
  0x1f   : > { %v19077_v25 = vld [vmem:[%s20304_s11 + $0x18] sm:$0xff]  ;;  %v19095_v26 = vld [vmem:[%s20304_s11 + $0xa8] sm:$0xff]  ;;  %v19112_v27 = vld [vmem:[%s20304_s11 + $0x130] sm:$0xff] }
  0x20   : > { %v19129_v28 = vld [vmem:[%s20304_s11 + $0x1b8] sm:$0xff]  ;;  %v19078_v29 = vld [vmem:[%s20304_s11 + $0x20] sm:$0xff]  ;;  %v19096_v30 = vld [vmem:[%s20304_s11 + $0xb0] sm:$0xff] }
  0x21   : > { %v19113_v31 = vld [vmem:[%s20304_s11 + $0x138] sm:$0xff]  ;;  %v19130_v32 = vld [vmem:[%s20304_s11 + $0x1c0] sm:$0xff]  ;;  %v19079_v33 = vld [vmem:[%s20304_s11 + $0x28] sm:$0xff] }
  0x22   : > { %v19097_v34 = vld [vmem:[%s20304_s11 + $0xb8] sm:$0xff]  ;;  %v19114_v35 = vld [vmem:[%s20304_s11 + $0x140] sm:$0xff]  ;;  %v19131_v36 = vld [vmem:[%s20304_s11 + $0x1c8] sm:$0xff] }
  0x23   : > { %v19080_v37 = vld [vmem:[%s20304_s11 + $0x30] sm:$0xff]  ;;  %v19098_v38 = vld [vmem:[%s20304_s11 + $0xc0] sm:$0xff]  ;;  %v19115_v39 = vld [vmem:[%s20304_s11 + $0x148] sm:$0xff] }
  0x24   : > { %v19132_v40 = vld [vmem:[%s20304_s11 + $0x1d0] sm:$0xff]  ;;  %v19081_v41 = vld [vmem:[%s20304_s11 + $0x38] sm:$0xff]  ;;  %v19099_v42 = vld [vmem:[%s20304_s11 + $0xc8] sm:$0xff] }
  0x25   : > { %v19116_v43 = vld [vmem:[%s20304_s11 + $0x150] sm:$0xff]  ;;  %v19133_v45 = vld [vmem:[%s20304_s11 + $0x1d8] sm:$0xff]  ;;  %v19082_v46 = vld [vmem:[%s20304_s11 + $0x40] sm:$0xff] }
  0x26   : > { %v19100_v54 = vld [vmem:[%s20304_s11 + $0xd0] sm:$0xff]  ;;  %v19117_v55 = vld [vmem:[%s20304_s11 + $0x158] sm:$0xff]  ;;  %v19134_v57 = vld [vmem:[%s20304_s11 + $0x1e0] sm:$0xff] }
  0x27   : > { %v19083_v58 = vld [vmem:[%s20304_s11 + $0x48] sm:$0xff]  ;;  %v19101_v2 = vld [vmem:[%s20304_s11 + $0xd8] sm:$0xff]  ;;  %v19118_v3 = vld [vmem:[%s20304_s11 + $0x160] sm:$0xff] }
  0x28   : > { %v19135_v5 = vld [vmem:[%s20304_s11 + $0x1e8] sm:$0xff]  ;;  %v19084_v6 = vld [vmem:[%s20304_s11 + $0x50] sm:$0xff] }
  0x2b   : > { %16301 = vmatmul.msk.bf16.gmra.mxu1 %vm647_vm1, %v19092_v14  ;;  %16318 = vmatmul.msk.bf16.gmra.mxu2 %vm647_vm1, %v19109_v15  ;;  %v19102_v14 = vld [vmem:[%s20304_s11 + $0xe0] sm:$0xff]  ;;  %v19119_v15 = vld [vmem:[%s20304_s11 + $0x168] sm:$0xff] }
  0x2c   : > { %16335 = vmatmul.msk.bf16.gmra.mxu3 %vm647_vm1, %v19126_v16  ;;  %16284 = vmatmul.msk.bf16.gmra.mxu0 %vm647_vm1, %v19075_v17  ;;  %v19136_v17 = vld [vmem:[%s20304_s11 + $0x1f0] sm:$0xff] }
  0x3b   : > { %16302 = vmatmul.msk.bf16.gmra.mxu1 %vm647_vm1, %v19093_v18  ;;  %16319 = vmatmul.msk.bf16.gmra.mxu2 %vm647_vm1, %v19110_v19  ;;  %v19085_v18 = vld [vmem:[%s20304_s11 + $0x58] sm:$0xff] }
  0x3c   : > { %16336 = vmatmul.msk.bf16.gmra.mxu3 %vm647_vm1, %v19127_v20  ;;  %16285 = vmatmul.msk.bf16.gmra.mxu0 %vm647_vm1, %v19076_v21 }
  0x4b   : > { %16303 = vmatmul.msk.bf16.gmra.mxu1 %vm647_vm1, %v19094_v22  ;;  %16320 = vmatmul.msk.bf16.gmra.mxu2 %vm647_vm1, %v19111_v23 }
  0x4c   : > { %16337 = vmatmul.msk.bf16.gmra.mxu3 %vm647_vm1, %v19128_v24  ;;  %16286 = vmatmul.msk.bf16.gmra.mxu0 %vm647_vm1, %v19077_v25 }
  0x5b   : > { %16304 = vmatmul.msk.bf16.gmra.mxu1 %vm647_vm1, %v19095_v26  ;;  %16321 = vmatmul.msk.bf16.gmra.mxu2 %vm647_vm1, %v19112_v27  ;;  %v19103_v26 = vld [vmem:[%s20304_s11 + $0xe8] sm:$0xff]  ;;  %v19120_v27 = vld [vmem:[%s20304_s11 + $0x170] sm:$0xff] }
  0x5c   : > { %16338 = vmatmul.msk.bf16.gmra.mxu3 %vm647_vm1, %v19129_v28  ;;  %16287 = vmatmul.msk.bf16.gmra.mxu0 %vm647_vm1, %v19078_v29  ;;  %v19137_v29 = vld [vmem:[%s20304_s11 + $0x1f8] sm:$0xff] }
  0x6b   : > { %16305 = vmatmul.msk.bf16.gmra.mxu1 %vm647_vm1, %v19096_v30  ;;  %16322 = vmatmul.msk.bf16.gmra.mxu2 %vm647_vm1, %v19113_v31  ;;  %v19086_v30 = vld [vmem:[%s20304_s11 + $0x60] sm:$0xff] }
  0x6c   : > { %16339 = vmatmul.msk.bf16.gmra.mxu3 %vm647_vm1, %v19130_v32  ;;  %16288 = vmatmul.msk.bf16.gmra.mxu0 %vm647_vm1, %v19079_v33 }
  0x7b   : > { %16306 = vmatmul.msk.bf16.gmra.mxu1 %vm647_vm1, %v19097_v34  ;;  %16323 = vmatmul.msk.bf16.gmra.mxu2 %vm647_vm1, %v19114_v35 }
  0x7c   : > { %16340 = vmatmul.msk.bf16.gmra.mxu3 %vm647_vm1, %v19131_v36  ;;  %16289 = vmatmul.msk.bf16.gmra.mxu0 %vm647_vm1, %v19080_v37 }
  0x8b   : > { %16307 = vmatmul.msk.bf16.gmra.mxu1 %vm647_vm1, %v19098_v38  ;;  %16324 = vmatmul.msk.bf16.gmra.mxu2 %vm647_vm1, %v19115_v39  ;;  %v19104_v38 = vld [vmem:[%s20304_s11 + $0xf0] sm:$0xff]  ;;  %v19121_v39 = vld [vmem:[%s20304_s11 + $0x178] sm:$0xff] }
  0x8c   : > { %16341 = vmatmul.msk.bf16.gmra.mxu3 %vm647_vm1, %v19132_v40  ;;  %16290 = vmatmul.msk.bf16.gmra.mxu0 %vm647_vm1, %v19081_v41  ;;  %v19138_v41 = vld [vmem:[%s20304_s11 + $0x200] sm:$0xff] }
  0x98   : > { %v20372_v44 = vpop.f32.mrf.mxu1 }
  0x99   : > { %v20376_v47 = vpop.f32.mrf.mxu0 }
  0x9b   : > { %16308 = vmatmul.msk.bf16.gmra.mxu1 %vm647_vm1, %v19099_v42  ;;  %16325 = vmatmul.msk.bf16.gmra.mxu2 %vm647_vm1, %v19116_v43  ;;  %v19087_v42 = vld [vmem:[%s20304_s11 + $0x68] sm:$0xff] }
  0x9c   : > { %16342 = vmatmul.msk.bf16.gmra.mxu3 %vm647_vm1, %v19133_v45  ;;  %16291 = vmatmul.msk.bf16.gmra.mxu0 %vm647_vm1, %v19082_v46 }
  0x9e   : > { %v20382_v48 = vpop.f32.mrf.mxu2 }
  0x9f   : > { %23236 = vst [vmem:[#allocation6_spill] sm:$0xff] %v20382_v48  ;;  %v20384_v49 = vpop.f32.mrf.mxu3 }
  0xa0   : > { %23237 = vst [vmem:[#allocation7_spill] sm:$0xff] %v20384_v49  ;;  %v20386_v50 = vpop.f32.mrf.mxu1  ;;  %v17033_v49 = vld [vmem:[%s20304_s11 + $0x10] sm:$0xe] }
  0xa1   : > { %23238 = vst [vmem:[#allocation8_spill] sm:$0xff] %v20386_v50  ;;  %v20388_v51 = vpop.f32.mrf.mxu0 }
  0xa6   : > { %v20390_v52 = vpop.f32.mrf.mxu2 }
  0xa7   : > { %23239 = vst [vmem:[#allocation9_spill] sm:$0xff] %v20390_v52  ;;  %v20392_v53 = vpop.f32.mrf.mxu3 }
  0xa8   : > { %23240 = vst [vmem:[#allocation10_spill] sm:$0xff] %v20392_v53  ;;  %v20396_v56 = vpop.f32.mrf.mxu1  ;;  %v19210_v53 = vld [vmem:[%s20304_s11] sm:$0xf0] }
  0xa9   : > { %23241 = vst [vmem:[#allocation11_spill] sm:$0xff] %v20396_v56  ;;  %v20400_v59 = vpop.f32.mrf.mxu0 }
  0xab   : > { %16309 = vmatmul.msk.bf16.gmra.mxu1 %vm647_vm1, %v19100_v54  ;;  %16326 = vmatmul.msk.bf16.gmra.mxu2 %vm647_vm1, %v19117_v55 }
  0xac   : > { %16343 = vmatmul.msk.bf16.gmra.mxu3 %vm647_vm1, %v19134_v57  ;;  %16292 = vmatmul.msk.bf16.gmra.mxu0 %vm647_vm1, %v19083_v58 }
  0xae   : > { %v20406_v60 = vpop.f32.mrf.mxu2 }
  0xaf   : > { %23242 = vst [vmem:[#allocation12_spill] sm:$0xff] %v20406_v60  ;;  %v20408_v61 = vpop.f32.mrf.mxu3 }
  0xb0   : > { %23243 = vst [vmem:[#allocation13_spill] sm:$0xff] %v20408_v61  ;;  %v20410_v62 = vpop.f32.mrf.mxu1  ;;  %v16693_v61 = vld [vmem:[%s20304_s11] sm:$0xe] }
  0xb1   : > { %23244 = vst [vmem:[#allocation14_spill] sm:$0xff] %v20410_v62  ;;  %v20412_v63 = vpop.f32.mrf.mxu0 }
  0xb6   : > { %v20414_v0 = vpop.f32.mrf.mxu2 }
  0xb7   : > { %23245 = vst [vmem:[#allocation15_spill] sm:$0xff] %v20414_v0  ;;  %v20416_v1 = vpop.f32.mrf.mxu3 }
  0xb8   : > { %23246 = vst [vmem:[#allocation16_spill] sm:$0xff] %v20416_v1  ;;  %v20420_v4 = vpop.f32.mrf.mxu1 }
  0xb9   : > { %23247 = vst [vmem:[#allocation17_spill] sm:$0xff] %v20420_v4  ;;  %v20424_v7 = vpop.f32.mrf.mxu0 }
  0xbb   : > { %16310 = vmatmul.msk.bf16.gmra.mxu1 %vm647_vm1, %v19101_v2  ;;  %16327 = vmatmul.msk.bf16.gmra.mxu2 %vm647_vm1, %v19118_v3  ;;  %v19105_v2 = vld [vmem:[%s20304_s11 + $0xf8] sm:$0xff]  ;;  %v19122_v3 = vld [vmem:[%s20304_s11 + $0x180] sm:$0xff] }
  0xbc   : > { %16344 = vmatmul.msk.bf16.gmra.mxu3 %vm647_vm1, %v19135_v5  ;;  %16293 = vmatmul.msk.bf16.gmra.mxu0 %vm647_vm1, %v19084_v6  ;;  %v19139_v6 = vld [vmem:[%s20304_s11 + $0x208] sm:$0xff] }
  0xbe   : > { %v20430_v8 = vpop.f32.mrf.mxu2 }
  0xbf   : > { %23248 = vst [vmem:[#allocation18_spill] sm:$0xff] %v20430_v8  ;;  %v20432_v9 = vpop.f32.mrf.mxu3 }
  0xc0   : > { %23249 = vst [vmem:[#allocation19_spill] sm:$0xff] %v20432_v9  ;;  %v20434_v10 = vpop.f32.mrf.mxu1 }
  0xc1   : > { %23250 = vst [vmem:[#allocation20_spill] sm:$0xff] %v20434_v10  ;;  %v20436_v11 = vpop.f32.mrf.mxu0 }
  0xc6   : > { %v20438_v12 = vpop.f32.mrf.mxu2 }
  0xc7   : > { %23251 = vst [vmem:[#allocation21_spill] sm:$0xff] %v20438_v12  ;;  %v20440_v13 = vpop.f32.mrf.mxu3 }
  0xc8   : > { %23252 = vst [vmem:[#allocation22_spill] sm:$0xff] %v20440_v13  ;;  %v20444_v16 = vpop.f32.mrf.mxu1  ;;  %v19090_v13 = vld [vmem:[%s20304_s11 + $0x80] sm:$0xff] }
  0xc9   : > { %23253 = vst [vmem:[#allocation23_spill] sm:$0xff] %v20444_v16  ;;  %v20448_v19 = vpop.f32.mrf.mxu0 }
  0xcb   : > { %16311 = vmatmul.msk.bf16.gmra.mxu1 %vm647_vm1, %v19102_v14  ;;  %16328 = vmatmul.msk.bf16.gmra.mxu2 %vm647_vm1, %v19119_v15  ;;  %v19088_v14 = vld [vmem:[%s20304_s11 + $0x70] sm:$0xff] }
  0xcc   : > { %16345 = vmatmul.msk.bf16.gmra.mxu3 %vm647_vm1, %v19136_v17  ;;  %16294 = vmatmul.msk.bf16.gmra.mxu0 %vm647_vm1, %v19085_v18 }
  0xce   : > { %v20454_v20 = vpop.f32.mrf.mxu2 }
  0xcf   : > { %23254 = vst [vmem:[#allocation24_spill] sm:$0xff] %v20454_v20  ;;  %v20456_v21 = vpop.f32.mrf.mxu3  ;;  %v19279_v20 = vld [vmem:[%s20304_s11 + $0x18] sm:$0xff] }
  0xd0   : > { %23255 = vst [vmem:[#allocation25_spill] sm:$0xff] %v20456_v21  ;;  %v20458_v22 = vpop.f32.mrf.mxu1  ;;  %v19141_v21 = vld [vmem:[%s20304_s11 + $0x218] sm:$0xff]  ;;  %v5400_v60 = vrot.slane %v19279_v20, 1  ;;  %v19144_v20 = vld [vmem:[%s20304_s11 + $0x10] sm:$0xff] }
  0xd1   : > { %23256 = vst [vmem:[#allocation26_spill] sm:$0xff] %v20458_v22  ;;  %v20460_v23 = vpop.f32.mrf.mxu0 }
  0xd6   : > { %v20462_v24 = vpop.f32.mrf.mxu2 }
  0xd7   : > { %23257 = vst [vmem:[#allocation27_spill] sm:$0xff] %v20462_v24  ;;  %v20464_v25 = vpop.f32.mrf.mxu3 }
  0xd8   : > { %23258 = vst [vmem:[#allocation28_spill] sm:$0xff] %v20464_v25  ;;  %v20468_v28 = vpop.f32.mrf.mxu1 }
  0xd9   : > { %23259 = vst [vmem:[#allocation29_spill] sm:$0xff] %v20468_v28  ;;  %v20472_v31 = vpop.f32.mrf.mxu0 }
  0xdb   : > { %16312 = vmatmul.msk.bf16.gmra.mxu1 %vm647_vm1, %v19103_v26  ;;  %16329 = vmatmul.msk.bf16.gmra.mxu2 %vm647_vm1, %v19120_v27 }
  0xdc   : > { %16346 = vmatmul.msk.bf16.gmra.mxu3 %vm647_vm1, %v19137_v29  ;;  %16295 = vmatmul.msk.bf16.gmra.mxu0 %vm647_vm1, %v19086_v30 }
  0xde   : > { %v20478_v32 = vpop.f32.mrf.mxu2 }
  0xdf   : > { %23260 = vst [vmem:[#allocation30_spill] sm:$0xff] %v20478_v32  ;;  %v20480_v33 = vpop.f32.mrf.mxu3 }
  0xe0   : > { %23261 = vst [vmem:[#allocation31_spill] sm:$0xff] %v20480_v33  ;;  %v20482_v34 = vpop.f32.mrf.mxu1  ;;  %v19124_v33 = vld [vmem:[%s20304_s11 + $0x190] sm:$0xff] }
  0xe1   : > { %23262 = vst [vmem:[#allocation32_spill] sm:$0xff] %v20482_v34  ;;  %v20484_v35 = vpop.f32.mrf.mxu0 }
  0xe6   : > { %v20486_v36 = vpop.f32.mrf.mxu2 }
  0xe7   : > { %23263 = vst [vmem:[#allocation33_spill] sm:$0xff] %v20486_v36  ;;  %v20488_v37 = vpop.f32.mrf.mxu3  ;;  %v16694_v36 = vor.u32 %v19210_v53, %v16693_v61 }
  0xe8   : > { %23264 = vst [vmem:[#allocation34_spill] sm:$0xff] %v20488_v37  ;;  %v20492_v40 = vpop.f32.mrf.mxu1 }
  0xe9   : > { %23265 = vst [vmem:[#allocation35_spill] sm:$0xff] %v20492_v40  ;;  %v20496_v43 = vpop.f32.mrf.mxu0 }
  0xeb   : > { %16313 = vmatmul.msk.bf16.gmra.mxu1 %vm647_vm1, %v19104_v38  ;;  %16330 = vmatmul.msk.bf16.gmra.mxu2 %vm647_vm1, %v19121_v39  ;;  %v19106_v38 = vld [vmem:[%s20304_s11 + $0x100] sm:$0xff]  ;;  %v19123_v39 = vld [vmem:[%s20304_s11 + $0x188] sm:$0xff] }
  0xec   : > { %16347 = vmatmul.msk.bf16.gmra.mxu3 %vm647_vm1, %v19138_v41  ;;  %16296 = vmatmul.msk.bf16.gmra.mxu0 %vm647_vm1, %v19087_v42  ;;  %v19140_v42 = vld [vmem:[%s20304_s11 + $0x210] sm:$0xff] }
  0xee   : > { %v20502_v45 = vpop.f32.mrf.mxu2 }
  0xef   : > { %23266 = vst [vmem:[#allocation36_spill] sm:$0xff] %v20502_v45  ;;  %v20504_v46 = vpop.f32.mrf.mxu3 }
  0xf0   : > { %23267 = vst [vmem:[#allocation37_spill] sm:$0xff] %v20504_v46  ;;  %v20506_v54 = vpop.f32.mrf.mxu1  ;;  %v19346_v46 = vld [vmem:[%s20304_s11 + $0x10] sm:$0xf0] }
  0xf1   : > { %23268 = vst [vmem:[#allocation38_spill] sm:$0xff] %v20506_v54  ;;  %v20508_v55 = vpop.f32.mrf.mxu0 }
  0xf6   : > { %v20510_v57 = vpop.f32.mrf.mxu2 }
  0xf7   : > { %23269 = vst [vmem:[#allocation39_spill] sm:$0xff] %v20510_v57  ;;  %v20512_v58 = vpop.f32.mrf.mxu3 }
  0xf8   : > { %23270 = vst [vmem:[#allocation40_spill] sm:$0xff] %v20512_v58  ;;  %v20516_v5 = vpop.f32.mrf.mxu1 }
  0xf9   : > { %23271 = vst [vmem:[#allocation41_spill] sm:$0xff] %v20516_v5  ;;  %v20520_v15 = vpop.f32.mrf.mxu0 }
  0xfb   : > { %16314 = vmatmul.msk.bf16.gmra.mxu1 %vm647_vm1, %v19105_v2  ;;  %16331 = vmatmul.msk.bf16.gmra.mxu2 %vm647_vm1, %v19122_v3  ;;  %v19089_v2 = vld [vmem:[%s20304_s11 + $0x78] sm:$0xff] }
  0xfc   : > { %16348 = vmatmul.msk.bf16.gmra.mxu3 %vm647_vm1, %v19139_v6  ;;  %16297 = vmatmul.msk.bf16.gmra.mxu0 %vm647_vm1, %v19088_v14  ;;  %v10286_v6 = vld [vmem:[%s23231_s1 + $0x18] sm:$0xf] }
  0xfd   : > { %v10972_v14 = vsel %vm852_vm0, %v10286_v6, 0 }
  0xfe   : > { %v20526_v17 = vpop.f32.mrf.mxu2  ;;  %10981 = vmatpush.bf16.msra.mxu2 %v10972_v14 }
  0xff   : > { %23272 = vst [vmem:[#allocation42_spill] sm:$0xff] %v20526_v17  ;;  %v20528_v18 = vpop.f32.mrf.mxu3 }
 0x100   : > { %23273 = vst [vmem:[#allocation43_spill] sm:$0xff] %v20528_v18  ;;  %v20530_v26 = vpop.f32.mrf.mxu1 }
 0x101   : > { %23274 = vst [vmem:[#allocation44_spill] sm:$0xff] %v20530_v26  ;;  %v20532_v27 = vpop.f32.mrf.mxu0 }
 0x106   : > { %v20534_v29 = vpop.f32.mrf.mxu2 }
 0x107   : > { %23275 = vst [vmem:[#allocation45_spill] sm:$0xff] %v20534_v29  ;;  %v20536_v30 = vpop.f32.mrf.mxu3 }
 0x108   : > { %23276 = vst [vmem:[#allocation46_spill] sm:$0xff] %v20536_v30  ;;  %v20540_v41 = vpop.f32.mrf.mxu1  ;;  %v11868_v30 = vld [vmem:[%s23231_s1 + $0x1c] sm:$0xf] }
 0x109   : > { %23277 = vst [vmem:[#allocation47_spill] sm:$0xff] %v20540_v41  ;;  %v20544_v3 = vpop.f32.mrf.mxu0 }
 0x10b   : > { %16315 = vmatmul.msk.bf16.gmra.mxu1 %vm647_vm1, %v19106_v38  ;;  %16332 = vmatmul.msk.bf16.gmra.mxu2 %vm647_vm1, %v19123_v39  ;;  %v13038_v38 = vsel %vm852_vm0, %v11868_v30, 0  ;;  %v13934_v30 = vld [vmem:[%s23231_s1 + $0x20] sm:$0xf] }
 0x10c   : > { %16349 = vmatmul.msk.bf16.gmra.mxu3 %vm647_vm1, %v19140_v42  ;;  %16298 = vmatmul.msk.bf16.gmra.mxu0 %vm647_vm1, %v19089_v2  ;;  %v8703_v42 = vld [vmem:[%s23231_s1 + $0x14] sm:$0xf]  ;;  %v14621_v14 = vsel %vm852_vm0, %v13934_v30, 0 }
 0x10d   : > { %13047 = vmatpush.bf16.msra.mxu3 %v13038_v38  ;;  %v9390_v6 = vsel %vm852_vm0, %v8703_v42, 0  ;;  %14630 = vmatpush.bf16.msra.mxu0 %v14621_v14  ;;  %v19107_v42 = vld [vmem:[%s20304_s11 + $0x108] sm:$0xff]  ;;  %v19347_v14 = vld [vmem:[%s20304_s11 + $0x18] sm:$0xff] }
 0x10e   : > { %v20557_v18 = vpop.f32.mrf.mxu2  ;;  %9399 = vmatpush.bf16.msra.mxu1 %v9390_v6  ;;  %v19142_v6 = vld [vmem:[%s20304_s11] sm:$0xff] }
 0x10f   : > { %23278 = vst [vmem:[#allocation48_spill] sm:$0xff] %v20557_v18  ;;  %v20560_v39 = vpop.f32.mrf.mxu3  ;;  %v1826_v1 = vshll.u32 %v19142_v6, 16  ;;  %v1824_v17 = vshrl.u32 %v19142_v6, 16 }
 0x110   : > { %23279 = vst [vmem:[#allocation49_spill] sm:$0xff] %v20560_v39  ;;  %v20565_v2 = vpop.f32.mrf.mxu1  ;;  %v17373_v39 = vld [vmem:[%s20304_s11 + $0x10] sm:$0xe] }
 0x111   : > { %23280 = vst [vmem:[#allocation50_spill] sm:$0xff] %v20565_v2  ;;  %v20568_v58 = vpop.f32.mrf.mxu0  ;;  %v17374_v9 = vor.u32 %v19346_v46, %v17373_v39  ;;  %v6991_v46 = vshrl.u32 %v19347_v14, 16  ;;  %v6994_v39 = vshll.u32 %v19347_v14, 16  ;;  %v1828_v57 = vrot.slane %v1826_v1, 1 }
 0x112   : > { %v3817_v1 = vrot.slane %v16694_v36, 1 }
 0x113   : > { %v6983_v18 = vshrl.u32 %v17374_v9, 16  ;;  %v6986_v29 = vshll.u32 %v17374_v9, 16  ;;  %v6993_v8 = vrot.slane %v6991_v46, 1  ;;  %v6996_v14 = vrot.slane %v6994_v39, 2 }
 0x115   : > { %v6985_v12 = vrot.slane %v6983_v18, 1  ;;  %v6988_v9 = vrot.slane %v6986_v29, 2  ;;  %v6997_v53 = vor.u32 %v6996_v14, %v6993_v8  ;;  %v19348_v8 = vld [vmem:[%s20304_s11 + $0x20] sm:$0xff] }
 0x116   : > { %v20574_v38 = vpop.f32.mrf.mxu2  ;;  %v7000_v36 = vshrl.u32 %v19348_v8, 16 }
 0x117   : > { %23281 = vst [vmem:[#allocation51_spill] sm:$0xff] %v20574_v38  ;;  %v20578_v37 = vpop.f32.mrf.mxu3  ;;  %v19278_v38 = vld [vmem:[%s20304_s11 + $0x10] sm:$0xf0]  ;;  %v6989_v52 = vor.u32 %v6988_v9, %v6985_v12  ;;  %v19280_v9 = vld [vmem:[%s20304_s11 + $0x20] sm:$0xff] }
 0x118   : > { %23282 = vst [vmem:[#allocation52_spill] sm:$0xff] %v20578_v37  ;;  %v20583_v25 = vpop.f32.mrf.mxu1  ;;  %v20593_v37 = vld [vmem:[%s20304_s11 + $0x8] sm:$0xff]  ;;  %v17034_v32 = vor.u32 %v19278_v38, %v17033_v49  ;;  %v7003_v38 = vshll.u32 %v19348_v8, 16  ;;  %v7002_v14 = vrot.slane %v7000_v36, 1 }
 0x119   : > { %23283 = vst [vmem:[#allocation53_spill] sm:$0xff] %v20583_v25  ;;  %v20587_v30 = vpop.f32.mrf.mxu0  ;;  %v6998_v12 = vsel %vm6981_vm4, %v6989_v52, %v6997_v53  ;;  %v1835_v52 = vshrl.u32 %v20593_v37, 16 }
 0x11b   : > { %16316 = vmatmul.msk.bf16.gmra.mxu1 %vm647_vm1, %v19107_v42  ;;  %16333 = vmatmul.msk.bf16.gmra.mxu2 %vm647_vm1, %v19124_v33 }
 0x11c   : > { %16350 = vmatmul.msk.bf16.gmra.mxu3 %vm647_vm1, %v19141_v21  ;;  %16299 = vmatmul.msk.bf16.gmra.mxu0 %vm647_vm1, %v19090_v13  ;;  %v1831_v21 = vshll.u32 %v20593_v37, 16  ;;  %v19211_v13 = vld [vmem:[%s20304_s11 + $0x8] sm:$0xff] }
 0x11d   : > { %v3818_v6 = vrot.slane %v19211_v13, 1 }
 0x11e   : > { %v20601_v42 = vpop.f32.mrf.mxu2  ;;  %v1833_v0 = vrot.slane %v1831_v21, 1  ;;  %v19212_v21 = vld [vmem:[%s20304_s11 + $0x10] sm:$0xff] }
 0x11f   : > { %23284 = vst [vmem:[#allocation54_spill] sm:$0xff] %v20601_v42  ;;  %v20603_v33 = vpop.f32.mrf.mxu3  ;;  %v1829_v42 = vor.u32 %v1828_v57, %v1824_v17  ;;  %v3819_v57 = vsel %vm3816_vm3, %v3817_v1, %v3818_v6  ;;  %v7005_v1 = vrot.slane %v7003_v38, 2  ;;  %v19349_v38 = vld [vmem:[%s20304_s11 + $0x28] sm:$0xff] }
 0x120   : > { %23285 = vst [vmem:[#allocation55_spill] sm:$0xff] %v20603_v33  ;;  %v20605_v45 = vpop.f32.mrf.mxu1  ;;  %v5399_v33 = vrot.slane %v17034_v32, 1 }
 0x121   : > { %23286 = vst [vmem:[#allocation56_spill] sm:$0xff] %v20605_v45  ;;  %v20609_v24 = vpop.f32.mrf.mxu0  ;;  %v1834_v29 = vsel %vm1822_vm2, %v1829_v42, %v1833_v0  ;;  %v7006_v8 = vor.u32 %v7005_v1, %v7002_v14  ;;  %v19213_v1 = vld [vmem:[%s20304_s11 + $0x18] sm:$0xff] }
 0x122   : > { %v5401_v32 = vsel %vm3816_vm3, %v5399_v33, %v5400_v60  ;;  %v1839_v33 = vshll.u32 %v19144_v20, 16 }
 0x123   : > { %v7007_v36 = vsel %vm6981_vm4, %v6997_v53, %v7006_v8  ;;  %v1843_v53 = vshrl.u32 %v19144_v20, 16 }
 0x126   : > { %v20612_v49 = vpop.f32.mrf.mxu2 }
 0x127   : > { %23287 = vst [vmem:[#allocation57_spill] sm:$0xff] %v20612_v49  ;;  %v20614_v61 = vpop.f32.mrf.mxu3 }
 0x128   : > { %23288 = vst [vmem:[#allocation58_spill] sm:$0xff] %v20614_v61  ;;  %v20616_v18 = vpop.f32.mrf.mxu1 }
 0x129   : > { %23289 = vst [vmem:[#allocation59_spill] sm:$0xff] %v20616_v18  ;;  %v20620_v17 = vpop.f32.mrf.mxu0 }
 0x12b   : > { %16623 = vmatmul.msk.bf16.vlgmr.msrb.gmra.mxu1 %vm647_vm1, %v1834_v29  ;;  %16963 = vmatmul.msk.bf16.vlgmr.msrb.gmra.mxu2 %vm647_vm1, %v3819_v57  ;;  %v1837_v29 = vor.u32 %v1835_v52, %v1833_v0  ;;  %v1841_v57 = vrot.slane %v1839_v33, 1  ;;  %v19145_v52 = vld [vmem:[%s20304_s11 + $0x18] sm:$0xff]  ;;  %v7009_v33 = vshrl.u32 %v19349_v38, 16 }
 0x12c   : > { %17303 = vmatmul.msk.bf16.vlgmr.msrb.gmra.mxu3 %vm647_vm1, %v5401_v32  ;;  %17643 = vmatmul.msk.bf16.vlgmr.msrb.gmra.mxu0 %vm647_vm1, %v6998_v12  ;;  %v3820_v32 = vrot.slane %v19212_v21, 1  ;;  %v5402_v12 = vrot.slane %v19280_v9, 1  ;;  %v1847_v14 = vshll.u32 %v19145_v52, 16 }
 0x12d   : > { %v1842_v37 = vsel %vm1822_vm2, %v1837_v29, %v1841_v57 }
 0x12e   : > { %v20630_v46 = vpop.f32.mrf.mxu2  ;;  %v3821_v49 = vsel %vm3816_vm3, %v3818_v6, %v3820_v32  ;;  %v5403_v0 = vsel %vm3816_vm3, %v5400_v60, %v5402_v12  ;;  %v7012_v6 = vshll.u32 %v19349_v38, 16 }
 0x12f   : > { %23290 = vst [vmem:[#allocation60_spill] sm:$0xff] %v20630_v46  ;;  %v20632_v39 = vpop.f32.mrf.mxu3 }
 0x130   : > { %23291 = vst [vmem:[#allocation61_spill] sm:$0xff] %v20632_v39  ;;  %v20634_v42 = vpop.f32.mrf.mxu1 }
 0x131   : > { %23292 = vst [vmem:[#allocation62_spill] sm:$0xff] %v20634_v42  ;;  %v20638_v13 = vpop.f32.mrf.mxu0 }
 0x136   : > { %v20641_v61 = vpop.f32.mrf.mxu2 }
 0x137   : > { %23293 = vst [vmem:[#allocation63_spill] sm:$0xff] %v20641_v61  ;;  %v20643_v39 = vpop.f32.mrf.mxu3  ;;  %v3822_v61 = vrot.slane %v19213_v1, 1 }
 0x138   : > { %23294 = vst [vmem:[#allocation64_spill] sm:$0xff] %v20643_v39  ;;  %v20645_v46 = vpop.f32.mrf.mxu1  ;;  %v1845_v39 = vor.u32 %v1843_v53, %v1841_v57 }
 0x139   : > { %23295 = vst [vmem:[#allocation65_spill] sm:$0xff] %v20645_v46  ;;  %v20649_v48 = vpop.f32.mrf.mxu0  ;;  %v3823_v42 = vsel %vm3816_vm3, %v3820_v32, %v3822_v61 }
 0x13b   : > { %16624 = vmatmul.msk.bf16.gmra.mxu1 %vm647_vm1, %v1842_v37  ;;  %16964 = vmatmul.msk.bf16.gmra.mxu2 %vm647_vm1, %v3821_v49  ;;  %v19281_v37 = vld [vmem:[%s20304_s11 + $0x28] sm:$0xff]  ;;  %v7011_v49 = vrot.slane %v7009_v33, 1 }
 0x13c   : > { %17304 = vmatmul.msk.bf16.gmra.mxu3 %vm647_vm1, %v5403_v0  ;;  %17644 = vmatmul.msk.bf16.gmra.mxu0 %vm647_vm1, %v7007_v36  ;;  %v7014_v0 = vrot.slane %v7012_v6, 2  ;;  %v1849_v36 = vrot.slane %v1847_v14, 1  ;;  %v5404_v38 = vrot.slane %v19281_v37, 1  ;;  %v19350_v6 = vld [vmem:[%s20304_s11 + $0x30] sm:$0xff] }
 0x13d   : > { %v7018_v53 = vshrl.u32 %v19350_v6, 16  ;;  %v7021_v32 = vshll.u32 %v19350_v6, 16 }
 0x13e   : > { %v20659_v21 = vpop.f32.mrf.mxu2  ;;  %v7015_v46 = vor.u32 %v7014_v0, %v7011_v49  ;;  %v1850_v20 = vsel %vm1822_vm2, %v1845_v39, %v1849_v36  ;;  %v5405_v57 = vsel %vm3816_vm3, %v5402_v12, %v5404_v38  ;;  %v19146_v39 = vld [vmem:[%s20304_s11 + $0x20] sm:$0xff] }
 0x13f   : > { %23296 = vst [vmem:[#allocation66_spill] sm:$0xff] %v20659_v21  ;;  %v20661_v9 = vpop.f32.mrf.mxu3  ;;  %v1855_v37 = vshll.u32 %v19146_v39, 16  ;;  %v19214_v49 = vld [vmem:[%s20304_s11 + $0x20] sm:$0xff] }
 0x140   : > { %23297 = vst [vmem:[#allocation67_spill] sm:$0xff] %v20661_v9  ;;  %v20663_v60 = vpop.f32.mrf.mxu1  ;;  %v7016_v33 = vsel %vm6981_vm4, %v7006_v8, %v7015_v46  ;;  %v1851_v8 = vshrl.u32 %v19145_v52, 16 }
 0x141   : > { %23298 = vst [vmem:[#allocation68_spill] sm:$0xff] %v20663_v60  ;;  %v20666_v29 = vpop.f32.mrf.mxu0 }
 0x146   : > { %v20669_v21 = vpop.f32.mrf.mxu2 }
 0x147   : > { %23299 = vst [vmem:[#allocation69_spill] sm:$0xff] %v20669_v21  ;;  %v20671_v9 = vpop.f32.mrf.mxu3  ;;  %v3824_v21 = vrot.slane %v19214_v49, 1 }
 0x148   : > { %23300 = vst [vmem:[#allocation70_spill] sm:$0xff] %v20671_v9  ;;  %v20673_v60 = vpop.f32.mrf.mxu1  ;;  %v1853_v9 = vor.u32 %v1851_v8, %v1849_v36 }
 0x149   : > { %23301 = vst [vmem:[#allocation71_spill] sm:$0xff] %v20673_v60  ;;  %v20677_v18 = vpop.f32.mrf.mxu0  ;;  %v3825_v45 = vsel %vm3816_vm3, %v3822_v61, %v3824_v21 }
 0x14b   : > { %16625 = vmatmul.msk.bf16.gmra.mxu1 %vm647_vm1, %v1850_v20  ;;  %16965 = vmatmul.msk.bf16.gmra.mxu2 %vm647_vm1, %v3823_v42  ;;  %v19282_v20 = vld [vmem:[%s20304_s11 + $0x30] sm:$0xff]  ;;  %v7020_v42 = vrot.slane %v7018_v53, 1 }
 0x14c   : > { %17305 = vmatmul.msk.bf16.gmra.mxu3 %vm647_vm1, %v5405_v57  ;;  %17645 = vmatmul.msk.bf16.gmra.mxu0 %vm647_vm1, %v7016_v33  ;;  %v7023_v57 = vrot.slane %v7021_v32, 2  ;;  %v1857_v33 = vrot.slane %v1855_v37, 1  ;;  %v5406_v6 = vrot.slane %v19282_v20, 1  ;;  %v19351_v32 = vld [vmem:[%s20304_s11 + $0x38] sm:$0xff] }
 0x14d   : > { %v7027_v8 = vshrl.u32 %v19351_v32, 16  ;;  %v7030_v61 = vshll.u32 %v19351_v32, 16 }
 0x14e   : > { %v20687_v14 = vpop.f32.mrf.mxu2  ;;  %v7024_v60 = vor.u32 %v7023_v57, %v7020_v42  ;;  %v1858_v52 = vsel %vm1822_vm2, %v1853_v9, %v1857_v33  ;;  %v5407_v36 = vsel %vm3816_vm3, %v5404_v38, %v5406_v6  ;;  %v19147_v9 = vld [vmem:[%s20304_s11 + $0x28] sm:$0xff] }
 0x14f   : > { %23302 = vst [vmem:[#allocation72_spill] sm:$0xff] %v20687_v14  ;;  %v20689_v1 = vpop.f32.mrf.mxu3  ;;  %v1863_v20 = vshll.u32 %v19147_v9, 16  ;;  %v19215_v42 = vld [vmem:[%s20304_s11 + $0x28] sm:$0xff] }
 0x150   : > { %23303 = vst [vmem:[#allocation73_spill] sm:$0xff] %v20689_v1  ;;  %v20691_v12 = vpop.f32.mrf.mxu1  ;;  %v7025_v53 = vsel %vm6981_vm4, %v7015_v46, %v7024_v60  ;;  %v1859_v46 = vshrl.u32 %v19146_v39, 16 }
 0x151   : > { %23304 = vst [vmem:[#allocation74_spill] sm:$0xff] %v20691_v12  ;;  %v20694_v0 = vpop.f32.mrf.mxu0 }
 0x156   : > { %v20697_v14 = vpop.f32.mrf.mxu2 }
 0x157   : > { %23305 = vst [vmem:[#allocation75_spill] sm:$0xff] %v20697_v14  ;;  %v20699_v1 = vpop.f32.mrf.mxu3  ;;  %v3826_v14 = vrot.slane %v19215_v42, 1 }
 0x158   : > { %23306 = vst [vmem:[#allocation76_spill] sm:$0xff] %v20699_v1  ;;  %v20701_v12 = vpop.f32.mrf.mxu1  ;;  %v1861_v1 = vor.u32 %v1859_v46, %v1857_v33 }
 0x159   : > { %23307 = vst [vmem:[#allocation77_spill] sm:$0xff] %v20701_v12  ;;  %v20705_v25 = vpop.f32.mrf.mxu0  ;;  %v3827_v2 = vsel %vm3816_vm3, %v3824_v21, %v3826_v14 }
 0x15b   : > { %16626 = vmatmul.msk.bf16.gmra.mxu1 %vm647_vm1, %v1858_v52  ;;  %16966 = vmatmul.msk.bf16.gmra.mxu2 %vm647_vm1, %v3825_v45  ;;  %v19283_v52 = vld [vmem:[%s20304_s11 + $0x38] sm:$0xff]  ;;  %v7029_v45 = vrot.slane %v7027_v8, 1 }
 0x15c   : > { %17306 = vmatmul.msk.bf16.gmra.mxu3 %vm647_vm1, %v5407_v36  ;;  %17646 = vmatmul.msk.bf16.gmra.mxu0 %vm647_vm1, %v7025_v53  ;;  %v7032_v36 = vrot.slane %v7030_v61, 2  ;;  %v1865_v53 = vrot.slane %v1863_v20, 1  ;;  %v5408_v32 = vrot.slane %v19283_v52, 1  ;;  %v19352_v61 = vld [vmem:[%s20304_s11 + $0x40] sm:$0xff] }
 0x15d   : > { %v7036_v46 = vshrl.u32 %v19352_v61, 16  ;;  %v7039_v21 = vshll.u32 %v19352_v61, 16 }
 0x15e   : > { %v20715_v37 = vpop.f32.mrf.mxu2  ;;  %v7033_v12 = vor.u32 %v7032_v36, %v7029_v45  ;;  %v1866_v39 = vsel %vm1822_vm2, %v1861_v1, %v1865_v53  ;;  %v5409_v33 = vsel %vm3816_vm3, %v5406_v6, %v5408_v32  ;;  %v19148_v1 = vld [vmem:[%s20304_s11 + $0x30] sm:$0xff] }
 0x15f   : > { %23308 = vst [vmem:[#allocation78_spill] sm:$0xff] %v20715_v37  ;;  %v20717_v49 = vpop.f32.mrf.mxu3  ;;  %v1871_v52 = vshll.u32 %v19148_v1, 16  ;;  %v19216_v45 = vld [vmem:[%s20304_s11 + $0x30] sm:$0xff] }
 0x160   : > { %23309 = vst [vmem:[#allocation79_spill] sm:$0xff] %v20717_v49  ;;  %v20719_v38 = vpop.f32.mrf.mxu1  ;;  %v7034_v8 = vsel %vm6981_vm4, %v7024_v60, %v7033_v12  ;;  %v1867_v60 = vshrl.u32 %v19147_v9, 16 }
 0x161   : > { %23310 = vst [vmem:[#allocation80_spill] sm:$0xff] %v20719_v38  ;;  %v20722_v57 = vpop.f32.mrf.mxu0 }
 0x166   : > { %v20725_v37 = vpop.f32.mrf.mxu2 }
 0x167   : > { %23311 = vst [vmem:[#allocation81_spill] sm:$0xff] %v20725_v37  ;;  %v20727_v49 = vpop.f32.mrf.mxu3  ;;  %v3828_v37 = vrot.slane %v19216_v45, 1 }
 0x168   : > { %23312 = vst [vmem:[#allocation82_spill] sm:$0xff] %v20727_v49  ;;  %v20729_v38 = vpop.f32.mrf.mxu1  ;;  %v1869_v49 = vor.u32 %v1867_v60, %v1865_v53 }
 0x169   : > { %23313 = vst [vmem:[#allocation83_spill] sm:$0xff] %v20729_v38  ;;  %v20733_v41 = vpop.f32.mrf.mxu0  ;;  %v3829_v26 = vsel %vm3816_vm3, %v3826_v14, %v3828_v37 }
 0x16b   : > { %16627 = vmatmul.msk.bf16.gmra.mxu1 %vm647_vm1, %v1866_v39  ;;  %16967 = vmatmul.msk.bf16.gmra.mxu2 %vm647_vm1, %v3827_v2  ;;  %v19284_v39 = vld [vmem:[%s20304_s11 + $0x40] sm:$0xff]  ;;  %v7038_v2 = vrot.slane %v7036_v46, 1 }
 0x16c   : > { %17307 = vmatmul.msk.bf16.gmra.mxu3 %vm647_vm1, %v5409_v33  ;;  %17647 = vmatmul.msk.bf16.gmra.mxu0 %vm647_vm1, %v7034_v8  ;;  %v7041_v33 = vrot.slane %v7039_v21, 2  ;;  %v1873_v8 = vrot.slane %v1871_v52, 1  ;;  %v5410_v61 = vrot.slane %v19284_v39, 1  ;;  %v19353_v21 = vld [vmem:[%s20304_s11 + $0x48] sm:$0xff] }
 0x16d   : > { %v7045_v60 = vshrl.u32 %v19353_v21, 16  ;;  %v7048_v14 = vshll.u32 %v19353_v21, 16 }
 0x16e   : > { %v20743_v20 = vpop.f32.mrf.mxu2  ;;  %v7042_v38 = vor.u32 %v7041_v33, %v7038_v2  ;;  %v1874_v9 = vsel %vm1822_vm2, %v1869_v49, %v1873_v8  ;;  %v5411_v53 = vsel %vm3816_vm3, %v5408_v32, %v5410_v61  ;;  %v19149_v49 = vld [vmem:[%s20304_s11 + $0x38] sm:$0xff] }
 0x16f   : > { %23314 = vst [vmem:[#allocation84_spill] sm:$0xff] %v20743_v20  ;;  %v20745_v42 = vpop.f32.mrf.mxu3  ;;  %v1879_v39 = vshll.u32 %v19149_v49, 16  ;;  %v19217_v2 = vld [vmem:[%s20304_s11 + $0x38] sm:$0xff] }
 0x170   : > { %23315 = vst [vmem:[#allocation85_spill] sm:$0xff] %v20745_v42  ;;  %v20747_v6 = vpop.f32.mrf.mxu1  ;;  %v7043_v46 = vsel %vm6981_vm4, %v7033_v12, %v7042_v38  ;;  %v1875_v12 = vshrl.u32 %v19148_v1, 16 }
 0x171   : > { %23316 = vst [vmem:[#allocation86_spill] sm:$0xff] %v20747_v6  ;;  %v20750_v36 = vpop.f32.mrf.mxu0 }
 0x176   : > { %v20753_v20 = vpop.f32.mrf.mxu2 }
 0x177   : > { %23317 = vst [vmem:[#allocation87_spill] sm:$0xff] %v20753_v20  ;;  %v20755_v42 = vpop.f32.mrf.mxu3  ;;  %v3830_v20 = vrot.slane %v19217_v2, 1 }
 0x178   : > { %23318 = vst [vmem:[#allocation88_spill] sm:$0xff] %v20755_v42  ;;  %v20757_v6 = vpop.f32.mrf.mxu1  ;;  %v1877_v42 = vor.u32 %v1875_v12, %v1873_v8 }
 0x179   : > { %23319 = vst [vmem:[#allocation89_spill] sm:$0xff] %v20757_v6  ;;  %v20761_v5 = vpop.f32.mrf.mxu0  ;;  %v3831_v54 = vsel %vm3816_vm3, %v3828_v37, %v3830_v20 }
 0x17b   : > { %16628 = vmatmul.msk.bf16.gmra.mxu1 %vm647_vm1, %v1874_v9  ;;  %16968 = vmatmul.msk.bf16.gmra.mxu2 %vm647_vm1, %v3829_v26  ;;  %v19285_v9 = vld [vmem:[%s20304_s11 + $0x48] sm:$0xff]  ;;  %v7047_v26 = vrot.slane %v7045_v60, 1 }
 0x17c   : > { %17308 = vmatmul.msk.bf16.gmra.mxu3 %vm647_vm1, %v5411_v53  ;;  %17648 = vmatmul.msk.bf16.gmra.mxu0 %vm647_vm1, %v7043_v46  ;;  %v7050_v53 = vrot.slane %v7048_v14, 2  ;;  %v1881_v46 = vrot.slane %v1879_v39, 1  ;;  %v5412_v21 = vrot.slane %v19285_v9, 1  ;;  %v19354_v14 = vld [vmem:[%s20304_s11 + $0x50] sm:$0xff] }
 0x17d   : > { %v7054_v12 = vshrl.u32 %v19354_v14, 16  ;;  %v7057_v37 = vshll.u32 %v19354_v14, 16 }
 0x17e   : > { %v20771_v52 = vpop.f32.mrf.mxu2  ;;  %v7051_v6 = vor.u32 %v7050_v53, %v7047_v26  ;;  %v1882_v1 = vsel %vm1822_vm2, %v1877_v42, %v1881_v46  ;;  %v5413_v8 = vsel %vm3816_vm3, %v5410_v61, %v5412_v21  ;;  %v19150_v42 = vld [vmem:[%s20304_s11 + $0x40] sm:$0xff] }
 0x17f   : > { %23320 = vst [vmem:[#allocation90_spill] sm:$0xff] %v20771_v52  ;;  %v20773_v45 = vpop.f32.mrf.mxu3  ;;  %v1887_v9 = vshll.u32 %v19150_v42, 16  ;;  %v19218_v26 = vld [vmem:[%s20304_s11 + $0x40] sm:$0xff] }
 0x180   : > { %23321 = vst [vmem:[#allocation91_spill] sm:$0xff] %v20773_v45  ;;  %v20775_v32 = vpop.f32.mrf.mxu1  ;;  %v7052_v60 = vsel %vm6981_vm4, %v7042_v38, %v7051_v6  ;;  %v1883_v38 = vshrl.u32 %v19149_v49, 16 }
 0x181   : > { %23322 = vst [vmem:[#allocation92_spill] sm:$0xff] %v20775_v32  ;;  %v20778_v33 = vpop.f32.mrf.mxu0 }
 0x186   : > { %v20781_v52 = vpop.f32.mrf.mxu2 }
 0x187   : > { %23323 = vst [vmem:[#allocation93_spill] sm:$0xff] %v20781_v52  ;;  %v20783_v45 = vpop.f32.mrf.mxu3  ;;  %v3832_v52 = vrot.slane %v19218_v26, 1 }
 0x188   : > { %23324 = vst [vmem:[#allocation94_spill] sm:$0xff] %v20783_v45  ;;  %v20785_v32 = vpop.f32.mrf.mxu1  ;;  %v1885_v45 = vor.u32 %v1883_v38, %v1881_v46 }
 0x189   : > { %23325 = vst [vmem:[#allocation95_spill] sm:$0xff] %v20785_v32  ;;  %v20789_v40 = vpop.f32.mrf.mxu0  ;;  %v3833_v34 = vsel %vm3816_vm3, %v3830_v20, %v3832_v52 }
 0x18b   : > { %16629 = vmatmul.msk.bf16.gmra.mxu1 %vm647_vm1, %v1882_v1  ;;  %16969 = vmatmul.msk.bf16.gmra.mxu2 %vm647_vm1, %v3831_v54  ;;  %v19286_v1 = vld [vmem:[%s20304_s11 + $0x50] sm:$0xff]  ;;  %v7056_v54 = vrot.slane %v7054_v12, 1 }
 0x18c   : > { %17309 = vmatmul.msk.bf16.gmra.mxu3 %vm647_vm1, %v5413_v8  ;;  %17649 = vmatmul.msk.bf16.gmra.mxu0 %vm647_vm1, %v7052_v60  ;;  %v7059_v8 = vrot.slane %v7057_v37, 2  ;;  %v1889_v60 = vrot.slane %v1887_v9, 1  ;;  %v5414_v14 = vrot.slane %v19286_v1, 1  ;;  %v19355_v37 = vld [vmem:[%s20304_s11 + $0x58] sm:$0xff] }
 0x18d   : > { %v7063_v38 = vshrl.u32 %v19355_v37, 16  ;;  %v7066_v20 = vshll.u32 %v19355_v37, 16 }
 0x18e   : > { %v20799_v39 = vpop.f32.mrf.mxu2  ;;  %v7060_v32 = vor.u32 %v7059_v8, %v7056_v54  ;;  %v1890_v49 = vsel %vm1822_vm2, %v1885_v45, %v1889_v60  ;;  %v5415_v46 = vsel %vm3816_vm3, %v5412_v21, %v5414_v14  ;;  %v19151_v45 = vld [vmem:[%s20304_s11 + $0x48] sm:$0xff] }
 0x18f   : > { %23326 = vst [vmem:[#allocation96_spill] sm:$0xff] %v20799_v39  ;;  %v20801_v2 = vpop.f32.mrf.mxu3  ;;  %v1895_v1 = vshll.u32 %v19151_v45, 16  ;;  %v19219_v54 = vld [vmem:[%s20304_s11 + $0x48] sm:$0xff] }
 0x190   : > { %23327 = vst [vmem:[#allocation97_spill] sm:$0xff] %v20801_v2  ;;  %v20803_v61 = vpop.f32.mrf.mxu1  ;;  %v7061_v12 = vsel %vm6981_vm4, %v7051_v6, %v7060_v32  ;;  %v1891_v6 = vshrl.u32 %v19150_v42, 16 }
 0x191   : > { %23328 = vst [vmem:[#allocation98_spill] sm:$0xff] %v20803_v61  ;;  %v20806_v53 = vpop.f32.mrf.mxu0 }
 0x196   : > { %v20809_v39 = vpop.f32.mrf.mxu2 }
 0x197   : > { %23329 = vst [vmem:[#allocation99_spill] sm:$0xff] %v20809_v39  ;;  %v20811_v2 = vpop.f32.mrf.mxu3  ;;  %v3834_v39 = vrot.slane %v19219_v54, 1 }
 0x198   : > { %23330 = vst [vmem:[#allocation100_spill] sm:$0xff] %v20811_v2  ;;  %v20813_v61 = vpop.f32.mrf.mxu1  ;;  %v1893_v2 = vor.u32 %v1891_v6, %v1889_v60  ;;  %v19356_v60 = vld [vmem:[%s20304_s11 + $0x60] sm:$0xff] }
 0x199   : > { %23331 = vst [vmem:[#allocation101_spill] sm:$0xff] %v20813_v61  ;;  %v20817_v28 = vpop.f32.mrf.mxu0  ;;  %v3835_v22 = vsel %vm3816_vm3, %v3832_v52, %v3834_v39  ;;  %v7072_v52 = vshrl.u32 %v19356_v60, 16  ;;  %v7075_v6 = vshll.u32 %v19356_v60, 16 }
 0x19b   : > { %16630 = vmatmul.msk.bf16.gmra.mxu1 %vm647_vm1, %v1890_v49  ;;  %16970 = vmatmul.msk.bf16.gmra.mxu2 %vm647_vm1, %v3833_v34  ;;  %v19287_v49 = vld [vmem:[%s20304_s11 + $0x58] sm:$0xff]  ;;  %v7065_v34 = vrot.slane %v7063_v38, 1  ;;  %v7077_v4 = vrot.slane %v7075_v6, 2 }
 0x19c   : > { %17310 = vmatmul.msk.bf16.gmra.mxu3 %vm647_vm1, %v5415_v46  ;;  %17650 = vmatmul.msk.bf16.gmra.mxu0 %vm647_vm1, %v7061_v12  ;;  %v7068_v46 = vrot.slane %v7066_v20, 2  ;;  %v1897_v12 = vrot.slane %v1895_v1, 1  ;;  %v5416_v37 = vrot.slane %v19287_v49, 1  ;;  %v19152_v20 = vld [vmem:[%s20304_s11 + $0x50] sm:$0xff]  ;;  %v1899_v49 = vshrl.u32 %v19151_v45, 16 }
 0x19e   : > { %v20827_v9 = vpop.f32.mrf.mxu2  ;;  %v7069_v61 = vor.u32 %v7068_v46, %v7065_v34  ;;  %v1898_v42 = vsel %vm1822_vm2, %v1893_v2, %v1897_v12  ;;  %v5417_v10 = vsel %vm3816_vm3, %v5414_v14, %v5416_v37  ;;  %v1903_v34 = vshll.u32 %v19152_v20, 16  ;;  %v19220_v46 = vld [vmem:[%s20304_s11 + $0x50] sm:$0xff] }
 0x19f   : > { %23332 = vst [vmem:[#allocation102_spill] sm:$0xff] %v20827_v9  ;;  %v20829_v26 = vpop.f32.mrf.mxu3 }
 0x1a0   : > { %23333 = vst [vmem:[#allocation103_spill] sm:$0xff] %v20829_v26  ;;  %v20831_v21 = vpop.f32.mrf.mxu1  ;;  %v7070_v38 = vsel %vm6981_vm4, %v7060_v32, %v7069_v61  ;;  %v1905_v62 = vrot.slane %v1903_v34, 1 }
 0x1a1   : > { %23334 = vst [vmem:[#allocation104_spill] sm:$0xff] %v20831_v21  ;;  %v20834_v8 = vpop.f32.mrf.mxu0 }
 0x1a6   : > { %v20837_v9 = vpop.f32.mrf.mxu2 }
 0x1a7   : > { %23335 = vst [vmem:[#allocation105_spill] sm:$0xff] %v20837_v9  ;;  %v20839_v26 = vpop.f32.mrf.mxu3  ;;  %v7074_v9 = vrot.slane %v7072_v52, 1 }
 0x1a8   : > { %23336 = vst [vmem:[#allocation106_spill] sm:$0xff] %v20839_v26  ;;  %v2587_v21 = vpop.f32.mrf.mxu1 }
 0x1a9   : > { %v7818_v16 = vpop.f32.mrf.mxu0  ;;  %v3063_v2 = vadd.f32 %v2587_v21, %v20376_v47  ;;  %v3836_v47 = vrot.slane %v19220_v46, 1  ;;  %v1907_v46 = vshrl.u32 %v19152_v20, 16 }
 0x1ab   : > { %16631 = vmatmul.msk.bf16.gmra.mxu1 %vm647_vm1, %v1898_v42  ;;  %16971 = vmatmul.msk.bf16.gmra.mxu2 %vm647_vm1, %v3835_v22  ;;  %v19288_v22 = vld [vmem:[%s20304_s11 + $0x60] sm:$0xff]  ;;  %v3837_v52 = vsel %vm3816_vm3, %v3834_v39, %v3836_v47 }
 0x1ac   : > { %17311 = vmatmul.msk.bf16.gmra.mxu3 %vm647_vm1, %v5417_v10  ;;  %17651 = vmatmul.msk.bf16.gmra.mxu0 %vm647_vm1, %v7070_v38  ;;  %v1901_v38 = vor.u32 %v1899_v49, %v1897_v12  ;;  %v5418_v60 = vrot.slane %v19288_v22, 1  ;;  %v19357_v49 = vld [vmem:[%s20304_s11 + $0x68] sm:$0xff]  ;;  %v19221_v22 = vld [vmem:[%s20304_s11 + $0x58] sm:$0xff] }
 0x1ad   : > { %v7081_v39 = vshrl.u32 %v19357_v49, 16 }
 0x1ae   : > { %v4170_v1 = vpop.f32.mrf.mxu2  ;;  %v5419_v12 = vsel %vm3816_vm3, %v5416_v37, %v5418_v60 }
 0x1af   : > { %v4646_v14 = vadd.f32 %v4170_v1, %v3063_v2  ;;  %v5752_v54 = vpop.f32.mrf.mxu3  ;;  %v7078_v2 = vor.u32 %v7077_v4, %v7074_v9  ;;  %v19153_v4 = vld [vmem:[%s20304_s11 + $0x58] sm:$0xff]  ;;  %v7084_v9 = vshll.u32 %v19357_v49, 16 }
 0x1b0   : > { %v2589_v32 = vpop.f32.mrf.mxu1 }
 0x1b1   : > { %v6228_v42 = vadd.f32 %v5752_v54, %v4646_v14  ;;  %v7820_v26 = vpop.f32.mrf.mxu0  ;;  %v3064_v21 = vadd.f32 %v2589_v32, %v20388_v51  ;;  %v1906_v14 = vsel %vm1822_vm2, %v1901_v38, %v1905_v62  ;;  %v7079_v54 = vsel %vm6981_vm4, %v7069_v61, %v7078_v2 }
 0x1b3   : > { %v20854_v10 = vadd.f32 %v7818_v16, %v6228_v42  ;;  %v1911_v42 = vshll.u32 %v19153_v4, 16 }
 0x1b6   : > { %v4172_v1 = vpop.f32.mrf.mxu2 }
 0x1b7   : > { %v4647_v45 = vadd.f32 %v4172_v1, %v3064_v21  ;;  %v5754_v56 = vpop.f32.mrf.mxu3  ;;  %v19289_v21 = vld [vmem:[%s20304_s11 + $0x68] sm:$0xff]  ;;  %v7083_v1 = vrot.slane %v7081_v39, 1 }
 0x1b8   : > { %v2592_v50 = vpop.f32.mrf.mxu1 }
 0x1b9   : > { %v6229_v6 = vadd.f32 %v5754_v56, %v4647_v45  ;;  %v7823_v16 = vpop.f32.mrf.mxu0  ;;  %v3065_v56 = vadd.f32 %v2592_v50, %v20400_v59  ;;  %v7086_v45 = vrot.slane %v7084_v9, 2  ;;  %v3838_v50 = vrot.slane %v19221_v22, 1 }
 0x1bb   : > { %16632 = vmatmul.msk.bf16.gmra.mxu1 %vm647_vm1, %v1906_v14  ;;  %16972 = vmatmul.msk.bf16.gmra.mxu2 %vm647_vm1, %v3837_v52  ;;  %v20864_v51 = vadd.f32 %v7820_v26, %v6229_v6  ;;  %v1909_v52 = vor.u32 %v1907_v46, %v1905_v62  ;;  %v1913_v6 = vrot.slane %v1911_v42, 1  ;;  %v3839_v39 = vsel %vm3816_vm3, %v3836_v47, %v3838_v50  ;;  %v19358_v46 = vld [vmem:[%s20304_s11 + $0x70] sm:$0xff]  ;;  %v19154_v47 = vld [vmem:[%s20304_s11 + $0x60] sm:$0xff] }
 0x1bc   : > { %17312 = vmatmul.msk.bf16.gmra.mxu3 %vm647_vm1, %v5419_v12  ;;  %17652 = vmatmul.msk.bf16.gmra.mxu0 %vm647_vm1, %v7079_v54  ;;  %v5420_v12 = vrot.slane %v19289_v21, 1  ;;  %v7087_v54 = vor.u32 %v7086_v45, %v7083_v1  ;;  %v7090_v42 = vshrl.u32 %v19358_v46, 16  ;;  %v1915_v1 = vshrl.u32 %v19153_v4, 16 }
 0x1bd   : > { %v1919_v45 = vshll.u32 %v19154_v47, 16 }
 0x1be   : > { %v4175_v37 = vpop.f32.mrf.mxu2  ;;  %v5421_v62 = vsel %vm3816_vm3, %v5418_v60, %v5420_v12  ;;  %v7093_v60 = vshll.u32 %v19358_v46, 16 }
 0x1bf   : > { %v4648_v61 = vadd.f32 %v4175_v37, %v3065_v56  ;;  %v5757_v32 = vpop.f32.mrf.mxu3 }
 0x1c0   : > { %v2594_v34 = vpop.f32.mrf.mxu1 }
 0x1c1   : > { %v6230_v38 = vadd.f32 %v5757_v32, %v4648_v61  ;;  %v7825_v26 = vpop.f32.mrf.mxu0  ;;  %v3066_v59 = vadd.f32 %v2594_v34, %v20412_v63  ;;  %v1914_v61 = vsel %vm1822_vm2, %v1909_v52, %v1913_v6  ;;  %v7088_v32 = vsel %vm6981_vm4, %v7078_v2, %v7087_v54  ;;  %v19222_v52 = vld [vmem:[%s20304_s11 + $0x60] sm:$0xff] }
 0x1c3   : > { %v20872_v14 = vadd.f32 %v7823_v16, %v6230_v38 }
 0x1c6   : > { %v4177_v49 = vpop.f32.mrf.mxu2 }
 0x1c7   : > { %v4649_v20 = vadd.f32 %v4177_v49, %v3066_v59  ;;  %v5759_v56 = vpop.f32.mrf.mxu3  ;;  %v19290_v49 = vld [vmem:[%s20304_s11 + $0x70] sm:$0xff] }
 0x1c8   : > { %v2597_v37 = vpop.f32.mrf.mxu1 }
 0x1c9   : > { %v6231_v9 = vadd.f32 %v5759_v56, %v4649_v20  ;;  %v7828_v16 = vpop.f32.mrf.mxu0  ;;  %v3067_v34 = vadd.f32 %v2597_v37, %v20424_v7  ;;  %v7092_v20 = vrot.slane %v7090_v42, 1  ;;  %v7095_v56 = vrot.slane %v7093_v60, 2 }
 0x1ca   : > { %v3840_v7 = vrot.slane %v19222_v52, 1 }
 0x1cb   : > { %16633 = vmatmul.msk.bf16.gmra.mxu1 %vm647_vm1, %v1914_v61  ;;  %16973 = vmatmul.msk.bf16.gmra.mxu2 %vm647_vm1, %v3839_v39  ;;  %v20882_v63 = vadd.f32 %v7825_v26, %v6231_v9  ;;  %v1917_v39 = vor.u32 %v1915_v1, %v1913_v6  ;;  %v1921_v9 = vrot.slane %v1919_v45, 1  ;;  %v19359_v1 = vld [vmem:[%s20304_s11 + $0x78] sm:$0xff] }
 0x1cc   : > { %17313 = vmatmul.msk.bf16.gmra.mxu3 %vm647_vm1, %v5421_v62  ;;  %17653 = vmatmul.msk.bf16.gmra.mxu0 %vm647_vm1, %v7088_v32  ;;  %v5422_v62 = vrot.slane %v19290_v49, 1  ;;  %v7096_v32 = vor.u32 %v7095_v56, %v7092_v20  ;;  %v3841_v42 = vsel %vm3816_vm3, %v3838_v50, %v3840_v7  ;;  %v19155_v50 = vld [vmem:[%s20304_s11 + $0x68] sm:$0xff]  ;;  %v7099_v45 = vshrl.u32 %v19359_v1, 16 }
 0x1cd   : > { %v1923_v20 = vshrl.u32 %v19154_v47, 16  ;;  %v1927_v56 = vshll.u32 %v19155_v50, 16 }
 0x1ce   : > { %v4180_v22 = vpop.f32.mrf.mxu2  ;;  %v5423_v6 = vsel %vm3816_vm3, %v5420_v12, %v5422_v62  ;;  %v7102_v12 = vshll.u32 %v19359_v1, 16 }
 0x1cf   : > { %v4650_v2 = vadd.f32 %v4180_v22, %v3067_v34  ;;  %v5762_v38 = vpop.f32.mrf.mxu3 }
 0x1d0   : > { %v2599_v21 = vpop.f32.mrf.mxu1 }
 0x1d1   : > { %v6232_v59 = vadd.f32 %v5762_v38, %v4650_v2  ;;  %v7830_v26 = vpop.f32.mrf.mxu0  ;;  %v3068_v37 = vadd.f32 %v2599_v21, %v20436_v11  ;;  %v1922_v2 = vsel %vm1822_vm2, %v1917_v39, %v1921_v9  ;;  %v7097_v38 = vsel %vm6981_vm4, %v7087_v54, %v7096_v32  ;;  %v19223_v39 = vld [vmem:[%s20304_s11 + $0x68] sm:$0xff] }
 0x1d3   : > { %v20890_v61 = vadd.f32 %v7828_v16, %v6232_v59 }
 0x1d6   : > { %v4182_v46 = vpop.f32.mrf.mxu2 }
 0x1d7   : > { %v4651_v4 = vadd.f32 %v4182_v46, %v3068_v37  ;;  %v5764_v34 = vpop.f32.mrf.mxu3  ;;  %v19291_v46 = vld [vmem:[%s20304_s11 + $0x78] sm:$0xff] }
 0x1d8   : > { %v2602_v22 = vpop.f32.mrf.mxu1 }
 0x1d9   : > { %v6233_v60 = vadd.f32 %v5764_v34, %v4651_v4  ;;  %v7833_v16 = vpop.f32.mrf.mxu0  ;;  %v3069_v21 = vadd.f32 %v2602_v22, %v20448_v19  ;;  %v7101_v4 = vrot.slane %v7099_v45, 1  ;;  %v7104_v34 = vrot.slane %v7102_v12, 2 }
 0x1da   : > { %v3842_v19 = vrot.slane %v19223_v39, 1 }
 0x1db   : > { %16634 = vmatmul.msk.bf16.gmra.mxu1 %vm647_vm1, %v1922_v2  ;;  %16974 = vmatmul.msk.bf16.gmra.mxu2 %vm647_vm1, %v3841_v42  ;;  %v20900_v11 = vadd.f32 %v7830_v26, %v6233_v60  ;;  %v1925_v42 = vor.u32 %v1923_v20, %v1921_v9  ;;  %v1929_v60 = vrot.slane %v1927_v56, 1  ;;  %v19360_v20 = vld [vmem:[%s20304_s11 + $0x80] sm:$0xff] }
 0x1dc   : > { %17314 = vmatmul.msk.bf16.gmra.mxu3 %vm647_vm1, %v5423_v6  ;;  %17654 = vmatmul.msk.bf16.gmra.mxu0 %vm647_vm1, %v7097_v38  ;;  %v5424_v6 = vrot.slane %v19291_v46, 1  ;;  %v7105_v38 = vor.u32 %v7104_v34, %v7101_v4  ;;  %v3843_v45 = vsel %vm3816_vm3, %v3840_v7, %v3842_v19  ;;  %v19156_v7 = vld [vmem:[%s20304_s11 + $0x70] sm:$0xff]  ;;  %v7108_v56 = vshrl.u32 %v19360_v20, 16 }
 0x1dd   : > { %v1931_v4 = vshrl.u32 %v19155_v50, 16  ;;  %v1935_v34 = vshll.u32 %v19156_v7, 16 }
 0x1de   : > { %v4185_v52 = vpop.f32.mrf.mxu2  ;;  %v5425_v9 = vsel %vm3816_vm3, %v5422_v62, %v5424_v6  ;;  %v7111_v62 = vshll.u32 %v19360_v20, 16 }
 0x1df   : > { %v4652_v54 = vadd.f32 %v4185_v52, %v3069_v21  ;;  %v5767_v59 = vpop.f32.mrf.mxu3 }
 0x1e0   : > { %v2604_v49 = vpop.f32.mrf.mxu1 }
 0x1e1   : > { %v6234_v37 = vadd.f32 %v5767_v59, %v4652_v54  ;;  %v7835_v26 = vpop.f32.mrf.mxu0  ;;  %v3070_v22 = vadd.f32 %v2604_v49, %v20460_v23  ;;  %v1930_v54 = vsel %vm1822_vm2, %v1925_v42, %v1929_v60  ;;  %v7106_v59 = vsel %vm6981_vm4, %v7096_v32, %v7105_v38  ;;  %v19224_v42 = vld [vmem:[%s20304_s11 + $0x70] sm:$0xff] }
 0x1e3   : > { %v20908_v2 = vadd.f32 %v7833_v16, %v6234_v37 }
 0x1e6   : > { %v4187_v1 = vpop.f32.mrf.mxu2 }
 0x1e7   : > { %v4653_v47 = vadd.f32 %v4187_v1, %v3070_v22  ;;  %v5769_v21 = vpop.f32.mrf.mxu3  ;;  %v19292_v1 = vld [vmem:[%s20304_s11 + $0x80] sm:$0xff] }
 0x1e8   : > { %v2607_v52 = vpop.f32.mrf.mxu1 }
 0x1e9   : > { %v6235_v12 = vadd.f32 %v5769_v21, %v4653_v47  ;;  %v7838_v16 = vpop.f32.mrf.mxu0  ;;  %v3071_v49 = vadd.f32 %v2607_v52, %v20472_v31  ;;  %v7110_v47 = vrot.slane %v7108_v56, 1  ;;  %v7113_v21 = vrot.slane %v7111_v62, 2 }
 0x1ea   : > { %v3844_v31 = vrot.slane %v19224_v42, 1 }
 0x1eb   : > { %16635 = vmatmul.msk.bf16.gmra.mxu1 %vm647_vm1, %v1930_v54  ;;  %16975 = vmatmul.msk.bf16.gmra.mxu2 %vm647_vm1, %v3843_v45  ;;  %v20918_v23 = vadd.f32 %v7835_v26, %v6235_v12  ;;  %v1933_v45 = vor.u32 %v1931_v4, %v1929_v60  ;;  %v1937_v12 = vrot.slane %v1935_v34, 1  ;;  %v19361_v4 = vld [vmem:[%s20304_s11 + $0x88] sm:$0xff] }
 0x1ec   : > { %17315 = vmatmul.msk.bf16.gmra.mxu3 %vm647_vm1, %v5425_v9  ;;  %17655 = vmatmul.msk.bf16.gmra.mxu0 %vm647_vm1, %v7106_v59  ;;  %v5426_v9 = vrot.slane %v19292_v1, 1  ;;  %v7114_v59 = vor.u32 %v7113_v21, %v7110_v47  ;;  %v3845_v56 = vsel %vm3816_vm3, %v3842_v19, %v3844_v31  ;;  %v19157_v19 = vld [vmem:[%s20304_s11 + $0x78] sm:$0xff]  ;;  %v7117_v34 = vshrl.u32 %v19361_v4, 16 }
 0x1ed   : > { %v1939_v47 = vshrl.u32 %v19156_v7, 16  ;;  %v1943_v21 = vshll.u32 %v19157_v19, 16 }
 0x1ee   : > { %v4190_v39 = vpop.f32.mrf.mxu2  ;;  %v5427_v60 = vsel %vm3816_vm3, %v5424_v6, %v5426_v9  ;;  %v7120_v6 = vshll.u32 %v19361_v4, 16 }
 0x1ef   : > { %v4654_v32 = vadd.f32 %v4190_v39, %v3071_v49  ;;  %v5772_v37 = vpop.f32.mrf.mxu3 }
 0x1f0   : > { %v2609_v46 = vpop.f32.mrf.mxu1 }
 0x1f1   : > { %v6236_v22 = vadd.f32 %v5772_v37, %v4654_v32  ;;  %v7840_v26 = vpop.f32.mrf.mxu0  ;;  %v3072_v52 = vadd.f32 %v2609_v46, %v20484_v35  ;;  %v1938_v32 = vsel %vm1822_vm2, %v1933_v45, %v1937_v12  ;;  %v7115_v37 = vsel %vm6981_vm4, %v7105_v38, %v7114_v59  ;;  %v19225_v45 = vld [vmem:[%s20304_s11 + $0x78] sm:$0xff] }
 0x1f3   : > { %v20926_v54 = vadd.f32 %v7838_v16, %v6236_v22 }
 0x1f6   : > { %v4192_v20 = vpop.f32.mrf.mxu2 }
 0x1f7   : > { %v4655_v50 = vadd.f32 %v4192_v20, %v3072_v52  ;;  %v5774_v49 = vpop.f32.mrf.mxu3  ;;  %v19293_v20 = vld [vmem:[%s20304_s11 + $0x88] sm:$0xff] }
 0x1f8   : > { %v2612_v39 = vpop.f32.mrf.mxu1 }
 0x1f9   : > { %v6237_v62 = vadd.f32 %v5774_v49, %v4655_v50  ;;  %v7843_v16 = vpop.f32.mrf.mxu0  ;;  %v3073_v46 = vadd.f32 %v2612_v39, %v20496_v43  ;;  %v7119_v50 = vrot.slane %v7117_v34, 1  ;;  %v7122_v49 = vrot.slane %v7120_v6, 2 }
 0x1fa   : > { %v3846_v43 = vrot.slane %v19225_v45, 1 }
 0x1fb   : > { %16636 = vmatmul.msk.bf16.gmra.mxu1 %vm647_vm1, %v1938_v32  ;;  %16976 = vmatmul.msk.bf16.gmra.mxu2 %vm647_vm1, %v3845_v56  ;;  %v20936_v35 = vadd.f32 %v7840_v26, %v6237_v62  ;;  %v1941_v56 = vor.u32 %v1939_v47, %v1937_v12  ;;  %v1945_v62 = vrot.slane %v1943_v21, 1  ;;  %v19362_v47 = vld [vmem:[%s20304_s11 + $0x90] sm:$0xff] }
 0x1fc   : > { %17316 = vmatmul.msk.bf16.gmra.mxu3 %vm647_vm1, %v5427_v60  ;;  %17656 = vmatmul.msk.bf16.gmra.mxu0 %vm647_vm1, %v7115_v37  ;;  %v5428_v60 = vrot.slane %v19293_v20, 1  ;;  %v7123_v37 = vor.u32 %v7122_v49, %v7119_v50  ;;  %v3847_v34 = vsel %vm3816_vm3, %v3844_v31, %v3846_v43  ;;  %v19158_v31 = vld [vmem:[%s20304_s11 + $0x80] sm:$0xff]  ;;  %v7126_v21 = vshrl.u32 %v19362_v47, 16 }
 0x1fd   : > { %v1947_v50 = vshrl.u32 %v19157_v19, 16  ;;  %v1951_v49 = vshll.u32 %v19158_v31, 16 }
 0x1fe   : > { %v4195_v42 = vpop.f32.mrf.mxu2  ;;  %v5429_v12 = vsel %vm3816_vm3, %v5426_v9, %v5428_v60  ;;  %v7129_v9 = vshll.u32 %v19362_v47, 16 }
 0x1ff   : > { %v4656_v38 = vadd.f32 %v4195_v42, %v3073_v46  ;;  %v5777_v22 = vpop.f32.mrf.mxu3 }
 0x200   : > { %v2614_v1 = vpop.f32.mrf.mxu1 }
 0x201   : > { %v6238_v52 = vadd.f32 %v5777_v22, %v4656_v38  ;;  %v7845_v26 = vpop.f32.mrf.mxu0  ;;  %v3074_v39 = vadd.f32 %v2614_v1, %v20508_v55  ;;  %v1946_v38 = vsel %vm1822_vm2, %v1941_v56, %v1945_v62  ;;  %v7124_v22 = vsel %vm6981_vm4, %v7114_v59, %v7123_v37  ;;  %v19226_v56 = vld [vmem:[%s20304_s11 + $0x80] sm:$0xff] }
 0x203   : > { %v20944_v32 = vadd.f32 %v7843_v16, %v6238_v52 }
 0x206   : > { %v4197_v4 = vpop.f32.mrf.mxu2 }
 0x207   : > { %v4657_v7 = vadd.f32 %v4197_v4, %v3074_v39  ;;  %v5779_v46 = vpop.f32.mrf.mxu3  ;;  %v19294_v4 = vld [vmem:[%s20304_s11 + $0x90] sm:$0xff] }
 0x208   : > { %v2617_v42 = vpop.f32.mrf.mxu1 }
 0x209   : > { %v6239_v6 = vadd.f32 %v5779_v46, %v4657_v7  ;;  %v7848_v16 = vpop.f32.mrf.mxu0  ;;  %v3075_v1 = vadd.f32 %v2617_v42, %v20520_v15  ;;  %v7128_v7 = vrot.slane %v7126_v21, 1  ;;  %v7131_v46 = vrot.slane %v7129_v9, 2 }
 0x20a   : > { %v3848_v15 = vrot.slane %v19226_v56, 1 }
 0x20b   : > { %16637 = vmatmul.msk.bf16.gmra.mxu1 %vm647_vm1, %v1946_v38  ;;  %16977 = vmatmul.msk.bf16.gmra.mxu2 %vm647_vm1, %v3847_v34  ;;  %v20954_v55 = vadd.f32 %v7845_v26, %v6239_v6  ;;  %v1949_v34 = vor.u32 %v1947_v50, %v1945_v62  ;;  %v1953_v6 = vrot.slane %v1951_v49, 1  ;;  %v19363_v50 = vld [vmem:[%s20304_s11 + $0x98] sm:$0xff] }
 0x20c   : > { %17317 = vmatmul.msk.bf16.gmra.mxu3 %vm647_vm1, %v5429_v12  ;;  %17657 = vmatmul.msk.bf16.gmra.mxu0 %vm647_vm1, %v7124_v22  ;;  %v5430_v12 = vrot.slane %v19294_v4, 1  ;;  %v7132_v22 = vor.u32 %v7131_v46, %v7128_v7  ;;  %v3849_v21 = vsel %vm3816_vm3, %v3846_v43, %v3848_v15  ;;  %v19159_v43 = vld [vmem:[%s20304_s11 + $0x88] sm:$0xff]  ;;  %v7135_v49 = vshrl.u32 %v19363_v50, 16 }
 0x20d   : > { %v1955_v7 = vshrl.u32 %v19158_v31, 16  ;;  %v1959_v46 = vshll.u32 %v19159_v43, 16 }
 0x20e   : > { %v4200_v45 = vpop.f32.mrf.mxu2  ;;  %v5431_v62 = vsel %vm3816_vm3, %v5428_v60, %v5430_v12  ;;  %v7138_v60 = vshll.u32 %v19363_v50, 16 }
 0x20f   : > { %v4658_v59 = vadd.f32 %v4200_v45, %v3075_v1  ;;  %v5782_v52 = vpop.f32.mrf.mxu3 }
 0x210   : > { %v2619_v20 = vpop.f32.mrf.mxu1 }
 0x211   : > { %v6240_v39 = vadd.f32 %v5782_v52, %v4658_v59  ;;  %v7850_v26 = vpop.f32.mrf.mxu0  ;;  %v3076_v42 = vadd.f32 %v2619_v20, %v20532_v27  ;;  %v1954_v59 = vsel %vm1822_vm2, %v1949_v34, %v1953_v6  ;;  %v7133_v52 = vsel %vm6981_vm4, %v7123_v37, %v7132_v22  ;;  %v19227_v34 = vld [vmem:[%s20304_s11 + $0x88] sm:$0xff] }
 0x213   : > { %v20962_v38 = vadd.f32 %v7848_v16, %v6240_v39 }
 0x216   : > { %v4202_v47 = vpop.f32.mrf.mxu2 }
 0x217   : > { %v4659_v19 = vadd.f32 %v4202_v47, %v3076_v42  ;;  %v5784_v1 = vpop.f32.mrf.mxu3  ;;  %v19295_v47 = vld [vmem:[%s20304_s11 + $0x98] sm:$0xff] }
 0x218   : > { %v2622_v45 = vpop.f32.mrf.mxu1 }
 0x219   : > { %v6241_v9 = vadd.f32 %v5784_v1, %v4659_v19  ;;  %v7853_v16 = vpop.f32.mrf.mxu0  ;;  %v3077_v20 = vadd.f32 %v2622_v45, %v20544_v3  ;;  %v7137_v19 = vrot.slane %v7135_v49, 1  ;;  %v7140_v1 = vrot.slane %v7138_v60, 2 }
 0x21a   : > { %v3850_v3 = vrot.slane %v19227_v34, 1 }
 0x21b   : > { %16638 = vmatmul.msk.bf16.gmra.mxu1 %vm647_vm1, %v1954_v59  ;;  %16978 = vmatmul.msk.bf16.gmra.mxu2 %vm647_vm1, %v3849_v21  ;;  %v20972_v27 = vadd.f32 %v7850_v26, %v6241_v9  ;;  %v1957_v21 = vor.u32 %v1955_v7, %v1953_v6  ;;  %v1961_v9 = vrot.slane %v1959_v46, 1  ;;  %v19364_v7 = vld [vmem:[%s20304_s11 + $0xa0] sm:$0xff] }
 0x21c   : > { %17318 = vmatmul.msk.bf16.gmra.mxu3 %vm647_vm1, %v5431_v62  ;;  %17658 = vmatmul.msk.bf16.gmra.mxu0 %vm647_vm1, %v7133_v52  ;;  %v5432_v62 = vrot.slane %v19295_v47, 1  ;;  %v7141_v52 = vor.u32 %v7140_v1, %v7137_v19  ;;  %v3851_v49 = vsel %vm3816_vm3, %v3848_v15, %v3850_v3  ;;  %v19160_v15 = vld [vmem:[%s20304_s11 + $0x90] sm:$0xff]  ;;  %v7144_v46 = vshrl.u32 %v19364_v7, 16 }
 0x21d   : > { %v1963_v19 = vshrl.u32 %v19159_v43, 16  ;;  %v1967_v1 = vshll.u32 %v19160_v15, 16 }
 0x21e   : > { %v4205_v56 = vpop.f32.mrf.mxu2  ;;  %v5433_v6 = vsel %vm3816_vm3, %v5430_v12, %v5432_v62  ;;  %v7147_v12 = vshll.u32 %v19364_v7, 16 }
 0x21f   : > { %v4660_v37 = vadd.f32 %v4205_v56, %v3077_v20  ;;  %v5787_v39 = vpop.f32.mrf.mxu3 }
 0x220   : > { %v2624_v4 = vpop.f32.mrf.mxu1 }
 0x221   : > { %v6242_v42 = vadd.f32 %v5787_v39, %v4660_v37  ;;  %v7855_v26 = vpop.f32.mrf.mxu0  ;;  %v3078_v45 = vadd.f32 %v2624_v4, %v20568_v58  ;;  %v1962_v37 = vsel %vm1822_vm2, %v1957_v21, %v1961_v9  ;;  %v7142_v39 = vsel %vm6981_vm4, %v7132_v22, %v7141_v52  ;;  %v19228_v21 = vld [vmem:[%s20304_s11 + $0x90] sm:$0xff] }
 0x223   : > { %v20980_v59 = vadd.f32 %v7853_v16, %v6242_v42 }
 0x226   : > { %v4207_v50 = vpop.f32.mrf.mxu2 }
 0x227   : > { %v4661_v31 = vadd.f32 %v4207_v50, %v3078_v45  ;;  %v5789_v20 = vpop.f32.mrf.mxu3  ;;  %v19296_v50 = vld [vmem:[%s20304_s11 + $0xa0] sm:$0xff] }
 0x228   : > { %v2627_v56 = vpop.f32.mrf.mxu1 }
 0x229   : > { %v6243_v60 = vadd.f32 %v5789_v20, %v4661_v31  ;;  %v7858_v16 = vpop.f32.mrf.mxu0  ;;  %v3079_v4 = vadd.f32 %v2627_v56, %v20587_v30  ;;  %v7146_v31 = vrot.slane %v7144_v46, 1  ;;  %v7149_v20 = vrot.slane %v7147_v12, 2 }
 0x22a   : > { %v3852_v30 = vrot.slane %v19228_v21, 1 }
 0x22b   : > { %16639 = vmatmul.msk.bf16.gmra.mxu1 %vm647_vm1, %v1962_v37  ;;  %16979 = vmatmul.msk.bf16.gmra.mxu2 %vm647_vm1, %v3851_v49  ;;  %v20990_v58 = vadd.f32 %v7855_v26, %v6243_v60  ;;  %v1965_v49 = vor.u32 %v1963_v19, %v1961_v9  ;;  %v1969_v60 = vrot.slane %v1967_v1, 1  ;;  %v19365_v19 = vld [vmem:[%s20304_s11 + $0xa8] sm:$0xff] }
 0x22c   : > { %17319 = vmatmul.msk.bf16.gmra.mxu3 %vm647_vm1, %v5433_v6  ;;  %17659 = vmatmul.msk.bf16.gmra.mxu0 %vm647_vm1, %v7142_v39  ;;  %v5434_v6 = vrot.slane %v19296_v50, 1  ;;  %v7150_v39 = vor.u32 %v7149_v20, %v7146_v31  ;;  %v3853_v46 = vsel %vm3816_vm3, %v3850_v3, %v3852_v30  ;;  %v19161_v3 = vld [vmem:[%s20304_s11 + $0x98] sm:$0xff]  ;;  %v7153_v1 = vshrl.u32 %v19365_v19, 16 }
 0x22d   : > { %v1971_v31 = vshrl.u32 %v19160_v15, 16  ;;  %v1975_v20 = vshll.u32 %v19161_v3, 16 }
 0x22e   : > { %v4210_v34 = vpop.f32.mrf.mxu2  ;;  %v5435_v9 = vsel %vm3816_vm3, %v5432_v62, %v5434_v6  ;;  %v7156_v62 = vshll.u32 %v19365_v19, 16 }
 0x22f   : > { %v4662_v22 = vadd.f32 %v4210_v34, %v3079_v4  ;;  %v5792_v42 = vpop.f32.mrf.mxu3 }
 0x230   : > { %v2629_v47 = vpop.f32.mrf.mxu1 }
 0x231   : > { %v6244_v45 = vadd.f32 %v5792_v42, %v4662_v22  ;;  %v7860_v26 = vpop.f32.mrf.mxu0  ;;  %v3080_v56 = vadd.f32 %v2629_v47, %v20609_v24  ;;  %v1970_v22 = vsel %vm1822_vm2, %v1965_v49, %v1969_v60  ;;  %v7151_v42 = vsel %vm6981_vm4, %v7141_v52, %v7150_v39  ;;  %v19229_v49 = vld [vmem:[%s20304_s11 + $0x98] sm:$0xff] }
 0x233   : > { %v20998_v37 = vadd.f32 %v7858_v16, %v6244_v45 }
 0x236   : > { %v4212_v7 = vpop.f32.mrf.mxu2 }
 0x237   : > { %v4663_v43 = vadd.f32 %v4212_v7, %v3080_v56  ;;  %v5794_v4 = vpop.f32.mrf.mxu3  ;;  %v19297_v7 = vld [vmem:[%s20304_s11 + $0xa8] sm:$0xff] }
 0x238   : > { %v2632_v34 = vpop.f32.mrf.mxu1 }
 0x239   : > { %v6245_v12 = vadd.f32 %v5794_v4, %v4663_v43  ;;  %v7863_v16 = vpop.f32.mrf.mxu0  ;;  %v3081_v47 = vadd.f32 %v2632_v34, %v20620_v17  ;;  %v7155_v43 = vrot.slane %v7153_v1, 1  ;;  %v7158_v4 = vrot.slane %v7156_v62, 2 }
 0x23a   : > { %v3854_v17 = vrot.slane %v19229_v49, 1 }
 0x23b   : > { %16640 = vmatmul.msk.bf16.gmra.mxu1 %vm647_vm1, %v1970_v22  ;;  %16980 = vmatmul.msk.bf16.gmra.mxu2 %vm647_vm1, %v3853_v46  ;;  %v21008_v24 = vadd.f32 %v7860_v26, %v6245_v12  ;;  %v1973_v46 = vor.u32 %v1971_v31, %v1969_v60  ;;  %v1977_v12 = vrot.slane %v1975_v20, 1  ;;  %v19366_v31 = vld [vmem:[%s20304_s11 + $0xb0] sm:$0xff] }
 0x23c   : > { %17320 = vmatmul.msk.bf16.gmra.mxu3 %vm647_vm1, %v5435_v9  ;;  %17660 = vmatmul.msk.bf16.gmra.mxu0 %vm647_vm1, %v7151_v42  ;;  %v5436_v9 = vrot.slane %v19297_v7, 1  ;;  %v7159_v42 = vor.u32 %v7158_v4, %v7155_v43  ;;  %v3855_v1 = vsel %vm3816_vm3, %v3852_v30, %v3854_v17  ;;  %v19162_v30 = vld [vmem:[%s20304_s11 + $0xa0] sm:$0xff]  ;;  %v7162_v20 = vshrl.u32 %v19366_v31, 16 }
 0x23d   : > { %v1979_v43 = vshrl.u32 %v19161_v3, 16  ;;  %v1983_v4 = vshll.u32 %v19162_v30, 16 }
 0x23e   : > { %v4215_v21 = vpop.f32.mrf.mxu2  ;;  %v5437_v60 = vsel %vm3816_vm3, %v5434_v6, %v5436_v9  ;;  %v7165_v6 = vshll.u32 %v19366_v31, 16 }
 0x23f   : > { %v4664_v52 = vadd.f32 %v4215_v21, %v3081_v47  ;;  %v5797_v45 = vpop.f32.mrf.mxu3 }
 0x240   : > { %v2634_v50 = vpop.f32.mrf.mxu1 }
 0x241   : > { %v6246_v56 = vadd.f32 %v5797_v45, %v4664_v52  ;;  %v7865_v26 = vpop.f32.mrf.mxu0  ;;  %v3082_v34 = vadd.f32 %v2634_v50, %v20638_v13  ;;  %v1978_v52 = vsel %vm1822_vm2, %v1973_v46, %v1977_v12  ;;  %v7160_v45 = vsel %vm6981_vm4, %v7150_v39, %v7159_v42  ;;  %v19230_v46 = vld [vmem:[%s20304_s11 + $0xa0] sm:$0xff] }
 0x243   : > { %v21016_v22 = vadd.f32 %v7863_v16, %v6246_v56 }
 0x246   : > { %v4217_v19 = vpop.f32.mrf.mxu2 }
 0x247   : > { %v4665_v15 = vadd.f32 %v4217_v19, %v3082_v34  ;;  %v5799_v47 = vpop.f32.mrf.mxu3  ;;  %v19298_v19 = vld [vmem:[%s20304_s11 + $0xb0] sm:$0xff] }
 0x248   : > { %v2637_v21 = vpop.f32.mrf.mxu1 }
 0x249   : > { %v6247_v62 = vadd.f32 %v5799_v47, %v4665_v15  ;;  %v7868_v16 = vpop.f32.mrf.mxu0  ;;  %v3083_v50 = vadd.f32 %v2637_v21, %v20649_v48  ;;  %v7164_v15 = vrot.slane %v7162_v20, 1  ;;  %v7167_v47 = vrot.slane %v7165_v6, 2 }
 0x24a   : > { %v3856_v48 = vrot.slane %v19230_v46, 1 }
 0x24b   : > { %16641 = vmatmul.msk.bf16.gmra.mxu1 %vm647_vm1, %v1978_v52  ;;  %16981 = vmatmul.msk.bf16.gmra.mxu2 %vm647_vm1, %v3855_v1  ;;  %v21026_v13 = vadd.f32 %v7865_v26, %v6247_v62  ;;  %v1981_v1 = vor.u32 %v1979_v43, %v1977_v12  ;;  %v1985_v62 = vrot.slane %v1983_v4, 1  ;;  %v19367_v43 = vld [vmem:[%s20304_s11 + $0xb8] sm:$0xff] }
 0x24c   : > { %17321 = vmatmul.msk.bf16.gmra.mxu3 %vm647_vm1, %v5437_v60  ;;  %17661 = vmatmul.msk.bf16.gmra.mxu0 %vm647_vm1, %v7160_v45  ;;  %v5438_v60 = vrot.slane %v19298_v19, 1  ;;  %v7168_v45 = vor.u32 %v7167_v47, %v7164_v15  ;;  %v3857_v20 = vsel %vm3816_vm3, %v3854_v17, %v3856_v48  ;;  %v19163_v17 = vld [vmem:[%s20304_s11 + $0xa8] sm:$0xff]  ;;  %v7171_v4 = vshrl.u32 %v19367_v43, 16 }
 0x24d   : > { %v1987_v15 = vshrl.u32 %v19162_v30, 16  ;;  %v1991_v47 = vshll.u32 %v19163_v17, 16 }
 0x24e   : > { %v4220_v49 = vpop.f32.mrf.mxu2  ;;  %v5439_v12 = vsel %vm3816_vm3, %v5436_v9, %v5438_v60  ;;  %v7174_v9 = vshll.u32 %v19367_v43, 16 }
 0x24f   : > { %v4666_v39 = vadd.f32 %v4220_v49, %v3083_v50  ;;  %v5802_v56 = vpop.f32.mrf.mxu3 }
 0x250   : > { %v2639_v7 = vpop.f32.mrf.mxu1 }
 0x251   : > { %v6248_v34 = vadd.f32 %v5802_v56, %v4666_v39  ;;  %v7870_v26 = vpop.f32.mrf.mxu0  ;;  %v3084_v21 = vadd.f32 %v2639_v7, %v20666_v29  ;;  %v1986_v39 = vsel %vm1822_vm2, %v1981_v1, %v1985_v62  ;;  %v7169_v56 = vsel %vm6981_vm4, %v7159_v42, %v7168_v45  ;;  %v19231_v1 = vld [vmem:[%s20304_s11 + $0xa8] sm:$0xff] }
 0x253   : > { %v21034_v52 = vadd.f32 %v7868_v16, %v6248_v34 }
 0x256   : > { %v4222_v31 = vpop.f32.mrf.mxu2 }
 0x257   : > { %v4667_v3 = vadd.f32 %v4222_v31, %v3084_v21  ;;  %v5804_v50 = vpop.f32.mrf.mxu3  ;;  %v19299_v31 = vld [vmem:[%s20304_s11 + $0xb8] sm:$0xff] }
 0x258   : > { %v2642_v49 = vpop.f32.mrf.mxu1 }
 0x259   : > { %v6249_v6 = vadd.f32 %v5804_v50, %v4667_v3  ;;  %v7873_v16 = vpop.f32.mrf.mxu0  ;;  %v3085_v7 = vadd.f32 %v2642_v49, %v20677_v18  ;;  %v7173_v3 = vrot.slane %v7171_v4, 1  ;;  %v7176_v50 = vrot.slane %v7174_v9, 2 }
 0x25a   : > { %v3858_v18 = vrot.slane %v19231_v1, 1 }
 0x25b   : > { %16642 = vmatmul.msk.bf16.gmra.mxu1 %vm647_vm1, %v1986_v39  ;;  %16982 = vmatmul.msk.bf16.gmra.mxu2 %vm647_vm1, %v3857_v20  ;;  %v21044_v29 = vadd.f32 %v7870_v26, %v6249_v6  ;;  %v1989_v20 = vor.u32 %v1987_v15, %v1985_v62  ;;  %v1993_v6 = vrot.slane %v1991_v47, 1  ;;  %v19368_v15 = vld [vmem:[%s20304_s11 + $0xc0] sm:$0xff] }
 0x25c   : > { %17322 = vmatmul.msk.bf16.gmra.mxu3 %vm647_vm1, %v5439_v12  ;;  %17662 = vmatmul.msk.bf16.gmra.mxu0 %vm647_vm1, %v7169_v56  ;;  %v5440_v12 = vrot.slane %v19299_v31, 1  ;;  %v7177_v56 = vor.u32 %v7176_v50, %v7173_v3  ;;  %v3859_v4 = vsel %vm3816_vm3, %v3856_v48, %v3858_v18  ;;  %v19164_v48 = vld [vmem:[%s20304_s11 + $0xb0] sm:$0xff]  ;;  %v7180_v47 = vshrl.u32 %v19368_v15, 16 }
 0x25d   : > { %v1995_v3 = vshrl.u32 %v19163_v17, 16  ;;  %v1999_v50 = vshll.u32 %v19164_v48, 16 }
 0x25e   : > { %v4225_v46 = vpop.f32.mrf.mxu2  ;;  %v5441_v62 = vsel %vm3816_vm3, %v5438_v60, %v5440_v12  ;;  %v7183_v60 = vshll.u32 %v19368_v15, 16 }
 0x25f   : > { %v4668_v42 = vadd.f32 %v4225_v46, %v3085_v7  ;;  %v5807_v34 = vpop.f32.mrf.mxu3 }
 0x260   : > { %v2644_v19 = vpop.f32.mrf.mxu1 }
 0x261   : > { %v6250_v21 = vadd.f32 %v5807_v34, %v4668_v42  ;;  %v7875_v26 = vpop.f32.mrf.mxu0  ;;  %v3086_v49 = vadd.f32 %v2644_v19, %v20694_v0  ;;  %v1994_v42 = vsel %vm1822_vm2, %v1989_v20, %v1993_v6  ;;  %v7178_v34 = vsel %vm6981_vm4, %v7168_v45, %v7177_v56  ;;  %v19232_v20 = vld [vmem:[%s20304_s11 + $0xb0] sm:$0xff] }
 0x263   : > { %v21052_v39 = vadd.f32 %v7873_v16, %v6250_v21 }
 0x266   : > { %v4227_v43 = vpop.f32.mrf.mxu2 }
 0x267   : > { %v4669_v30 = vadd.f32 %v4227_v43, %v3086_v49  ;;  %v5809_v7 = vpop.f32.mrf.mxu3  ;;  %v19300_v43 = vld [vmem:[%s20304_s11 + $0xc0] sm:$0xff] }
 0x268   : > { %v2647_v46 = vpop.f32.mrf.mxu1 }
 0x269   : > { %v6251_v9 = vadd.f32 %v5809_v7, %v4669_v30  ;;  %v7878_v16 = vpop.f32.mrf.mxu0  ;;  %v3087_v19 = vadd.f32 %v2647_v46, %v20705_v25  ;;  %v7182_v30 = vrot.slane %v7180_v47, 1  ;;  %v7185_v7 = vrot.slane %v7183_v60, 2 }
 0x26a   : > { %v3860_v25 = vrot.slane %v19232_v20, 1 }
 0x26b   : > { %16643 = vmatmul.msk.bf16.gmra.mxu1 %vm647_vm1, %v1994_v42  ;;  %16983 = vmatmul.msk.bf16.gmra.mxu2 %vm647_vm1, %v3859_v4  ;;  %v21062_v0 = vadd.f32 %v7875_v26, %v6251_v9  ;;  %v1997_v4 = vor.u32 %v1995_v3, %v1993_v6  ;;  %v2001_v9 = vrot.slane %v1999_v50, 1  ;;  %v19369_v3 = vld [vmem:[%s20304_s11 + $0xc8] sm:$0xff] }
 0x26c   : > { %17323 = vmatmul.msk.bf16.gmra.mxu3 %vm647_vm1, %v5441_v62  ;;  %17663 = vmatmul.msk.bf16.gmra.mxu0 %vm647_vm1, %v7178_v34  ;;  %v5442_v62 = vrot.slane %v19300_v43, 1  ;;  %v7186_v34 = vor.u32 %v7185_v7, %v7182_v30  ;;  %v3861_v47 = vsel %vm3816_vm3, %v3858_v18, %v3860_v25  ;;  %v19165_v18 = vld [vmem:[%s20304_s11 + $0xb8] sm:$0xff]  ;;  %v7189_v50 = vshrl.u32 %v19369_v3, 16 }
 0x26d   : > { %v2003_v30 = vshrl.u32 %v19164_v48, 16  ;;  %v2007_v7 = vshll.u32 %v19165_v18, 16 }
 0x26e   : > { %v4230_v1 = vpop.f32.mrf.mxu2  ;;  %v5443_v6 = vsel %vm3816_vm3, %v5440_v12, %v5442_v62  ;;  %v7192_v12 = vshll.u32 %v19369_v3, 16 }
 0x26f   : > { %v4670_v45 = vadd.f32 %v4230_v1, %v3087_v19  ;;  %v5812_v21 = vpop.f32.mrf.mxu3 }
 0x270   : > { %v2649_v31 = vpop.f32.mrf.mxu1 }
 0x271   : > { %v6252_v49 = vadd.f32 %v5812_v21, %v4670_v45  ;;  %v7880_v26 = vpop.f32.mrf.mxu0  ;;  %v3088_v46 = vadd.f32 %v2649_v31, %v20722_v57  ;;  %v2002_v45 = vsel %vm1822_vm2, %v1997_v4, %v2001_v9  ;;  %v7187_v21 = vsel %vm6981_vm4, %v7177_v56, %v7186_v34  ;;  %v19233_v4 = vld [vmem:[%s20304_s11 + $0xb8] sm:$0xff] }
 0x273   : > { %v21070_v42 = vadd.f32 %v7878_v16, %v6252_v49 }
 0x276   : > { %v4232_v15 = vpop.f32.mrf.mxu2 }
 0x277   : > { %v4671_v17 = vadd.f32 %v4232_v15, %v3088_v46  ;;  %v5814_v19 = vpop.f32.mrf.mxu3  ;;  %v19301_v15 = vld [vmem:[%s20304_s11 + $0xc8] sm:$0xff] }
 0x278   : > { %v2652_v1 = vpop.f32.mrf.mxu1 }
 0x279   : > { %v6253_v60 = vadd.f32 %v5814_v19, %v4671_v17  ;;  %v7883_v16 = vpop.f32.mrf.mxu0  ;;  %v3089_v31 = vadd.f32 %v2652_v1, %v20733_v41  ;;  %v7191_v17 = vrot.slane %v7189_v50, 1  ;;  %v7194_v19 = vrot.slane %v7192_v12, 2 }
 0x27a   : > { %v3862_v41 = vrot.slane %v19233_v4, 1 }
 0x27b   : > { %16644 = vmatmul.msk.bf16.gmra.mxu1 %vm647_vm1, %v2002_v45  ;;  %16984 = vmatmul.msk.bf16.gmra.mxu2 %vm647_vm1, %v3861_v47  ;;  %v21080_v57 = vadd.f32 %v7880_v26, %v6253_v60  ;;  %v2005_v47 = vor.u32 %v2003_v30, %v2001_v9  ;;  %v2009_v60 = vrot.slane %v2007_v7, 1  ;;  %v19370_v30 = vld [vmem:[%s20304_s11 + $0xd0] sm:$0xff] }
 0x27c   : > { %17324 = vmatmul.msk.bf16.gmra.mxu3 %vm647_vm1, %v5443_v6  ;;  %17664 = vmatmul.msk.bf16.gmra.mxu0 %vm647_vm1, %v7187_v21  ;;  %v5444_v6 = vrot.slane %v19301_v15, 1  ;;  %v7195_v21 = vor.u32 %v7194_v19, %v7191_v17  ;;  %v3863_v50 = vsel %vm3816_vm3, %v3860_v25, %v3862_v41  ;;  %v19166_v25 = vld [vmem:[%s20304_s11 + $0xc0] sm:$0xff]  ;;  %v7198_v7 = vshrl.u32 %v19370_v30, 16 }
 0x27d   : > { %v2011_v17 = vshrl.u32 %v19165_v18, 16  ;;  %v2015_v19 = vshll.u32 %v19166_v25, 16 }
 0x27e   : > { %v4235_v20 = vpop.f32.mrf.mxu2  ;;  %v5445_v9 = vsel %vm3816_vm3, %v5442_v62, %v5444_v6  ;;  %v7201_v62 = vshll.u32 %v19370_v30, 16 }
 0x27f   : > { %v4672_v56 = vadd.f32 %v4235_v20, %v3089_v31  ;;  %v5817_v49 = vpop.f32.mrf.mxu3 }
 0x280   : > { %v2654_v43 = vpop.f32.mrf.mxu1 }
 0x281   : > { %v6254_v46 = vadd.f32 %v5817_v49, %v4672_v56  ;;  %v7885_v26 = vpop.f32.mrf.mxu0  ;;  %v3090_v1 = vadd.f32 %v2654_v43, %v20750_v36  ;;  %v2010_v56 = vsel %vm1822_vm2, %v2005_v47, %v2009_v60  ;;  %v7196_v49 = vsel %vm6981_vm4, %v7186_v34, %v7195_v21  ;;  %v19234_v47 = vld [vmem:[%s20304_s11 + $0xc0] sm:$0xff] }
 0x283   : > { %v21088_v45 = vadd.f32 %v7883_v16, %v6254_v46 }
 0x286   : > { %v4237_v3 = vpop.f32.mrf.mxu2 }
 0x287   : > { %v4673_v48 = vadd.f32 %v4237_v3, %v3090_v1  ;;  %v5819_v31 = vpop.f32.mrf.mxu3  ;;  %v19302_v3 = vld [vmem:[%s20304_s11 + $0xd0] sm:$0xff] }
 0x288   : > { %v2657_v20 = vpop.f32.mrf.mxu1 }
 0x289   : > { %v6255_v12 = vadd.f32 %v5819_v31, %v4673_v48  ;;  %v7888_v16 = vpop.f32.mrf.mxu0  ;;  %v3091_v43 = vadd.f32 %v2657_v20, %v20761_v5  ;;  %v7200_v48 = vrot.slane %v7198_v7, 1  ;;  %v7203_v31 = vrot.slane %v7201_v62, 2 }
 0x28a   : > { %v3864_v5 = vrot.slane %v19234_v47, 1 }
 0x28b   : > { %16645 = vmatmul.msk.bf16.gmra.mxu1 %vm647_vm1, %v2010_v56  ;;  %16985 = vmatmul.msk.bf16.gmra.mxu2 %vm647_vm1, %v3863_v50  ;;  %v21098_v36 = vadd.f32 %v7885_v26, %v6255_v12  ;;  %v2013_v50 = vor.u32 %v2011_v17, %v2009_v60  ;;  %v2017_v12 = vrot.slane %v2015_v19, 1  ;;  %v19371_v17 = vld [vmem:[%s20304_s11 + $0xd8] sm:$0xff] }
 0x28c   : > { %17325 = vmatmul.msk.bf16.gmra.mxu3 %vm647_vm1, %v5445_v9  ;;  %17665 = vmatmul.msk.bf16.gmra.mxu0 %vm647_vm1, %v7196_v49  ;;  %v5446_v9 = vrot.slane %v19302_v3, 1  ;;  %v7204_v49 = vor.u32 %v7203_v31, %v7200_v48  ;;  %v3865_v7 = vsel %vm3816_vm3, %v3862_v41, %v3864_v5  ;;  %v19167_v41 = vld [vmem:[%s20304_s11 + $0xc8] sm:$0xff]  ;;  %v7207_v19 = vshrl.u32 %v19371_v17, 16 }
 0x28d   : > { %v2019_v48 = vshrl.u32 %v19166_v25, 16  ;;  %v2023_v31 = vshll.u32 %v19167_v41, 16 }
 0x28e   : > { %v4240_v4 = vpop.f32.mrf.mxu2  ;;  %v5447_v60 = vsel %vm3816_vm3, %v5444_v6, %v5446_v9  ;;  %v7210_v6 = vshll.u32 %v19371_v17, 16 }
 0x28f   : > { %v4674_v34 = vadd.f32 %v4240_v4, %v3091_v43  ;;  %v5822_v46 = vpop.f32.mrf.mxu3 }
 0x290   : > { %v2659_v15 = vpop.f32.mrf.mxu1 }
 0x291   : > { %v6256_v1 = vadd.f32 %v5822_v46, %v4674_v34  ;;  %v7890_v26 = vpop.f32.mrf.mxu0  ;;  %v3092_v20 = vadd.f32 %v2659_v15, %v20778_v33  ;;  %v2018_v34 = vsel %vm1822_vm2, %v2013_v50, %v2017_v12  ;;  %v7205_v46 = vsel %vm6981_vm4, %v7195_v21, %v7204_v49  ;;  %v19235_v50 = vld [vmem:[%s20304_s11 + $0xc8] sm:$0xff] }
 0x293   : > { %v21106_v56 = vadd.f32 %v7888_v16, %v6256_v1 }
 0x296   : > { %v4242_v30 = vpop.f32.mrf.mxu2 }
 0x297   : > { %v4675_v18 = vadd.f32 %v4242_v30, %v3092_v20  ;;  %v5824_v43 = vpop.f32.mrf.mxu3  ;;  %v19303_v30 = vld [vmem:[%s20304_s11 + $0xd8] sm:$0xff] }
 0x298   : > { %v2662_v4 = vpop.f32.mrf.mxu1 }
 0x299   : > { %v6257_v62 = vadd.f32 %v5824_v43, %v4675_v18  ;;  %v7893_v16 = vpop.f32.mrf.mxu0  ;;  %v3093_v15 = vadd.f32 %v2662_v4, %v20789_v40  ;;  %v7209_v18 = vrot.slane %v7207_v19, 1  ;;  %v7212_v43 = vrot.slane %v7210_v6, 2 }
 0x29a   : > { %v3866_v40 = vrot.slane %v19235_v50, 1 }
 0x29b   : > { %16646 = vmatmul.msk.bf16.gmra.mxu1 %vm647_vm1, %v2018_v34  ;;  %16986 = vmatmul.msk.bf16.gmra.mxu2 %vm647_vm1, %v3865_v7  ;;  %v21116_v33 = vadd.f32 %v7890_v26, %v6257_v62  ;;  %v2021_v7 = vor.u32 %v2019_v48, %v2017_v12  ;;  %v2025_v62 = vrot.slane %v2023_v31, 1  ;;  %v19372_v48 = vld [vmem:[%s20304_s11 + $0xe0] sm:$0xff] }
 0x29c   : > { %17326 = vmatmul.msk.bf16.gmra.mxu3 %vm647_vm1, %v5447_v60  ;;  %17666 = vmatmul.msk.bf16.gmra.mxu0 %vm647_vm1, %v7205_v46  ;;  %v5448_v60 = vrot.slane %v19303_v30, 1  ;;  %v7213_v46 = vor.u32 %v7212_v43, %v7209_v18  ;;  %v3867_v19 = vsel %vm3816_vm3, %v3864_v5, %v3866_v40  ;;  %v19168_v5 = vld [vmem:[%s20304_s11 + $0xd0] sm:$0xff]  ;;  %v7216_v31 = vshrl.u32 %v19372_v48, 16 }
 0x29d   : > { %v2027_v18 = vshrl.u32 %v19167_v41, 16  ;;  %v2031_v43 = vshll.u32 %v19168_v5, 16 }
 0x29e   : > { %v4245_v47 = vpop.f32.mrf.mxu2  ;;  %v5449_v12 = vsel %vm3816_vm3, %v5446_v9, %v5448_v60  ;;  %v7219_v9 = vshll.u32 %v19372_v48, 16 }
 0x29f   : > { %v4676_v21 = vadd.f32 %v4245_v47, %v3093_v15  ;;  %v5827_v1 = vpop.f32.mrf.mxu3 }
 0x2a0   : > { %v2664_v3 = vpop.f32.mrf.mxu1 }
 0x2a1   : > { %v6258_v20 = vadd.f32 %v5827_v1, %v4676_v21  ;;  %v7895_v26 = vpop.f32.mrf.mxu0  ;;  %v3094_v4 = vadd.f32 %v2664_v3, %v20806_v53  ;;  %v2026_v21 = vsel %vm1822_vm2, %v2021_v7, %v2025_v62  ;;  %v7214_v1 = vsel %vm6981_vm4, %v7204_v49, %v7213_v46  ;;  %v19236_v7 = vld [vmem:[%s20304_s11 + $0xd0] sm:$0xff] }
 0x2a3   : > { %v21124_v34 = vadd.f32 %v7893_v16, %v6258_v20 }
 0x2a6   : > { %v4247_v17 = vpop.f32.mrf.mxu2 }
 0x2a7   : > { %v4677_v25 = vadd.f32 %v4247_v17, %v3094_v4  ;;  %v5829_v15 = vpop.f32.mrf.mxu3  ;;  %v19304_v17 = vld [vmem:[%s20304_s11 + $0xe0] sm:$0xff] }
 0x2a8   : > { %v2667_v47 = vpop.f32.mrf.mxu1 }
 0x2a9   : > { %v6259_v6 = vadd.f32 %v5829_v15, %v4677_v25  ;;  %v7898_v16 = vpop.f32.mrf.mxu0  ;;  %v3095_v3 = vadd.f32 %v2667_v47, %v20817_v28  ;;  %v7218_v25 = vrot.slane %v7216_v31, 1  ;;  %v7221_v15 = vrot.slane %v7219_v9, 2 }
 0x2aa   : > { %v3868_v28 = vrot.slane %v19236_v7, 1 }
 0x2ab   : > { %16647 = vmatmul.msk.bf16.gmra.mxu1 %vm647_vm1, %v2026_v21  ;;  %16987 = vmatmul.msk.bf16.gmra.mxu2 %vm647_vm1, %v3867_v19  ;;  %v21134_v53 = vadd.f32 %v7895_v26, %v6259_v6  ;;  %v2029_v19 = vor.u32 %v2027_v18, %v2025_v62  ;;  %v2033_v6 = vrot.slane %v2031_v43, 1  ;;  %v19373_v18 = vld [vmem:[%s20304_s11 + $0xe8] sm:$0xff] }
 0x2ac   : > { %17327 = vmatmul.msk.bf16.gmra.mxu3 %vm647_vm1, %v5449_v12  ;;  %17667 = vmatmul.msk.bf16.gmra.mxu0 %vm647_vm1, %v7214_v1  ;;  %v5450_v12 = vrot.slane %v19304_v17, 1  ;;  %v7222_v1 = vor.u32 %v7221_v15, %v7218_v25  ;;  %v3869_v31 = vsel %vm3816_vm3, %v3866_v40, %v3868_v28  ;;  %v19169_v40 = vld [vmem:[%s20304_s11 + $0xd8] sm:$0xff]  ;;  %v7225_v43 = vshrl.u32 %v19373_v18, 16 }
 0x2ad   : > { %v2035_v25 = vshrl.u32 %v19168_v5, 16  ;;  %v2039_v15 = vshll.u32 %v19169_v40, 16 }
 0x2ae   : > { %v4250_v50 = vpop.f32.mrf.mxu2  ;;  %v5451_v62 = vsel %vm3816_vm3, %v5448_v60, %v5450_v12  ;;  %v7228_v60 = vshll.u32 %v19373_v18, 16 }
 0x2af   : > { %v4678_v49 = vadd.f32 %v4250_v50, %v3095_v3  ;;  %v5832_v20 = vpop.f32.mrf.mxu3 }
 0x2b0   : > { %v2669_v30 = vpop.f32.mrf.mxu1 }
 0x2b1   : > { %v6260_v4 = vadd.f32 %v5832_v20, %v4678_v49  ;;  %v7900_v26 = vpop.f32.mrf.mxu0  ;;  %v3096_v47 = vadd.f32 %v2669_v30, %v20834_v8  ;;  %v2034_v49 = vsel %vm1822_vm2, %v2029_v19, %v2033_v6  ;;  %v7223_v20 = vsel %vm6981_vm4, %v7213_v46, %v7222_v1  ;;  %v19237_v19 = vld [vmem:[%s20304_s11 + $0xd8] sm:$0xff] }
 0x2b3   : > { %v21142_v21 = vadd.f32 %v7898_v16, %v6260_v4 }
 0x2b5   : > { %23337 = vst [vmem:[#allocation107_spill] sm:$0xff] %v21142_v21 }
 0x2b6   : > { %v4252_v48 = vpop.f32.mrf.mxu2 }
 0x2b7   : > { %v4679_v41 = vadd.f32 %v4252_v48, %v3096_v47  ;;  %v5834_v3 = vpop.f32.mrf.mxu3  ;;  %v19305_v48 = vld [vmem:[%s20304_s11 + $0xe8] sm:$0xff] }
 0x2b8   : > { %v2672_v50 = vpop.f32.mrf.mxu1 }
 0x2b9   : > { %v6261_v9 = vadd.f32 %v5834_v3, %v4679_v41  ;;  %v7903_v16 = vpop.f32.mrf.mxu0  ;;  %v3097_v30 = vadd.f32 %v2672_v50, %v20372_v44  ;;  %v7227_v41 = vrot.slane %v7225_v43, 1  ;;  %v7230_v3 = vrot.slane %v7228_v60, 2  ;;  %v23340_v50 = vld [vmem:[#allocation8_spill] sm:$0xff] }
 0x2ba   : > { %v3870_v44 = vrot.slane %v19237_v19, 1 }
 0x2bb   : > { %16648 = vmatmul.msk.bf16.gmra.mxu1 %vm647_vm1, %v2034_v49  ;;  %16988 = vmatmul.msk.bf16.gmra.mxu2 %vm647_vm1, %v3869_v31  ;;  %v21152_v8 = vadd.f32 %v7900_v26, %v6261_v9  ;;  %v2037_v31 = vor.u32 %v2035_v25, %v2033_v6  ;;  %v2041_v9 = vrot.slane %v2039_v15, 1  ;;  %v7231_v18 = vor.u32 %v7230_v3, %v7227_v41  ;;  %v19374_v25 = vld [vmem:[%s20304_s11 + $0xf0] sm:$0xff]  ;;  %v23342_v15 = vld [vmem:[#allocation11_spill] sm:$0xff] }
 0x2bc   : > { %17328 = vmatmul.msk.bf16.gmra.mxu3 %vm647_vm1, %v5451_v62  ;;  %17668 = vmatmul.msk.bf16.gmra.mxu0 %vm647_vm1, %v7223_v20  ;;  %v5452_v20 = vrot.slane %v19305_v48, 1  ;;  %v3871_v43 = vsel %vm3816_vm3, %v3868_v28, %v3870_v44  ;;  %v19170_v28 = vld [vmem:[%s20304_s11 + $0xe0] sm:$0xff] }
 0x2bd   : > { %23338 = vst [vmem:[#allocation108_spill] sm:$0xff] %v21152_v8 }
 0x2be   : > { %v4255_v7 = vpop.f32.mrf.mxu2  ;;  %v5453_v6 = vsel %vm3816_vm3, %v5450_v12, %v5452_v20  ;;  %v7237_v12 = vshll.u32 %v19374_v25, 16 }
 0x2bf   : > { %v4680_v46 = vadd.f32 %v4255_v7, %v3097_v30  ;;  %v5837_v4 = vpop.f32.mrf.mxu3 }
 0x2c0   : > { %v2674_v17 = vpop.f32.mrf.mxu1 }
 0x2c1   : > { %v6262_v47 = vadd.f32 %v5837_v4, %v4680_v46  ;;  %v7905_v26 = vpop.f32.mrf.mxu0  ;;  %v3098_v62 = vadd.f32 %v2674_v17, %v23340_v50  ;;  %v2042_v46 = vsel %vm1822_vm2, %v2037_v31, %v2041_v9  ;;  %v7232_v4 = vsel %vm6981_vm4, %v7222_v1, %v7231_v18 }
 0x2c2   : > { %v2043_v31 = vshrl.u32 %v19169_v40, 16  ;;  %v2047_v50 = vshll.u32 %v19170_v28, 16 }
 0x2c3   : > { %v21160_v49 = vadd.f32 %v7903_v16, %v6262_v47  ;;  %v7234_v47 = vshrl.u32 %v19374_v25, 16 }
 0x2c5   : > { %23339 = vst [vmem:[#allocation109_spill] sm:$0xff] %v21160_v49 }
 0x2c6   : > { %v4257_v30 = vpop.f32.mrf.mxu2 }
 0x2c7   : > { %v4681_v5 = vadd.f32 %v4257_v30, %v3098_v62  ;;  %v5839_v7 = vpop.f32.mrf.mxu3  ;;  %v19238_v62 = vld [vmem:[%s20304_s11 + $0xe0] sm:$0xff] }
 0x2c8   : > { %v2677_v8 = vpop.f32.mrf.mxu1 }
 0x2c9   : > { %v6263_v60 = vadd.f32 %v5839_v7, %v4681_v5  ;;  %v7908_v16 = vpop.f32.mrf.mxu0  ;;  %v3099_v19 = vadd.f32 %v2677_v8, %v23342_v15  ;;  %v19306_v5 = vld [vmem:[%s20304_s11 + $0xf0] sm:$0xff]  ;;  %v7236_v7 = vrot.slane %v7234_v47, 1  ;;  %v3872_v8 = vrot.slane %v19238_v62, 1 }
 0x2ca   : > { %v5454_v15 = vrot.slane %v19306_v5, 1 }
 0x2cb   : > { %16649 = vmatmul.msk.bf16.gmra.mxu1 %vm647_vm1, %v2042_v46  ;;  %16989 = vmatmul.msk.bf16.gmra.mxu2 %vm647_vm1, %v3871_v43  ;;  %v21170_v17 = vadd.f32 %v7905_v26, %v6263_v60  ;;  %v7239_v46 = vrot.slane %v7237_v12, 2  ;;  %v2045_v60 = vor.u32 %v2043_v31, %v2041_v9  ;;  %v3873_v47 = vsel %vm3816_vm3, %v3870_v44, %v3872_v8  ;;  %v19375_v31 = vld [vmem:[%s20304_s11 + $0xf8] sm:$0xff]  ;;  %v19171_v44 = vld [vmem:[%s20304_s11 + $0xe8] sm:$0xff] }
 0x2cc   : > { %17329 = vmatmul.msk.bf16.gmra.mxu3 %vm647_vm1, %v5453_v6  ;;  %17669 = vmatmul.msk.bf16.gmra.mxu0 %vm647_vm1, %v7232_v4  ;;  %v2049_v6 = vrot.slane %v2047_v50, 1  ;;  %v23344_v4 = vld [vmem:[#allocation14_spill] sm:$0xff]  ;;  %v5455_v9 = vsel %vm3816_vm3, %v5452_v20, %v5454_v15  ;;  %v7243_v62 = vshrl.u32 %v19375_v31, 16  ;;  %v7246_v20 = vshll.u32 %v19375_v31, 16 }
 0x2cd   : > { %23341 = vst [vmem:[#allocation8_spill] sm:$0xff] %v21170_v17 }
 0x2ce   : > { %v4260_v48 = vpop.f32.mrf.mxu2 }
 0x2cf   : > { %v4682_v1 = vadd.f32 %v4260_v48, %v3099_v19  ;;  %v5842_v41 = vpop.f32.mrf.mxu3  ;;  %v7240_v19 = vor.u32 %v7239_v46, %v7236_v7  ;;  %v2051_v46 = vshrl.u32 %v19170_v28, 16 }
 0x2d0   : > { %v2679_v3 = vpop.f32.mrf.mxu1 }
 0x2d1   : > { %v6264_v30 = vadd.f32 %v5842_v41, %v4682_v1  ;;  %v7910_v26 = vpop.f32.mrf.mxu0  ;;  %v3100_v25 = vadd.f32 %v2679_v3, %v23344_v4  ;;  %v2050_v1 = vsel %vm1822_vm2, %v2045_v60, %v2049_v6  ;;  %v7241_v41 = vsel %vm6981_vm4, %v7231_v18, %v7240_v19  ;;  %v19239_v4 = vld [vmem:[%s20304_s11 + $0xe8] sm:$0xff] }
 0x2d2   : > { %v2055_v60 = vshll.u32 %v19171_v44, 16 }
 0x2d3   : > { %v21178_v43 = vadd.f32 %v7908_v16, %v6264_v30 }
 0x2d5   : > { %23343 = vst [vmem:[#allocation11_spill] sm:$0xff] %v21178_v43 }
 0x2d6   : > { %v4262_v48 = vpop.f32.mrf.mxu2 }
 0x2d7   : > { %v4683_v40 = vadd.f32 %v4262_v48, %v3100_v25  ;;  %v5844_v17 = vpop.f32.mrf.mxu3  ;;  %v19307_v48 = vld [vmem:[%s20304_s11 + $0xf8] sm:$0xff] }
 0x2d8   : > { %v2682_v49 = vpop.f32.mrf.mxu1 }
 0x2d9   : > { %v6265_v12 = vadd.f32 %v5844_v17, %v4683_v40  ;;  %v7913_v16 = vpop.f32.mrf.mxu0  ;;  %v23346_v17 = vld [vmem:[#allocation17_spill] sm:$0xff]  ;;  %v7245_v40 = vrot.slane %v7243_v62, 1 }
 0x2da   : > { %v3101_v50 = vadd.f32 %v2682_v49, %v23346_v17  ;;  %v3874_v49 = vrot.slane %v19239_v4, 1  ;;  %v5456_v17 = vrot.slane %v19307_v48, 1 }
 0x2db   : > { %16650 = vmatmul.msk.bf16.gmra.mxu1 %vm647_vm1, %v2050_v1  ;;  %16990 = vmatmul.msk.bf16.gmra.mxu2 %vm647_vm1, %v3873_v47  ;;  %v21188_v3 = vadd.f32 %v7910_v26, %v6265_v12  ;;  %v7248_v1 = vrot.slane %v7246_v20, 2  ;;  %v2053_v12 = vor.u32 %v2051_v46, %v2049_v6  ;;  %v19376_v46 = vld [vmem:[%s20304_s11 + $0x100] sm:$0xff] }
 0x2dc   : > { %17330 = vmatmul.msk.bf16.gmra.mxu3 %vm647_vm1, %v5455_v9  ;;  %17670 = vmatmul.msk.bf16.gmra.mxu0 %vm647_vm1, %v7241_v41  ;;  %v2057_v9 = vrot.slane %v2055_v60, 1  ;;  %v23348_v41 = vld [vmem:[#allocation20_spill] sm:$0xff]  ;;  %v3875_v62 = vsel %vm3816_vm3, %v3872_v8, %v3874_v49  ;;  %v5457_v6 = vsel %vm3816_vm3, %v5454_v15, %v5456_v17  ;;  %v7252_v4 = vshrl.u32 %v19376_v46, 16 }
 0x2dd   : > { %23345 = vst [vmem:[#allocation14_spill] sm:$0xff] %v21188_v3  ;;  %v19172_v8 = vld [vmem:[%s20304_s11 + $0xf0] sm:$0xff]  ;;  %v7255_v15 = vshll.u32 %v19376_v46, 16 }
 0x2de   : > { %v4265_v30 = vpop.f32.mrf.mxu2 }
 0x2df   : > { %v4684_v18 = vadd.f32 %v4265_v30, %v3101_v50  ;;  %v5847_v5 = vpop.f32.mrf.mxu3  ;;  %v7249_v50 = vor.u32 %v7248_v1, %v7245_v40  ;;  %v2059_v1 = vshrl.u32 %v19171_v44, 16 }
 0x2e0   : > { %v2684_v7 = vpop.f32.mrf.mxu1 }
 0x2e1   : > { %v6266_v25 = vadd.f32 %v5847_v5, %v4684_v18  ;;  %v7915_v26 = vpop.f32.mrf.mxu0  ;;  %v3102_v31 = vadd.f32 %v2684_v7, %v23348_v41  ;;  %v2058_v18 = vsel %vm1822_vm2, %v2053_v12, %v2057_v9  ;;  %v7250_v5 = vsel %vm6981_vm4, %v7240_v19, %v7249_v50  ;;  %v19240_v41 = vld [vmem:[%s20304_s11 + $0xf0] sm:$0xff] }
 0x2e2   : > { %v2063_v12 = vshll.u32 %v19172_v8, 16 }
 0x2e3   : > { %v21196_v47 = vadd.f32 %v7913_v16, %v6266_v25 }
 0x2e5   : > { %23347 = vst [vmem:[#allocation17_spill] sm:$0xff] %v21196_v47 }
 0x2e6   : > { %v4267_v30 = vpop.f32.mrf.mxu2 }
 0x2e7   : > { %v4685_v28 = vadd.f32 %v4267_v30, %v3102_v31  ;;  %v5849_v3 = vpop.f32.mrf.mxu3  ;;  %v19308_v30 = vld [vmem:[%s20304_s11 + $0x100] sm:$0xff] }
 0x2e8   : > { %v2687_v43 = vpop.f32.mrf.mxu1 }
 0x2e9   : > { %v6267_v20 = vadd.f32 %v5849_v3, %v4685_v28  ;;  %v7918_v16 = vpop.f32.mrf.mxu0  ;;  %v23350_v3 = vld [vmem:[#allocation23_spill] sm:$0xff]  ;;  %v7254_v28 = vrot.slane %v7252_v4, 1 }
 0x2ea   : > { %v3103_v60 = vadd.f32 %v2687_v43, %v23350_v3  ;;  %v3876_v43 = vrot.slane %v19240_v41, 1  ;;  %v5458_v3 = vrot.slane %v19308_v30, 1 }
 0x2eb   : > { %16651 = vmatmul.msk.bf16.gmra.mxu1 %vm647_vm1, %v2058_v18  ;;  %16991 = vmatmul.msk.bf16.gmra.mxu2 %vm647_vm1, %v3875_v62  ;;  %v21206_v7 = vadd.f32 %v7915_v26, %v6267_v20  ;;  %v7257_v18 = vrot.slane %v7255_v15, 2  ;;  %v2061_v20 = vor.u32 %v2059_v1, %v2057_v9  ;;  %v19377_v1 = vld [vmem:[%s20304_s11 + $0x108] sm:$0xff] }
 0x2ec   : > { %17331 = vmatmul.msk.bf16.gmra.mxu3 %vm647_vm1, %v5457_v6  ;;  %17671 = vmatmul.msk.bf16.gmra.mxu0 %vm647_vm1, %v7250_v5  ;;  %v2065_v6 = vrot.slane %v2063_v12, 1  ;;  %v23352_v5 = vld [vmem:[#allocation26_spill] sm:$0xff]  ;;  %v3877_v4 = vsel %vm3816_vm3, %v3874_v49, %v3876_v43  ;;  %v5459_v9 = vsel %vm3816_vm3, %v5456_v17, %v5458_v3  ;;  %v19173_v49 = vld [vmem:[%s20304_s11 + $0xf8] sm:$0xff]  ;;  %v7261_v41 = vshrl.u32 %v19377_v1, 16 }
 0x2ed   : > { %23349 = vst [vmem:[#allocation20_spill] sm:$0xff] %v21206_v7  ;;  %v7264_v17 = vshll.u32 %v19377_v1, 16 }
 0x2ee   : > { %v4270_v25 = vpop.f32.mrf.mxu2 }
 0x2ef   : > { %v4686_v19 = vadd.f32 %v4270_v25, %v3103_v60  ;;  %v5852_v48 = vpop.f32.mrf.mxu3  ;;  %v7258_v60 = vor.u32 %v7257_v18, %v7254_v28  ;;  %v2067_v18 = vshrl.u32 %v19172_v8, 16 }
 0x2f0   : > { %v2689_v40 = vpop.f32.mrf.mxu1 }
 0x2f1   : > { %v6268_v31 = vadd.f32 %v5852_v48, %v4686_v19  ;;  %v7920_v26 = vpop.f32.mrf.mxu0  ;;  %v3104_v46 = vadd.f32 %v2689_v40, %v23352_v5  ;;  %v2066_v19 = vsel %vm1822_vm2, %v2061_v20, %v2065_v6  ;;  %v7259_v48 = vsel %vm6981_vm4, %v7249_v50, %v7258_v60  ;;  %v19241_v5 = vld [vmem:[%s20304_s11 + $0xf8] sm:$0xff] }
 0x2f2   : > { %v2071_v20 = vshll.u32 %v19173_v49, 16 }
 0x2f3   : > { %v21214_v62 = vadd.f32 %v7918_v16, %v6268_v31 }
 0x2f5   : > { %23351 = vst [vmem:[#allocation23_spill] sm:$0xff] %v21214_v62 }
 0x2f6   : > { %v4272_v25 = vpop.f32.mrf.mxu2 }
 0x2f7   : > { %v4687_v44 = vadd.f32 %v4272_v25, %v3104_v46  ;;  %v5854_v7 = vpop.f32.mrf.mxu3  ;;  %v19309_v25 = vld [vmem:[%s20304_s11 + $0x108] sm:$0xff] }
 0x2f8   : > { %v2692_v47 = vpop.f32.mrf.mxu1 }
 0x2f9   : > { %v6269_v15 = vadd.f32 %v5854_v7, %v4687_v44  ;;  %v7923_v16 = vpop.f32.mrf.mxu0  ;;  %v23354_v7 = vld [vmem:[#allocation29_spill] sm:$0xff]  ;;  %v7263_v44 = vrot.slane %v7261_v41, 1 }
 0x2fa   : > { %v3105_v12 = vadd.f32 %v2692_v47, %v23354_v7  ;;  %v3878_v47 = vrot.slane %v19241_v5, 1  ;;  %v5460_v7 = vrot.slane %v19309_v25, 1 }
 0x2fb   : > { %16652 = vmatmul.msk.bf16.gmra.mxu1 %vm647_vm1, %v2066_v19  ;;  %16992 = vmatmul.msk.bf16.gmra.mxu2 %vm647_vm1, %v3877_v4  ;;  %v21224_v40 = vadd.f32 %v7920_v26, %v6269_v15  ;;  %v7266_v19 = vrot.slane %v7264_v17, 2  ;;  %v2069_v15 = vor.u32 %v2067_v18, %v2065_v6  ;;  %v19378_v18 = vld [vmem:[%s20304_s11 + $0x110] sm:$0xff] }
 0x2fc   : > { %17332 = vmatmul.msk.bf16.gmra.mxu3 %vm647_vm1, %v5459_v9  ;;  %17672 = vmatmul.msk.bf16.gmra.mxu0 %vm647_vm1, %v7259_v48  ;;  %v2073_v9 = vrot.slane %v2071_v20, 1  ;;  %v23356_v48 = vld [vmem:[#allocation32_spill] sm:$0xff]  ;;  %v3879_v41 = vsel %vm3816_vm3, %v3876_v43, %v3878_v47  ;;  %v5461_v6 = vsel %vm3816_vm3, %v5458_v3, %v5460_v7  ;;  %v19174_v43 = vld [vmem:[%s20304_s11 + $0x100] sm:$0xff]  ;;  %v7270_v5 = vshrl.u32 %v19378_v18, 16 }
 0x2fd   : > { %23353 = vst [vmem:[#allocation26_spill] sm:$0xff] %v21224_v40  ;;  %v7273_v3 = vshll.u32 %v19378_v18, 16 }
 0x2fe   : > { %v4275_v31 = vpop.f32.mrf.mxu2 }
 0x2ff   : > { %v4688_v50 = vadd.f32 %v4275_v31, %v3105_v12  ;;  %v5857_v30 = vpop.f32.mrf.mxu3  ;;  %v7267_v12 = vor.u32 %v7266_v19, %v7263_v44  ;;  %v2075_v19 = vshrl.u32 %v19173_v49, 16 }
 0x300   : > { %v2694_v28 = vpop.f32.mrf.mxu1 }
 0x301   : > { %v6270_v46 = vadd.f32 %v5857_v30, %v4688_v50  ;;  %v7925_v26 = vpop.f32.mrf.mxu0  ;;  %v3106_v1 = vadd.f32 %v2694_v28, %v23356_v48  ;;  %v2074_v50 = vsel %vm1822_vm2, %v2069_v15, %v2073_v9  ;;  %v7268_v30 = vsel %vm6981_vm4, %v7258_v60, %v7267_v12  ;;  %v19242_v48 = vld [vmem:[%s20304_s11 + $0x100] sm:$0xff] }
 0x302   : > { %v2079_v15 = vshll.u32 %v19174_v43, 16 }
 0x303   : > { %v21232_v4 = vadd.f32 %v7923_v16, %v6270_v46 }
 0x305   : > { %23355 = vst [vmem:[#allocation29_spill] sm:$0xff] %v21232_v4 }
 0x306   : > { %v4277_v31 = vpop.f32.mrf.mxu2 }
 0x307   : > { %v4689_v8 = vadd.f32 %v4277_v31, %v3106_v1  ;;  %v5859_v40 = vpop.f32.mrf.mxu3  ;;  %v19310_v31 = vld [vmem:[%s20304_s11 + $0x110] sm:$0xff] }
 0x308   : > { %v2697_v62 = vpop.f32.mrf.mxu1 }
 0x309   : > { %v6271_v17 = vadd.f32 %v5859_v40, %v4689_v8  ;;  %v7928_v16 = vpop.f32.mrf.mxu0  ;;  %v23358_v40 = vld [vmem:[#allocation35_spill] sm:$0xff]  ;;  %v7272_v8 = vrot.slane %v7270_v5, 1 }
 0x30a   : > { %v3107_v20 = vadd.f32 %v2697_v62, %v23358_v40  ;;  %v3880_v62 = vrot.slane %v19242_v48, 1  ;;  %v5462_v40 = vrot.slane %v19310_v31, 1 }
 0x30b   : > { %16653 = vmatmul.msk.bf16.gmra.mxu1 %vm647_vm1, %v2074_v50  ;;  %16993 = vmatmul.msk.bf16.gmra.mxu2 %vm647_vm1, %v3879_v41  ;;  %v21242_v28 = vadd.f32 %v7925_v26, %v6271_v17  ;;  %v7275_v50 = vrot.slane %v7273_v3, 2  ;;  %v2077_v17 = vor.u32 %v2075_v19, %v2073_v9  ;;  %v19379_v19 = vld [vmem:[%s20304_s11 + $0x118] sm:$0xff] }
 0x30c   : > { %17333 = vmatmul.msk.bf16.gmra.mxu3 %vm647_vm1, %v5461_v6  ;;  %17673 = vmatmul.msk.bf16.gmra.mxu0 %vm647_vm1, %v7268_v30  ;;  %v2081_v6 = vrot.slane %v2079_v15, 1  ;;  %v23360_v30 = vld [vmem:[#allocation38_spill] sm:$0xff]  ;;  %v3881_v5 = vsel %vm3816_vm3, %v3878_v47, %v3880_v62  ;;  %v5463_v9 = vsel %vm3816_vm3, %v5460_v7, %v5462_v40  ;;  %v19175_v47 = vld [vmem:[%s20304_s11 + $0x108] sm:$0xff]  ;;  %v7279_v48 = vshrl.u32 %v19379_v19, 16 }
 0x30d   : > { %23357 = vst [vmem:[#allocation32_spill] sm:$0xff] %v21242_v28  ;;  %v7282_v7 = vshll.u32 %v19379_v19, 16 }
 0x30e   : > { %v4280_v46 = vpop.f32.mrf.mxu2 }
 0x30f   : > { %v4690_v60 = vadd.f32 %v4280_v46, %v3107_v20  ;;  %v5862_v25 = vpop.f32.mrf.mxu3  ;;  %v7276_v20 = vor.u32 %v7275_v50, %v7272_v8  ;;  %v2083_v50 = vshrl.u32 %v19174_v43, 16 }
 0x310   : > { %v2699_v44 = vpop.f32.mrf.mxu1 }
 0x311   : > { %v6272_v1 = vadd.f32 %v5862_v25, %v4690_v60  ;;  %v7930_v26 = vpop.f32.mrf.mxu0  ;;  %v3108_v18 = vadd.f32 %v2699_v44, %v23360_v30  ;;  %v2082_v60 = vsel %vm1822_vm2, %v2077_v17, %v2081_v6  ;;  %v7277_v25 = vsel %vm6981_vm4, %v7267_v12, %v7276_v20  ;;  %v19243_v30 = vld [vmem:[%s20304_s11 + $0x108] sm:$0xff] }
 0x312   : > { %v2087_v17 = vshll.u32 %v19175_v47, 16 }
 0x313   : > { %v21250_v41 = vadd.f32 %v7928_v16, %v6272_v1 }
 0x315   : > { %23359 = vst [vmem:[#allocation35_spill] sm:$0xff] %v21250_v41 }
 0x316   : > { %v4282_v46 = vpop.f32.mrf.mxu2 }
 0x317   : > { %v4691_v49 = vadd.f32 %v4282_v46, %v3108_v18  ;;  %v5864_v28 = vpop.f32.mrf.mxu3  ;;  %v19311_v46 = vld [vmem:[%s20304_s11 + $0x118] sm:$0xff] }
 0x318   : > { %v2702_v4 = vpop.f32.mrf.mxu1 }
 0x319   : > { %v6273_v3 = vadd.f32 %v5864_v28, %v4691_v49  ;;  %v7933_v16 = vpop.f32.mrf.mxu0  ;;  %v23362_v28 = vld [vmem:[#allocation41_spill] sm:$0xff]  ;;  %v7281_v49 = vrot.slane %v7279_v48, 1 }
 0x31a   : > { %v3109_v15 = vadd.f32 %v2702_v4, %v23362_v28  ;;  %v3882_v4 = vrot.slane %v19243_v30, 1  ;;  %v5464_v28 = vrot.slane %v19311_v46, 1 }
 0x31b   : > { %16654 = vmatmul.msk.bf16.gmra.mxu1 %vm647_vm1, %v2082_v60  ;;  %16994 = vmatmul.msk.bf16.gmra.mxu2 %vm647_vm1, %v3881_v5  ;;  %v21260_v44 = vadd.f32 %v7930_v26, %v6273_v3  ;;  %v7284_v60 = vrot.slane %v7282_v7, 2  ;;  %v2085_v3 = vor.u32 %v2083_v50, %v2081_v6  ;;  %v19380_v50 = vld [vmem:[%s20304_s11 + $0x120] sm:$0xff] }
 0x31c   : > { %17334 = vmatmul.msk.bf16.gmra.mxu3 %vm647_vm1, %v5463_v9  ;;  %17674 = vmatmul.msk.bf16.gmra.mxu0 %vm647_vm1, %v7277_v25  ;;  %v2089_v9 = vrot.slane %v2087_v17, 1  ;;  %v23364_v25 = vld [vmem:[#allocation44_spill] sm:$0xff]  ;;  %v3883_v48 = vsel %vm3816_vm3, %v3880_v62, %v3882_v4  ;;  %v5465_v6 = vsel %vm3816_vm3, %v5462_v40, %v5464_v28  ;;  %v7288_v30 = vshrl.u32 %v19380_v50, 16 }
 0x31d   : > { %23361 = vst [vmem:[#allocation38_spill] sm:$0xff] %v21260_v44  ;;  %v19176_v62 = vld [vmem:[%s20304_s11 + $0x110] sm:$0xff]  ;;  %v7291_v40 = vshll.u32 %v19380_v50, 16 }
 0x31e   : > { %v4285_v1 = vpop.f32.mrf.mxu2 }
 0x31f   : > { %v4692_v12 = vadd.f32 %v4285_v1, %v3109_v15  ;;  %v5867_v31 = vpop.f32.mrf.mxu3  ;;  %v7285_v15 = vor.u32 %v7284_v60, %v7281_v49  ;;  %v2091_v60 = vshrl.u32 %v19175_v47, 16 }
 0x320   : > { %v2704_v8 = vpop.f32.mrf.mxu1 }
 0x321   : > { %v6274_v18 = vadd.f32 %v5867_v31, %v4692_v12  ;;  %v7935_v26 = vpop.f32.mrf.mxu0  ;;  %v3110_v19 = vadd.f32 %v2704_v8, %v23364_v25  ;;  %v2090_v12 = vsel %vm1822_vm2, %v2085_v3, %v2089_v9  ;;  %v7286_v31 = vsel %vm6981_vm4, %v7276_v20, %v7285_v15  ;;  %v19244_v25 = vld [vmem:[%s20304_s11 + $0x110] sm:$0xff] }
 0x322   : > { %v2095_v3 = vshll.u32 %v19176_v62, 16 }
 0x323   : > { %v21268_v5 = vadd.f32 %v7933_v16, %v6274_v18 }
 0x325   : > { %23363 = vst [vmem:[#allocation41_spill] sm:$0xff] %v21268_v5 }
 0x326   : > { %v4287_v1 = vpop.f32.mrf.mxu2 }
 0x327   : > { %v4693_v43 = vadd.f32 %v4287_v1, %v3110_v19  ;;  %v5869_v44 = vpop.f32.mrf.mxu3  ;;  %v19312_v1 = vld [vmem:[%s20304_s11 + $0x120] sm:$0xff] }
 0x328   : > { %v2707_v41 = vpop.f32.mrf.mxu1 }
 0x329   : > { %v6275_v7 = vadd.f32 %v5869_v44, %v4693_v43  ;;  %v7938_v16 = vpop.f32.mrf.mxu0  ;;  %v23366_v44 = vld [vmem:[#allocation47_spill] sm:$0xff]  ;;  %v7290_v43 = vrot.slane %v7288_v30, 1 }
 0x32a   : > { %v3111_v17 = vadd.f32 %v2707_v41, %v23366_v44  ;;  %v3884_v41 = vrot.slane %v19244_v25, 1  ;;  %v5466_v44 = vrot.slane %v19312_v1, 1 }
 0x32b   : > { %16655 = vmatmul.msk.bf16.gmra.mxu1 %vm647_vm1, %v2090_v12  ;;  %16995 = vmatmul.msk.bf16.gmra.mxu2 %vm647_vm1, %v3883_v48  ;;  %v21278_v8 = vadd.f32 %v7935_v26, %v6275_v7  ;;  %v7293_v12 = vrot.slane %v7291_v40, 2  ;;  %v2093_v7 = vor.u32 %v2091_v60, %v2089_v9  ;;  %v19381_v60 = vld [vmem:[%s20304_s11 + $0x128] sm:$0xff] }
 0x32c   : > { %17335 = vmatmul.msk.bf16.gmra.mxu3 %vm647_vm1, %v5465_v6  ;;  %17675 = vmatmul.msk.bf16.gmra.mxu0 %vm647_vm1, %v7286_v31  ;;  %v2097_v6 = vrot.slane %v2095_v3, 1  ;;  %v23368_v31 = vld [vmem:[#allocation50_spill] sm:$0xff]  ;;  %v3885_v30 = vsel %vm3816_vm3, %v3882_v4, %v3884_v41  ;;  %v5467_v9 = vsel %vm3816_vm3, %v5464_v28, %v5466_v44  ;;  %v19177_v4 = vld [vmem:[%s20304_s11 + $0x118] sm:$0xff]  ;;  %v7297_v25 = vshrl.u32 %v19381_v60, 16 }
 0x32d   : > { %23365 = vst [vmem:[#allocation44_spill] sm:$0xff] %v21278_v8  ;;  %v7300_v28 = vshll.u32 %v19381_v60, 16 }
 0x32e   : > { %v4290_v18 = vpop.f32.mrf.mxu2 }
 0x32f   : > { %v4694_v20 = vadd.f32 %v4290_v18, %v3111_v17  ;;  %v5872_v46 = vpop.f32.mrf.mxu3  ;;  %v7294_v17 = vor.u32 %v7293_v12, %v7290_v43  ;;  %v2099_v12 = vshrl.u32 %v19176_v62, 16 }
 0x330   : > { %v2709_v49 = vpop.f32.mrf.mxu1 }
 0x331   : > { %v6276_v19 = vadd.f32 %v5872_v46, %v4694_v20  ;;  %v7940_v26 = vpop.f32.mrf.mxu0  ;;  %v3112_v50 = vadd.f32 %v2709_v49, %v23368_v31  ;;  %v2098_v20 = vsel %vm1822_vm2, %v2093_v7, %v2097_v6  ;;  %v7295_v46 = vsel %vm6981_vm4, %v7285_v15, %v7294_v17  ;;  %v19245_v31 = vld [vmem:[%s20304_s11 + $0x118] sm:$0xff] }
 0x332   : > { %v2103_v7 = vshll.u32 %v19177_v4, 16 }
 0x333   : > { %v21286_v48 = vadd.f32 %v7938_v16, %v6276_v19 }
 0x335   : > { %23367 = vst [vmem:[#allocation47_spill] sm:$0xff] %v21286_v48 }
 0x336   : > { %v4292_v18 = vpop.f32.mrf.mxu2 }
 0x337   : > { %v4695_v47 = vadd.f32 %v4292_v18, %v3112_v50  ;;  %v5874_v8 = vpop.f32.mrf.mxu3  ;;  %v19313_v18 = vld [vmem:[%s20304_s11 + $0x128] sm:$0xff] }
 0x338   : > { %v2712_v5 = vpop.f32.mrf.mxu1 }
 0x339   : > { %v6277_v40 = vadd.f32 %v5874_v8, %v4695_v47  ;;  %v7943_v16 = vpop.f32.mrf.mxu0  ;;  %v23370_v8 = vld [vmem:[#allocation53_spill] sm:$0xff]  ;;  %v7299_v47 = vrot.slane %v7297_v25, 1 }
 0x33a   : > { %v3113_v3 = vadd.f32 %v2712_v5, %v23370_v8  ;;  %v3886_v5 = vrot.slane %v19245_v31, 1  ;;  %v5468_v8 = vrot.slane %v19313_v18, 1 }
 0x33b   : > { %16656 = vmatmul.msk.bf16.gmra.mxu1 %vm647_vm1, %v2098_v20  ;;  %16996 = vmatmul.msk.bf16.gmra.mxu2 %vm647_vm1, %v3885_v30  ;;  %v21296_v49 = vadd.f32 %v7940_v26, %v6277_v40  ;;  %v7302_v20 = vrot.slane %v7300_v28, 2  ;;  %v2101_v40 = vor.u32 %v2099_v12, %v2097_v6  ;;  %v19382_v12 = vld [vmem:[%s20304_s11 + $0x130] sm:$0xff] }
 0x33c   : > { %17336 = vmatmul.msk.bf16.gmra.mxu3 %vm647_vm1, %v5467_v9  ;;  %17676 = vmatmul.msk.bf16.gmra.mxu0 %vm647_vm1, %v7295_v46  ;;  %v2105_v9 = vrot.slane %v2103_v7, 1  ;;  %v23372_v46 = vld [vmem:[#allocation56_spill] sm:$0xff]  ;;  %v3887_v25 = vsel %vm3816_vm3, %v3884_v41, %v3886_v5  ;;  %v5469_v6 = vsel %vm3816_vm3, %v5466_v44, %v5468_v8  ;;  %v19178_v41 = vld [vmem:[%s20304_s11 + $0x120] sm:$0xff]  ;;  %v7306_v31 = vshrl.u32 %v19382_v12, 16 }
 0x33d   : > { %23369 = vst [vmem:[#allocation50_spill] sm:$0xff] %v21296_v49  ;;  %v7309_v44 = vshll.u32 %v19382_v12, 16 }
 0x33e   : > { %v4295_v19 = vpop.f32.mrf.mxu2 }
 0x33f   : > { %v4696_v15 = vadd.f32 %v4295_v19, %v3113_v3  ;;  %v5877_v1 = vpop.f32.mrf.mxu3  ;;  %v7303_v3 = vor.u32 %v7302_v20, %v7299_v47  ;;  %v2107_v20 = vshrl.u32 %v19177_v4, 16 }
 0x340   : > { %v2714_v43 = vpop.f32.mrf.mxu1 }
 0x341   : > { %v6278_v50 = vadd.f32 %v5877_v1, %v4696_v15  ;;  %v7945_v26 = vpop.f32.mrf.mxu0  ;;  %v3114_v60 = vadd.f32 %v2714_v43, %v23372_v46  ;;  %v2106_v15 = vsel %vm1822_vm2, %v2101_v40, %v2105_v9  ;;  %v7304_v1 = vsel %vm6981_vm4, %v7294_v17, %v7303_v3  ;;  %v19246_v46 = vld [vmem:[%s20304_s11 + $0x120] sm:$0xff] }
 0x342   : > { %v2111_v40 = vshll.u32 %v19178_v41, 16 }
 0x343   : > { %v21304_v30 = vadd.f32 %v7943_v16, %v6278_v50 }
 0x345   : > { %23371 = vst [vmem:[#allocation53_spill] sm:$0xff] %v21304_v30 }
 0x346   : > { %v4297_v19 = vpop.f32.mrf.mxu2 }
 0x347   : > { %v4697_v62 = vadd.f32 %v4297_v19, %v3114_v60  ;;  %v5879_v49 = vpop.f32.mrf.mxu3  ;;  %v19314_v19 = vld [vmem:[%s20304_s11 + $0x130] sm:$0xff] }
 0x348   : > { %v2717_v48 = vpop.f32.mrf.mxu1 }
 0x349   : > { %v6279_v28 = vadd.f32 %v5879_v49, %v4697_v62  ;;  %v7948_v16 = vpop.f32.mrf.mxu0  ;;  %v23374_v49 = vld [vmem:[#allocation59_spill] sm:$0xff]  ;;  %v7308_v62 = vrot.slane %v7306_v31, 1 }
 0x34a   : > { %v3115_v7 = vadd.f32 %v2717_v48, %v23374_v49  ;;  %v3888_v48 = vrot.slane %v19246_v46, 1  ;;  %v5470_v49 = vrot.slane %v19314_v19, 1 }
 0x34b   : > { %16657 = vmatmul.msk.bf16.gmra.mxu1 %vm647_vm1, %v2106_v15  ;;  %16997 = vmatmul.msk.bf16.gmra.mxu2 %vm647_vm1, %v3887_v25  ;;  %v21314_v43 = vadd.f32 %v7945_v26, %v6279_v28  ;;  %v7311_v15 = vrot.slane %v7309_v44, 2  ;;  %v2109_v28 = vor.u32 %v2107_v20, %v2105_v9  ;;  %v19383_v20 = vld [vmem:[%s20304_s11 + $0x138] sm:$0xff] }
 0x34c   : > { %17337 = vmatmul.msk.bf16.gmra.mxu3 %vm647_vm1, %v5469_v6  ;;  %17677 = vmatmul.msk.bf16.gmra.mxu0 %vm647_vm1, %v7304_v1  ;;  %v2113_v6 = vrot.slane %v2111_v40, 1  ;;  %v23376_v1 = vld [vmem:[#allocation62_spill] sm:$0xff]  ;;  %v3889_v31 = vsel %vm3816_vm3, %v3886_v5, %v3888_v48  ;;  %v5471_v9 = vsel %vm3816_vm3, %v5468_v8, %v5470_v49  ;;  %v19179_v5 = vld [vmem:[%s20304_s11 + $0x128] sm:$0xff]  ;;  %v7315_v46 = vshrl.u32 %v19383_v20, 16 }
 0x34d   : > { %23373 = vst [vmem:[#allocation56_spill] sm:$0xff] %v21314_v43  ;;  %v7318_v8 = vshll.u32 %v19383_v20, 16 }
 0x34e   : > { %v4300_v50 = vpop.f32.mrf.mxu2 }
 0x34f   : > { %v4698_v17 = vadd.f32 %v4300_v50, %v3115_v7  ;;  %v5882_v18 = vpop.f32.mrf.mxu3  ;;  %v7312_v7 = vor.u32 %v7311_v15, %v7308_v62  ;;  %v2115_v15 = vshrl.u32 %v19178_v41, 16 }
 0x350   : > { %v2719_v47 = vpop.f32.mrf.mxu1 }
 0x351   : > { %v6280_v60 = vadd.f32 %v5882_v18, %v4698_v17  ;;  %v7950_v26 = vpop.f32.mrf.mxu0  ;;  %v3116_v12 = vadd.f32 %v2719_v47, %v23376_v1  ;;  %v2114_v17 = vsel %vm1822_vm2, %v2109_v28, %v2113_v6  ;;  %v7313_v18 = vsel %vm6981_vm4, %v7303_v3, %v7312_v7  ;;  %v19247_v1 = vld [vmem:[%s20304_s11 + $0x128] sm:$0xff] }
 0x352   : > { %v2119_v28 = vshll.u32 %v19179_v5, 16 }
 0x353   : > { %v21322_v25 = vadd.f32 %v7948_v16, %v6280_v60 }
 0x355   : > { %23375 = vst [vmem:[#allocation59_spill] sm:$0xff] %v21322_v25 }
 0x356   : > { %v4302_v50 = vpop.f32.mrf.mxu2 }
 0x357   : > { %v4699_v4 = vadd.f32 %v4302_v50, %v3116_v12  ;;  %v5884_v43 = vpop.f32.mrf.mxu3  ;;  %v19315_v50 = vld [vmem:[%s20304_s11 + $0x138] sm:$0xff] }
 0x358   : > { %v2722_v30 = vpop.f32.mrf.mxu1 }
 0x359   : > { %v6281_v44 = vadd.f32 %v5884_v43, %v4699_v4  ;;  %v7953_v16 = vpop.f32.mrf.mxu0  ;;  %v23378_v43 = vld [vmem:[#allocation65_spill] sm:$0xff]  ;;  %v7317_v4 = vrot.slane %v7315_v46, 1 }
 0x35a   : > { %v3117_v40 = vadd.f32 %v2722_v30, %v23378_v43  ;;  %v3890_v30 = vrot.slane %v19247_v1, 1  ;;  %v5472_v43 = vrot.slane %v19315_v50, 1 }
 0x35b   : > { %16658 = vmatmul.msk.bf16.gmra.mxu1 %vm647_vm1, %v2114_v17  ;;  %16998 = vmatmul.msk.bf16.gmra.mxu2 %vm647_vm1, %v3889_v31  ;;  %v21332_v47 = vadd.f32 %v7950_v26, %v6281_v44  ;;  %v7320_v17 = vrot.slane %v7318_v8, 2  ;;  %v2117_v44 = vor.u32 %v2115_v15, %v2113_v6  ;;  %v19384_v15 = vld [vmem:[%s20304_s11 + $0x140] sm:$0xff] }
 0x35c   : > { %17338 = vmatmul.msk.bf16.gmra.mxu3 %vm647_vm1, %v5471_v9  ;;  %17678 = vmatmul.msk.bf16.gmra.mxu0 %vm647_vm1, %v7313_v18  ;;  %v2121_v9 = vrot.slane %v2119_v28, 1  ;;  %v23380_v18 = vld [vmem:[#allocation68_spill] sm:$0xff]  ;;  %v3891_v46 = vsel %vm3816_vm3, %v3888_v48, %v3890_v30  ;;  %v5473_v6 = vsel %vm3816_vm3, %v5470_v49, %v5472_v43  ;;  %v7324_v1 = vshrl.u32 %v19384_v15, 16 }
 0x35d   : > { %23377 = vst [vmem:[#allocation62_spill] sm:$0xff] %v21332_v47  ;;  %v19180_v48 = vld [vmem:[%s20304_s11 + $0x130] sm:$0xff]  ;;  %v7327_v49 = vshll.u32 %v19384_v15, 16 }
 0x35e   : > { %v4305_v60 = vpop.f32.mrf.mxu2 }
 0x35f   : > { %v4700_v3 = vadd.f32 %v4305_v60, %v3117_v40  ;;  %v5887_v19 = vpop.f32.mrf.mxu3  ;;  %v7321_v40 = vor.u32 %v7320_v17, %v7317_v4  ;;  %v2123_v17 = vshrl.u32 %v19179_v5, 16 }
 0x360   : > { %v2724_v62 = vpop.f32.mrf.mxu1 }
 0x361   : > { %v6282_v12 = vadd.f32 %v5887_v19, %v4700_v3  ;;  %v7955_v26 = vpop.f32.mrf.mxu0  ;;  %v3118_v20 = vadd.f32 %v2724_v62, %v23380_v18  ;;  %v2122_v3 = vsel %vm1822_vm2, %v2117_v44, %v2121_v9  ;;  %v7322_v19 = vsel %vm6981_vm4, %v7312_v7, %v7321_v40  ;;  %v19248_v18 = vld [vmem:[%s20304_s11 + $0x130] sm:$0xff] }
 0x362   : > { %v2127_v44 = vshll.u32 %v19180_v48, 16 }
 0x363   : > { %v21340_v31 = vadd.f32 %v7953_v16, %v6282_v12 }
 0x365   : > { %23379 = vst [vmem:[#allocation65_spill] sm:$0xff] %v21340_v31 }
 0x366   : > { %v4307_v60 = vpop.f32.mrf.mxu2 }
 0x367   : > { %v4701_v41 = vadd.f32 %v4307_v60, %v3118_v20  ;;  %v5889_v47 = vpop.f32.mrf.mxu3  ;;  %v19316_v60 = vld [vmem:[%s20304_s11 + $0x140] sm:$0xff] }
 0x368   : > { %v2727_v25 = vpop.f32.mrf.mxu1 }
 0x369   : > { %v6283_v8 = vadd.f32 %v5889_v47, %v4701_v41  ;;  %v7958_v16 = vpop.f32.mrf.mxu0  ;;  %v23382_v47 = vld [vmem:[#allocation71_spill] sm:$0xff]  ;;  %v7326_v41 = vrot.slane %v7324_v1, 1 }
 0x36a   : > { %v3119_v28 = vadd.f32 %v2727_v25, %v23382_v47  ;;  %v3892_v25 = vrot.slane %v19248_v18, 1  ;;  %v5474_v47 = vrot.slane %v19316_v60, 1 }
 0x36b   : > { %16659 = vmatmul.msk.bf16.gmra.mxu1 %vm647_vm1, %v2122_v3  ;;  %16999 = vmatmul.msk.bf16.gmra.mxu2 %vm647_vm1, %v3891_v46  ;;  %v21350_v62 = vadd.f32 %v7955_v26, %v6283_v8  ;;  %v7329_v3 = vrot.slane %v7327_v49, 2  ;;  %v2125_v8 = vor.u32 %v2123_v17, %v2121_v9  ;;  %v19385_v17 = vld [vmem:[%s20304_s11 + $0x148] sm:$0xff] }
 0x36c   : > { %17339 = vmatmul.msk.bf16.gmra.mxu3 %vm647_vm1, %v5473_v6  ;;  %17679 = vmatmul.msk.bf16.gmra.mxu0 %vm647_vm1, %v7322_v19  ;;  %v2129_v6 = vrot.slane %v2127_v44, 1  ;;  %v23384_v19 = vld [vmem:[#allocation74_spill] sm:$0xff]  ;;  %v3893_v1 = vsel %vm3816_vm3, %v3890_v30, %v3892_v25  ;;  %v5475_v9 = vsel %vm3816_vm3, %v5472_v43, %v5474_v47  ;;  %v19181_v30 = vld [vmem:[%s20304_s11 + $0x138] sm:$0xff]  ;;  %v7333_v18 = vshrl.u32 %v19385_v17, 16 }
 0x36d   : > { %23381 = vst [vmem:[#allocation68_spill] sm:$0xff] %v21350_v62  ;;  %v7336_v43 = vshll.u32 %v19385_v17, 16 }
 0x36e   : > { %v4310_v12 = vpop.f32.mrf.mxu2 }
 0x36f   : > { %v4702_v7 = vadd.f32 %v4310_v12, %v3119_v28  ;;  %v5892_v50 = vpop.f32.mrf.mxu3  ;;  %v7330_v28 = vor.u32 %v7329_v3, %v7326_v41  ;;  %v2131_v3 = vshrl.u32 %v19180_v48, 16 }
 0x370   : > { %v2729_v4 = vpop.f32.mrf.mxu1 }
 0x371   : > { %v6284_v20 = vadd.f32 %v5892_v50, %v4702_v7  ;;  %v7960_v26 = vpop.f32.mrf.mxu0  ;;  %v3120_v15 = vadd.f32 %v2729_v4, %v23384_v19  ;;  %v2130_v7 = vsel %vm1822_vm2, %v2125_v8, %v2129_v6  ;;  %v7331_v50 = vsel %vm6981_vm4, %v7321_v40, %v7330_v28  ;;  %v19249_v19 = vld [vmem:[%s20304_s11 + $0x138] sm:$0xff] }
 0x372   : > { %v2135_v8 = vshll.u32 %v19181_v30, 16 }
 0x373   : > { %v21358_v46 = vadd.f32 %v7958_v16, %v6284_v20 }
 0x375   : > { %23383 = vst [vmem:[#allocation71_spill] sm:$0xff] %v21358_v46 }
 0x376   : > { %v4312_v12 = vpop.f32.mrf.mxu2 }
 0x377   : > { %v4703_v5 = vadd.f32 %v4312_v12, %v3120_v15  ;;  %v5894_v62 = vpop.f32.mrf.mxu3  ;;  %v19317_v12 = vld [vmem:[%s20304_s11 + $0x148] sm:$0xff] }
 0x378   : > { %v2732_v31 = vpop.f32.mrf.mxu1 }
 0x379   : > { %v6285_v49 = vadd.f32 %v5894_v62, %v4703_v5  ;;  %v7963_v16 = vpop.f32.mrf.mxu0  ;;  %v23386_v62 = vld [vmem:[#allocation77_spill] sm:$0xff]  ;;  %v7335_v5 = vrot.slane %v7333_v18, 1 }
 0x37a   : > { %v3121_v44 = vadd.f32 %v2732_v31, %v23386_v62  ;;  %v3894_v31 = vrot.slane %v19249_v19, 1  ;;  %v5476_v62 = vrot.slane %v19317_v12, 1 }
 0x37b   : > { %16660 = vmatmul.msk.bf16.gmra.mxu1 %vm647_vm1, %v2130_v7  ;;  %17000 = vmatmul.msk.bf16.gmra.mxu2 %vm647_vm1, %v3893_v1  ;;  %v21368_v4 = vadd.f32 %v7960_v26, %v6285_v49  ;;  %v7338_v7 = vrot.slane %v7336_v43, 2  ;;  %v2133_v49 = vor.u32 %v2131_v3, %v2129_v6  ;;  %v19386_v3 = vld [vmem:[%s20304_s11 + $0x150] sm:$0xff] }
 0x37c   : > { %17340 = vmatmul.msk.bf16.gmra.mxu3 %vm647_vm1, %v5475_v9  ;;  %17680 = vmatmul.msk.bf16.gmra.mxu0 %vm647_vm1, %v7331_v50  ;;  %v2137_v9 = vrot.slane %v2135_v8, 1  ;;  %v23388_v50 = vld [vmem:[#allocation80_spill] sm:$0xff]  ;;  %v3895_v18 = vsel %vm3816_vm3, %v3892_v25, %v3894_v31  ;;  %v5477_v6 = vsel %vm3816_vm3, %v5474_v47, %v5476_v62  ;;  %v19182_v25 = vld [vmem:[%s20304_s11 + $0x140] sm:$0xff]  ;;  %v7342_v19 = vshrl.u32 %v19386_v3, 16 }
 0x37d   : > { %23385 = vst [vmem:[#allocation74_spill] sm:$0xff] %v21368_v4  ;;  %v7345_v47 = vshll.u32 %v19386_v3, 16 }
 0x37e   : > { %v4315_v20 = vpop.f32.mrf.mxu2 }
 0x37f   : > { %v4704_v40 = vadd.f32 %v4315_v20, %v3121_v44  ;;  %v5897_v60 = vpop.f32.mrf.mxu3  ;;  %v7339_v44 = vor.u32 %v7338_v7, %v7335_v5  ;;  %v2139_v7 = vshrl.u32 %v19181_v30, 16 }
 0x380   : > { %v2734_v41 = vpop.f32.mrf.mxu1 }
 0x381   : > { %v6286_v15 = vadd.f32 %v5897_v60, %v4704_v40  ;;  %v7965_v26 = vpop.f32.mrf.mxu0  ;;  %v3122_v17 = vadd.f32 %v2734_v41, %v23388_v50  ;;  %v2138_v40 = vsel %vm1822_vm2, %v2133_v49, %v2137_v9  ;;  %v7340_v60 = vsel %vm6981_vm4, %v7330_v28, %v7339_v44  ;;  %v19250_v50 = vld [vmem:[%s20304_s11 + $0x140] sm:$0xff] }
 0x382   : > { %v2143_v49 = vshll.u32 %v19182_v25, 16 }
 0x383   : > { %v21376_v1 = vadd.f32 %v7963_v16, %v6286_v15 }
 0x385   : > { %23387 = vst [vmem:[#allocation77_spill] sm:$0xff] %v21376_v1 }
 0x386   : > { %v4317_v20 = vpop.f32.mrf.mxu2 }
 0x387   : > { %v4705_v48 = vadd.f32 %v4317_v20, %v3122_v17  ;;  %v5899_v4 = vpop.f32.mrf.mxu3  ;;  %v19318_v20 = vld [vmem:[%s20304_s11 + $0x150] sm:$0xff] }
 0x388   : > { %v2737_v46 = vpop.f32.mrf.mxu1 }
 0x389   : > { %v6287_v43 = vadd.f32 %v5899_v4, %v4705_v48  ;;  %v7968_v16 = vpop.f32.mrf.mxu0  ;;  %v23390_v4 = vld [vmem:[#allocation83_spill] sm:$0xff]  ;;  %v7344_v48 = vrot.slane %v7342_v19, 1 }
 0x38a   : > { %v3123_v8 = vadd.f32 %v2737_v46, %v23390_v4  ;;  %v3896_v46 = vrot.slane %v19250_v50, 1  ;;  %v5478_v4 = vrot.slane %v19318_v20, 1 }
 0x38b   : > { %16661 = vmatmul.msk.bf16.gmra.mxu1 %vm647_vm1, %v2138_v40  ;;  %17001 = vmatmul.msk.bf16.gmra.mxu2 %vm647_vm1, %v3895_v18  ;;  %v21386_v41 = vadd.f32 %v7965_v26, %v6287_v43  ;;  %v7347_v40 = vrot.slane %v7345_v47, 2  ;;  %v2141_v43 = vor.u32 %v2139_v7, %v2137_v9  ;;  %v19387_v7 = vld [vmem:[%s20304_s11 + $0x158] sm:$0xff] }
 0x38c   : > { %17341 = vmatmul.msk.bf16.gmra.mxu3 %vm647_vm1, %v5477_v6  ;;  %17681 = vmatmul.msk.bf16.gmra.mxu0 %vm647_vm1, %v7340_v60  ;;  %v2145_v6 = vrot.slane %v2143_v49, 1  ;;  %v23392_v60 = vld [vmem:[#allocation86_spill] sm:$0xff]  ;;  %v3897_v19 = vsel %vm3816_vm3, %v3894_v31, %v3896_v46  ;;  %v5479_v9 = vsel %vm3816_vm3, %v5476_v62, %v5478_v4  ;;  %v19183_v31 = vld [vmem:[%s20304_s11 + $0x148] sm:$0xff]  ;;  %v7351_v50 = vshrl.u32 %v19387_v7, 16 }
 0x38d   : > { %23389 = vst [vmem:[#allocation80_spill] sm:$0xff] %v21386_v41  ;;  %v7354_v62 = vshll.u32 %v19387_v7, 16 }
 0x38e   : > { %v4320_v15 = vpop.f32.mrf.mxu2 }
 0x38f   : > { %v4706_v28 = vadd.f32 %v4320_v15, %v3123_v8  ;;  %v5902_v12 = vpop.f32.mrf.mxu3  ;;  %v7348_v8 = vor.u32 %v7347_v40, %v7344_v48  ;;  %v2147_v40 = vshrl.u32 %v19182_v25, 16 }
 0x390   : > { %v2739_v5 = vpop.f32.mrf.mxu1 }
 0x391   : > { %v6288_v17 = vadd.f32 %v5902_v12, %v4706_v28  ;;  %v7970_v26 = vpop.f32.mrf.mxu0  ;;  %v3124_v3 = vadd.f32 %v2739_v5, %v23392_v60  ;;  %v2146_v28 = vsel %vm1822_vm2, %v2141_v43, %v2145_v6  ;;  %v7349_v12 = vsel %vm6981_vm4, %v7339_v44, %v7348_v8  ;;  %v19251_v60 = vld [vmem:[%s20304_s11 + $0x148] sm:$0xff] }
 0x392   : > { %v2151_v43 = vshll.u32 %v19183_v31, 16 }
 0x393   : > { %v21394_v18 = vadd.f32 %v7968_v16, %v6288_v17 }
 0x395   : > { %23391 = vst [vmem:[#allocation83_spill] sm:$0xff] %v21394_v18 }
 0x396   : > { %v4322_v15 = vpop.f32.mrf.mxu2 }
 0x397   : > { %v4707_v30 = vadd.f32 %v4322_v15, %v3124_v3  ;;  %v5904_v41 = vpop.f32.mrf.mxu3  ;;  %v19319_v15 = vld [vmem:[%s20304_s11 + $0x158] sm:$0xff] }
 0x398   : > { %v2742_v1 = vpop.f32.mrf.mxu1 }
 0x399   : > { %v6289_v47 = vadd.f32 %v5904_v41, %v4707_v30  ;;  %v7973_v16 = vpop.f32.mrf.mxu0  ;;  %v23394_v41 = vld [vmem:[#allocation89_spill] sm:$0xff]  ;;  %v7353_v30 = vrot.slane %v7351_v50, 1 }
 0x39a   : > { %v3125_v49 = vadd.f32 %v2742_v1, %v23394_v41  ;;  %v3898_v1 = vrot.slane %v19251_v60, 1  ;;  %v5480_v41 = vrot.slane %v19319_v15, 1 }
 0x39b   : > { %16662 = vmatmul.msk.bf16.gmra.mxu1 %vm647_vm1, %v2146_v28  ;;  %17002 = vmatmul.msk.bf16.gmra.mxu2 %vm647_vm1, %v3897_v19  ;;  %v21404_v5 = vadd.f32 %v7970_v26, %v6289_v47  ;;  %v7356_v28 = vrot.slane %v7354_v62, 2  ;;  %v2149_v47 = vor.u32 %v2147_v40, %v2145_v6  ;;  %v19388_v40 = vld [vmem:[%s20304_s11 + $0x160] sm:$0xff] }
 0x39c   : > { %17342 = vmatmul.msk.bf16.gmra.mxu3 %vm647_vm1, %v5479_v9  ;;  %17682 = vmatmul.msk.bf16.gmra.mxu0 %vm647_vm1, %v7349_v12  ;;  %v2153_v9 = vrot.slane %v2151_v43, 1  ;;  %v23396_v12 = vld [vmem:[#allocation92_spill] sm:$0xff]  ;;  %v3899_v50 = vsel %vm3816_vm3, %v3896_v46, %v3898_v1  ;;  %v5481_v6 = vsel %vm3816_vm3, %v5478_v4, %v5480_v41  ;;  %v7360_v60 = vshrl.u32 %v19388_v40, 16 }
 0x39d   : > { %23393 = vst [vmem:[#allocation86_spill] sm:$0xff] %v21404_v5  ;;  %v19184_v46 = vld [vmem:[%s20304_s11 + $0x150] sm:$0xff]  ;;  %v7363_v4 = vshll.u32 %v19388_v40, 16 }
 0x39e   : > { %v4325_v17 = vpop.f32.mrf.mxu2 }
 0x39f   : > { %v4708_v44 = vadd.f32 %v4325_v17, %v3125_v49  ;;  %v5907_v20 = vpop.f32.mrf.mxu3  ;;  %v7357_v49 = vor.u32 %v7356_v28, %v7353_v30  ;;  %v2155_v28 = vshrl.u32 %v19183_v31, 16 }
 0x3a0   : > { %v2744_v48 = vpop.f32.mrf.mxu1 }
 0x3a1   : > { %v6290_v3 = vadd.f32 %v5907_v20, %v4708_v44  ;;  %v7975_v26 = vpop.f32.mrf.mxu0  ;;  %v3126_v7 = vadd.f32 %v2744_v48, %v23396_v12  ;;  %v2154_v44 = vsel %vm1822_vm2, %v2149_v47, %v2153_v9  ;;  %v7358_v20 = vsel %vm6981_vm4, %v7348_v8, %v7357_v49  ;;  %v19252_v12 = vld [vmem:[%s20304_s11 + $0x150] sm:$0xff] }
 0x3a2   : > { %v2159_v47 = vshll.u32 %v19184_v46, 16 }
 0x3a3   : > { %v21412_v19 = vadd.f32 %v7973_v16, %v6290_v3 }
 0x3a5   : > { %23395 = vst [vmem:[#allocation89_spill] sm:$0xff] %v21412_v19 }
 0x3a6   : > { %v4327_v17 = vpop.f32.mrf.mxu2 }
 0x3a7   : > { %v4709_v25 = vadd.f32 %v4327_v17, %v3126_v7  ;;  %v5909_v5 = vpop.f32.mrf.mxu3  ;;  %v19320_v17 = vld [vmem:[%s20304_s11 + $0x160] sm:$0xff] }
 0x3a8   : > { %v2747_v18 = vpop.f32.mrf.mxu1 }
 0x3a9   : > { %v6291_v62 = vadd.f32 %v5909_v5, %v4709_v25  ;;  %v7978_v16 = vpop.f32.mrf.mxu0  ;;  %v23398_v5 = vld [vmem:[#allocation95_spill] sm:$0xff]  ;;  %v7362_v25 = vrot.slane %v7360_v60, 1 }
 0x3aa   : > { %v3127_v43 = vadd.f32 %v2747_v18, %v23398_v5  ;;  %v3900_v18 = vrot.slane %v19252_v12, 1  ;;  %v5482_v5 = vrot.slane %v19320_v17, 1 }
 0x3ab   : > { %16663 = vmatmul.msk.bf16.gmra.mxu1 %vm647_vm1, %v2154_v44  ;;  %17003 = vmatmul.msk.bf16.gmra.mxu2 %vm647_vm1, %v3899_v50  ;;  %v21422_v48 = vadd.f32 %v7975_v26, %v6291_v62  ;;  %v7365_v44 = vrot.slane %v7363_v4, 2  ;;  %v2157_v62 = vor.u32 %v2155_v28, %v2153_v9  ;;  %v19389_v28 = vld [vmem:[%s20304_s11 + $0x168] sm:$0xff] }
 0x3ac   : > { %17343 = vmatmul.msk.bf16.gmra.mxu3 %vm647_vm1, %v5481_v6  ;;  %17683 = vmatmul.msk.bf16.gmra.mxu0 %vm647_vm1, %v7358_v20  ;;  %v2161_v6 = vrot.slane %v2159_v47, 1  ;;  %v23400_v20 = vld [vmem:[#allocation98_spill] sm:$0xff]  ;;  %v3901_v60 = vsel %vm3816_vm3, %v3898_v1, %v3900_v18  ;;  %v5483_v9 = vsel %vm3816_vm3, %v5480_v41, %v5482_v5  ;;  %v19185_v1 = vld [vmem:[%s20304_s11 + $0x158] sm:$0xff]  ;;  %v7369_v12 = vshrl.u32 %v19389_v28, 16 }
 0x3ad   : > { %23397 = vst [vmem:[#allocation92_spill] sm:$0xff] %v21422_v48  ;;  %v7372_v41 = vshll.u32 %v19389_v28, 16 }
 0x3ae   : > { %v4330_v3 = vpop.f32.mrf.mxu2 }
 0x3af   : > { %v4710_v8 = vadd.f32 %v4330_v3, %v3127_v43  ;;  %v5912_v15 = vpop.f32.mrf.mxu3  ;;  %v7366_v43 = vor.u32 %v7365_v44, %v7362_v25  ;;  %v2163_v44 = vshrl.u32 %v19184_v46, 16 }
 0x3b0   : > { %v2749_v30 = vpop.f32.mrf.mxu1 }
 0x3b1   : > { %v6292_v7 = vadd.f32 %v5912_v15, %v4710_v8  ;;  %v7980_v26 = vpop.f32.mrf.mxu0  ;;  %v3128_v40 = vadd.f32 %v2749_v30, %v23400_v20  ;;  %v2162_v8 = vsel %vm1822_vm2, %v2157_v62, %v2161_v6  ;;  %v7367_v15 = vsel %vm6981_vm4, %v7357_v49, %v7366_v43  ;;  %v19253_v20 = vld [vmem:[%s20304_s11 + $0x158] sm:$0xff] }
 0x3b2   : > { %v2167_v62 = vshll.u32 %v19185_v1, 16 }
 0x3b3   : > { %v21430_v50 = vadd.f32 %v7978_v16, %v6292_v7 }
 0x3b5   : > { %23399 = vst [vmem:[#allocation95_spill] sm:$0xff] %v21430_v50 }
 0x3b6   : > { %v4332_v3 = vpop.f32.mrf.mxu2 }
 0x3b7   : > { %v4711_v31 = vadd.f32 %v4332_v3, %v3128_v40  ;;  %v5914_v48 = vpop.f32.mrf.mxu3  ;;  %v19321_v3 = vld [vmem:[%s20304_s11 + $0x168] sm:$0xff] }
 0x3b8   : > { %v2752_v19 = vpop.f32.mrf.mxu1 }
 0x3b9   : > { %v6293_v4 = vadd.f32 %v5914_v48, %v4711_v31  ;;  %v7983_v16 = vpop.f32.mrf.mxu0  ;;  %v23402_v48 = vld [vmem:[#allocation101_spill] sm:$0xff]  ;;  %v7371_v31 = vrot.slane %v7369_v12, 1 }
 0x3ba   : > { %v3129_v47 = vadd.f32 %v2752_v19, %v23402_v48  ;;  %v3902_v19 = vrot.slane %v19253_v20, 1  ;;  %v5484_v48 = vrot.slane %v19321_v3, 1 }
 0x3bb   : > { %16664 = vmatmul.msk.bf16.gmra.mxu1 %vm647_vm1, %v2162_v8  ;;  %17004 = vmatmul.msk.bf16.gmra.mxu2 %vm647_vm1, %v3901_v60  ;;  %v21440_v30 = vadd.f32 %v7980_v26, %v6293_v4  ;;  %v7374_v8 = vrot.slane %v7372_v41, 2  ;;  %v2165_v4 = vor.u32 %v2163_v44, %v2161_v6  ;;  %v19390_v44 = vld [vmem:[%s20304_s11 + $0x170] sm:$0xff] }
 0x3bc   : > { %17344 = vmatmul.msk.bf16.gmra.mxu3 %vm647_vm1, %v5483_v9  ;;  %17684 = vmatmul.msk.bf16.gmra.mxu0 %vm647_vm1, %v7367_v15  ;;  %v2169_v9 = vrot.slane %v2167_v62, 1  ;;  %v23404_v15 = vld [vmem:[#allocation104_spill] sm:$0xff]  ;;  %v3903_v12 = vsel %vm3816_vm3, %v3900_v18, %v3902_v19  ;;  %v5485_v6 = vsel %vm3816_vm3, %v5482_v5, %v5484_v48  ;;  %v19186_v18 = vld [vmem:[%s20304_s11 + $0x160] sm:$0xff]  ;;  %v7378_v20 = vshrl.u32 %v19390_v44, 16 }
 0x3bd   : > { %23401 = vst [vmem:[#allocation98_spill] sm:$0xff] %v21440_v30  ;;  %v7381_v5 = vshll.u32 %v19390_v44, 16 }
 0x3be   : > { %v4335_v7 = vpop.f32.mrf.mxu2 }
 0x3bf   : > { %v4712_v49 = vadd.f32 %v4335_v7, %v3129_v47  ;;  %v5917_v17 = vpop.f32.mrf.mxu3  ;;  %v7375_v47 = vor.u32 %v7374_v8, %v7371_v31  ;;  %v2171_v8 = vshrl.u32 %v19185_v1, 16 }
 0x3c0   : > { %v2754_v25 = vpop.f32.mrf.mxu1 }
 0x3c1   : > { %v6294_v40 = vadd.f32 %v5917_v17, %v4712_v49  ;;  %v7985_v26 = vpop.f32.mrf.mxu0  ;;  %v3130_v28 = vadd.f32 %v2754_v25, %v23404_v15  ;;  %v2170_v49 = vsel %vm1822_vm2, %v2165_v4, %v2169_v9  ;;  %v7376_v17 = vsel %vm6981_vm4, %v7366_v43, %v7375_v47  ;;  %v19254_v15 = vld [vmem:[%s20304_s11 + $0x160] sm:$0xff] }
 0x3c2   : > { %v2175_v4 = vshll.u32 %v19186_v18, 16 }
 0x3c3   : > { %v21448_v60 = vadd.f32 %v7983_v16, %v6294_v40 }
 0x3c5   : > { %23403 = vst [vmem:[#allocation101_spill] sm:$0xff] %v21448_v60 }
 0x3c6   : > { %v4337_v7 = vpop.f32.mrf.mxu2 }
 0x3c7   : > { %v4713_v46 = vadd.f32 %v4337_v7, %v3130_v28  ;;  %v5919_v30 = vpop.f32.mrf.mxu3  ;;  %v19322_v7 = vld [vmem:[%s20304_s11 + $0x170] sm:$0xff] }
 0x3c8   : > { %v2757_v50 = vpop.f32.mrf.mxu1 }
 0x3c9   : > { %v6295_v41 = vadd.f32 %v5919_v30, %v4713_v46  ;;  %v7988_v16 = vpop.f32.mrf.mxu0  ;;  %v23406_v30 = vld [vmem:[#allocation6_spill] sm:$0xff]  ;;  %v7380_v46 = vrot.slane %v7378_v20, 1 }
 0x3ca   : > { %v3131_v62 = vadd.f32 %v2757_v50, %v23406_v30  ;;  %v3904_v50 = vrot.slane %v19254_v15, 1  ;;  %v5486_v30 = vrot.slane %v19322_v7, 1 }
 0x3cb   : > { %16665 = vmatmul.msk.bf16.gmra.mxu1 %vm647_vm1, %v2170_v49  ;;  %17005 = vmatmul.msk.bf16.gmra.mxu2 %vm647_vm1, %v3903_v12  ;;  %v21458_v25 = vadd.f32 %v7985_v26, %v6295_v41  ;;  %v7383_v49 = vrot.slane %v7381_v5, 2  ;;  %v2173_v41 = vor.u32 %v2171_v8, %v2169_v9  ;;  %v19391_v8 = vld [vmem:[%s20304_s11 + $0x178] sm:$0xff] }
 0x3cc   : > { %17345 = vmatmul.msk.bf16.gmra.mxu3 %vm647_vm1, %v5485_v6  ;;  %17685 = vmatmul.msk.bf16.gmra.mxu0 %vm647_vm1, %v7376_v17  ;;  %v2177_v6 = vrot.slane %v2175_v4, 1  ;;  %v23408_v17 = vld [vmem:[#allocation9_spill] sm:$0xff]  ;;  %v3905_v20 = vsel %vm3816_vm3, %v3902_v19, %v3904_v50  ;;  %v5487_v9 = vsel %vm3816_vm3, %v5484_v48, %v5486_v30  ;;  %v19187_v19 = vld [vmem:[%s20304_s11 + $0x168] sm:$0xff]  ;;  %v7387_v15 = vshrl.u32 %v19391_v8, 16 }
 0x3cd   : > { %23405 = vst [vmem:[#allocation104_spill] sm:$0xff] %v21458_v25  ;;  %v7390_v48 = vshll.u32 %v19391_v8, 16 }
 0x3ce   : > { %v4340_v40 = vpop.f32.mrf.mxu2 }
 0x3cf   : > { %v4714_v43 = vadd.f32 %v4340_v40, %v3131_v62  ;;  %v5922_v3 = vpop.f32.mrf.mxu3  ;;  %v7384_v62 = vor.u32 %v7383_v49, %v7380_v46  ;;  %v2179_v49 = vshrl.u32 %v19186_v18, 16 }
 0x3d0   : > { %v2759_v31 = vpop.f32.mrf.mxu1 }
 0x3d1   : > { %v6296_v28 = vadd.f32 %v5922_v3, %v4714_v43  ;;  %v7990_v26 = vpop.f32.mrf.mxu0  ;;  %v3132_v44 = vadd.f32 %v2759_v31, %v23408_v17  ;;  %v2178_v43 = vsel %vm1822_vm2, %v2173_v41, %v2177_v6  ;;  %v7385_v3 = vsel %vm6981_vm4, %v7375_v47, %v7384_v62  ;;  %v19255_v17 = vld [vmem:[%s20304_s11 + $0x168] sm:$0xff] }
 0x3d2   : > { %v2183_v41 = vshll.u32 %v19187_v19, 16 }
 0x3d3   : > { %v21466_v12 = vadd.f32 %v7988_v16, %v6296_v28 }
 0x3d5   : > { %23407 = vst [vmem:[#allocation6_spill] sm:$0xff] %v21466_v12 }
 0x3d6   : > { %v4342_v40 = vpop.f32.mrf.mxu2 }
 0x3d7   : > { %v4715_v1 = vadd.f32 %v4342_v40, %v3132_v44  ;;  %v5924_v25 = vpop.f32.mrf.mxu3  ;;  %v19323_v40 = vld [vmem:[%s20304_s11 + $0x178] sm:$0xff] }
 0x3d8   : > { %v2762_v60 = vpop.f32.mrf.mxu1 }
 0x3d9   : > { %v6297_v5 = vadd.f32 %v5924_v25, %v4715_v1  ;;  %v7993_v16 = vpop.f32.mrf.mxu0  ;;  %v23410_v25 = vld [vmem:[#allocation12_spill] sm:$0xff]  ;;  %v7389_v1 = vrot.slane %v7387_v15, 1 }
 0x3da   : > { %v3133_v4 = vadd.f32 %v2762_v60, %v23410_v25  ;;  %v3906_v60 = vrot.slane %v19255_v17, 1  ;;  %v5488_v25 = vrot.slane %v19323_v40, 1 }
 0x3db   : > { %16666 = vmatmul.msk.bf16.gmra.mxu1 %vm647_vm1, %v2178_v43  ;;  %17006 = vmatmul.msk.bf16.gmra.mxu2 %vm647_vm1, %v3905_v20  ;;  %v21476_v31 = vadd.f32 %v7990_v26, %v6297_v5  ;;  %v7392_v43 = vrot.slane %v7390_v48, 2  ;;  %v2181_v5 = vor.u32 %v2179_v49, %v2177_v6  ;;  %v19392_v49 = vld [vmem:[%s20304_s11 + $0x180] sm:$0xff] }
 0x3dc   : > { %17346 = vmatmul.msk.bf16.gmra.mxu3 %vm647_vm1, %v5487_v9  ;;  %17686 = vmatmul.msk.bf16.gmra.mxu0 %vm647_vm1, %v7385_v3  ;;  %v2185_v9 = vrot.slane %v2183_v41, 1  ;;  %v23412_v3 = vld [vmem:[#allocation15_spill] sm:$0xff]  ;;  %v3907_v15 = vsel %vm3816_vm3, %v3904_v50, %v3906_v60  ;;  %v5489_v6 = vsel %vm3816_vm3, %v5486_v30, %v5488_v25  ;;  %v19188_v50 = vld [vmem:[%s20304_s11 + $0x170] sm:$0xff]  ;;  %v7396_v17 = vshrl.u32 %v19392_v49, 16 }
 0x3dd   : > { %23409 = vst [vmem:[#allocation9_spill] sm:$0xff] %v21476_v31  ;;  %v7399_v30 = vshll.u32 %v19392_v49, 16 }
 0x3de   : > { %v4345_v28 = vpop.f32.mrf.mxu2 }
 0x3df   : > { %v4716_v47 = vadd.f32 %v4345_v28, %v3133_v4  ;;  %v5927_v7 = vpop.f32.mrf.mxu3  ;;  %v7393_v4 = vor.u32 %v7392_v43, %v7389_v1  ;;  %v2187_v43 = vshrl.u32 %v19187_v19, 16 }
 0x3e0   : > { %v2764_v46 = vpop.f32.mrf.mxu1 }
 0x3e1   : > { %v6298_v44 = vadd.f32 %v5927_v7, %v4716_v47  ;;  %v7995_v26 = vpop.f32.mrf.mxu0  ;;  %v3134_v8 = vadd.f32 %v2764_v46, %v23412_v3  ;;  %v2186_v47 = vsel %vm1822_vm2, %v2181_v5, %v2185_v9  ;;  %v7394_v7 = vsel %vm6981_vm4, %v7384_v62, %v7393_v4  ;;  %v19256_v3 = vld [vmem:[%s20304_s11 + $0x170] sm:$0xff] }
 0x3e2   : > { %v2191_v5 = vshll.u32 %v19188_v50, 16 }
 0x3e3   : > { %v21484_v20 = vadd.f32 %v7993_v16, %v6298_v44 }
 0x3e5   : > { %23411 = vst [vmem:[#allocation12_spill] sm:$0xff] %v21484_v20 }
 0x3e6   : > { %v4347_v28 = vpop.f32.mrf.mxu2 }
 0x3e7   : > { %v4717_v18 = vadd.f32 %v4347_v28, %v3134_v8  ;;  %v5929_v31 = vpop.f32.mrf.mxu3  ;;  %v19324_v28 = vld [vmem:[%s20304_s11 + $0x180] sm:$0xff] }
 0x3e8   : > { %v2767_v12 = vpop.f32.mrf.mxu1 }
 0x3e9   : > { %v6299_v48 = vadd.f32 %v5929_v31, %v4717_v18  ;;  %v7998_v16 = vpop.f32.mrf.mxu0  ;;  %v23414_v31 = vld [vmem:[#allocation18_spill] sm:$0xff]  ;;  %v7398_v18 = vrot.slane %v7396_v17, 1 }
 0x3ea   : > { %v3135_v41 = vadd.f32 %v2767_v12, %v23414_v31  ;;  %v3908_v12 = vrot.slane %v19256_v3, 1  ;;  %v5490_v31 = vrot.slane %v19324_v28, 1 }
 0x3eb   : > { %16667 = vmatmul.msk.bf16.gmra.mxu1 %vm647_vm1, %v2186_v47  ;;  %17007 = vmatmul.msk.bf16.gmra.mxu2 %vm647_vm1, %v3907_v15  ;;  %v21494_v46 = vadd.f32 %v7995_v26, %v6299_v48  ;;  %v7401_v47 = vrot.slane %v7399_v30, 2  ;;  %v2189_v48 = vor.u32 %v2187_v43, %v2185_v9  ;;  %v19393_v43 = vld [vmem:[%s20304_s11 + $0x188] sm:$0xff] }
 0x3ec   : > { %17347 = vmatmul.msk.bf16.gmra.mxu3 %vm647_vm1, %v5489_v6  ;;  %17687 = vmatmul.msk.bf16.gmra.mxu0 %vm647_vm1, %v7394_v7  ;;  %v2193_v6 = vrot.slane %v2191_v5, 1  ;;  %v23416_v7 = vld [vmem:[#allocation21_spill] sm:$0xff]  ;;  %v3909_v17 = vsel %vm3816_vm3, %v3906_v60, %v3908_v12  ;;  %v5491_v9 = vsel %vm3816_vm3, %v5488_v25, %v5490_v31  ;;  %v7405_v3 = vshrl.u32 %v19393_v43, 16 }
 0x3ed   : > { %23413 = vst [vmem:[#allocation15_spill] sm:$0xff] %v21494_v46  ;;  %v19189_v60 = vld [vmem:[%s20304_s11 + $0x178] sm:$0xff]  ;;  %v7408_v25 = vshll.u32 %v19393_v43, 16 }
 0x3ee   : > { %v4350_v44 = vpop.f32.mrf.mxu2 }
 0x3ef   : > { %v4718_v62 = vadd.f32 %v4350_v44, %v3135_v41  ;;  %v5932_v40 = vpop.f32.mrf.mxu3  ;;  %v7402_v41 = vor.u32 %v7401_v47, %v7398_v18  ;;  %v2195_v47 = vshrl.u32 %v19188_v50, 16 }
 0x3f0   : > { %v2769_v1 = vpop.f32.mrf.mxu1 }
 0x3f1   : > { %v6300_v8 = vadd.f32 %v5932_v40, %v4718_v62  ;;  %v8000_v26 = vpop.f32.mrf.mxu0  ;;  %v3136_v49 = vadd.f32 %v2769_v1, %v23416_v7  ;;  %v2194_v62 = vsel %vm1822_vm2, %v2189_v48, %v2193_v6  ;;  %v7403_v40 = vsel %vm6981_vm4, %v7393_v4, %v7402_v41  ;;  %v19257_v7 = vld [vmem:[%s20304_s11 + $0x178] sm:$0xff] }
 0x3f2   : > { %v2199_v48 = vshll.u32 %v19189_v60, 16 }
 0x3f3   : > { %v21502_v15 = vadd.f32 %v7998_v16, %v6300_v8 }
 0x3f5   : > { %23415 = vst [vmem:[#allocation18_spill] sm:$0xff] %v21502_v15 }
 0x3f6   : > { %v4352_v44 = vpop.f32.mrf.mxu2 }
 0x3f7   : > { %v4719_v19 = vadd.f32 %v4352_v44, %v3136_v49  ;;  %v5934_v46 = vpop.f32.mrf.mxu3  ;;  %v19325_v44 = vld [vmem:[%s20304_s11 + $0x188] sm:$0xff] }
 0x3f8   : > { %v2772_v20 = vpop.f32.mrf.mxu1 }
 0x3f9   : > { %v6301_v30 = vadd.f32 %v5934_v46, %v4719_v19  ;;  %v8003_v16 = vpop.f32.mrf.mxu0  ;;  %v23418_v46 = vld [vmem:[#allocation24_spill] sm:$0xff]  ;;  %v7407_v19 = vrot.slane %v7405_v3, 1 }
 0x3fa   : > { %v3137_v5 = vadd.f32 %v2772_v20, %v23418_v46  ;;  %v3910_v20 = vrot.slane %v19257_v7, 1  ;;  %v5492_v46 = vrot.slane %v19325_v44, 1 }
 0x3fb   : > { %16668 = vmatmul.msk.bf16.gmra.mxu1 %vm647_vm1, %v2194_v62  ;;  %17008 = vmatmul.msk.bf16.gmra.mxu2 %vm647_vm1, %v3909_v17  ;;  %v21512_v1 = vadd.f32 %v8000_v26, %v6301_v30  ;;  %v7410_v62 = vrot.slane %v7408_v25, 2  ;;  %v2197_v30 = vor.u32 %v2195_v47, %v2193_v6  ;;  %v19394_v47 = vld [vmem:[%s20304_s11 + $0x190] sm:$0xff] }
 0x3fc   : > { %17348 = vmatmul.msk.bf16.gmra.mxu3 %vm647_vm1, %v5491_v9  ;;  %17688 = vmatmul.msk.bf16.gmra.mxu0 %vm647_vm1, %v7403_v40  ;;  %v2201_v9 = vrot.slane %v2199_v48, 1  ;;  %v23420_v40 = vld [vmem:[#allocation27_spill] sm:$0xff]  ;;  %v3911_v3 = vsel %vm3816_vm3, %v3908_v12, %v3910_v20  ;;  %v5493_v6 = vsel %vm3816_vm3, %v5490_v31, %v5492_v46  ;;  %v19190_v12 = vld [vmem:[%s20304_s11 + $0x180] sm:$0xff]  ;;  %v7414_v7 = vshrl.u32 %v19394_v47, 16 }
 0x3fd   : > { %23417 = vst [vmem:[#allocation21_spill] sm:$0xff] %v21512_v1  ;;  %v7417_v31 = vshll.u32 %v19394_v47, 16 }
 0x3fe   : > { %v4355_v8 = vpop.f32.mrf.mxu2 }
 0x3ff   : > { %v4720_v4 = vadd.f32 %v4355_v8, %v3137_v5  ;;  %v5937_v28 = vpop.f32.mrf.mxu3  ;;  %v7411_v5 = vor.u32 %v7410_v62, %v7407_v19  ;;  %v2203_v62 = vshrl.u32 %v19189_v60, 16 }
 0x400   : > { %v2774_v18 = vpop.f32.mrf.mxu1 }
 0x401   : > { %v6302_v49 = vadd.f32 %v5937_v28, %v4720_v4  ;;  %v8005_v26 = vpop.f32.mrf.mxu0  ;;  %v3138_v43 = vadd.f32 %v2774_v18, %v23420_v40  ;;  %v2202_v4 = vsel %vm1822_vm2, %v2197_v30, %v2201_v9  ;;  %v7412_v28 = vsel %vm6981_vm4, %v7402_v41, %v7411_v5  ;;  %v19258_v40 = vld [vmem:[%s20304_s11 + $0x180] sm:$0xff] }
 0x402   : > { %v2207_v30 = vshll.u32 %v19190_v12, 16 }
 0x403   : > { %v21520_v17 = vadd.f32 %v8003_v16, %v6302_v49 }
 0x405   : > { %23419 = vst [vmem:[#allocation24_spill] sm:$0xff] %v21520_v17 }
 0x406   : > { %v4357_v8 = vpop.f32.mrf.mxu2 }
 0x407   : > { %v4721_v50 = vadd.f32 %v4357_v8, %v3138_v43  ;;  %v5939_v1 = vpop.f32.mrf.mxu3  ;;  %v19326_v8 = vld [vmem:[%s20304_s11 + $0x190] sm:$0xff] }
 0x408   : > { %v2777_v15 = vpop.f32.mrf.mxu1 }
 0x409   : > { %v6303_v25 = vadd.f32 %v5939_v1, %v4721_v50  ;;  %v8008_v16 = vpop.f32.mrf.mxu0  ;;  %v23422_v1 = vld [vmem:[#allocation30_spill] sm:$0xff]  ;;  %v7416_v50 = vrot.slane %v7414_v7, 1 }
 0x40a   : > { %v3139_v48 = vadd.f32 %v2777_v15, %v23422_v1  ;;  %v3912_v15 = vrot.slane %v19258_v40, 1  ;;  %v5494_v1 = vrot.slane %v19326_v8, 1 }
 0x40b   : > { %16669 = vmatmul.msk.bf16.gmra.mxu1 %vm647_vm1, %v2202_v4  ;;  %17009 = vmatmul.msk.bf16.gmra.mxu2 %vm647_vm1, %v3911_v3  ;;  %v21530_v18 = vadd.f32 %v8005_v26, %v6303_v25  ;;  %v7419_v4 = vrot.slane %v7417_v31, 2  ;;  %v2205_v25 = vor.u32 %v2203_v62, %v2201_v9  ;;  %v19395_v62 = vld [vmem:[%s20304_s11 + $0x198] sm:$0xff] }
 0x40c   : > { %17349 = vmatmul.msk.bf16.gmra.mxu3 %vm647_vm1, %v5493_v6  ;;  %17689 = vmatmul.msk.bf16.gmra.mxu0 %vm647_vm1, %v7412_v28  ;;  %v2209_v6 = vrot.slane %v2207_v30, 1  ;;  %v23424_v28 = vld [vmem:[#allocation33_spill] sm:$0xff]  ;;  %v3913_v7 = vsel %vm3816_vm3, %v3910_v20, %v3912_v15  ;;  %v5495_v9 = vsel %vm3816_vm3, %v5492_v46, %v5494_v1  ;;  %v19191_v20 = vld [vmem:[%s20304_s11 + $0x188] sm:$0xff]  ;;  %v7423_v40 = vshrl.u32 %v19395_v62, 16 }
 0x40d   : > { %23421 = vst [vmem:[#allocation27_spill] sm:$0xff] %v21530_v18  ;;  %v7426_v46 = vshll.u32 %v19395_v62, 16 }
 0x40e   : > { %v4360_v49 = vpop.f32.mrf.mxu2 }
 0x40f   : > { %v4722_v41 = vadd.f32 %v4360_v49, %v3139_v48  ;;  %v5942_v44 = vpop.f32.mrf.mxu3  ;;  %v7420_v48 = vor.u32 %v7419_v4, %v7416_v50  ;;  %v2211_v4 = vshrl.u32 %v19190_v12, 16 }
 0x410   : > { %v2779_v19 = vpop.f32.mrf.mxu1 }
 0x411   : > { %v6304_v43 = vadd.f32 %v5942_v44, %v4722_v41  ;;  %v8010_v26 = vpop.f32.mrf.mxu0  ;;  %v3140_v47 = vadd.f32 %v2779_v19, %v23424_v28  ;;  %v2210_v41 = vsel %vm1822_vm2, %v2205_v25, %v2209_v6  ;;  %v7421_v44 = vsel %vm6981_vm4, %v7411_v5, %v7420_v48  ;;  %v19259_v28 = vld [vmem:[%s20304_s11 + $0x188] sm:$0xff] }
 0x412   : > { %v2215_v25 = vshll.u32 %v19191_v20, 16 }
 0x413   : > { %v21538_v3 = vadd.f32 %v8008_v16, %v6304_v43 }
 0x415   : > { %23423 = vst [vmem:[#allocation30_spill] sm:$0xff] %v21538_v3 }
 0x416   : > { %v4362_v49 = vpop.f32.mrf.mxu2 }
 0x417   : > { %v4723_v60 = vadd.f32 %v4362_v49, %v3140_v47  ;;  %v5944_v18 = vpop.f32.mrf.mxu3  ;;  %v19327_v49 = vld [vmem:[%s20304_s11 + $0x198] sm:$0xff] }
 0x418   : > { %v2782_v17 = vpop.f32.mrf.mxu1 }
 0x419   : > { %v6305_v31 = vadd.f32 %v5944_v18, %v4723_v60  ;;  %v8013_v16 = vpop.f32.mrf.mxu0  ;;  %v23426_v18 = vld [vmem:[#allocation36_spill] sm:$0xff]  ;;  %v7425_v60 = vrot.slane %v7423_v40, 1 }
 0x41a   : > { %v3141_v30 = vadd.f32 %v2782_v17, %v23426_v18  ;;  %v3914_v17 = vrot.slane %v19259_v28, 1  ;;  %v5496_v18 = vrot.slane %v19327_v49, 1 }
 0x41b   : > { %16670 = vmatmul.msk.bf16.gmra.mxu1 %vm647_vm1, %v2210_v41  ;;  %17010 = vmatmul.msk.bf16.gmra.mxu2 %vm647_vm1, %v3913_v7  ;;  %v21548_v19 = vadd.f32 %v8010_v26, %v6305_v31  ;;  %v7428_v41 = vrot.slane %v7426_v46, 2  ;;  %v2213_v31 = vor.u32 %v2211_v4, %v2209_v6  ;;  %v19396_v4 = vld [vmem:[%s20304_s11 + $0x1a0] sm:$0xff] }
 0x41c   : > { %17350 = vmatmul.msk.bf16.gmra.mxu3 %vm647_vm1, %v5495_v9  ;;  %17690 = vmatmul.msk.bf16.gmra.mxu0 %vm647_vm1, %v7421_v44  ;;  %v2217_v9 = vrot.slane %v2215_v25, 1  ;;  %v23428_v44 = vld [vmem:[#allocation39_spill] sm:$0xff]  ;;  %v3915_v40 = vsel %vm3816_vm3, %v3912_v15, %v3914_v17  ;;  %v5497_v6 = vsel %vm3816_vm3, %v5494_v1, %v5496_v18  ;;  %v19192_v15 = vld [vmem:[%s20304_s11 + $0x190] sm:$0xff]  ;;  %v7432_v28 = vshrl.u32 %v19396_v4, 16 }
 0x41d   : > { %23425 = vst [vmem:[#allocation33_spill] sm:$0xff] %v21548_v19  ;;  %v7435_v1 = vshll.u32 %v19396_v4, 16 }
 0x41e   : > { %v4365_v43 = vpop.f32.mrf.mxu2 }
 0x41f   : > { %v4724_v5 = vadd.f32 %v4365_v43, %v3141_v30  ;;  %v5947_v8 = vpop.f32.mrf.mxu3  ;;  %v7429_v30 = vor.u32 %v7428_v41, %v7425_v60  ;;  %v2219_v41 = vshrl.u32 %v19191_v20, 16 }
 0x420   : > { %v2784_v50 = vpop.f32.mrf.mxu1 }
 0x421   : > { %v6306_v47 = vadd.f32 %v5947_v8, %v4724_v5  ;;  %v8015_v26 = vpop.f32.mrf.mxu0  ;;  %v3142_v62 = vadd.f32 %v2784_v50, %v23428_v44  ;;  %v2218_v5 = vsel %vm1822_vm2, %v2213_v31, %v2217_v9  ;;  %v7430_v8 = vsel %vm6981_vm4, %v7420_v48, %v7429_v30  ;;  %v19260_v44 = vld [vmem:[%s20304_s11 + $0x190] sm:$0xff] }
 0x422   : > { %v2223_v31 = vshll.u32 %v19192_v15, 16 }
 0x423   : > { %v21556_v7 = vadd.f32 %v8013_v16, %v6306_v47 }
 0x425   : > { %23427 = vst [vmem:[#allocation36_spill] sm:$0xff] %v21556_v7 }
 0x426   : > { %v4367_v43 = vpop.f32.mrf.mxu2 }
 0x427   : > { %v4725_v12 = vadd.f32 %v4367_v43, %v3142_v62  ;;  %v5949_v19 = vpop.f32.mrf.mxu3  ;;  %v19328_v43 = vld [vmem:[%s20304_s11 + $0x1a0] sm:$0xff] }
 0x428   : > { %v2787_v3 = vpop.f32.mrf.mxu1 }
 0x429   : > { %v6307_v46 = vadd.f32 %v5949_v19, %v4725_v12  ;;  %v8018_v16 = vpop.f32.mrf.mxu0  ;;  %v23430_v19 = vld [vmem:[#allocation42_spill] sm:$0xff]  ;;  %v7434_v12 = vrot.slane %v7432_v28, 1 }
 0x42a   : > { %v3143_v25 = vadd.f32 %v2787_v3, %v23430_v19  ;;  %v3916_v3 = vrot.slane %v19260_v44, 1  ;;  %v5498_v19 = vrot.slane %v19328_v43, 1 }
 0x42b   : > { %16671 = vmatmul.msk.bf16.gmra.mxu1 %vm647_vm1, %v2218_v5  ;;  %17011 = vmatmul.msk.bf16.gmra.mxu2 %vm647_vm1, %v3915_v40  ;;  %v21566_v50 = vadd.f32 %v8015_v26, %v6307_v46  ;;  %v7437_v5 = vrot.slane %v7435_v1, 2  ;;  %v2221_v46 = vor.u32 %v2219_v41, %v2217_v9  ;;  %v19397_v41 = vld [vmem:[%s20304_s11 + $0x1a8] sm:$0xff] }
 0x42c   : > { %17351 = vmatmul.msk.bf16.gmra.mxu3 %vm647_vm1, %v5497_v6  ;;  %17691 = vmatmul.msk.bf16.gmra.mxu0 %vm647_vm1, %v7430_v8  ;;  %v2225_v6 = vrot.slane %v2223_v31, 1  ;;  %v23432_v8 = vld [vmem:[#allocation45_spill] sm:$0xff]  ;;  %v3917_v28 = vsel %vm3816_vm3, %v3914_v17, %v3916_v3  ;;  %v5499_v9 = vsel %vm3816_vm3, %v5496_v18, %v5498_v19  ;;  %v7441_v44 = vshrl.u32 %v19397_v41, 16 }
 0x42d   : > { %23429 = vst [vmem:[#allocation39_spill] sm:$0xff] %v21566_v50  ;;  %v19193_v17 = vld [vmem:[%s20304_s11 + $0x198] sm:$0xff]  ;;  %v7444_v18 = vshll.u32 %v19397_v41, 16 }
 0x42e   : > { %v4370_v47 = vpop.f32.mrf.mxu2 }
 0x42f   : > { %v4726_v48 = vadd.f32 %v4370_v47, %v3143_v25  ;;  %v5952_v49 = vpop.f32.mrf.mxu3  ;;  %v7438_v25 = vor.u32 %v7437_v5, %v7434_v12  ;;  %v2227_v5 = vshrl.u32 %v19192_v15, 16 }
 0x430   : > { %v2789_v60 = vpop.f32.mrf.mxu1 }
 0x431   : > { %v6308_v62 = vadd.f32 %v5952_v49, %v4726_v48  ;;  %v8020_v26 = vpop.f32.mrf.mxu0  ;;  %v3144_v4 = vadd.f32 %v2789_v60, %v23432_v8  ;;  %v2226_v48 = vsel %vm1822_vm2, %v2221_v46, %v2225_v6  ;;  %v7439_v49 = vsel %vm6981_vm4, %v7429_v30, %v7438_v25  ;;  %v19261_v8 = vld [vmem:[%s20304_s11 + $0x198] sm:$0xff] }
 0x432   : > { %v2231_v46 = vshll.u32 %v19193_v17, 16 }
 0x433   : > { %v21574_v40 = vadd.f32 %v8018_v16, %v6308_v62 }
 0x435   : > { %23431 = vst [vmem:[#allocation42_spill] sm:$0xff] %v21574_v40 }
 0x436   : > { %v4372_v47 = vpop.f32.mrf.mxu2 }
 0x437   : > { %v4727_v20 = vadd.f32 %v4372_v47, %v3144_v4  ;;  %v5954_v50 = vpop.f32.mrf.mxu3  ;;  %v19329_v47 = vld [vmem:[%s20304_s11 + $0x1a8] sm:$0xff] }
 0x438   : > { %v2792_v7 = vpop.f32.mrf.mxu1 }
 0x439   : > { %v6309_v1 = vadd.f32 %v5954_v50, %v4727_v20  ;;  %v8023_v16 = vpop.f32.mrf.mxu0  ;;  %v23434_v50 = vld [vmem:[#allocation48_spill] sm:$0xff]  ;;  %v7443_v20 = vrot.slane %v7441_v44, 1 }
 0x43a   : > { %v3145_v31 = vadd.f32 %v2792_v7, %v23434_v50  ;;  %v3918_v7 = vrot.slane %v19261_v8, 1  ;;  %v5500_v50 = vrot.slane %v19329_v47, 1 }
 0x43b   : > { %16672 = vmatmul.msk.bf16.gmra.mxu1 %vm647_vm1, %v2226_v48  ;;  %17012 = vmatmul.msk.bf16.gmra.mxu2 %vm647_vm1, %v3917_v28  ;;  %v21584_v60 = vadd.f32 %v8020_v26, %v6309_v1  ;;  %v7446_v48 = vrot.slane %v7444_v18, 2  ;;  %v2229_v1 = vor.u32 %v2227_v5, %v2225_v6  ;;  %v19398_v5 = vld [vmem:[%s20304_s11 + $0x1b0] sm:$0xff] }
 0x43c   : > { %17352 = vmatmul.msk.bf16.gmra.mxu3 %vm647_vm1, %v5499_v9  ;;  %17692 = vmatmul.msk.bf16.gmra.mxu0 %vm647_vm1, %v7439_v49  ;;  %v2233_v9 = vrot.slane %v2231_v46, 1  ;;  %v23436_v49 = vld [vmem:[#allocation51_spill] sm:$0xff]  ;;  %v3919_v44 = vsel %vm3816_vm3, %v3916_v3, %v3918_v7  ;;  %v5501_v6 = vsel %vm3816_vm3, %v5498_v19, %v5500_v50  ;;  %v19194_v3 = vld [vmem:[%s20304_s11 + $0x1a0] sm:$0xff]  ;;  %v7450_v8 = vshrl.u32 %v19398_v5, 16 }
 0x43d   : > { %23433 = vst [vmem:[#allocation45_spill] sm:$0xff] %v21584_v60  ;;  %v7453_v19 = vshll.u32 %v19398_v5, 16 }
 0x43e   : > { %v4375_v62 = vpop.f32.mrf.mxu2 }
 0x43f   : > { %v4728_v30 = vadd.f32 %v4375_v62, %v3145_v31  ;;  %v5957_v43 = vpop.f32.mrf.mxu3  ;;  %v7447_v31 = vor.u32 %v7446_v48, %v7443_v20  ;;  %v2235_v48 = vshrl.u32 %v19193_v17, 16 }
 0x440   : > { %v2794_v12 = vpop.f32.mrf.mxu1 }
 0x441   : > { %v6310_v4 = vadd.f32 %v5957_v43, %v4728_v30  ;;  %v8025_v26 = vpop.f32.mrf.mxu0  ;;  %v3146_v41 = vadd.f32 %v2794_v12, %v23436_v49  ;;  %v2234_v30 = vsel %vm1822_vm2, %v2229_v1, %v2233_v9  ;;  %v7448_v43 = vsel %vm6981_vm4, %v7438_v25, %v7447_v31  ;;  %v19262_v49 = vld [vmem:[%s20304_s11 + $0x1a0] sm:$0xff] }
 0x442   : > { %v2239_v1 = vshll.u32 %v19194_v3, 16 }
 0x443   : > { %v21592_v28 = vadd.f32 %v8023_v16, %v6310_v4 }
 0x445   : > { %23435 = vst [vmem:[#allocation48_spill] sm:$0xff] %v21592_v28 }
 0x446   : > { %v4377_v62 = vpop.f32.mrf.mxu2 }
 0x447   : > { %v4729_v15 = vadd.f32 %v4377_v62, %v3146_v41  ;;  %v5959_v60 = vpop.f32.mrf.mxu3  ;;  %v19330_v62 = vld [vmem:[%s20304_s11 + $0x1b0] sm:$0xff] }
 0x448   : > { %v2797_v40 = vpop.f32.mrf.mxu1 }
 0x449   : > { %v6311_v18 = vadd.f32 %v5959_v60, %v4729_v15  ;;  %v8028_v16 = vpop.f32.mrf.mxu0  ;;  %v23438_v60 = vld [vmem:[#allocation54_spill] sm:$0xff]  ;;  %v7452_v15 = vrot.slane %v7450_v8, 1 }
 0x44a   : > { %v3147_v46 = vadd.f32 %v2797_v40, %v23438_v60  ;;  %v3920_v40 = vrot.slane %v19262_v49, 1  ;;  %v5502_v60 = vrot.slane %v19330_v62, 1 }
 0x44b   : > { %16673 = vmatmul.msk.bf16.gmra.mxu1 %vm647_vm1, %v2234_v30  ;;  %17013 = vmatmul.msk.bf16.gmra.mxu2 %vm647_vm1, %v3919_v44  ;;  %v21602_v12 = vadd.f32 %v8025_v26, %v6311_v18  ;;  %v7455_v30 = vrot.slane %v7453_v19, 2  ;;  %v2237_v18 = vor.u32 %v2235_v48, %v2233_v9  ;;  %v19399_v48 = vld [vmem:[%s20304_s11 + $0x1b8] sm:$0xff] }
 0x44c   : > { %17353 = vmatmul.msk.bf16.gmra.mxu3 %vm647_vm1, %v5501_v6  ;;  %17693 = vmatmul.msk.bf16.gmra.mxu0 %vm647_vm1, %v7448_v43  ;;  %v2241_v6 = vrot.slane %v2239_v1, 1  ;;  %v23440_v43 = vld [vmem:[#allocation57_spill] sm:$0xff]  ;;  %v3921_v8 = vsel %vm3816_vm3, %v3918_v7, %v3920_v40  ;;  %v5503_v9 = vsel %vm3816_vm3, %v5500_v50, %v5502_v60  ;;  %v19195_v7 = vld [vmem:[%s20304_s11 + $0x1a8] sm:$0xff]  ;;  %v7459_v49 = vshrl.u32 %v19399_v48, 16 }
 0x44d   : > { %23437 = vst [vmem:[#allocation51_spill] sm:$0xff] %v21602_v12  ;;  %v7462_v50 = vshll.u32 %v19399_v48, 16 }
 0x44e   : > { %v4380_v4 = vpop.f32.mrf.mxu2 }
 0x44f   : > { %v4730_v25 = vadd.f32 %v4380_v4, %v3147_v46  ;;  %v5962_v47 = vpop.f32.mrf.mxu3  ;;  %v7456_v46 = vor.u32 %v7455_v30, %v7452_v15  ;;  %v2243_v30 = vshrl.u32 %v19194_v3, 16 }
 0x450   : > { %v2799_v20 = vpop.f32.mrf.mxu1 }
 0x451   : > { %v6312_v41 = vadd.f32 %v5962_v47, %v4730_v25  ;;  %v8030_v26 = vpop.f32.mrf.mxu0  ;;  %v3148_v5 = vadd.f32 %v2799_v20, %v23440_v43  ;;  %v2242_v25 = vsel %vm1822_vm2, %v2237_v18, %v2241_v6  ;;  %v7457_v47 = vsel %vm6981_vm4, %v7447_v31, %v7456_v46  ;;  %v19263_v43 = vld [vmem:[%s20304_s11 + $0x1a8] sm:$0xff] }
 0x452   : > { %v2247_v18 = vshll.u32 %v19195_v7, 16 }
 0x453   : > { %v21610_v44 = vadd.f32 %v8028_v16, %v6312_v41 }
 0x455   : > { %23439 = vst [vmem:[#allocation54_spill] sm:$0xff] %v21610_v44 }
 0x456   : > { %v4382_v4 = vpop.f32.mrf.mxu2 }
 0x457   : > { %v4731_v17 = vadd.f32 %v4382_v4, %v3148_v5  ;;  %v5964_v12 = vpop.f32.mrf.mxu3  ;;  %v19331_v4 = vld [vmem:[%s20304_s11 + $0x1b8] sm:$0xff] }
 0x458   : > { %v2802_v28 = vpop.f32.mrf.mxu1 }
 0x459   : > { %v6313_v19 = vadd.f32 %v5964_v12, %v4731_v17  ;;  %v8033_v16 = vpop.f32.mrf.mxu0  ;;  %v23442_v12 = vld [vmem:[#allocation60_spill] sm:$0xff]  ;;  %v7461_v17 = vrot.slane %v7459_v49, 1 }
 0x45a   : > { %v3149_v1 = vadd.f32 %v2802_v28, %v23442_v12  ;;  %v3922_v28 = vrot.slane %v19263_v43, 1  ;;  %v5504_v12 = vrot.slane %v19331_v4, 1 }
 0x45b   : > { %16674 = vmatmul.msk.bf16.gmra.mxu1 %vm647_vm1, %v2242_v25  ;;  %17014 = vmatmul.msk.bf16.gmra.mxu2 %vm647_vm1, %v3921_v8  ;;  %v21620_v20 = vadd.f32 %v8030_v26, %v6313_v19  ;;  %v7464_v25 = vrot.slane %v7462_v50, 2  ;;  %v2245_v19 = vor.u32 %v2243_v30, %v2241_v6  ;;  %v19400_v30 = vld [vmem:[%s20304_s11 + $0x1c0] sm:$0xff] }
 0x45c   : > { %17354 = vmatmul.msk.bf16.gmra.mxu3 %vm647_vm1, %v5503_v9  ;;  %17694 = vmatmul.msk.bf16.gmra.mxu0 %vm647_vm1, %v7457_v47  ;;  %v2249_v9 = vrot.slane %v2247_v18, 1  ;;  %v23444_v47 = vld [vmem:[#allocation63_spill] sm:$0xff]  ;;  %v3923_v49 = vsel %vm3816_vm3, %v3920_v40, %v3922_v28  ;;  %v5505_v6 = vsel %vm3816_vm3, %v5502_v60, %v5504_v12  ;;  %v19196_v40 = vld [vmem:[%s20304_s11 + $0x1b0] sm:$0xff]  ;;  %v7468_v43 = vshrl.u32 %v19400_v30, 16 }
 0x45d   : > { %23441 = vst [vmem:[#allocation57_spill] sm:$0xff] %v21620_v20  ;;  %v7471_v60 = vshll.u32 %v19400_v30, 16 }
 0x45e   : > { %v4385_v41 = vpop.f32.mrf.mxu2 }
 0x45f   : > { %v4732_v31 = vadd.f32 %v4385_v41, %v3149_v1  ;;  %v5967_v62 = vpop.f32.mrf.mxu3  ;;  %v7465_v1 = vor.u32 %v7464_v25, %v7461_v17  ;;  %v2251_v25 = vshrl.u32 %v19195_v7, 16 }
 0x460   : > { %v2804_v15 = vpop.f32.mrf.mxu1 }
 0x461   : > { %v6314_v5 = vadd.f32 %v5967_v62, %v4732_v31  ;;  %v8035_v26 = vpop.f32.mrf.mxu0  ;;  %v3150_v48 = vadd.f32 %v2804_v15, %v23444_v47  ;;  %v2250_v31 = vsel %vm1822_vm2, %v2245_v19, %v2249_v9  ;;  %v7466_v62 = vsel %vm6981_vm4, %v7456_v46, %v7465_v1  ;;  %v19264_v47 = vld [vmem:[%s20304_s11 + $0x1b0] sm:$0xff] }
 0x462   : > { %v2255_v19 = vshll.u32 %v19196_v40, 16 }
 0x463   : > { %v21628_v8 = vadd.f32 %v8033_v16, %v6314_v5 }
 0x465   : > { %23443 = vst [vmem:[#allocation60_spill] sm:$0xff] %v21628_v8 }
 0x466   : > { %v4387_v41 = vpop.f32.mrf.mxu2 }
 0x467   : > { %v4733_v3 = vadd.f32 %v4387_v41, %v3150_v48  ;;  %v5969_v20 = vpop.f32.mrf.mxu3  ;;  %v19332_v41 = vld [vmem:[%s20304_s11 + $0x1c0] sm:$0xff] }
 0x468   : > { %v2807_v44 = vpop.f32.mrf.mxu1 }
 0x469   : > { %v6315_v50 = vadd.f32 %v5969_v20, %v4733_v3  ;;  %v8038_v16 = vpop.f32.mrf.mxu0  ;;  %v23446_v20 = vld [vmem:[#allocation66_spill] sm:$0xff]  ;;  %v7470_v3 = vrot.slane %v7468_v43, 1 }
 0x46a   : > { %v3151_v18 = vadd.f32 %v2807_v44, %v23446_v20  ;;  %v3924_v44 = vrot.slane %v19264_v47, 1  ;;  %v5506_v20 = vrot.slane %v19332_v41, 1 }
 0x46b   : > { %16675 = vmatmul.msk.bf16.gmra.mxu1 %vm647_vm1, %v2250_v31  ;;  %17015 = vmatmul.msk.bf16.gmra.mxu2 %vm647_vm1, %v3923_v49  ;;  %v21638_v15 = vadd.f32 %v8035_v26, %v6315_v50  ;;  %v7473_v31 = vrot.slane %v7471_v60, 2  ;;  %v2253_v50 = vor.u32 %v2251_v25, %v2249_v9  ;;  %v19401_v25 = vld [vmem:[%s20304_s11 + $0x1c8] sm:$0xff] }
 0x46c   : > { %17355 = vmatmul.msk.bf16.gmra.mxu3 %vm647_vm1, %v5505_v6  ;;  %17695 = vmatmul.msk.bf16.gmra.mxu0 %vm647_vm1, %v7466_v62  ;;  %v2257_v6 = vrot.slane %v2255_v19, 1  ;;  %v23448_v62 = vld [vmem:[#allocation69_spill] sm:$0xff]  ;;  %v3925_v43 = vsel %vm3816_vm3, %v3922_v28, %v3924_v44  ;;  %v5507_v9 = vsel %vm3816_vm3, %v5504_v12, %v5506_v20  ;;  %v7477_v47 = vshrl.u32 %v19401_v25, 16 }
 0x46d   : > { %23445 = vst [vmem:[#allocation63_spill] sm:$0xff] %v21638_v15  ;;  %v19197_v28 = vld [vmem:[%s20304_s11 + $0x1b8] sm:$0xff]  ;;  %v7480_v12 = vshll.u32 %v19401_v25, 16 }
 0x46e   : > { %v4390_v5 = vpop.f32.mrf.mxu2 }
 0x46f   : > { %v4734_v46 = vadd.f32 %v4390_v5, %v3151_v18  ;;  %v5972_v4 = vpop.f32.mrf.mxu3  ;;  %v7474_v18 = vor.u32 %v7473_v31, %v7470_v3  ;;  %v2259_v31 = vshrl.u32 %v19196_v40, 16 }
 0x470   : > { %v2809_v17 = vpop.f32.mrf.mxu1 }
 0x471   : > { %v6316_v48 = vadd.f32 %v5972_v4, %v4734_v46  ;;  %v8040_v26 = vpop.f32.mrf.mxu0  ;;  %v3152_v30 = vadd.f32 %v2809_v17, %v23448_v62  ;;  %v2258_v46 = vsel %vm1822_vm2, %v2253_v50, %v2257_v6  ;;  %v7475_v4 = vsel %vm6981_vm4, %v7465_v1, %v7474_v18  ;;  %v19265_v62 = vld [vmem:[%s20304_s11 + $0x1b8] sm:$0xff] }
 0x472   : > { %v2263_v50 = vshll.u32 %v19197_v28, 16 }
 0x473   : > { %v21646_v49 = vadd.f32 %v8038_v16, %v6316_v48 }
 0x475   : > { %23447 = vst [vmem:[#allocation66_spill] sm:$0xff] %v21646_v49 }
 0x476   : > { %v4392_v5 = vpop.f32.mrf.mxu2 }
 0x477   : > { %v4735_v7 = vadd.f32 %v4392_v5, %v3152_v30  ;;  %v5974_v15 = vpop.f32.mrf.mxu3  ;;  %v19333_v5 = vld [vmem:[%s20304_s11 + $0x1c8] sm:$0xff] }
 0x478   : > { %v2812_v8 = vpop.f32.mrf.mxu1 }
 0x479   : > { %v6317_v60 = vadd.f32 %v5974_v15, %v4735_v7  ;;  %v8043_v16 = vpop.f32.mrf.mxu0  ;;  %v23450_v15 = vld [vmem:[#allocation72_spill] sm:$0xff]  ;;  %v7479_v7 = vrot.slane %v7477_v47, 1 }
 0x47a   : > { %v3153_v19 = vadd.f32 %v2812_v8, %v23450_v15  ;;  %v3926_v8 = vrot.slane %v19265_v62, 1  ;;  %v5508_v15 = vrot.slane %v19333_v5, 1 }
 0x47b   : > { %16676 = vmatmul.msk.bf16.gmra.mxu1 %vm647_vm1, %v2258_v46  ;;  %17016 = vmatmul.msk.bf16.gmra.mxu2 %vm647_vm1, %v3925_v43  ;;  %v21656_v17 = vadd.f32 %v8040_v26, %v6317_v60  ;;  %v7482_v46 = vrot.slane %v7480_v12, 2  ;;  %v2261_v60 = vor.u32 %v2259_v31, %v2257_v6  ;;  %v19402_v31 = vld [vmem:[%s20304_s11 + $0x1d0] sm:$0xff] }
 0x47c   : > { %17356 = vmatmul.msk.bf16.gmra.mxu3 %vm647_vm1, %v5507_v9  ;;  %17696 = vmatmul.msk.bf16.gmra.mxu0 %vm647_vm1, %v7475_v4  ;;  %v2265_v9 = vrot.slane %v2263_v50, 1  ;;  %v23452_v4 = vld [vmem:[#allocation75_spill] sm:$0xff]  ;;  %v3927_v47 = vsel %vm3816_vm3, %v3924_v44, %v3926_v8  ;;  %v5509_v6 = vsel %vm3816_vm3, %v5506_v20, %v5508_v15  ;;  %v19198_v44 = vld [vmem:[%s20304_s11 + $0x1c0] sm:$0xff]  ;;  %v7486_v62 = vshrl.u32 %v19402_v31, 16 }
 0x47d   : > { %23449 = vst [vmem:[#allocation69_spill] sm:$0xff] %v21656_v17  ;;  %v7489_v20 = vshll.u32 %v19402_v31, 16 }
 0x47e   : > { %v4395_v48 = vpop.f32.mrf.mxu2 }
 0x47f   : > { %v4736_v1 = vadd.f32 %v4395_v48, %v3153_v19  ;;  %v5977_v41 = vpop.f32.mrf.mxu3  ;;  %v7483_v19 = vor.u32 %v7482_v46, %v7479_v7  ;;  %v2267_v46 = vshrl.u32 %v19197_v28, 16 }
 0x480   : > { %v2814_v3 = vpop.f32.mrf.mxu1 }
 0x481   : > { %v6318_v30 = vadd.f32 %v5977_v41, %v4736_v1  ;;  %v8045_v26 = vpop.f32.mrf.mxu0  ;;  %v3154_v25 = vadd.f32 %v2814_v3, %v23452_v4  ;;  %v2266_v1 = vsel %vm1822_vm2, %v2261_v60, %v2265_v9  ;;  %v7484_v41 = vsel %vm6981_vm4, %v7474_v18, %v7483_v19  ;;  %v19266_v4 = vld [vmem:[%s20304_s11 + $0x1c0] sm:$0xff] }
 0x482   : > { %v2271_v60 = vshll.u32 %v19198_v44, 16 }
 0x483   : > { %v21664_v43 = vadd.f32 %v8043_v16, %v6318_v30 }
 0x485   : > { %23451 = vst [vmem:[#allocation72_spill] sm:$0xff] %v21664_v43 }
 0x486   : > { %v4397_v48 = vpop.f32.mrf.mxu2 }
 0x487   : > { %v4737_v40 = vadd.f32 %v4397_v48, %v3154_v25  ;;  %v5979_v17 = vpop.f32.mrf.mxu3  ;;  %v19334_v48 = vld [vmem:[%s20304_s11 + $0x1d0] sm:$0xff] }
 0x488   : > { %v2817_v49 = vpop.f32.mrf.mxu1 }
 0x489   : > { %v6319_v12 = vadd.f32 %v5979_v17, %v4737_v40  ;;  %v8048_v16 = vpop.f32.mrf.mxu0  ;;  %v23454_v17 = vld [vmem:[#allocation78_spill] sm:$0xff]  ;;  %v7488_v40 = vrot.slane %v7486_v62, 1 }
 0x48a   : > { %v3155_v50 = vadd.f32 %v2817_v49, %v23454_v17  ;;  %v3928_v49 = vrot.slane %v19266_v4, 1  ;;  %v5510_v17 = vrot.slane %v19334_v48, 1 }
 0x48b   : > { %16677 = vmatmul.msk.bf16.gmra.mxu1 %vm647_vm1, %v2266_v1  ;;  %17017 = vmatmul.msk.bf16.gmra.mxu2 %vm647_vm1, %v3927_v47  ;;  %v21674_v3 = vadd.f32 %v8045_v26, %v6319_v12  ;;  %v7491_v1 = vrot.slane %v7489_v20, 2  ;;  %v2269_v12 = vor.u32 %v2267_v46, %v2265_v9  ;;  %v19403_v46 = vld [vmem:[%s20304_s11 + $0x1d8] sm:$0xff] }
 0x48c   : > { %17357 = vmatmul.msk.bf16.gmra.mxu3 %vm647_vm1, %v5509_v6  ;;  %17697 = vmatmul.msk.bf16.gmra.mxu0 %vm647_vm1, %v7484_v41  ;;  %v2273_v6 = vrot.slane %v2271_v60, 1  ;;  %v23456_v41 = vld [vmem:[#allocation81_spill] sm:$0xff]  ;;  %v3929_v62 = vsel %vm3816_vm3, %v3926_v8, %v3928_v49  ;;  %v5511_v9 = vsel %vm3816_vm3, %v5508_v15, %v5510_v17  ;;  %v19199_v8 = vld [vmem:[%s20304_s11 + $0x1c8] sm:$0xff]  ;;  %v7495_v4 = vshrl.u32 %v19403_v46, 16 }
 0x48d   : > { %23453 = vst [vmem:[#allocation75_spill] sm:$0xff] %v21674_v3  ;;  %v7498_v15 = vshll.u32 %v19403_v46, 16 }
 0x48e   : > { %v4400_v30 = vpop.f32.mrf.mxu2 }
 0x48f   : > { %v4738_v18 = vadd.f32 %v4400_v30, %v3155_v50  ;;  %v5982_v5 = vpop.f32.mrf.mxu3  ;;  %v7492_v50 = vor.u32 %v7491_v1, %v7488_v40  ;;  %v2275_v1 = vshrl.u32 %v19198_v44, 16 }
 0x490   : > { %v2819_v7 = vpop.f32.mrf.mxu1 }
 0x491   : > { %v6320_v25 = vadd.f32 %v5982_v5, %v4738_v18  ;;  %v8050_v26 = vpop.f32.mrf.mxu0  ;;  %v3156_v31 = vadd.f32 %v2819_v7, %v23456_v41  ;;  %v2274_v18 = vsel %vm1822_vm2, %v2269_v12, %v2273_v6  ;;  %v7493_v5 = vsel %vm6981_vm4, %v7483_v19, %v7492_v50  ;;  %v19267_v41 = vld [vmem:[%s20304_s11 + $0x1c8] sm:$0xff] }
 0x492   : > { %v2279_v12 = vshll.u32 %v19199_v8, 16 }
 0x493   : > { %v21682_v47 = vadd.f32 %v8048_v16, %v6320_v25 }
 0x495   : > { %23455 = vst [vmem:[#allocation78_spill] sm:$0xff] %v21682_v47 }
 0x496   : > { %v4402_v30 = vpop.f32.mrf.mxu2 }
 0x497   : > { %v4739_v28 = vadd.f32 %v4402_v30, %v3156_v31  ;;  %v5984_v3 = vpop.f32.mrf.mxu3  ;;  %v19335_v30 = vld [vmem:[%s20304_s11 + $0x1d8] sm:$0xff] }
 0x498   : > { %v2822_v43 = vpop.f32.mrf.mxu1 }
 0x499   : > { %v6321_v20 = vadd.f32 %v5984_v3, %v4739_v28  ;;  %v8053_v16 = vpop.f32.mrf.mxu0  ;;  %v23458_v3 = vld [vmem:[#allocation84_spill] sm:$0xff]  ;;  %v7497_v28 = vrot.slane %v7495_v4, 1 }
 0x49a   : > { %v3157_v60 = vadd.f32 %v2822_v43, %v23458_v3  ;;  %v3930_v43 = vrot.slane %v19267_v41, 1  ;;  %v5512_v3 = vrot.slane %v19335_v30, 1 }
 0x49b   : > { %16678 = vmatmul.msk.bf16.gmra.mxu1 %vm647_vm1, %v2274_v18  ;;  %17018 = vmatmul.msk.bf16.gmra.mxu2 %vm647_vm1, %v3929_v62  ;;  %v21692_v7 = vadd.f32 %v8050_v26, %v6321_v20  ;;  %v7500_v18 = vrot.slane %v7498_v15, 2  ;;  %v2277_v20 = vor.u32 %v2275_v1, %v2273_v6  ;;  %v19404_v1 = vld [vmem:[%s20304_s11 + $0x1e0] sm:$0xff] }
 0x49c   : > { %17358 = vmatmul.msk.bf16.gmra.mxu3 %vm647_vm1, %v5511_v9  ;;  %17698 = vmatmul.msk.bf16.gmra.mxu0 %vm647_vm1, %v7493_v5  ;;  %v2281_v9 = vrot.slane %v2279_v12, 1  ;;  %v23460_v5 = vld [vmem:[#allocation87_spill] sm:$0xff]  ;;  %v3931_v4 = vsel %vm3816_vm3, %v3928_v49, %v3930_v43  ;;  %v5513_v6 = vsel %vm3816_vm3, %v5510_v17, %v5512_v3  ;;  %v19200_v49 = vld [vmem:[%s20304_s11 + $0x1d0] sm:$0xff]  ;;  %v7504_v41 = vshrl.u32 %v19404_v1, 16 }
 0x49d   : > { %23457 = vst [vmem:[#allocation81_spill] sm:$0xff] %v21692_v7  ;;  %v7507_v17 = vshll.u32 %v19404_v1, 16 }
 0x49e   : > { %v4405_v25 = vpop.f32.mrf.mxu2 }
 0x49f   : > { %v4740_v19 = vadd.f32 %v4405_v25, %v3157_v60  ;;  %v5987_v48 = vpop.f32.mrf.mxu3  ;;  %v7501_v60 = vor.u32 %v7500_v18, %v7497_v28  ;;  %v2283_v18 = vshrl.u32 %v19199_v8, 16 }
 0x4a0   : > { %v2824_v40 = vpop.f32.mrf.mxu1 }
 0x4a1   : > { %v6322_v31 = vadd.f32 %v5987_v48, %v4740_v19  ;;  %v8055_v26 = vpop.f32.mrf.mxu0  ;;  %v3158_v46 = vadd.f32 %v2824_v40, %v23460_v5  ;;  %v2282_v19 = vsel %vm1822_vm2, %v2277_v20, %v2281_v9  ;;  %v7502_v48 = vsel %vm6981_vm4, %v7492_v50, %v7501_v60  ;;  %v19268_v5 = vld [vmem:[%s20304_s11 + $0x1d0] sm:$0xff] }
 0x4a2   : > { %v2287_v20 = vshll.u32 %v19200_v49, 16 }
 0x4a3   : > { %v21700_v62 = vadd.f32 %v8053_v16, %v6322_v31 }
 0x4a5   : > { %23459 = vst [vmem:[#allocation84_spill] sm:$0xff] %v21700_v62 }
 0x4a6   : > { %v4407_v25 = vpop.f32.mrf.mxu2 }
 0x4a7   : > { %v4741_v44 = vadd.f32 %v4407_v25, %v3158_v46  ;;  %v5989_v7 = vpop.f32.mrf.mxu3  ;;  %v19336_v25 = vld [vmem:[%s20304_s11 + $0x1e0] sm:$0xff] }
 0x4a8   : > { %v2827_v47 = vpop.f32.mrf.mxu1 }
 0x4a9   : > { %v6323_v15 = vadd.f32 %v5989_v7, %v4741_v44  ;;  %v8058_v16 = vpop.f32.mrf.mxu0  ;;  %v23462_v7 = vld [vmem:[#allocation90_spill] sm:$0xff]  ;;  %v7506_v44 = vrot.slane %v7504_v41, 1 }
 0x4aa   : > { %v3159_v12 = vadd.f32 %v2827_v47, %v23462_v7  ;;  %v3932_v47 = vrot.slane %v19268_v5, 1  ;;  %v5514_v7 = vrot.slane %v19336_v25, 1 }
 0x4ab   : > { %16679 = vmatmul.msk.bf16.gmra.mxu1 %vm647_vm1, %v2282_v19  ;;  %17019 = vmatmul.msk.bf16.gmra.mxu2 %vm647_vm1, %v3931_v4  ;;  %v21710_v40 = vadd.f32 %v8055_v26, %v6323_v15  ;;  %v7509_v19 = vrot.slane %v7507_v17, 2  ;;  %v2285_v15 = vor.u32 %v2283_v18, %v2281_v9  ;;  %v19405_v18 = vld [vmem:[%s20304_s11 + $0x1e8] sm:$0xff] }
 0x4ac   : > { %17359 = vmatmul.msk.bf16.gmra.mxu3 %vm647_vm1, %v5513_v6  ;;  %17699 = vmatmul.msk.bf16.gmra.mxu0 %vm647_vm1, %v7502_v48  ;;  %v2289_v6 = vrot.slane %v2287_v20, 1  ;;  %v23464_v48 = vld [vmem:[#allocation93_spill] sm:$0xff]  ;;  %v3933_v41 = vsel %vm3816_vm3, %v3930_v43, %v3932_v47  ;;  %v5515_v9 = vsel %vm3816_vm3, %v5512_v3, %v5514_v7  ;;  %v7513_v5 = vshrl.u32 %v19405_v18, 16 }
 0x4ad   : > { %23461 = vst [vmem:[#allocation87_spill] sm:$0xff] %v21710_v40  ;;  %v19201_v43 = vld [vmem:[%s20304_s11 + $0x1d8] sm:$0xff]  ;;  %v7516_v3 = vshll.u32 %v19405_v18, 16 }
 0x4ae   : > { %v4410_v31 = vpop.f32.mrf.mxu2 }
 0x4af   : > { %v4742_v50 = vadd.f32 %v4410_v31, %v3159_v12  ;;  %v5992_v30 = vpop.f32.mrf.mxu3  ;;  %v7510_v12 = vor.u32 %v7509_v19, %v7506_v44  ;;  %v2291_v19 = vshrl.u32 %v19200_v49, 16 }
 0x4b0   : > { %v2829_v28 = vpop.f32.mrf.mxu1 }
 0x4b1   : > { %v6324_v46 = vadd.f32 %v5992_v30, %v4742_v50  ;;  %v8060_v26 = vpop.f32.mrf.mxu0  ;;  %v3160_v1 = vadd.f32 %v2829_v28, %v23464_v48  ;;  %v2290_v50 = vsel %vm1822_vm2, %v2285_v15, %v2289_v6  ;;  %v7511_v30 = vsel %vm6981_vm4, %v7501_v60, %v7510_v12  ;;  %v19269_v48 = vld [vmem:[%s20304_s11 + $0x1d8] sm:$0xff] }
 0x4b2   : > { %v2295_v15 = vshll.u32 %v19201_v43, 16 }
 0x4b3   : > { %v21718_v4 = vadd.f32 %v8058_v16, %v6324_v46 }
 0x4b5   : > { %23463 = vst [vmem:[#allocation90_spill] sm:$0xff] %v21718_v4 }
 0x4b6   : > { %v4412_v31 = vpop.f32.mrf.mxu2 }
 0x4b7   : > { %v4743_v8 = vadd.f32 %v4412_v31, %v3160_v1  ;;  %v5994_v40 = vpop.f32.mrf.mxu3  ;;  %v19337_v31 = vld [vmem:[%s20304_s11 + $0x1e8] sm:$0xff] }
 0x4b8   : > { %v2832_v62 = vpop.f32.mrf.mxu1 }
 0x4b9   : > { %v6325_v17 = vadd.f32 %v5994_v40, %v4743_v8  ;;  %v8063_v16 = vpop.f32.mrf.mxu0  ;;  %v23466_v40 = vld [vmem:[#allocation96_spill] sm:$0xff]  ;;  %v7515_v8 = vrot.slane %v7513_v5, 1 }
 0x4ba   : > { %v3161_v20 = vadd.f32 %v2832_v62, %v23466_v40  ;;  %v3934_v62 = vrot.slane %v19269_v48, 1  ;;  %v5516_v40 = vrot.slane %v19337_v31, 1 }
 0x4bb   : > { %16680 = vmatmul.msk.bf16.gmra.mxu1 %vm647_vm1, %v2290_v50  ;;  %17020 = vmatmul.msk.bf16.gmra.mxu2 %vm647_vm1, %v3933_v41  ;;  %v21728_v28 = vadd.f32 %v8060_v26, %v6325_v17  ;;  %v7518_v50 = vrot.slane %v7516_v3, 2  ;;  %v2293_v17 = vor.u32 %v2291_v19, %v2289_v6  ;;  %v19406_v19 = vld [vmem:[%s20304_s11 + $0x1f0] sm:$0xff] }
 0x4bc   : > { %17360 = vmatmul.msk.bf16.gmra.mxu3 %vm647_vm1, %v5515_v9  ;;  %17700 = vmatmul.msk.bf16.gmra.mxu0 %vm647_vm1, %v7511_v30  ;;  %v2297_v9 = vrot.slane %v2295_v15, 1  ;;  %v23468_v30 = vld [vmem:[#allocation99_spill] sm:$0xff]  ;;  %v3935_v5 = vsel %vm3816_vm3, %v3932_v47, %v3934_v62  ;;  %v5517_v6 = vsel %vm3816_vm3, %v5514_v7, %v5516_v40  ;;  %v19202_v47 = vld [vmem:[%s20304_s11 + $0x1e0] sm:$0xff]  ;;  %v7522_v48 = vshrl.u32 %v19406_v19, 16 }
 0x4bd   : > { %23465 = vst [vmem:[#allocation93_spill] sm:$0xff] %v21728_v28  ;;  %v7525_v7 = vshll.u32 %v19406_v19, 16 }
 0x4be   : > { %v4415_v46 = vpop.f32.mrf.mxu2 }
 0x4bf   : > { %v4744_v60 = vadd.f32 %v4415_v46, %v3161_v20  ;;  %v5997_v25 = vpop.f32.mrf.mxu3  ;;  %v7519_v20 = vor.u32 %v7518_v50, %v7515_v8  ;;  %v2299_v50 = vshrl.u32 %v19201_v43, 16 }
 0x4c0   : > { %v2834_v44 = vpop.f32.mrf.mxu1 }
 0x4c1   : > { %v6326_v1 = vadd.f32 %v5997_v25, %v4744_v60  ;;  %v8065_v26 = vpop.f32.mrf.mxu0  ;;  %v3162_v18 = vadd.f32 %v2834_v44, %v23468_v30  ;;  %v2298_v60 = vsel %vm1822_vm2, %v2293_v17, %v2297_v9  ;;  %v7520_v25 = vsel %vm6981_vm4, %v7510_v12, %v7519_v20  ;;  %v19270_v30 = vld [vmem:[%s20304_s11 + $0x1e0] sm:$0xff] }
 0x4c2   : > { %v2303_v17 = vshll.u32 %v19202_v47, 16 }
 0x4c3   : > { %v21736_v41 = vadd.f32 %v8063_v16, %v6326_v1 }
 0x4c5   : > { %23467 = vst [vmem:[#allocation96_spill] sm:$0xff] %v21736_v41 }
 0x4c6   : > { %v4417_v46 = vpop.f32.mrf.mxu2 }
 0x4c7   : > { %v4745_v49 = vadd.f32 %v4417_v46, %v3162_v18  ;;  %v5999_v28 = vpop.f32.mrf.mxu3  ;;  %v19338_v46 = vld [vmem:[%s20304_s11 + $0x1f0] sm:$0xff] }
 0x4c8   : > { %v2837_v4 = vpop.f32.mrf.mxu1 }
 0x4c9   : > { %v6327_v3 = vadd.f32 %v5999_v28, %v4745_v49  ;;  %v8068_v16 = vpop.f32.mrf.mxu0  ;;  %v23470_v28 = vld [vmem:[#allocation102_spill] sm:$0xff]  ;;  %v7524_v49 = vrot.slane %v7522_v48, 1 }
 0x4ca   : > { %v3163_v15 = vadd.f32 %v2837_v4, %v23470_v28  ;;  %v3936_v4 = vrot.slane %v19270_v30, 1  ;;  %v5518_v28 = vrot.slane %v19338_v46, 1 }
 0x4cb   : > { %16681 = vmatmul.msk.bf16.gmra.mxu1 %vm647_vm1, %v2298_v60  ;;  %17021 = vmatmul.msk.bf16.gmra.mxu2 %vm647_vm1, %v3935_v5  ;;  %v21746_v44 = vadd.f32 %v8065_v26, %v6327_v3  ;;  %v7527_v60 = vrot.slane %v7525_v7, 2  ;;  %v2301_v3 = vor.u32 %v2299_v50, %v2297_v9  ;;  %v19407_v50 = vld [vmem:[%s20304_s11 + $0x1f8] sm:$0xff] }
 0x4cc   : > { %17361 = vmatmul.msk.bf16.gmra.mxu3 %vm647_vm1, %v5517_v6  ;;  %17701 = vmatmul.msk.bf16.gmra.mxu0 %vm647_vm1, %v7520_v25  ;;  %v2305_v6 = vrot.slane %v2303_v17, 1  ;;  %v23472_v25 = vld [vmem:[#allocation105_spill] sm:$0xff]  ;;  %v3937_v48 = vsel %vm3816_vm3, %v3934_v62, %v3936_v4  ;;  %v5519_v9 = vsel %vm3816_vm3, %v5516_v40, %v5518_v28  ;;  %v19203_v62 = vld [vmem:[%s20304_s11 + $0x1e8] sm:$0xff]  ;;  %v7531_v30 = vshrl.u32 %v19407_v50, 16 }
 0x4cd   : > { %23469 = vst [vmem:[#allocation99_spill] sm:$0xff] %v21746_v44  ;;  %v7534_v40 = vshll.u32 %v19407_v50, 16 }
 0x4ce   : > { %v4420_v1 = vpop.f32.mrf.mxu2 }
 0x4cf   : > { %v4746_v12 = vadd.f32 %v4420_v1, %v3163_v15  ;;  %v6002_v31 = vpop.f32.mrf.mxu3  ;;  %v7528_v15 = vor.u32 %v7527_v60, %v7524_v49  ;;  %v2307_v60 = vshrl.u32 %v19202_v47, 16 }
 0x4d0   : > { %v2839_v8 = vpop.f32.mrf.mxu1 }
 0x4d1   : > { %v6328_v18 = vadd.f32 %v6002_v31, %v4746_v12  ;;  %v8070_v26 = vpop.f32.mrf.mxu0  ;;  %v3164_v19 = vadd.f32 %v2839_v8, %v23472_v25  ;;  %v2306_v12 = vsel %vm1822_vm2, %v2301_v3, %v2305_v6  ;;  %v7529_v31 = vsel %vm6981_vm4, %v7519_v20, %v7528_v15  ;;  %v19271_v25 = vld [vmem:[%s20304_s11 + $0x1e8] sm:$0xff] }
 0x4d2   : > { %v2311_v3 = vshll.u32 %v19203_v62, 16 }
 0x4d3   : > { %v21754_v5 = vadd.f32 %v8068_v16, %v6328_v18 }
 0x4d5   : > { %23471 = vst [vmem:[#allocation102_spill] sm:$0xff] %v21754_v5 }
 0x4d6   : > { %v4422_v1 = vpop.f32.mrf.mxu2 }
 0x4d7   : > { %v4747_v43 = vadd.f32 %v4422_v1, %v3164_v19  ;;  %v6004_v44 = vpop.f32.mrf.mxu3  ;;  %v19339_v1 = vld [vmem:[%s20304_s11 + $0x1f8] sm:$0xff] }
 0x4d8   : > { %v2842_v41 = vpop.f32.mrf.mxu1 }
 0x4d9   : > { %v6329_v7 = vadd.f32 %v6004_v44, %v4747_v43  ;;  %v8073_v16 = vpop.f32.mrf.mxu0  ;;  %v23474_v44 = vld [vmem:[#allocation7_spill] sm:$0xff]  ;;  %v7533_v43 = vrot.slane %v7531_v30, 1 }
 0x4da   : > { %v3165_v17 = vadd.f32 %v2842_v41, %v23474_v44  ;;  %v3938_v41 = vrot.slane %v19271_v25, 1  ;;  %v5520_v44 = vrot.slane %v19339_v1, 1 }
 0x4db   : > { %16682 = vmatmul.msk.bf16.gmra.mxu1 %vm647_vm1, %v2306_v12  ;;  %17022 = vmatmul.msk.bf16.gmra.mxu2 %vm647_vm1, %v3937_v48  ;;  %v21764_v8 = vadd.f32 %v8070_v26, %v6329_v7  ;;  %v7536_v12 = vrot.slane %v7534_v40, 2  ;;  %v2309_v7 = vor.u32 %v2307_v60, %v2305_v6  ;;  %v19408_v60 = vld [vmem:[%s20304_s11 + $0x200] sm:$0xff] }
 0x4dc   : > { %17362 = vmatmul.msk.bf16.gmra.mxu3 %vm647_vm1, %v5519_v9  ;;  %17702 = vmatmul.msk.bf16.gmra.mxu0 %vm647_vm1, %v7529_v31  ;;  %v2313_v9 = vrot.slane %v2311_v3, 1  ;;  %v23476_v31 = vld [vmem:[#allocation10_spill] sm:$0xff]  ;;  %v3939_v30 = vsel %vm3816_vm3, %v3936_v4, %v3938_v41  ;;  %v5521_v6 = vsel %vm3816_vm3, %v5518_v28, %v5520_v44  ;;  %v19204_v4 = vld [vmem:[%s20304_s11 + $0x1f0] sm:$0xff]  ;;  %v7540_v25 = vshrl.u32 %v19408_v60, 16 }
 0x4dd   : > { %23473 = vst [vmem:[#allocation105_spill] sm:$0xff] %v21764_v8  ;;  %v7543_v28 = vshll.u32 %v19408_v60, 16 }
 0x4de   : > { %v4425_v18 = vpop.f32.mrf.mxu2 }
 0x4df   : > { %v4748_v20 = vadd.f32 %v4425_v18, %v3165_v17  ;;  %v6007_v46 = vpop.f32.mrf.mxu3  ;;  %v7537_v17 = vor.u32 %v7536_v12, %v7533_v43  ;;  %v2315_v12 = vshrl.u32 %v19203_v62, 16 }
 0x4e0   : > { %v2844_v49 = vpop.f32.mrf.mxu1 }
 0x4e1   : > { %v6330_v19 = vadd.f32 %v6007_v46, %v4748_v20  ;;  %v8075_v26 = vpop.f32.mrf.mxu0  ;;  %v3166_v50 = vadd.f32 %v2844_v49, %v23476_v31  ;;  %v2314_v20 = vsel %vm1822_vm2, %v2309_v7, %v2313_v9  ;;  %v7538_v46 = vsel %vm6981_vm4, %v7528_v15, %v7537_v17  ;;  %v19272_v31 = vld [vmem:[%s20304_s11 + $0x1f0] sm:$0xff] }
 0x4e2   : > { %v2319_v7 = vshll.u32 %v19204_v4, 16 }
 0x4e3   : > { %v21772_v48 = vadd.f32 %v8073_v16, %v6330_v19 }
 0x4e5   : > { %23475 = vst [vmem:[#allocation7_spill] sm:$0xff] %v21772_v48 }
 0x4e6   : > { %v4427_v18 = vpop.f32.mrf.mxu2 }
 0x4e7   : > { %v4749_v47 = vadd.f32 %v4427_v18, %v3166_v50  ;;  %v6009_v8 = vpop.f32.mrf.mxu3  ;;  %v19340_v18 = vld [vmem:[%s20304_s11 + $0x200] sm:$0xff] }
 0x4e8   : > { %v2847_v5 = vpop.f32.mrf.mxu1 }
 0x4e9   : > { %v6331_v40 = vadd.f32 %v6009_v8, %v4749_v47  ;;  %v8078_v16 = vpop.f32.mrf.mxu0  ;;  %v23478_v8 = vld [vmem:[#allocation13_spill] sm:$0xff]  ;;  %v7542_v47 = vrot.slane %v7540_v25, 1 }
 0x4ea   : > { %v3167_v3 = vadd.f32 %v2847_v5, %v23478_v8  ;;  %v3940_v5 = vrot.slane %v19272_v31, 1  ;;  %v5522_v8 = vrot.slane %v19340_v18, 1 }
 0x4eb   : > { %16683 = vmatmul.msk.bf16.gmra.mxu1 %vm647_vm1, %v2314_v20  ;;  %17023 = vmatmul.msk.bf16.gmra.mxu2 %vm647_vm1, %v3939_v30  ;;  %v21782_v49 = vadd.f32 %v8075_v26, %v6331_v40  ;;  %v7545_v20 = vrot.slane %v7543_v28, 2  ;;  %v2317_v40 = vor.u32 %v2315_v12, %v2313_v9  ;;  %v19409_v12 = vld [vmem:[%s20304_s11 + $0x208] sm:$0xff] }
 0x4ec   : > { %17363 = vmatmul.msk.bf16.gmra.mxu3 %vm647_vm1, %v5521_v6  ;;  %17703 = vmatmul.msk.bf16.gmra.mxu0 %vm647_vm1, %v7538_v46  ;;  %v2321_v6 = vrot.slane %v2319_v7, 1  ;;  %v23480_v46 = vld [vmem:[#allocation16_spill] sm:$0xff]  ;;  %v3941_v25 = vsel %vm3816_vm3, %v3938_v41, %v3940_v5  ;;  %v5523_v9 = vsel %vm3816_vm3, %v5520_v44, %v5522_v8  ;;  %v19205_v41 = vld [vmem:[%s20304_s11 + $0x1f8] sm:$0xff]  ;;  %v7549_v31 = vshrl.u32 %v19409_v12, 16 }
 0x4ed   : > { %23477 = vst [vmem:[#allocation10_spill] sm:$0xff] %v21782_v49  ;;  %v7552_v44 = vshll.u32 %v19409_v12, 16 }
 0x4ee   : > { %v4430_v19 = vpop.f32.mrf.mxu2 }
 0x4ef   : > { %v4750_v15 = vadd.f32 %v4430_v19, %v3167_v3  ;;  %v6012_v1 = vpop.f32.mrf.mxu3  ;;  %v7546_v3 = vor.u32 %v7545_v20, %v7542_v47  ;;  %v2323_v20 = vshrl.u32 %v19204_v4, 16 }
 0x4f0   : > { %v2849_v43 = vpop.f32.mrf.mxu1 }
 0x4f1   : > { %v6332_v50 = vadd.f32 %v6012_v1, %v4750_v15  ;;  %v8080_v26 = vpop.f32.mrf.mxu0  ;;  %v3168_v60 = vadd.f32 %v2849_v43, %v23480_v46  ;;  %v2322_v15 = vsel %vm1822_vm2, %v2317_v40, %v2321_v6  ;;  %v7547_v1 = vsel %vm6981_vm4, %v7537_v17, %v7546_v3  ;;  %v19273_v46 = vld [vmem:[%s20304_s11 + $0x1f8] sm:$0xff] }
 0x4f2   : > { %v2327_v40 = vshll.u32 %v19205_v41, 16 }
 0x4f3   : > { %v21790_v30 = vadd.f32 %v8078_v16, %v6332_v50 }
 0x4f5   : > { %23479 = vst [vmem:[#allocation13_spill] sm:$0xff] %v21790_v30 }
 0x4f6   : > { %v4432_v19 = vpop.f32.mrf.mxu2 }
 0x4f7   : > { %v4751_v62 = vadd.f32 %v4432_v19, %v3168_v60  ;;  %v6014_v49 = vpop.f32.mrf.mxu3  ;;  %v19341_v19 = vld [vmem:[%s20304_s11 + $0x208] sm:$0xff] }
 0x4f8   : > { %v2852_v48 = vpop.f32.mrf.mxu1 }
 0x4f9   : > { %v6333_v28 = vadd.f32 %v6014_v49, %v4751_v62  ;;  %v8083_v16 = vpop.f32.mrf.mxu0  ;;  %v23482_v49 = vld [vmem:[#allocation19_spill] sm:$0xff]  ;;  %v7551_v62 = vrot.slane %v7549_v31, 1 }
 0x4fa   : > { %v3169_v7 = vadd.f32 %v2852_v48, %v23482_v49  ;;  %v3942_v48 = vrot.slane %v19273_v46, 1  ;;  %v5524_v49 = vrot.slane %v19341_v19, 1 }
 0x4fb   : > { %16684 = vmatmul.msk.bf16.gmra.mxu1 %vm647_vm1, %v2322_v15  ;;  %17024 = vmatmul.msk.bf16.gmra.mxu2 %vm647_vm1, %v3941_v25  ;;  %v21800_v43 = vadd.f32 %v8080_v26, %v6333_v28  ;;  %v7554_v15 = vrot.slane %v7552_v44, 2  ;;  %v2325_v28 = vor.u32 %v2323_v20, %v2321_v6  ;;  %v19410_v20 = vld [vmem:[%s20304_s11 + $0x210] sm:$0xff] }
 0x4fc   : > { %17364 = vmatmul.msk.bf16.gmra.mxu3 %vm647_vm1, %v5523_v9  ;;  %17704 = vmatmul.msk.bf16.gmra.mxu0 %vm647_vm1, %v7547_v1  ;;  %v2329_v9 = vrot.slane %v2327_v40, 1  ;;  %v23484_v1 = vld [vmem:[#allocation22_spill] sm:$0xff]  ;;  %v3943_v31 = vsel %vm3816_vm3, %v3940_v5, %v3942_v48  ;;  %v5525_v6 = vsel %vm3816_vm3, %v5522_v8, %v5524_v49  ;;  %v7558_v46 = vshrl.u32 %v19410_v20, 16 }
 0x4fd   : > { %23481 = vst [vmem:[#allocation16_spill] sm:$0xff] %v21800_v43  ;;  %v19206_v5 = vld [vmem:[%s20304_s11 + $0x200] sm:$0xff]  ;;  %v7561_v8 = vshll.u32 %v19410_v20, 16 }
 0x4fe   : > { %v4435_v50 = vpop.f32.mrf.mxu2 }
 0x4ff   : > { %v4752_v17 = vadd.f32 %v4435_v50, %v3169_v7  ;;  %v6017_v18 = vpop.f32.mrf.mxu3  ;;  %v7555_v7 = vor.u32 %v7554_v15, %v7551_v62  ;;  %v2331_v15 = vshrl.u32 %v19205_v41, 16 }
 0x500   : > { %v2854_v47 = vpop.f32.mrf.mxu1 }
 0x501   : > { %v6334_v60 = vadd.f32 %v6017_v18, %v4752_v17  ;;  %v8085_v26 = vpop.f32.mrf.mxu0  ;;  %v3170_v12 = vadd.f32 %v2854_v47, %v23484_v1  ;;  %v2330_v17 = vsel %vm1822_vm2, %v2325_v28, %v2329_v9  ;;  %v7556_v18 = vsel %vm6981_vm4, %v7546_v3, %v7555_v7  ;;  %v19274_v1 = vld [vmem:[%s20304_s11 + $0x200] sm:$0xff] }
 0x502   : > { %v2335_v28 = vshll.u32 %v19206_v5, 16 }
 0x503   : > { %v21808_v25 = vadd.f32 %v8083_v16, %v6334_v60 }
 0x505   : > { %23483 = vst [vmem:[#allocation19_spill] sm:$0xff] %v21808_v25 }
 0x506   : > { %v4437_v50 = vpop.f32.mrf.mxu2 }
 0x507   : > { %v4753_v4 = vadd.f32 %v4437_v50, %v3170_v12  ;;  %v6019_v43 = vpop.f32.mrf.mxu3  ;;  %v19342_v50 = vld [vmem:[%s20304_s11 + $0x210] sm:$0xff] }
 0x508   : > { %v2857_v30 = vpop.f32.mrf.mxu1 }
 0x509   : > { %v6335_v44 = vadd.f32 %v6019_v43, %v4753_v4  ;;  %v8088_v16 = vpop.f32.mrf.mxu0  ;;  %v23486_v43 = vld [vmem:[#allocation25_spill] sm:$0xff]  ;;  %v7560_v4 = vrot.slane %v7558_v46, 1 }
 0x50a   : > { %v3171_v40 = vadd.f32 %v2857_v30, %v23486_v43  ;;  %v3944_v30 = vrot.slane %v19274_v1, 1  ;;  %v5526_v43 = vrot.slane %v19342_v50, 1 }
 0x50b   : > { %16685 = vmatmul.msk.bf16.gmra.mxu1 %vm647_vm1, %v2330_v17  ;;  %17025 = vmatmul.msk.bf16.gmra.mxu2 %vm647_vm1, %v3943_v31  ;;  %v21818_v47 = vadd.f32 %v8085_v26, %v6335_v44  ;;  %v7563_v17 = vrot.slane %v7561_v8, 2  ;;  %v2333_v44 = vor.u32 %v2331_v15, %v2329_v9  ;;  %v19411_v15 = vld [vmem:[%s20304_s11 + $0x218] sm:$0xff] }
 0x50c   : > { %17365 = vmatmul.msk.bf16.gmra.mxu3 %vm647_vm1, %v5525_v6  ;;  %17705 = vmatmul.msk.bf16.gmra.mxu0 %vm647_vm1, %v7556_v18  ;;  %v2337_v6 = vrot.slane %v2335_v28, 1  ;;  %v23488_v18 = vld [vmem:[#allocation28_spill] sm:$0xff]  ;;  %v3945_v46 = vsel %vm3816_vm3, %v3942_v48, %v3944_v30  ;;  %v5527_v9 = vsel %vm3816_vm3, %v5524_v49, %v5526_v43  ;;  %v19207_v48 = vld [vmem:[%s20304_s11 + $0x208] sm:$0xff]  ;;  %v7567_v1 = vshrl.u32 %v19411_v15, 16 }
 0x50d   : > { %23485 = vst [vmem:[#allocation22_spill] sm:$0xff] %v21818_v47  ;;  %v7570_v49 = vshll.u32 %v19411_v15, 16 }
 0x50e   : > { %v4440_v60 = vpop.f32.mrf.mxu2 }
 0x50f   : > { %v4754_v3 = vadd.f32 %v4440_v60, %v3171_v40  ;;  %v6022_v19 = vpop.f32.mrf.mxu3  ;;  %v7564_v40 = vor.u32 %v7563_v17, %v7560_v4  ;;  %v2339_v17 = vshrl.u32 %v19206_v5, 16 }
 0x510   : > { %v2859_v62 = vpop.f32.mrf.mxu1 }
 0x511   : > { %v6336_v12 = vadd.f32 %v6022_v19, %v4754_v3  ;;  %v8090_v26 = vpop.f32.mrf.mxu0  ;;  %v3172_v20 = vadd.f32 %v2859_v62, %v23488_v18  ;;  %v2338_v3 = vsel %vm1822_vm2, %v2333_v44, %v2337_v6  ;;  %v7565_v19 = vsel %vm6981_vm4, %v7555_v7, %v7564_v40  ;;  %v19275_v18 = vld [vmem:[%s20304_s11 + $0x208] sm:$0xff] }
 0x512   : > { %v2343_v44 = vshll.u32 %v19207_v48, 16 }
 0x513   : > { %v21826_v31 = vadd.f32 %v8088_v16, %v6336_v12 }
 0x515   : > { %23487 = vst [vmem:[#allocation25_spill] sm:$0xff] %v21826_v31 }
 0x516   : > { %v4442_v60 = vpop.f32.mrf.mxu2 }
 0x517   : > { %v4755_v41 = vadd.f32 %v4442_v60, %v3172_v20  ;;  %v6024_v47 = vpop.f32.mrf.mxu3  ;;  %v19343_v60 = vld [vmem:[%s20304_s11 + $0x218] sm:$0xff] }
 0x518   : > { %v2862_v25 = vpop.f32.mrf.mxu1 }
 0x519   : > { %v6337_v8 = vadd.f32 %v6024_v47, %v4755_v41  ;;  %v8093_v16 = vpop.f32.mrf.mxu0  ;;  %v23490_v47 = vld [vmem:[#allocation31_spill] sm:$0xff]  ;;  %v7569_v41 = vrot.slane %v7567_v1, 1 }
 0x51a   : > { %v3173_v28 = vadd.f32 %v2862_v25, %v23490_v47  ;;  %v3946_v25 = vrot.slane %v19275_v18, 1  ;;  %v5528_v47 = vrot.slane %v19343_v60, 1 }
 0x51b   : > { %16686 = vmatmul.msk.bf16.gmra.mxu1 %vm647_vm1, %v2338_v3  ;;  %17026 = vmatmul.msk.bf16.gmra.mxu2 %vm647_vm1, %v3945_v46  ;;  %v21836_v62 = vadd.f32 %v8090_v26, %v6337_v8  ;;  %v7572_v3 = vrot.slane %v7570_v49, 2  ;;  %v2341_v8 = vor.u32 %v2339_v17, %v2337_v6  ;;  %v19412_v17 = vld [vmem:[%s20304_s11 + $0x220] sm:$0xff] }
 0x51c   : > { %17366 = vmatmul.msk.bf16.gmra.mxu3 %vm647_vm1, %v5527_v9  ;;  %17706 = vmatmul.msk.bf16.gmra.mxu0 %vm647_vm1, %v7565_v19  ;;  %v2345_v9 = vrot.slane %v2343_v44, 1  ;;  %v23492_v19 = vld [vmem:[#allocation34_spill] sm:$0xff]  ;;  %v3947_v1 = vsel %vm3816_vm3, %v3944_v30, %v3946_v25  ;;  %v5529_v6 = vsel %vm3816_vm3, %v5526_v43, %v5528_v47  ;;  %v19208_v30 = vld [vmem:[%s20304_s11 + $0x210] sm:$0xff]  ;;  %v7576_v18 = vshrl.u32 %v19412_v17, 16 }
 0x51d   : > { %23489 = vst [vmem:[#allocation28_spill] sm:$0xff] %v21836_v62  ;;  %v7579_v43 = vshll.u32 %v19412_v17, 16 }
 0x51e   : > { %v4445_v12 = vpop.f32.mrf.mxu2 }
 0x51f   : > { %v4756_v7 = vadd.f32 %v4445_v12, %v3173_v28  ;;  %v6027_v50 = vpop.f32.mrf.mxu3  ;;  %v7573_v28 = vor.u32 %v7572_v3, %v7569_v41  ;;  %v2347_v3 = vshrl.u32 %v19207_v48, 16 }
 0x520   : > { %v2864_v4 = vpop.f32.mrf.mxu1 }
 0x521   : > { %v6338_v20 = vadd.f32 %v6027_v50, %v4756_v7  ;;  %v8095_v26 = vpop.f32.mrf.mxu0  ;;  %v3174_v15 = vadd.f32 %v2864_v4, %v23492_v19  ;;  %v2346_v7 = vsel %vm1822_vm2, %v2341_v8, %v2345_v9  ;;  %v7574_v50 = vsel %vm6981_vm4, %v7564_v40, %v7573_v28  ;;  %v19276_v19 = vld [vmem:[%s20304_s11 + $0x210] sm:$0xff] }
 0x522   : > { %v2351_v8 = vshll.u32 %v19208_v30, 16 }
 0x523   : > { %v21844_v46 = vadd.f32 %v8093_v16, %v6338_v20 }
 0x525   : > { %23491 = vst [vmem:[#allocation31_spill] sm:$0xff] %v21844_v46  ;;  %v18393_v46 = vld [vmem:[%s20304_s11 + $0x20] sm:$0xc] }
 0x526   : > { %v4447_v12 = vpop.f32.mrf.mxu2 }
 0x527   : > { %v4757_v5 = vadd.f32 %v4447_v12, %v3174_v15  ;;  %v6029_v62 = vpop.f32.mrf.mxu3  ;;  %v21862_v12 = vld [vmem:[%s20304_s11 + $0x220] sm:$0xff] }
 0x528   : > { %v2867_v31 = vpop.f32.mrf.mxu1 }
 0x529   : > { %v6339_v49 = vadd.f32 %v6029_v62, %v4757_v5  ;;  %v8098_v16 = vpop.f32.mrf.mxu0  ;;  %v23494_v62 = vld [vmem:[#allocation37_spill] sm:$0xff]  ;;  %v7578_v5 = vrot.slane %v7576_v18, 1 }
 0x52a   : > { %v3175_v44 = vadd.f32 %v2867_v31, %v23494_v62  ;;  %v2353_v31 = vrot.slane %v2351_v8, 1  ;;  %v5530_v62 = vrot.slane %v21862_v12, 1  ;;  %v19413_v8 = vld [vmem:[%s20304_s11 + $0x228] sm:$0xff] }
 0x52b   : > { %16687 = vmatmul.msk.bf16.gmra.mxu1 %vm647_vm1, %v2346_v7  ;;  %17027 = vmatmul.msk.bf16.gmra.mxu2 %vm647_vm1, %v3947_v1  ;;  %v21854_v4 = vadd.f32 %v8095_v26, %v6339_v49  ;;  %v7581_v7 = vrot.slane %v7579_v43, 2  ;;  %v2349_v49 = vor.u32 %v2347_v3, %v2345_v9 }
 0x52c   : > { %17367 = vmatmul.msk.bf16.gmra.mxu3 %vm647_vm1, %v5529_v6  ;;  %17707 = vmatmul.msk.bf16.gmra.mxu0 %vm647_vm1, %v7574_v50  ;;  %v3948_v6 = vrot.slane %v19276_v19, 1  ;;  %v23496_v50 = vld [vmem:[#allocation40_spill] sm:$0xff]  ;;  %v5531_v9 = vsel %vm3816_vm3, %v5528_v47, %v5530_v62  ;;  %v23498_v19 = vld [vmem:[#allocation43_spill] sm:$0xff] }
 0x52d   : > { %23493 = vst [vmem:[#allocation34_spill] sm:$0xff] %v21854_v4  ;;  %v2354_v4 = vsel %vm1822_vm2, %v2349_v49, %v2353_v31  ;;  %v2355_v49 = vshrl.u32 %v19208_v30, 16 }
 0x52e   : > { %v4450_v20 = vpop.f32.mrf.mxu2  ;;  %v3949_v18 = vsel %vm3816_vm3, %v3946_v25, %v3948_v6  ;;  %v21880_v25 = vld [vmem:[%s20304_s11 + $0x218] sm:$0xff] }
 0x52f   : > { %v4758_v40 = vadd.f32 %v4450_v20, %v3175_v44  ;;  %v6032_v60 = vpop.f32.mrf.mxu3  ;;  %v7582_v44 = vor.u32 %v7581_v7, %v7578_v5 }
 0x530   : > { %v2869_v41 = vpop.f32.mrf.mxu1 }
 0x531   : > { %v6340_v15 = vadd.f32 %v6032_v60, %v4758_v40  ;;  %v8100_v26 = vpop.f32.mrf.mxu0  ;;  %v3176_v17 = vadd.f32 %v2869_v41, %v23496_v50  ;;  %v7583_v3 = vsel %vm6981_vm4, %v7573_v28, %v7582_v44  ;;  %v7588_v28 = vshll.u32 %v19413_v8, 16  ;;  %v21885_v50 = vld [vmem:[%s20304_s11 + $0x218] sm:$0xff] }
 0x533   : > { %v21864_v1 = vadd.f32 %v8098_v16, %v6340_v15  ;;  %v7585_v15 = vshrl.u32 %v19413_v8, 16  ;;  %v3950_v8 = vrot.slane %v21885_v50, 1 }
 0x535   : > { %23495 = vst [vmem:[#allocation37_spill] sm:$0xff] %v21864_v1 }
 0x536   : > { %v4452_v48 = vpop.f32.mrf.mxu2 }
 0x537   : > { %v4759_v20 = vadd.f32 %v4452_v48, %v3176_v17  ;;  %v6034_v40 = vpop.f32.mrf.mxu3 }
 0x538   : > { %v2872_v60 = vpop.f32.mrf.mxu1 }
 0x539   : > { %v6341_v16 = vadd.f32 %v6034_v40, %v4759_v20  ;;  %v8103_v43 = vpop.f32.mrf.mxu0  ;;  %v3177_v47 = vadd.f32 %v2872_v60, %v23498_v19  ;;  %v21888_v20 = vld [vmem:[%s20304_s11 + $0x228] sm:$0xff]  ;;  %v7587_v40 = vrot.slane %v7585_v15, 1  ;;  %v23500_v19 = vld [vmem:[#allocation46_spill] sm:$0xff] }
 0x53b   : > { %16688 = vmatmul.msk.bf16.gmra.mxu1 %vm647_vm1, %v2354_v4  ;;  %17028 = vmatmul.msk.bf16.gmra.mxu2 %vm647_vm1, %v3949_v18  ;;  %v21875_v41 = vadd.f32 %v8100_v26, %v6341_v16  ;;  %v2359_v26 = vshll.u32 %v21880_v25, 16  ;;  %v7590_v18 = vrot.slane %v7588_v28, 2  ;;  %v6636_v16 = vld [vmem:[%s20304_s11 + $0x230] sm:$0x3] }
 0x53c   : > { %17368 = vmatmul.msk.bf16.gmra.mxu3 %vm647_vm1, %v5531_v9  ;;  %17708 = vmatmul.msk.bf16.gmra.mxu0 %vm647_vm1, %v7583_v3  ;;  %v2357_v9 = vor.u32 %v2355_v49, %v2353_v31  ;;  %v3951_v31 = vsel %vm3816_vm3, %v3948_v6, %v3950_v8 }
 0x53d   : > { %23497 = vst [vmem:[#allocation40_spill] sm:$0xff] %v21875_v41  ;;  %v2361_v3 = vrot.slane %v2359_v26, 1 }
 0x53e   : > { %v4455_v12 = vpop.f32.mrf.mxu2 }
 0x53f   : > { %v4760_v5 = vadd.f32 %v4455_v12, %v3177_v47  ;;  %v6037_v7 = vpop.f32.mrf.mxu3  ;;  %v5532_v47 = vrot.slane %v21888_v20, 1  ;;  %v7591_v12 = vor.u32 %v7590_v18, %v7587_v40  ;;  %v3471_v20 = vld [vmem:[%s20304_s11 + $0x220] sm:$0x1]  ;;  %v5054_v18 = vld [vmem:[%s20304_s11 + $0x230] sm:$0x1] }
 0x540   : > { %v2874_v4 = vpop.f32.mrf.mxu1  ;;  %v3746_v6 = vunpack.c.l.b16 %v3471_v20 }
 0x541   : > { %v6342_v17 = vadd.f32 %v6037_v7, %v4760_v5  ;;  %v8105_v48 = vpop.f32.mrf.mxu0  ;;  %v3178_v30 = vadd.f32 %v2874_v4, %v23500_v19  ;;  %v1477_v5 = vld [vmem:[%s20304_s11 + $0x220] sm:$0x1]  ;;  %v6911_v7 = vunpack.c.l.b16 %v6636_v16  ;;  %v5533_v4 = vsel %vm3816_vm3, %v5530_v62, %v5532_v47 }
 0x542   : > { %v1752_v49 = vunpack.c.l.b16 %v1477_v5  ;;  %v5329_v62 = vunpack.c.l.b16 %v5054_v18 }
 0x543   : > { %v21891_v60 = vadd.f32 %v8103_v43, %v6342_v17  ;;  %v2362_v43 = vsel %vm1822_vm2, %v2357_v9, %v2361_v3  ;;  %v7592_v17 = vsel %vm6981_vm4, %v7582_v44, %v7591_v12  ;;  %v6980_v40 = vpack.c.b16 %v6911_v7, %v6911_v7 }
 0x544   : > { %v5398_v20 = vpack.c.b16 %v5329_v62, %v5329_v62 }
 0x545   : > { %23499 = vst [vmem:[#allocation43_spill] sm:$0xff] %v21891_v60  ;;  %v7594_v19 = vshrl.u32 %v6980_v40, 16  ;;  %v7597_v44 = vshll.u32 %v6980_v40, 16 }
 0x546   : > { %v4457_v41 = vpop.f32.mrf.mxu2 }
 0x547   : > { %v4761_v1 = vadd.f32 %v4457_v41, %v3178_v30  ;;  %v6039_v15 = vpop.f32.mrf.mxu3  ;;  %v1821_v41 = vpack.c.b16 %v1752_v49, %v1752_v49 }
 0x548   : > { %v2877_v28 = vpop.f32.mrf.mxu1 }
 0x549   : > { %v6343_v26 = vadd.f32 %v6039_v15, %v4761_v1  ;;  %v8108_v50 = vpop.f32.mrf.mxu0  ;;  %v23502_v1 = vld [vmem:[#allocation49_spill] sm:$0xff] }
 0x54a   : > { %v3179_v9 = vadd.f32 %v2877_v28, %v23502_v1  ;;  %v23503_v1 = vld [vmem:[#allocation52_spill] sm:$0xff] }
 0x54b   : > { %16689 = vmatmul.msk.bf16.gmra.mxu1 %vm647_vm1, %v2362_v43  ;;  %17029 = vmatmul.msk.bf16.gmra.mxu2 %vm647_vm1, %v3951_v31  ;;  %v21907_v16 = vadd.f32 %v8105_v48, %v6343_v26  ;;  %v2363_v43 = vshrl.u32 %v21880_v25, 16  ;;  %v2367_v31 = vshll.u32 %v1821_v41, 16  ;;  %v7596_v48 = vrot.slane %v7594_v19, 1  ;;  %v19550_v25 = vld [vmem:[%s20304_s11 + $0x20] sm:$0xf0] }
 0x54c   : > { %17369 = vmatmul.msk.bf16.gmra.mxu3 %vm647_vm1, %v5533_v4  ;;  %17709 = vmatmul.msk.bf16.gmra.mxu0 %vm647_vm1, %v7592_v17  ;;  %v3815_v4 = vpack.c.b16 %v3746_v6, %v3746_v6  ;;  %v7599_v26 = vrot.slane %v7597_v44, 2 }
 0x54d   : > { %23501 = vst [vmem:[#allocation46_spill] sm:$0xff] %v21907_v16  ;;  %v2365_v28 = vor.u32 %v2363_v43, %v2361_v3  ;;  %v2369_v18 = vrot.slane %v2367_v31, 1  ;;  %v18394_v3 = vor.u32 %v19550_v25, %v18393_v46  ;;  %v19551_v43 = vld [vmem:[%s20304_s11 + $0x28] sm:$0xff]  ;;  %v17713_v46 = vld [vmem:[%s20304_s11 + $0x10] sm:$0xc] }
 0x54e   : > { %v4460_v30 = vpop.f32.mrf.mxu2  ;;  %v3952_v40 = vrot.slane %v3815_v4, 1  ;;  %v7600_v60 = vor.u32 %v7599_v26, %v7596_v48  ;;  %v18053_v4 = vld [vmem:[%s20304_s11 + $0x20] sm:$0xc]  ;;  %v12225_v48 = vshll.u32 %v19551_v43, 16  ;;  %v21938_v25 = vld [vmem:[%s20304_s11 + $0x28] sm:$0xff] }
 0x54f   : > { %v4762_v5 = vadd.f32 %v4460_v30, %v3179_v9  ;;  %v6042_v7 = vpop.f32.mrf.mxu3  ;;  %v5534_v30 = vrot.slane %v5398_v20, 1  ;;  %v2370_v19 = vsel %vm1822_vm2, %v2365_v28, %v2369_v18  ;;  %v12217_v31 = vshll.u32 %v18394_v3, 16  ;;  %v19618_v28 = vld [vmem:[%s20304_s11 + $0x20] sm:$0xf0] }
 0x550   : > { %v2879_v15 = vpop.f32.mrf.mxu1  ;;  %v12222_v20 = vshrl.u32 %v19551_v43, 16 }
 0x551   : > { %v6344_v17 = vadd.f32 %v6042_v7, %v4762_v5  ;;  %v8110_v49 = vpop.f32.mrf.mxu0  ;;  %v3180_v9 = vadd.f32 %v2879_v15, %v23503_v1  ;;  %v5535_v7 = vsel %vm3816_vm3, %v5532_v47, %v5534_v30  ;;  %v7601_v15 = vsel %vm6981_vm4, %v7591_v12, %v7600_v60  ;;  %v23505_v60 = vld [vmem:[#allocation55_spill] sm:$0xff]  ;;  %v21935_v30 = vld [vmem:[%s20304_s11 + $0x18] sm:$0xff] }
 0x552   : > { %v12214_v47 = vshrl.u32 %v18394_v3, 16  ;;  %v12224_v3 = vrot.slane %v12222_v20, 2 }
 0x553   : > { %v21911_v16 = vadd.f32 %v8108_v50, %v6344_v17  ;;  %v3953_v50 = vsel %vm3816_vm3, %v3950_v8, %v3952_v40  ;;  %v19414_v8 = vld [vmem:[%s20304_s11 + $0x10] sm:$0xf0]  ;;  %v19482_v17 = vld [vmem:[%s20304_s11 + $0x20] sm:$0xf0] }
 0x554   : > { %v17714_v1 = vor.u32 %v19414_v8, %v17713_v46  ;;  %v9049_v46 = vrot.slane %v21935_v30, 2 }
 0x556   : > { %v4462_v21 = vpop.f32.mrf.mxu2  ;;  %v9048_v43 = vrot.slane %v17714_v1, 2 }
 0x557   : > { %v4763_v41 = vadd.f32 %v4462_v21, %v3180_v9  ;;  %v6044_v6 = vpop.f32.mrf.mxu3 }
 0x558   : > { %v2882_v62 = vpop.f32.mrf.mxu1 }
 0x559   : > { %v6345_v44 = vadd.f32 %v6044_v6, %v4763_v41  ;;  %v8113_v5 = vpop.f32.mrf.mxu0  ;;  %v3181_v12 = vadd.f32 %v2882_v62, %v23505_v60  ;;  %v18054_v41 = vor.u32 %v19482_v17, %v18053_v4  ;;  %v12216_v6 = vrot.slane %v12214_v47, 2 }
 0x55b   : > { %16690 = vmatmul.msk.bf16.gmra.mxu1 %vm647_vm1, %v2370_v19  ;;  %17030 = vmatmul.msk.bf16.gmra.mxu2 %vm647_vm1, %v3953_v50  ;;  %v21923_v21 = vadd.f32 %v8110_v49, %v6345_v44  ;;  %v18733_v49 = vld [vmem:[%s20304_s11 + $0x20] sm:$0x8]  ;;  %v12219_v19 = vrot.slane %v12217_v31, 3  ;;  %v12227_v44 = vrot.slane %v12225_v48, 3  ;;  %v10630_v8 = vrot.slane %v18054_v41, 2  ;;  %v23507_v41 = vld [vmem:[#allocation61_spill] sm:$0xff] }
 0x55c   : > { %17370 = vmatmul.msk.bf16.gmra.mxu3 %vm647_vm1, %v5535_v7  ;;  %17710 = vmatmul.msk.bf16.gmra.mxu0 %vm647_vm1, %v7601_v15  ;;  %v19619_v7 = vld [vmem:[%s20304_s11 + $0x28] sm:$0xff]  ;;  %v18734_v15 = vor.u32 %v19618_v28, %v18733_v49 }
 0x55d   : > { %23504 = vst [vmem:[#allocation49_spill] sm:$0xff] %v21923_v21  ;;  %v23506_v21 = vld [vmem:[#allocation58_spill] sm:$0xff]  ;;  %v12228_v47 = vor.u32 %v12227_v44, %v12224_v3  ;;  %v14280_v17 = vrot.slane %v19619_v7, 3 }
 0x55e   : > { %v4465_v26 = vpop.f32.mrf.mxu2  ;;  %v14279_v31 = vrot.slane %v18734_v15, 3 }
 0x55f   : > { %v4764_v18 = vadd.f32 %v4465_v26, %v3181_v12  ;;  %v6047_v40 = vpop.f32.mrf.mxu3  ;;  %v10631_v12 = vrot.slane %v21938_v25, 2  ;;  %v12220_v26 = vor.u32 %v12219_v19, %v12216_v6 }
 0x560   : > { %v2884_v9 = vpop.f32.mrf.mxu1 }
 0x561   : > { %v6346_v62 = vadd.f32 %v6047_v40, %v4764_v18  ;;  %v8115_v50 = vpop.f32.mrf.mxu0  ;;  %v3182_v4 = vadd.f32 %v2884_v9, %v23506_v21  ;;  %v10632_v18 = vsel %vm9047_vm5, %v10630_v8, %v10631_v12  ;;  %v12229_v30 = vsel %vm12212_vm6, %v12220_v26, %v12228_v47  ;;  %v19552_v9 = vld [vmem:[%s20304_s11 + $0x30] sm:$0xff] }
 0x562   : > { %v14281_v21 = vsel %vm14278_vm7, %v14279_v31, %v14280_v17  ;;  %v12231_v19 = vshrl.u32 %v19552_v9, 16  ;;  %v19484_v8 = vld [vmem:[%s20304_s11 + $0x30] sm:$0xff] }
 0x563   : > { %v21941_v60 = vadd.f32 %v8113_v5, %v6346_v62  ;;  %v9050_v5 = vsel %vm9047_vm5, %v9048_v43, %v9049_v46  ;;  %v12234_v62 = vshll.u32 %v19552_v9, 16  ;;  %v19416_v43 = vld [vmem:[%s20304_s11 + $0x20] sm:$0xff] }
 0x564   : > { %v12233_v31 = vrot.slane %v12231_v19, 2 }
 0x566   : > { %v4467_v20 = vpop.f32.mrf.mxu2 }
 0x567   : > { %v4765_v48 = vadd.f32 %v4467_v20, %v3182_v4  ;;  %v6049_v49 = vpop.f32.mrf.mxu3  ;;  %v19620_v20 = vld [vmem:[%s20304_s11 + $0x30] sm:$0xff] }
 0x568   : > { %v2887_v28 = vpop.f32.mrf.mxu1 }
 0x569   : > { %v6347_v40 = vadd.f32 %v6049_v49, %v4765_v48  ;;  %v8118_v1 = vpop.f32.mrf.mxu0  ;;  %v3183_v6 = vadd.f32 %v2887_v28, %v23507_v41  ;;  %v9051_v49 = vrot.slane %v19416_v43, 2  ;;  %v19553_v43 = vld [vmem:[%s20304_s11 + $0x38] sm:$0xff] }
 0x56b   : > { %17983 = vmatmul.msk.bf16.vlgmr.msra.gmra.mxu1 %vm647_vm1, %v9050_v5  ;;  %18323 = vmatmul.msk.bf16.vlgmr.msra.gmra.mxu2 %vm647_vm1, %v10632_v18  ;;  %v21953_v25 = vadd.f32 %v8115_v50, %v6347_v40  ;;  %v12236_v50 = vrot.slane %v12234_v62, 3  ;;  %v10633_v5 = vrot.slane %v19484_v8, 2  ;;  %v23509_v18 = vld [vmem:[#allocation64_spill] sm:$0xff]  ;;  %v12240_v8 = vshrl.u32 %v19553_v43, 16 }
 0x56c   : > { %18663 = vmatmul.msk.bf16.vlgmr.msra.gmra.mxu3 %vm647_vm1, %v12229_v30  ;;  %19003 = vmatmul.msk.bf16.vlgmr.msra.gmra.mxu0 %vm647_vm1, %v14281_v21  ;;  %v14282_v30 = vrot.slane %v19620_v20, 3  ;;  %v19417_v20 = vld [vmem:[%s20304_s11 + $0x28] sm:$0xff] }
 0x56d   : > { %v12237_v40 = vor.u32 %v12236_v50, %v12233_v31 }
 0x56e   : > { %v4470_v3 = vpop.f32.mrf.mxu2 }
 0x56f   : > { %v4766_v44 = vadd.f32 %v4470_v3, %v3183_v6  ;;  %v6052_v7 = vpop.f32.mrf.mxu3  ;;  %v9052_v3 = vsel %vm9047_vm5, %v9049_v46, %v9051_v49  ;;  %v23511_v46 = vld [vmem:[#allocation67_spill] sm:$0xff] }
 0x570   : > { %v2889_v15 = vpop.f32.mrf.mxu1 }
 0x571   : > { %v6348_v26 = vadd.f32 %v6052_v7, %v4766_v44  ;;  %v8120_v4 = vpop.f32.mrf.mxu0  ;;  %v3184_v28 = vadd.f32 %v2889_v15, %v23509_v18  ;;  %v10634_v44 = vsel %vm9047_vm5, %v10631_v12, %v10633_v5  ;;  %v14283_v7 = vsel %vm14278_vm7, %v14280_v17, %v14282_v30  ;;  %v19485_v18 = vld [vmem:[%s20304_s11 + $0x38] sm:$0xff] }
 0x573   : > { %v21961_v48 = vadd.f32 %v8118_v1, %v6348_v26  ;;  %v12238_v1 = vsel %vm12212_vm6, %v12228_v47, %v12237_v40  ;;  %v12243_v26 = vshll.u32 %v19553_v43, 16 }
 0x575   : > { %23508 = vst [vmem:[#allocation52_spill] sm:$0xff] %v21961_v48 }
 0x576   : > { %v4472_v21 = vpop.f32.mrf.mxu2 }
 0x577   : > { %v4767_v9 = vadd.f32 %v4472_v21, %v3184_v28  ;;  %v6054_v41 = vpop.f32.mrf.mxu3 }
 0x578   : > { %v2892_v6 = vpop.f32.mrf.mxu1 }
 0x579   : > { %v6349_v19 = vadd.f32 %v6054_v41, %v4767_v9  ;;  %v8123_v62 = vpop.f32.mrf.mxu0  ;;  %v3185_v12 = vadd.f32 %v2892_v6, %v23511_v46  ;;  %v12242_v9 = vrot.slane %v12240_v8, 2  ;;  %v19621_v41 = vld [vmem:[%s20304_s11 + $0x38] sm:$0xff] }
 0x57a   : > { %v14284_v43 = vrot.slane %v19621_v41, 3  ;;  %v19418_v41 = vld [vmem:[%s20304_s11 + $0x30] sm:$0xff] }
 0x57b   : > { %17984 = vmatmul.msk.bf16.gmra.mxu1 %vm647_vm1, %v9052_v3  ;;  %18324 = vmatmul.msk.bf16.gmra.mxu2 %vm647_vm1, %v10634_v44  ;;  %v21971_v15 = vadd.f32 %v8120_v4, %v6349_v19  ;;  %v12245_v4 = vrot.slane %v12243_v26, 3  ;;  %v9053_v44 = vrot.slane %v19417_v20, 2  ;;  %v10635_v19 = vrot.slane %v19485_v18, 2  ;;  %v19554_v20 = vld [vmem:[%s20304_s11 + $0x40] sm:$0xff] }
 0x57c   : > { %18664 = vmatmul.msk.bf16.gmra.mxu3 %vm647_vm1, %v12238_v1  ;;  %19004 = vmatmul.msk.bf16.gmra.mxu0 %vm647_vm1, %v14283_v7  ;;  %v23513_v1 = vld [vmem:[#allocation70_spill] sm:$0xff]  ;;  %v12249_v18 = vshrl.u32 %v19554_v20, 16 }
 0x57d   : > { %23510 = vst [vmem:[#allocation55_spill] sm:$0xff] %v21971_v15  ;;  %v12246_v7 = vor.u32 %v12245_v4, %v12242_v9  ;;  %v9054_v48 = vsel %vm9047_vm5, %v9051_v49, %v9053_v44  ;;  %v23515_v49 = vld [vmem:[#allocation73_spill] sm:$0xff] }
 0x57e   : > { %v4475_v47 = vpop.f32.mrf.mxu2 }
 0x57f   : > { %v4768_v31 = vadd.f32 %v4475_v47, %v3185_v12  ;;  %v6057_v50 = vpop.f32.mrf.mxu3 }
 0x580   : > { %v2894_v17 = vpop.f32.mrf.mxu1 }
 0x581   : > { %v6350_v28 = vadd.f32 %v6057_v50, %v4768_v31  ;;  %v8125_v21 = vpop.f32.mrf.mxu0  ;;  %v3186_v6 = vadd.f32 %v2894_v17, %v23513_v1  ;;  %v10636_v31 = vsel %vm9047_vm5, %v10633_v5, %v10635_v19  ;;  %v14285_v50 = vsel %vm14278_vm7, %v14282_v30, %v14284_v43  ;;  %v19486_v1 = vld [vmem:[%s20304_s11 + $0x40] sm:$0xff] }
 0x583   : > { %v21979_v3 = vadd.f32 %v8123_v62, %v6350_v28  ;;  %v12247_v62 = vsel %vm12212_vm6, %v12237_v40, %v12246_v7  ;;  %v12252_v28 = vshll.u32 %v19554_v20, 16 }
 0x585   : > { %23512 = vst [vmem:[#allocation58_spill] sm:$0xff] %v21979_v3 }
 0x586   : > { %v4477_v46 = vpop.f32.mrf.mxu2 }
 0x587   : > { %v4769_v12 = vadd.f32 %v4477_v46, %v3186_v6  ;;  %v6059_v47 = vpop.f32.mrf.mxu3  ;;  %v12251_v46 = vrot.slane %v12249_v18, 2 }
 0x588   : > { %v2897_v15 = vpop.f32.mrf.mxu1 }
 0x589   : > { %v6351_v8 = vadd.f32 %v6059_v47, %v4769_v12  ;;  %v8128_v26 = vpop.f32.mrf.mxu0  ;;  %v3187_v5 = vadd.f32 %v2897_v15, %v23515_v49  ;;  %v19622_v12 = vld [vmem:[%s20304_s11 + $0x40] sm:$0xff] }
 0x58a   : > { %v14286_v20 = vrot.slane %v19622_v12, 3  ;;  %v19419_v12 = vld [vmem:[%s20304_s11 + $0x38] sm:$0xff] }
 0x58b   : > { %17985 = vmatmul.msk.bf16.gmra.mxu1 %vm647_vm1, %v9054_v48  ;;  %18325 = vmatmul.msk.bf16.gmra.mxu2 %vm647_vm1, %v10636_v31  ;;  %v21989_v17 = vadd.f32 %v8125_v21, %v6351_v8  ;;  %v12254_v21 = vrot.slane %v12252_v28, 3  ;;  %v9055_v31 = vrot.slane %v19418_v41, 2  ;;  %v10637_v8 = vrot.slane %v19486_v1, 2  ;;  %v19555_v41 = vld [vmem:[%s20304_s11 + $0x48] sm:$0xff] }
 0x58c   : > { %18665 = vmatmul.msk.bf16.gmra.mxu3 %vm647_vm1, %v12247_v62  ;;  %19005 = vmatmul.msk.bf16.gmra.mxu0 %vm647_vm1, %v14285_v50  ;;  %v23517_v62 = vld [vmem:[#allocation76_spill] sm:$0xff]  ;;  %v12258_v1 = vshrl.u32 %v19555_v41, 16 }
 0x58d   : > { %23514 = vst [vmem:[#allocation61_spill] sm:$0xff] %v21989_v17  ;;  %v12255_v50 = vor.u32 %v12254_v21, %v12251_v46  ;;  %v9056_v3 = vsel %vm9047_vm5, %v9053_v44, %v9055_v31  ;;  %v23519_v44 = vld [vmem:[#allocation79_spill] sm:$0xff] }
 0x58e   : > { %v4480_v40 = vpop.f32.mrf.mxu2 }
 0x58f   : > { %v4770_v9 = vadd.f32 %v4480_v40, %v3187_v5  ;;  %v6062_v4 = vpop.f32.mrf.mxu3 }
 0x590   : > { %v2899_v30 = vpop.f32.mrf.mxu1 }
 0x591   : > { %v6352_v48 = vadd.f32 %v6062_v4, %v4770_v9  ;;  %v8130_v6 = vpop.f32.mrf.mxu0  ;;  %v3188_v15 = vadd.f32 %v2899_v30, %v23517_v62  ;;  %v10638_v9 = vsel %vm9047_vm5, %v10635_v19, %v10637_v8  ;;  %v14287_v4 = vsel %vm14278_vm7, %v14284_v43, %v14286_v20  ;;  %v19487_v62 = vld [vmem:[%s20304_s11 + $0x48] sm:$0xff] }
 0x593   : > { %v21997_v47 = vadd.f32 %v8128_v26, %v6352_v48  ;;  %v12256_v26 = vsel %vm12212_vm6, %v12246_v7, %v12255_v50  ;;  %v12261_v48 = vshll.u32 %v19555_v41, 16 }
 0x595   : > { %23516 = vst [vmem:[#allocation64_spill] sm:$0xff] %v21997_v47 }
 0x596   : > { %v4482_v49 = vpop.f32.mrf.mxu2 }
 0x597   : > { %v4771_v5 = vadd.f32 %v4482_v49, %v3188_v15  ;;  %v6064_v40 = vpop.f32.mrf.mxu3  ;;  %v12260_v49 = vrot.slane %v12258_v1, 2 }
 0x598   : > { %v2902_v17 = vpop.f32.mrf.mxu1 }
 0x599   : > { %v6353_v18 = vadd.f32 %v6064_v40, %v4771_v5  ;;  %v8133_v28 = vpop.f32.mrf.mxu0  ;;  %v3189_v19 = vadd.f32 %v2902_v17, %v23519_v44  ;;  %v19623_v5 = vld [vmem:[%s20304_s11 + $0x48] sm:$0xff] }
 0x59a   : > { %v14288_v41 = vrot.slane %v19623_v5, 3  ;;  %v19420_v5 = vld [vmem:[%s20304_s11 + $0x40] sm:$0xff] }
 0x59b   : > { %17986 = vmatmul.msk.bf16.gmra.mxu1 %vm647_vm1, %v9056_v3  ;;  %18326 = vmatmul.msk.bf16.gmra.mxu2 %vm647_vm1, %v10638_v9  ;;  %v22007_v30 = vadd.f32 %v8130_v6, %v6353_v18  ;;  %v12263_v6 = vrot.slane %v12261_v48, 3  ;;  %v9057_v9 = vrot.slane %v19419_v12, 2  ;;  %v10639_v18 = vrot.slane %v19487_v62, 2  ;;  %v19556_v12 = vld [vmem:[%s20304_s11 + $0x50] sm:$0xff] }
 0x59c   : > { %18666 = vmatmul.msk.bf16.gmra.mxu3 %vm647_vm1, %v12256_v26  ;;  %19006 = vmatmul.msk.bf16.gmra.mxu0 %vm647_vm1, %v14287_v4  ;;  %v23521_v26 = vld [vmem:[#allocation82_spill] sm:$0xff]  ;;  %v12267_v62 = vshrl.u32 %v19556_v12, 16 }
 0x59d   : > { %23518 = vst [vmem:[#allocation67_spill] sm:$0xff] %v22007_v30  ;;  %v12264_v4 = vor.u32 %v12263_v6, %v12260_v49  ;;  %v9058_v47 = vsel %vm9047_vm5, %v9055_v31, %v9057_v9  ;;  %v23523_v31 = vld [vmem:[#allocation85_spill] sm:$0xff] }
 0x59e   : > { %v4485_v7 = vpop.f32.mrf.mxu2 }
 0x59f   : > { %v4772_v46 = vadd.f32 %v4485_v7, %v3189_v19  ;;  %v6067_v21 = vpop.f32.mrf.mxu3 }
 0x5a0   : > { %v2904_v43 = vpop.f32.mrf.mxu1 }
 0x5a1   : > { %v6354_v3 = vadd.f32 %v6067_v21, %v4772_v46  ;;  %v8135_v15 = vpop.f32.mrf.mxu0  ;;  %v3190_v17 = vadd.f32 %v2904_v43, %v23521_v26  ;;  %v10640_v46 = vsel %vm9047_vm5, %v10637_v8, %v10639_v18  ;;  %v14289_v21 = vsel %vm14278_vm7, %v14286_v20, %v14288_v41  ;;  %v19488_v26 = vld [vmem:[%s20304_s11 + $0x50] sm:$0xff] }
 0x5a3   : > { %v22015_v40 = vadd.f32 %v8133_v28, %v6354_v3  ;;  %v12265_v28 = vsel %vm12212_vm6, %v12255_v50, %v12264_v4  ;;  %v12270_v3 = vshll.u32 %v19556_v12, 16 }
 0x5a5   : > { %23520 = vst [vmem:[#allocation70_spill] sm:$0xff] %v22015_v40 }
 0x5a6   : > { %v4487_v44 = vpop.f32.mrf.mxu2 }
 0x5a7   : > { %v4773_v19 = vadd.f32 %v4487_v44, %v3190_v17  ;;  %v6069_v7 = vpop.f32.mrf.mxu3  ;;  %v12269_v44 = vrot.slane %v12267_v62, 2 }
 0x5a8   : > { %v2907_v30 = vpop.f32.mrf.mxu1 }
 0x5a9   : > { %v6355_v1 = vadd.f32 %v6069_v7, %v4773_v19  ;;  %v8138_v48 = vpop.f32.mrf.mxu0  ;;  %v3191_v8 = vadd.f32 %v2907_v30, %v23523_v31  ;;  %v19624_v19 = vld [vmem:[%s20304_s11 + $0x50] sm:$0xff] }
 0x5aa   : > { %v14290_v12 = vrot.slane %v19624_v19, 3  ;;  %v19421_v19 = vld [vmem:[%s20304_s11 + $0x48] sm:$0xff] }
 0x5ab   : > { %17987 = vmatmul.msk.bf16.gmra.mxu1 %vm647_vm1, %v9058_v47  ;;  %18327 = vmatmul.msk.bf16.gmra.mxu2 %vm647_vm1, %v10640_v46  ;;  %v22025_v43 = vadd.f32 %v8135_v15, %v6355_v1  ;;  %v12272_v15 = vrot.slane %v12270_v3, 3  ;;  %v9059_v46 = vrot.slane %v19420_v5, 2  ;;  %v10641_v1 = vrot.slane %v19488_v26, 2  ;;  %v19557_v5 = vld [vmem:[%s20304_s11 + $0x58] sm:$0xff] }
 0x5ac   : > { %18667 = vmatmul.msk.bf16.gmra.mxu3 %vm647_vm1, %v12265_v28  ;;  %19007 = vmatmul.msk.bf16.gmra.mxu0 %vm647_vm1, %v14289_v21  ;;  %v23525_v28 = vld [vmem:[#allocation88_spill] sm:$0xff]  ;;  %v12276_v26 = vshrl.u32 %v19557_v5, 16 }
 0x5ad   : > { %23522 = vst [vmem:[#allocation73_spill] sm:$0xff] %v22025_v43  ;;  %v12273_v21 = vor.u32 %v12272_v15, %v12269_v44  ;;  %v9060_v40 = vsel %vm9047_vm5, %v9057_v9, %v9059_v46  ;;  %v23527_v9 = vld [vmem:[#allocation91_spill] sm:$0xff] }
 0x5ae   : > { %v4490_v50 = vpop.f32.mrf.mxu2 }
 0x5af   : > { %v4774_v49 = vadd.f32 %v4490_v50, %v3191_v8  ;;  %v6072_v6 = vpop.f32.mrf.mxu3 }
 0x5b0   : > { %v2909_v20 = vpop.f32.mrf.mxu1 }
 0x5b1   : > { %v6356_v47 = vadd.f32 %v6072_v6, %v4774_v49  ;;  %v8140_v17 = vpop.f32.mrf.mxu0  ;;  %v3192_v30 = vadd.f32 %v2909_v20, %v23525_v28  ;;  %v10642_v49 = vsel %vm9047_vm5, %v10639_v18, %v10641_v1  ;;  %v14291_v6 = vsel %vm14278_vm7, %v14288_v41, %v14290_v12  ;;  %v19489_v28 = vld [vmem:[%s20304_s11 + $0x58] sm:$0xff] }
 0x5b3   : > { %v22033_v7 = vadd.f32 %v8138_v48, %v6356_v47  ;;  %v12274_v48 = vsel %vm12212_vm6, %v12264_v4, %v12273_v21  ;;  %v12279_v47 = vshll.u32 %v19557_v5, 16 }
 0x5b5   : > { %23524 = vst [vmem:[#allocation76_spill] sm:$0xff] %v22033_v7 }
 0x5b6   : > { %v4492_v31 = vpop.f32.mrf.mxu2 }
 0x5b7   : > { %v4775_v8 = vadd.f32 %v4492_v31, %v3192_v30  ;;  %v6074_v50 = vpop.f32.mrf.mxu3  ;;  %v12278_v31 = vrot.slane %v12276_v26, 2 }
 0x5b8   : > { %v2912_v43 = vpop.f32.mrf.mxu1 }
 0x5b9   : > { %v6357_v62 = vadd.f32 %v6074_v50, %v4775_v8  ;;  %v8143_v3 = vpop.f32.mrf.mxu0  ;;  %v3193_v18 = vadd.f32 %v2912_v43, %v23527_v9  ;;  %v19625_v8 = vld [vmem:[%s20304_s11 + $0x58] sm:$0xff] }
 0x5ba   : > { %v14292_v5 = vrot.slane %v19625_v8, 3  ;;  %v19422_v8 = vld [vmem:[%s20304_s11 + $0x50] sm:$0xff] }
 0x5bb   : > { %17988 = vmatmul.msk.bf16.gmra.mxu1 %vm647_vm1, %v9060_v40  ;;  %18328 = vmatmul.msk.bf16.gmra.mxu2 %vm647_vm1, %v10642_v49  ;;  %v22043_v20 = vadd.f32 %v8140_v17, %v6357_v62  ;;  %v12281_v17 = vrot.slane %v12279_v47, 3  ;;  %v9061_v49 = vrot.slane %v19421_v19, 2  ;;  %v10643_v62 = vrot.slane %v19489_v28, 2  ;;  %v19558_v19 = vld [vmem:[%s20304_s11 + $0x60] sm:$0xff] }
 0x5bc   : > { %18668 = vmatmul.msk.bf16.gmra.mxu3 %vm647_vm1, %v12274_v48  ;;  %19008 = vmatmul.msk.bf16.gmra.mxu0 %vm647_vm1, %v14291_v6  ;;  %v23529_v48 = vld [vmem:[#allocation94_spill] sm:$0xff]  ;;  %v12285_v28 = vshrl.u32 %v19558_v19, 16 }
 0x5bd   : > { %23526 = vst [vmem:[#allocation79_spill] sm:$0xff] %v22043_v20  ;;  %v12282_v6 = vor.u32 %v12281_v17, %v12278_v31  ;;  %v9062_v7 = vsel %vm9047_vm5, %v9059_v46, %v9061_v49  ;;  %v23531_v46 = vld [vmem:[#allocation97_spill] sm:$0xff] }
 0x5be   : > { %v4495_v4 = vpop.f32.mrf.mxu2 }
 0x5bf   : > { %v4776_v44 = vadd.f32 %v4495_v4, %v3193_v18  ;;  %v6077_v15 = vpop.f32.mrf.mxu3 }
 0x5c0   : > { %v2914_v41 = vpop.f32.mrf.mxu1 }
 0x5c1   : > { %v6358_v40 = vadd.f32 %v6077_v15, %v4776_v44  ;;  %v8145_v30 = vpop.f32.mrf.mxu0  ;;  %v3194_v43 = vadd.f32 %v2914_v41, %v23529_v48  ;;  %v10644_v44 = vsel %vm9047_vm5, %v10641_v1, %v10643_v62  ;;  %v14293_v15 = vsel %vm14278_vm7, %v14290_v12, %v14292_v5  ;;  %v19490_v48 = vld [vmem:[%s20304_s11 + $0x60] sm:$0xff] }
 0x5c3   : > { %v22051_v50 = vadd.f32 %v8143_v3, %v6358_v40  ;;  %v12283_v3 = vsel %vm12212_vm6, %v12273_v21, %v12282_v6  ;;  %v12288_v40 = vshll.u32 %v19558_v19, 16 }
 0x5c5   : > { %23528 = vst [vmem:[#allocation82_spill] sm:$0xff] %v22051_v50 }
 0x5c6   : > { %v4497_v9 = vpop.f32.mrf.mxu2 }
 0x5c7   : > { %v4777_v18 = vadd.f32 %v4497_v9, %v3194_v43  ;;  %v6079_v4 = vpop.f32.mrf.mxu3  ;;  %v12287_v9 = vrot.slane %v12285_v28, 2 }
 0x5c8   : > { %v2917_v20 = vpop.f32.mrf.mxu1 }
 0x5c9   : > { %v6359_v26 = vadd.f32 %v6079_v4, %v4777_v18  ;;  %v8148_v47 = vpop.f32.mrf.mxu0  ;;  %v3195_v1 = vadd.f32 %v2917_v20, %v23531_v46  ;;  %v19626_v18 = vld [vmem:[%s20304_s11 + $0x60] sm:$0xff] }
 0x5ca   : > { %v14294_v19 = vrot.slane %v19626_v18, 3  ;;  %v19423_v18 = vld [vmem:[%s20304_s11 + $0x58] sm:$0xff] }
 0x5cb   : > { %17989 = vmatmul.msk.bf16.gmra.mxu1 %vm647_vm1, %v9062_v7  ;;  %18329 = vmatmul.msk.bf16.gmra.mxu2 %vm647_vm1, %v10644_v44  ;;  %v22061_v41 = vadd.f32 %v8145_v30, %v6359_v26  ;;  %v12290_v30 = vrot.slane %v12288_v40, 3  ;;  %v9063_v44 = vrot.slane %v19422_v8, 2  ;;  %v10645_v26 = vrot.slane %v19490_v48, 2  ;;  %v19559_v8 = vld [vmem:[%s20304_s11 + $0x68] sm:$0xff] }
 0x5cc   : > { %18669 = vmatmul.msk.bf16.gmra.mxu3 %vm647_vm1, %v12283_v3  ;;  %19009 = vmatmul.msk.bf16.gmra.mxu0 %vm647_vm1, %v14293_v15  ;;  %v23533_v3 = vld [vmem:[#allocation100_spill] sm:$0xff]  ;;  %v12294_v48 = vshrl.u32 %v19559_v8, 16 }
 0x5cd   : > { %23530 = vst [vmem:[#allocation85_spill] sm:$0xff] %v22061_v41  ;;  %v12291_v15 = vor.u32 %v12290_v30, %v12287_v9  ;;  %v9064_v50 = vsel %vm9047_vm5, %v9061_v49, %v9063_v44  ;;  %v23535_v49 = vld [vmem:[#allocation103_spill] sm:$0xff] }
 0x5ce   : > { %v4500_v21 = vpop.f32.mrf.mxu2 }
 0x5cf   : > { %v4778_v31 = vadd.f32 %v4500_v21, %v3195_v1  ;;  %v6082_v17 = vpop.f32.mrf.mxu3 }
 0x5d0   : > { %v2919_v12 = vpop.f32.mrf.mxu1 }
 0x5d1   : > { %v6360_v7 = vadd.f32 %v6082_v17, %v4778_v31  ;;  %v8150_v43 = vpop.f32.mrf.mxu0  ;;  %v3196_v20 = vadd.f32 %v2919_v12, %v23533_v3  ;;  %v10646_v31 = vsel %vm9047_vm5, %v10643_v62, %v10645_v26  ;;  %v14295_v17 = vsel %vm14278_vm7, %v14292_v5, %v14294_v19  ;;  %v19491_v3 = vld [vmem:[%s20304_s11 + $0x68] sm:$0xff] }
 0x5d3   : > { %v22069_v4 = vadd.f32 %v8148_v47, %v6360_v7  ;;  %v12292_v47 = vsel %vm12212_vm6, %v12282_v6, %v12291_v15  ;;  %v12297_v7 = vshll.u32 %v19559_v8, 16 }
 0x5d5   : > { %23532 = vst [vmem:[#allocation88_spill] sm:$0xff] %v22069_v4 }
 0x5d6   : > { %v4502_v46 = vpop.f32.mrf.mxu2 }
 0x5d7   : > { %v4779_v1 = vadd.f32 %v4502_v46, %v3196_v20  ;;  %v6084_v21 = vpop.f32.mrf.mxu3  ;;  %v12296_v46 = vrot.slane %v12294_v48, 2 }
 0x5d8   : > { %v2922_v41 = vpop.f32.mrf.mxu1 }
 0x5d9   : > { %v6361_v28 = vadd.f32 %v6084_v21, %v4779_v1  ;;  %v8153_v40 = vpop.f32.mrf.mxu0  ;;  %v3197_v62 = vadd.f32 %v2922_v41, %v23535_v49  ;;  %v19627_v1 = vld [vmem:[%s20304_s11 + $0x68] sm:$0xff] }
 0x5da   : > { %v14296_v8 = vrot.slane %v19627_v1, 3 }
 0x5db   : > { %17990 = vmatmul.msk.bf16.gmra.mxu1 %vm647_vm1, %v9064_v50  ;;  %18330 = vmatmul.msk.bf16.gmra.mxu2 %vm647_vm1, %v10646_v31  ;;  %v22079_v12 = vadd.f32 %v8150_v43, %v6361_v28  ;;  %v12299_v43 = vrot.slane %v12297_v7, 3  ;;  %v9065_v31 = vrot.slane %v19423_v18, 2  ;;  %v10647_v28 = vrot.slane %v19491_v3, 2  ;;  %v19560_v18 = vld [vmem:[%s20304_s11 + $0x70] sm:$0xff] }
 0x5dc   : > { %18670 = vmatmul.msk.bf16.gmra.mxu3 %vm647_vm1, %v12292_v47  ;;  %19010 = vmatmul.msk.bf16.gmra.mxu0 %vm647_vm1, %v14295_v17  ;;  %v23536_v47 = vld [vmem:[#allocation106_spill] sm:$0xff] }
 0x5dd   : > { %23534 = vst [vmem:[#allocation91_spill] sm:$0xff] %v22079_v12  ;;  %v12300_v17 = vor.u32 %v12299_v43, %v12296_v46  ;;  %v9066_v4 = vsel %vm9047_vm5, %v9063_v44, %v9065_v31  ;;  %v12303_v44 = vshrl.u32 %v19560_v18, 16 }
 0x5de   : > { %v4505_v6 = vpop.f32.mrf.mxu2 }
 0x5df   : > { %v4780_v9 = vadd.f32 %v4505_v6, %v3197_v62  ;;  %v6087_v30 = vpop.f32.mrf.mxu3 }
 0x5e0   : > { %v2924_v5 = vpop.f32.mrf.mxu1 }
 0x5e1   : > { %v6362_v50 = vadd.f32 %v6087_v30, %v4780_v9  ;;  %v8155_v20 = vpop.f32.mrf.mxu0  ;;  %v3198_v41 = vadd.f32 %v2924_v5, %v23536_v47  ;;  %v10648_v9 = vsel %vm9047_vm5, %v10645_v26, %v10647_v28  ;;  %v14297_v30 = vsel %vm14278_vm7, %v14294_v19, %v14296_v8  ;;  %v22103_v19 = vld [vmem:[%s20304_s11 + $0x60] sm:$0xff] }
 0x5e2   : > { %v12306_v26 = vshll.u32 %v19560_v18, 16 }
 0x5e3   : > { %v22087_v21 = vadd.f32 %v8153_v40, %v6362_v50  ;;  %v12301_v40 = vsel %vm12212_vm6, %v12291_v15, %v12300_v17 }
 0x5e4   : > { %v12308_v47 = vrot.slane %v12306_v26, 3 }
 0x5e6   : > { %v4507_v49 = vpop.f32.mrf.mxu2 }
 0x5e7   : > { %v4781_v62 = vadd.f32 %v4507_v49, %v3198_v41  ;;  %v6089_v6 = vpop.f32.mrf.mxu3  ;;  %v22109_v41 = vld [vmem:[%s20304_s11 + $0x70] sm:$0xff]  ;;  %v9067_v49 = vrot.slane %v22103_v19, 2 }
 0x5e8   : > { %v9401_v12 = vpop.f32.mrf.mxu1 }
 0x5e9   : > { %v6363_v48 = vadd.f32 %v6089_v6, %v4781_v62  ;;  %v14632_v7 = vpop.f32.mrf.mxu0  ;;  %v9877_v50 = vadd.f32 %v9401_v12, %v20854_v10 }
 0x5eb   : > { %17991 = vmatmul.msk.bf16.gmra.mxu1 %vm647_vm1, %v9066_v4  ;;  %18331 = vmatmul.msk.bf16.gmra.mxu2 %vm647_vm1, %v10648_v9  ;;  %v22097_v5 = vadd.f32 %v8155_v20, %v6363_v48  ;;  %v22106_v4 = vld [vmem:[%s20304_s11 + $0x70] sm:$0xff]  ;;  %v12305_v20 = vrot.slane %v12303_v44, 2  ;;  %v14298_v9 = vrot.slane %v22109_v41, 3  ;;  %v9068_v44 = vsel %vm9047_vm5, %v9065_v31, %v9067_v49 }
 0x5ec   : > { %18671 = vmatmul.msk.bf16.gmra.mxu3 %vm647_vm1, %v12301_v40  ;;  %19011 = vmatmul.msk.bf16.gmra.mxu0 %vm647_vm1, %v14297_v30  ;;  %v10649_v62 = vrot.slane %v22106_v4, 2  ;;  %v19561_v4 = vld [vmem:[%s20304_s11 + $0x78] sm:$0xff] }
 0x5ed   : > { %23537 = vst [vmem:[#allocation94_spill] sm:$0xff] %v22097_v5  ;;  %v12309_v12 = vor.u32 %v12308_v47, %v12305_v20  ;;  %v14299_v19 = vsel %vm14278_vm7, %v14296_v8, %v14298_v9  ;;  %v12312_v8 = vshrl.u32 %v19561_v4, 16 }
 0x5ee   : > { %v10983_v3 = vpop.f32.mrf.mxu2  ;;  %v10650_v26 = vsel %vm9047_vm5, %v10647_v28, %v10649_v62 }
 0x5ef   : > { %v13049_v15 = vpop.f32.mrf.mxu3  ;;  %v11459_v43 = vadd.f32 %v10983_v3, %v9877_v50  ;;  %v22121_v50 = vld [vmem:[%s23232_s2] ss:$0 sm:$0xff] }
 0x5f0   : > { %v9403_v46 = vpop.f32.mrf.mxu1 }
 0x5f1   : > { %v14634_v1 = vpop.f32.mrf.mxu0  ;;  %v13525_v6 = vadd.f32 %v13049_v15, %v11459_v43  ;;  %v9878_v10 = vadd.f32 %v9403_v46, %v20864_v51  ;;  %v12310_v46 = vsel %vm12212_vm6, %v12300_v17, %v12309_v12 }
 0x5f3   : > { %v15108_v3 = vadd.f32 %v14632_v7, %v13525_v6  ;;  %v12315_v7 = vshll.u32 %v19561_v4, 16  ;;  %v19425_v6 = vld [vmem:[%s20304_s11 + $0x68] sm:$0xff] }
 0x5f5   : > { %v15520_v28 = vadd.f32 %v22121_v50, %v15108_v3  ;;  %v9069_v3 = vrot.slane %v19425_v6, 2 }
 0x5f6   : > { %v10985_v48 = vpop.f32.mrf.mxu2 }
 0x5f7   : > { %v11460_v40 = vadd.f32 %v10985_v48, %v9878_v10  ;;  %v13051_v30 = vpop.f32.mrf.mxu3  ;;  %v19493_v10 = vld [vmem:[%s20304_s11 + $0x78] sm:$0xff]  ;;  %v9070_v5 = vsel %vm9047_vm5, %v9067_v49, %v9069_v3 }
 0x5f8   : > { %v9406_v18 = vpop.f32.mrf.mxu1 }
 0x5f9   : > { %v13526_v51 = vadd.f32 %v13051_v30, %v11460_v40  ;;  %v14637_v15 = vpop.f32.mrf.mxu0  ;;  %v9879_v47 = vadd.f32 %v9406_v18, %v20872_v14  ;;  %v12314_v30 = vrot.slane %v12312_v8, 2 }
 0x5fb   : > { %v15109_v31 = vadd.f32 %v14634_v1, %v13526_v51  ;;  %17992 = vmatmul.msk.bf16.gmra.mxu1 %vm647_vm1, %v9068_v44  ;;  %18332 = vmatmul.msk.bf16.gmra.mxu2 %vm647_vm1, %v10650_v26  ;;  %v12317_v44 = vrot.slane %v12315_v7, 3  ;;  %v19629_v26 = vld [vmem:[%s20304_s11 + $0x78] sm:$0xff]  ;;  %v10651_v51 = vrot.slane %v19493_v10, 2 }
 0x5fc   : > { %18672 = vmatmul.msk.bf16.gmra.mxu3 %vm647_vm1, %v12310_v46  ;;  %19012 = vmatmul.msk.bf16.gmra.mxu0 %vm647_vm1, %v14299_v19  ;;  %v14300_v18 = vrot.slane %v19629_v26, 3 }
 0x5fd   : > { %v15521_v17 = vadd.f32 %v22121_v50, %v15109_v31  ;;  %v12318_v14 = vor.u32 %v12317_v44, %v12314_v30  ;;  %v19494_v30 = vld [vmem:[%s20304_s11 + $0x80] sm:$0xff] }
 0x5fe   : > { %v10988_v43 = vpop.f32.mrf.mxu2  ;;  %v14301_v6 = vsel %vm14278_vm7, %v14298_v9, %v14300_v18 }
 0x5ff   : > { %v19689_v20 = vpack.c.bf16 %v15521_v17, %v15520_v28  ;;  %v13054_v1 = vpop.f32.mrf.mxu3  ;;  %v11461_v48 = vadd.f32 %v10988_v43, %v9879_v47  ;;  %v10652_v43 = vsel %vm9047_vm5, %v10649_v62, %v10651_v51  ;;  %v12319_v47 = vsel %vm12212_vm6, %v12309_v12, %v12318_v14 }
 0x600   : > { %v9408_v41 = vpop.f32.mrf.mxu1 }
 0x601   : > { %19690 = vst [vmem:[%s22137_s6] sm:$0xff] %v19689_v20   ;;  %v14639_v40 = vpop.f32.mrf.mxu0  ;;  %v13527_v46 = vadd.f32 %v13054_v1, %v11461_v48  ;;  %v9880_v19 = vadd.f32 %v9408_v41, %v20882_v63  ;;  %v19562_v1 = vld [vmem:[%s20304_s11 + $0x80] sm:$0xff] }
 0x602   : > { %v12321_v12 = vshrl.u32 %v19562_v1, 16  ;;  %v12324_v9 = vshll.u32 %v19562_v1, 16 }
 0x603   : > { %v15110_v20 = vadd.f32 %v14637_v15, %v13527_v46 }
 0x604   : > { %v12323_v46 = vrot.slane %v12321_v12, 2 }
 0x605   : > { %v15522_v49 = vadd.f32 %v22121_v50, %v15110_v20 }
 0x606   : > { %v10990_v4 = vpop.f32.mrf.mxu2 }
 0x607   : > { %v11462_v31 = vadd.f32 %v10990_v4, %v9880_v19  ;;  %v13056_v28 = vpop.f32.mrf.mxu3  ;;  %v12326_v19 = vrot.slane %v12324_v9, 3  ;;  %v19630_v4 = vld [vmem:[%s20304_s11 + $0x80] sm:$0xff] }
 0x608   : > { %v9411_v17 = vpop.f32.mrf.mxu1 }
 0x609   : > { %v13528_v8 = vadd.f32 %v13056_v28, %v11462_v31  ;;  %v14642_v7 = vpop.f32.mrf.mxu0  ;;  %v9881_v10 = vadd.f32 %v9411_v17, %v20890_v61  ;;  %v10653_v28 = vrot.slane %v19494_v30, 2 }
 0x60b   : > { %v15111_v63 = vadd.f32 %v14639_v40, %v13528_v8  ;;  %17993 = vmatmul.msk.bf16.gmra.mxu1 %vm647_vm1, %v9070_v5  ;;  %18333 = vmatmul.msk.bf16.gmra.mxu2 %vm647_vm1, %v10652_v43  ;;  %v19426_v5 = vld [vmem:[%s20304_s11 + $0x70] sm:$0xff]  ;;  %v12327_v8 = vor.u32 %v12326_v19, %v12323_v46 }
 0x60c   : > { %18673 = vmatmul.msk.bf16.gmra.mxu3 %vm647_vm1, %v12319_v47  ;;  %19013 = vmatmul.msk.bf16.gmra.mxu0 %vm647_vm1, %v14301_v6  ;;  %v9071_v31 = vrot.slane %v19426_v5, 2  ;;  %v14302_v47 = vrot.slane %v19630_v4, 3 }
 0x60d   : > { %v15523_v62 = vadd.f32 %v22121_v50, %v15111_v63 }
 0x60e   : > { %v10993_v15 = vpop.f32.mrf.mxu2  ;;  %v9072_v63 = vsel %vm9047_vm5, %v9069_v3, %v9071_v31 }
 0x60f   : > { %v19694_v41 = vpack.c.bf16 %v15523_v62, %v15522_v49  ;;  %v13059_v48 = vpop.f32.mrf.mxu3  ;;  %v11463_v44 = vadd.f32 %v10993_v15, %v9881_v10  ;;  %v10654_v49 = vsel %vm9047_vm5, %v10651_v51, %v10653_v28  ;;  %v12328_v15 = vsel %vm12212_vm6, %v12318_v14, %v12327_v8  ;;  %v19563_v10 = vld [vmem:[%s20304_s11 + $0x88] sm:$0xff] }
 0x610   : > { %v9413_v40 = vpop.f32.mrf.mxu1  ;;  %v12330_v14 = vshrl.u32 %v19563_v10, 16 }
 0x611   : > { %20026 = vst [vmem:[%s22137_s6 + $0x8] sm:$0xff] %v19694_v41   ;;  %v14644_v26 = vpop.f32.mrf.mxu0  ;;  %v13529_v43 = vadd.f32 %v13059_v48, %v11463_v44  ;;  %v9882_v20 = vadd.f32 %v9413_v40, %v20900_v11  ;;  %v14303_v41 = vsel %vm14278_vm7, %v14300_v18, %v14302_v47  ;;  %v12333_v18 = vshll.u32 %v19563_v10, 16  ;;  %v19427_v44 = vld [vmem:[%s20304_s11 + $0x78] sm:$0xff] }
 0x612   : > { %v12332_v4 = vrot.slane %v12330_v14, 2 }
 0x613   : > { %v15112_v62 = vadd.f32 %v14642_v7, %v13529_v43  ;;  %v12335_v43 = vrot.slane %v12333_v18, 3 }
 0x615   : > { %v15524_v3 = vadd.f32 %v22121_v50, %v15112_v62 }
 0x616   : > { %v10995_v6 = vpop.f32.mrf.mxu2 }
 0x617   : > { %v11464_v61 = vadd.f32 %v10995_v6, %v9882_v20  ;;  %v13061_v17 = vpop.f32.mrf.mxu3  ;;  %v19631_v20 = vld [vmem:[%s20304_s11 + $0x88] sm:$0xff]  ;;  %v9073_v6 = vrot.slane %v19427_v44, 2  ;;  %v19428_v44 = vld [vmem:[%s20304_s11 + $0x80] sm:$0xff] }
 0x618   : > { %v9416_v1 = vpop.f32.mrf.mxu1  ;;  %v14304_v62 = vrot.slane %v19631_v20, 3  ;;  %v19632_v20 = vld [vmem:[%s20304_s11 + $0x90] sm:$0xff] }
 0x619   : > { %v13530_v12 = vadd.f32 %v13061_v17, %v11464_v61  ;;  %v14647_v9 = vpop.f32.mrf.mxu0  ;;  %v9883_v40 = vadd.f32 %v9416_v1, %v20908_v2 }
 0x61a   : > { %v14305_v18 = vsel %vm14278_vm7, %v14302_v47, %v14304_v62 }
 0x61b   : > { %v15113_v11 = vadd.f32 %v14644_v26, %v13530_v12  ;;  %17994 = vmatmul.msk.bf16.gmra.mxu1 %vm647_vm1, %v9072_v63  ;;  %18334 = vmatmul.msk.bf16.gmra.mxu2 %vm647_vm1, %v10654_v49  ;;  %v19495_v26 = vld [vmem:[%s20304_s11 + $0x88] sm:$0xff]  ;;  %v12336_v49 = vor.u32 %v12335_v43, %v12332_v4 }
 0x61c   : > { %18674 = vmatmul.msk.bf16.gmra.mxu3 %vm647_vm1, %v12328_v15  ;;  %19014 = vmatmul.msk.bf16.gmra.mxu0 %vm647_vm1, %v14303_v41  ;;  %v10655_v61 = vrot.slane %v19495_v26, 2  ;;  %v9074_v41 = vsel %vm9047_vm5, %v9071_v31, %v9073_v6  ;;  %v19496_v26 = vld [vmem:[%s20304_s11 + $0x90] sm:$0xff] }
 0x61d   : > { %v15525_v51 = vadd.f32 %v22121_v50, %v15113_v11  ;;  %v12337_v14 = vsel %vm12212_vm6, %v12327_v8, %v12336_v49 }
 0x61e   : > { %v10998_v7 = vpop.f32.mrf.mxu2  ;;  %v10656_v10 = vsel %vm9047_vm5, %v10653_v28, %v10655_v61 }
 0x61f   : > { %v19699_v48 = vpack.c.bf16 %v15525_v51, %v15524_v3  ;;  %v13064_v5 = vpop.f32.mrf.mxu3  ;;  %v11465_v46 = vadd.f32 %v10998_v7, %v9883_v40  ;;  %v19564_v7 = vld [vmem:[%s20304_s11 + $0x90] sm:$0xff] }
 0x620   : > { %v9418_v30 = vpop.f32.mrf.mxu1  ;;  %v12339_v8 = vshrl.u32 %v19564_v7, 16  ;;  %v12342_v47 = vshll.u32 %v19564_v7, 16 }
 0x621   : > { %20027 = vst [vmem:[%s22137_s6 + $0x10] sm:$0xff] %v19699_v48   ;;  %v14649_v19 = vpop.f32.mrf.mxu0  ;;  %v13531_v17 = vadd.f32 %v13064_v5, %v11465_v46  ;;  %v9884_v63 = vadd.f32 %v9418_v30, %v20918_v23 }
 0x622   : > { %v12341_v4 = vrot.slane %v12339_v8, 2  ;;  %v12344_v43 = vrot.slane %v12342_v47, 3  ;;  %v19565_v8 = vld [vmem:[%s20304_s11 + $0x98] sm:$0xff] }
 0x623   : > { %v15114_v11 = vadd.f32 %v14647_v9, %v13531_v17  ;;  %v9075_v17 = vrot.slane %v19428_v44, 2 }
 0x625   : > { %v15526_v31 = vadd.f32 %v22121_v50, %v15114_v11 }
 0x626   : > { %v11000_v12 = vpop.f32.mrf.mxu2 }
 0x627   : > { %v11466_v2 = vadd.f32 %v11000_v12, %v9884_v63  ;;  %v13066_v1 = vpop.f32.mrf.mxu3  ;;  %v10657_v63 = vrot.slane %v19496_v26, 2 }
 0x628   : > { %v9421_v15 = vpop.f32.mrf.mxu1 }
 0x629   : > { %v13532_v3 = vadd.f32 %v13066_v1, %v11466_v2  ;;  %v14652_v51 = vpop.f32.mrf.mxu0  ;;  %v9885_v40 = vadd.f32 %v9421_v15, %v20926_v54  ;;  %v12345_v1 = vor.u32 %v12344_v43, %v12341_v4  ;;  %v19633_v4 = vld [vmem:[%s20304_s11 + $0x98] sm:$0xff] }
 0x62b   : > { %v15115_v23 = vadd.f32 %v14649_v19, %v13532_v3  ;;  %17995 = vmatmul.msk.bf16.gmra.mxu1 %vm647_vm1, %v9074_v41  ;;  %18335 = vmatmul.msk.bf16.gmra.mxu2 %vm647_vm1, %v10656_v10  ;;  %v14306_v41 = vrot.slane %v19632_v20, 3  ;;  %v9076_v3 = vsel %vm9047_vm5, %v9073_v6, %v9075_v17 }
 0x62c   : > { %18675 = vmatmul.msk.bf16.gmra.mxu3 %vm647_vm1, %v12337_v14  ;;  %19015 = vmatmul.msk.bf16.gmra.mxu0 %vm647_vm1, %v14305_v18  ;;  %v10658_v14 = vsel %vm9047_vm5, %v10655_v61, %v10657_v63 }
 0x62d   : > { %v15527_v28 = vadd.f32 %v22121_v50, %v15115_v23 }
 0x62e   : > { %v11003_v9 = vpop.f32.mrf.mxu2 }
 0x62f   : > { %v19704_v48 = vpack.c.bf16 %v15527_v28, %v15526_v31  ;;  %v13069_v5 = vpop.f32.mrf.mxu3  ;;  %v11467_v46 = vadd.f32 %v11003_v9, %v9885_v40  ;;  %v12346_v31 = vsel %vm12212_vm6, %v12336_v49, %v12345_v1  ;;  %v14307_v28 = vsel %vm14278_vm7, %v14304_v62, %v14306_v41 }
 0x630   : > { %v9423_v30 = vpop.f32.mrf.mxu1  ;;  %v12348_v49 = vshrl.u32 %v19565_v8, 16  ;;  %v12351_v62 = vshll.u32 %v19565_v8, 16 }
 0x631   : > { %20028 = vst [vmem:[%s22137_s6 + $0x18] sm:$0xff] %v19704_v48   ;;  %v14654_v19 = vpop.f32.mrf.mxu0  ;;  %v13533_v12 = vadd.f32 %v13069_v5, %v11467_v46  ;;  %v9886_v2 = vadd.f32 %v9423_v30, %v20936_v35  ;;  %v19429_v5 = vld [vmem:[%s20304_s11 + $0x88] sm:$0xff]  ;;  %v19497_v30 = vld [vmem:[%s20304_s11 + $0x98] sm:$0xff] }
 0x632   : > { %v12350_v46 = vrot.slane %v12348_v49, 2  ;;  %v9077_v43 = vrot.slane %v19429_v5, 2  ;;  %v10659_v20 = vrot.slane %v19497_v30, 2 }
 0x633   : > { %v15116_v18 = vadd.f32 %v14652_v51, %v13533_v12 }
 0x635   : > { %v15528_v6 = vadd.f32 %v22121_v50, %v15116_v18  ;;  %v10660_v18 = vsel %vm9047_vm5, %v10657_v63, %v10659_v20 }
 0x636   : > { %v11005_v10 = vpop.f32.mrf.mxu2 }
 0x637   : > { %v11468_v54 = vadd.f32 %v11005_v10, %v9886_v2  ;;  %v13071_v15 = vpop.f32.mrf.mxu3 }
 0x638   : > { %v9426_v11 = vpop.f32.mrf.mxu1 }
 0x639   : > { %v13534_v7 = vadd.f32 %v13071_v15, %v11468_v54  ;;  %v14657_v23 = vpop.f32.mrf.mxu0  ;;  %v9887_v9 = vadd.f32 %v9426_v11, %v20944_v32  ;;  %v14308_v54 = vrot.slane %v19633_v4, 3 }
 0x63b   : > { %v15117_v35 = vadd.f32 %v14654_v19, %v13534_v7  ;;  %17996 = vmatmul.msk.bf16.gmra.mxu1 %vm647_vm1, %v9076_v3  ;;  %18336 = vmatmul.msk.bf16.gmra.mxu2 %vm647_vm1, %v10658_v14  ;;  %v12353_v19 = vrot.slane %v12351_v62, 3  ;;  %v9078_v14 = vsel %vm9047_vm5, %v9075_v17, %v9077_v43 }
 0x63c   : > { %18676 = vmatmul.msk.bf16.gmra.mxu3 %vm647_vm1, %v12346_v31  ;;  %19016 = vmatmul.msk.bf16.gmra.mxu0 %vm647_vm1, %v14307_v28 }
 0x63d   : > { %v15529_v61 = vadd.f32 %v22121_v50, %v15117_v35  ;;  %v12354_v10 = vor.u32 %v12353_v19, %v12350_v46  ;;  %v14309_v35 = vsel %vm14278_vm7, %v14306_v41, %v14308_v54 }
 0x63e   : > { %v11008_v51 = vpop.f32.mrf.mxu2 }
 0x63f   : > { %v19709_v47 = vpack.c.bf16 %v15529_v61, %v15528_v6  ;;  %v13074_v48 = vpop.f32.mrf.mxu3  ;;  %v11469_v44 = vadd.f32 %v11008_v51, %v9887_v9  ;;  %v12355_v8 = vsel %vm12212_vm6, %v12345_v1, %v12354_v10  ;;  %v19566_v6 = vld [vmem:[%s20304_s11 + $0xa0] sm:$0xff] }
 0x640   : > { %v9428_v40 = vpop.f32.mrf.mxu1  ;;  %v12357_v1 = vshrl.u32 %v19566_v6, 16  ;;  %v12360_v41 = vshll.u32 %v19566_v6, 16  ;;  %v19498_v9 = vld [vmem:[%s20304_s11 + $0xa0] sm:$0xff]  ;;  %v19567_v6 = vld [vmem:[%s20304_s11 + $0xa8] sm:$0xff] }
 0x641   : > { %20029 = vst [vmem:[%s22137_s6 + $0x20] sm:$0xff] %v19709_v47   ;;  %v14659_v26 = vpop.f32.mrf.mxu0  ;;  %v13535_v12 = vadd.f32 %v13074_v48, %v11469_v44  ;;  %v9888_v2 = vadd.f32 %v9428_v40, %v20954_v55  ;;  %v19430_v47 = vld [vmem:[%s20304_s11 + $0x90] sm:$0xff]  ;;  %v19634_v44 = vld [vmem:[%s20304_s11 + $0xa0] sm:$0xff]  ;;  %v10661_v46 = vrot.slane %v19498_v9, 2 }
 0x642   : > { %v12359_v5 = vrot.slane %v12357_v1, 2  ;;  %v12362_v30 = vrot.slane %v12360_v41, 3  ;;  %v19431_v41 = vld [vmem:[%s20304_s11 + $0x98] sm:$0xff] }
 0x643   : > { %v15118_v7 = vadd.f32 %v14657_v23, %v13535_v12  ;;  %v9081_v9 = vrot.slane %v19431_v41, 2 }
 0x644   : > { %v12363_v12 = vor.u32 %v12362_v30, %v12359_v5 }
 0x645   : > { %v15530_v17 = vadd.f32 %v22121_v50, %v15118_v7 }
 0x646   : > { %v11010_v15 = vpop.f32.mrf.mxu2 }
 0x647   : > { %v11470_v32 = vadd.f32 %v11010_v15, %v9888_v2  ;;  %v13076_v11 = vpop.f32.mrf.mxu3  ;;  %v14310_v2 = vrot.slane %v19634_v44, 3 }
 0x648   : > { %v9431_v3 = vpop.f32.mrf.mxu1 }
 0x649   : > { %v13536_v31 = vadd.f32 %v13076_v11, %v11470_v32  ;;  %v14662_v28 = vpop.f32.mrf.mxu0  ;;  %v9889_v49 = vadd.f32 %v9431_v3, %v20962_v38 }
 0x64b   : > { %v15119_v55 = vadd.f32 %v14659_v26, %v13536_v31  ;;  %17997 = vmatmul.msk.bf16.gmra.mxu1 %vm647_vm1, %v9078_v14  ;;  %18337 = vmatmul.msk.bf16.gmra.mxu2 %vm647_vm1, %v10660_v18  ;;  %v9079_v26 = vrot.slane %v19430_v47, 2  ;;  %v10662_v14 = vsel %vm9047_vm5, %v10659_v20, %v10661_v46  ;;  %v19635_v47 = vld [vmem:[%s20304_s11 + $0xa8] sm:$0xff] }
 0x64c   : > { %18677 = vmatmul.msk.bf16.gmra.mxu3 %vm647_vm1, %v12355_v8  ;;  %19017 = vmatmul.msk.bf16.gmra.mxu0 %vm647_vm1, %v14309_v35  ;;  %v12364_v8 = vsel %vm12212_vm6, %v12354_v10, %v12363_v12  ;;  %v14311_v35 = vsel %vm14278_vm7, %v14308_v54, %v14310_v2  ;;  %v12366_v10 = vshrl.u32 %v19567_v6, 16  ;;  %v12369_v54 = vshll.u32 %v19567_v6, 16 }
 0x64d   : > { %v15531_v63 = vadd.f32 %v22121_v50, %v15119_v55  ;;  %v9080_v3 = vsel %vm9047_vm5, %v9077_v43, %v9079_v26  ;;  %v14312_v44 = vrot.slane %v19635_v47, 3 }
 0x64e   : > { %v11013_v23 = vpop.f32.mrf.mxu2 }
 0x64f   : > { %v19714_v61 = vpack.c.bf16 %v15531_v63, %v15530_v17  ;;  %v13079_v62 = vpop.f32.mrf.mxu3  ;;  %v11471_v48 = vadd.f32 %v11013_v23, %v9889_v49  ;;  %v19499_v23 = vld [vmem:[%s20304_s11 + $0xa8] sm:$0xff] }
 0x650   : > { %v9433_v51 = vpop.f32.mrf.mxu1 }
 0x651   : > { %20030 = vst [vmem:[%s22137_s6 + $0x28] sm:$0xff] %v19714_v61   ;;  %v14664_v40 = vpop.f32.mrf.mxu0  ;;  %v13537_v19 = vadd.f32 %v13079_v62, %v11471_v48  ;;  %v9890_v4 = vadd.f32 %v9433_v51, %v20972_v27  ;;  %v12368_v62 = vrot.slane %v12366_v10, 2  ;;  %v12371_v51 = vrot.slane %v12369_v54, 3  ;;  %v19500_v10 = vld [vmem:[%s20304_s11 + $0xb0] sm:$0xff] }
 0x652   : > { %v10663_v48 = vrot.slane %v19499_v23, 2  ;;  %v10665_v41 = vrot.slane %v19500_v10, 2 }
 0x653   : > { %v15120_v18 = vadd.f32 %v14662_v28, %v13537_v19  ;;  %v12372_v30 = vor.u32 %v12371_v51, %v12368_v62 }
 0x655   : > { %v15532_v43 = vadd.f32 %v22121_v50, %v15120_v18  ;;  %v12373_v18 = vsel %vm12212_vm6, %v12363_v12, %v12372_v30 }
 0x656   : > { %v11015_v15 = vpop.f32.mrf.mxu2 }
 0x657   : > { %v11472_v38 = vadd.f32 %v11015_v15, %v9890_v4  ;;  %v13081_v32 = vpop.f32.mrf.mxu3 }
 0x658   : > { %v9436_v11 = vpop.f32.mrf.mxu1 }
 0x659   : > { %v13538_v7 = vadd.f32 %v13081_v32, %v11472_v38  ;;  %v14667_v31 = vpop.f32.mrf.mxu0  ;;  %v9891_v17 = vadd.f32 %v9436_v11, %v20980_v59  ;;  %v9082_v38 = vsel %vm9047_vm5, %v9079_v26, %v9081_v9  ;;  %v10664_v32 = vsel %vm9047_vm5, %v10661_v46, %v10663_v48 }
 0x65b   : > { %v15121_v27 = vadd.f32 %v14664_v40, %v13538_v7  ;;  %17998 = vmatmul.msk.bf16.gmra.mxu1 %vm647_vm1, %v9080_v3  ;;  %18338 = vmatmul.msk.bf16.gmra.mxu2 %vm647_vm1, %v10662_v14  ;;  %v14313_v7 = vsel %vm14278_vm7, %v14310_v2, %v14312_v44 }
 0x65c   : > { %18678 = vmatmul.msk.bf16.gmra.mxu3 %vm647_vm1, %v12364_v8  ;;  %19018 = vmatmul.msk.bf16.gmra.mxu0 %vm647_vm1, %v14311_v35  ;;  %v19568_v8 = vld [vmem:[%s20304_s11 + $0xb0] sm:$0xff] }
 0x65d   : > { %v15533_v20 = vadd.f32 %v22121_v50, %v15121_v27  ;;  %v12375_v12 = vshrl.u32 %v19568_v8, 16  ;;  %v12378_v2 = vshll.u32 %v19568_v8, 16 }
 0x65e   : > { %v11018_v28 = vpop.f32.mrf.mxu2 }
 0x65f   : > { %v19719_v55 = vpack.c.bf16 %v15533_v20, %v15532_v43  ;;  %v13084_v63 = vpop.f32.mrf.mxu3  ;;  %v11473_v61 = vadd.f32 %v11018_v28, %v9891_v17  ;;  %v19432_v20 = vld [vmem:[%s20304_s11 + $0xa0] sm:$0xff]  ;;  %v12380_v17 = vrot.slane %v12378_v2, 3 }
 0x660   : > { %v9438_v1 = vpop.f32.mrf.mxu1 }
 0x661   : > { %20031 = vst [vmem:[%s22137_s6 + $0x30] sm:$0xff] %v19719_v55   ;;  %v14669_v49 = vpop.f32.mrf.mxu0  ;;  %v13539_v40 = vadd.f32 %v13084_v63, %v11473_v61  ;;  %v9892_v5 = vadd.f32 %v9438_v1, %v20990_v58  ;;  %v12377_v55 = vrot.slane %v12375_v12, 2  ;;  %v19636_v63 = vld [vmem:[%s20304_s11 + $0xb0] sm:$0xff]  ;;  %v9083_v1 = vrot.slane %v19432_v20, 2 }
 0x662   : > { %v14314_v62 = vrot.slane %v19636_v63, 3 }
 0x663   : > { %v15122_v11 = vadd.f32 %v14667_v31, %v13539_v40 }
 0x665   : > { %v15534_v26 = vadd.f32 %v22121_v50, %v15122_v11  ;;  %v19569_v11 = vld [vmem:[%s20304_s11 + $0xb8] sm:$0xff] }
 0x666   : > { %v11020_v19 = vpop.f32.mrf.mxu2 }
 0x667   : > { %v11474_v59 = vadd.f32 %v11020_v19, %v9892_v5  ;;  %v13086_v4 = vpop.f32.mrf.mxu3  ;;  %v9084_v5 = vsel %vm9047_vm5, %v9081_v9, %v9083_v1  ;;  %v10666_v19 = vsel %vm9047_vm5, %v10663_v48, %v10665_v41 }
 0x668   : > { %v9441_v15 = vpop.f32.mrf.mxu1 }
 0x669   : > { %v13540_v3 = vadd.f32 %v13086_v4, %v11474_v59  ;;  %v14672_v14 = vpop.f32.mrf.mxu0  ;;  %v9893_v6 = vadd.f32 %v9441_v15, %v20998_v37 }
 0x66b   : > { %v15123_v58 = vadd.f32 %v14669_v49, %v13540_v3  ;;  %17999 = vmatmul.msk.bf16.gmra.mxu1 %vm647_vm1, %v9082_v38  ;;  %18339 = vmatmul.msk.bf16.gmra.mxu2 %vm647_vm1, %v10664_v32  ;;  %v12381_v49 = vor.u32 %v12380_v17, %v12377_v55  ;;  %v14315_v32 = vsel %vm14278_vm7, %v14312_v44, %v14314_v62  ;;  %v12387_v44 = vshll.u32 %v19569_v11, 16 }
 0x66c   : > { %18679 = vmatmul.msk.bf16.gmra.mxu3 %vm647_vm1, %v12373_v18  ;;  %19019 = vmatmul.msk.bf16.gmra.mxu0 %vm647_vm1, %v14313_v7 }
 0x66d   : > { %v15535_v46 = vadd.f32 %v22121_v50, %v15123_v58  ;;  %v12382_v38 = vsel %vm12212_vm6, %v12372_v30, %v12381_v49  ;;  %v12384_v30 = vshrl.u32 %v19569_v11, 16  ;;  %v19433_v58 = vld [vmem:[%s20304_s11 + $0xa8] sm:$0xff]  ;;  %v19502_v11 = vld [vmem:[%s20304_s11 + $0xc0] sm:$0xff] }
 0x66e   : > { %v11023_v31 = vpop.f32.mrf.mxu2 }
 0x66f   : > { %v19724_v35 = vpack.c.bf16 %v15535_v46, %v15534_v26  ;;  %v13089_v27 = vpop.f32.mrf.mxu3  ;;  %v11475_v54 = vadd.f32 %v11023_v31, %v9893_v6  ;;  %v19501_v26 = vld [vmem:[%s20304_s11 + $0xb8] sm:$0xff]  ;;  %v12386_v2 = vrot.slane %v12384_v30, 2  ;;  %v12389_v31 = vrot.slane %v12387_v44, 3  ;;  %v19638_v44 = vld [vmem:[%s20304_s11 + $0xc0] sm:$0xff] }
 0x670   : > { %v9443_v43 = vpop.f32.mrf.mxu1  ;;  %v9085_v6 = vrot.slane %v19433_v58, 2  ;;  %v14318_v58 = vrot.slane %v19638_v44, 3 }
 0x671   : > { %20032 = vst [vmem:[%s22137_s6 + $0x38] sm:$0xff] %v19724_v35   ;;  %v14674_v28 = vpop.f32.mrf.mxu0  ;;  %v13541_v23 = vadd.f32 %v13089_v27, %v11475_v54  ;;  %v9894_v61 = vadd.f32 %v9443_v43, %v21008_v24  ;;  %v19637_v35 = vld [vmem:[%s20304_s11 + $0xb8] sm:$0xff]  ;;  %v10667_v27 = vrot.slane %v19501_v26, 2  ;;  %v12390_v10 = vor.u32 %v12389_v31, %v12386_v2 }
 0x672   : > { %v14316_v54 = vrot.slane %v19637_v35, 3  ;;  %v9086_v63 = vsel %vm9047_vm5, %v9083_v1, %v9085_v6 }
 0x673   : > { %v15124_v59 = vadd.f32 %v14672_v14, %v13541_v23  ;;  %v10668_v23 = vsel %vm9047_vm5, %v10665_v41, %v10667_v27 }
 0x675   : > { %v15536_v9 = vadd.f32 %v22121_v50, %v15124_v59 }
 0x676   : > { %v11025_v51 = vpop.f32.mrf.mxu2 }
 0x677   : > { %v11476_v37 = vadd.f32 %v11025_v51, %v9894_v61  ;;  %v13091_v47 = vpop.f32.mrf.mxu3 }
 0x678   : > { %v9446_v40 = vpop.f32.mrf.mxu1 }
 0x679   : > { %v13542_v4 = vadd.f32 %v13091_v47, %v11476_v37  ;;  %v14677_v15 = vpop.f32.mrf.mxu0  ;;  %v9895_v18 = vadd.f32 %v9446_v40, %v21016_v22  ;;  %v12391_v47 = vsel %vm12212_vm6, %v12381_v49, %v12390_v10  ;;  %v14317_v40 = vsel %vm14278_vm7, %v14314_v62, %v14316_v54 }
 0x67b   : > { %v15125_v24 = vadd.f32 %v14674_v28, %v13542_v4  ;;  %18000 = vmatmul.msk.bf16.gmra.mxu1 %vm647_vm1, %v9084_v5  ;;  %18340 = vmatmul.msk.bf16.gmra.mxu2 %vm647_vm1, %v10666_v19  ;;  %v19570_v5 = vld [vmem:[%s20304_s11 + $0xc0] sm:$0xff] }
 0x67c   : > { %18680 = vmatmul.msk.bf16.gmra.mxu3 %vm647_vm1, %v12382_v38  ;;  %19020 = vmatmul.msk.bf16.gmra.mxu0 %vm647_vm1, %v14315_v32  ;;  %v12393_v49 = vshrl.u32 %v19570_v5, 16  ;;  %v12396_v62 = vshll.u32 %v19570_v5, 16  ;;  %v19434_v32 = vld [vmem:[%s20304_s11 + $0xb0] sm:$0xff] }
 0x67d   : > { %v15537_v48 = vadd.f32 %v22121_v50, %v15125_v24 }
 0x67e   : > { %v11028_v3 = vpop.f32.mrf.mxu2  ;;  %v12398_v30 = vrot.slane %v12396_v62, 3 }
 0x67f   : > { %v19729_v14 = vpack.c.bf16 %v15537_v48, %v15536_v9  ;;  %v13094_v7 = vpop.f32.mrf.mxu3  ;;  %v11477_v46 = vadd.f32 %v11028_v3, %v9895_v18  ;;  %v12395_v48 = vrot.slane %v12393_v49, 2  ;;  %v9087_v3 = vrot.slane %v19434_v32, 2 }
 0x680   : > { %v9448_v8 = vpop.f32.mrf.mxu1 }
 0x681   : > { %20033 = vst [vmem:[%s22137_s6 + $0x40] sm:$0xff] %v19729_v14   ;;  %v14679_v12 = vpop.f32.mrf.mxu0  ;;  %v13543_v43 = vadd.f32 %v13094_v7, %v11477_v46  ;;  %v9896_v20 = vadd.f32 %v9448_v8, %v21026_v13  ;;  %v10669_v14 = vrot.slane %v19502_v11, 2  ;;  %v12399_v8 = vor.u32 %v12398_v30, %v12395_v48 }
 0x682   : > { %v9088_v2 = vsel %vm9047_vm5, %v9085_v6, %v9087_v3 }
 0x683   : > { %v15126_v61 = vadd.f32 %v14677_v15, %v13543_v43  ;;  %v10670_v31 = vsel %vm9047_vm5, %v10667_v27, %v10669_v14 }
 0x685   : > { %v15538_v1 = vadd.f32 %v22121_v50, %v15126_v61 }
 0x686   : > { %v11030_v28 = vpop.f32.mrf.mxu2 }
 0x687   : > { %v11478_v22 = vadd.f32 %v11030_v28, %v9896_v20  ;;  %v13096_v55 = vpop.f32.mrf.mxu3  ;;  %v12400_v28 = vsel %vm12212_vm6, %v12390_v10, %v12399_v8 }
 0x688   : > { %v9451_v17 = vpop.f32.mrf.mxu1 }
 0x689   : > { %v13544_v51 = vadd.f32 %v13096_v55, %v11478_v22  ;;  %v14682_v37 = vpop.f32.mrf.mxu0  ;;  %v9897_v4 = vadd.f32 %v9451_v17, %v21034_v52  ;;  %v14319_v22 = vsel %vm14278_vm7, %v14316_v54, %v14318_v58  ;;  %v19571_v55 = vld [vmem:[%s20304_s11 + $0xc8] sm:$0xff] }
 0x68a   : > { %v12402_v10 = vshrl.u32 %v19571_v55, 16  ;;  %v12405_v54 = vshll.u32 %v19571_v55, 16 }
 0x68b   : > { %v15127_v13 = vadd.f32 %v14679_v12, %v13544_v51  ;;  %18001 = vmatmul.msk.bf16.gmra.mxu1 %vm647_vm1, %v9086_v63  ;;  %18341 = vmatmul.msk.bf16.gmra.mxu2 %vm647_vm1, %v10668_v23 }
 0x68c   : > { %18681 = vmatmul.msk.bf16.gmra.mxu3 %vm647_vm1, %v12391_v47  ;;  %19021 = vmatmul.msk.bf16.gmra.mxu0 %vm647_vm1, %v14317_v40  ;;  %v19503_v47 = vld [vmem:[%s20304_s11 + $0xc8] sm:$0xff] }
 0x68d   : > { %v15539_v41 = vadd.f32 %v22121_v50, %v15127_v13  ;;  %v12404_v13 = vrot.slane %v12402_v10, 2  ;;  %v10671_v62 = vrot.slane %v19503_v47, 2 }
 0x68e   : > { %v11033_v19 = vpop.f32.mrf.mxu2 }
 0x68f   : > { %v19734_v59 = vpack.c.bf16 %v15539_v41, %v15538_v1  ;;  %v13099_v15 = vpop.f32.mrf.mxu3  ;;  %v11479_v24 = vadd.f32 %v11033_v19, %v9897_v4  ;;  %v12407_v1 = vrot.slane %v12405_v54, 3  ;;  %v19639_v41 = vld [vmem:[%s20304_s11 + $0xc8] sm:$0xff] }
 0x690   : > { %v9453_v38 = vpop.f32.mrf.mxu1 }
 0x691   : > { %20034 = vst [vmem:[%s22137_s6 + $0x48] sm:$0xff] %v19734_v59   ;;  %v14684_v9 = vpop.f32.mrf.mxu0  ;;  %v13545_v18 = vadd.f32 %v13099_v15, %v11479_v24  ;;  %v9898_v7 = vadd.f32 %v9453_v38, %v21044_v29  ;;  %v12408_v4 = vor.u32 %v12407_v1, %v12404_v13  ;;  %v14320_v15 = vrot.slane %v19639_v41, 3 }
 0x693   : > { %v15128_v35 = vadd.f32 %v14682_v37, %v13545_v18  ;;  %v19435_v37 = vld [vmem:[%s20304_s11 + $0xb8] sm:$0xff]  ;;  %v12409_v18 = vsel %vm12212_vm6, %v12399_v8, %v12408_v4 }
 0x694   : > { %v9089_v49 = vrot.slane %v19435_v37, 2 }
 0x695   : > { %v15540_v6 = vadd.f32 %v22121_v50, %v15128_v35  ;;  %v19436_v35 = vld [vmem:[%s20304_s11 + $0xc0] sm:$0xff] }
 0x696   : > { %v11035_v26 = vpop.f32.mrf.mxu2  ;;  %v9090_v24 = vsel %vm9047_vm5, %v9087_v3, %v9089_v49 }
 0x697   : > { %v11480_v52 = vadd.f32 %v11035_v26, %v9898_v7  ;;  %v13101_v46 = vpop.f32.mrf.mxu3  ;;  %v14321_v7 = vsel %vm14278_vm7, %v14318_v58, %v14320_v15  ;;  %v19572_v26 = vld [vmem:[%s20304_s11 + $0xd0] sm:$0xff] }
 0x698   : > { %v9456_v12 = vpop.f32.mrf.mxu1  ;;  %v12411_v8 = vshrl.u32 %v19572_v26, 16  ;;  %v12414_v58 = vshll.u32 %v19572_v26, 16 }
 0x699   : > { %v13546_v43 = vadd.f32 %v13101_v46, %v11480_v52  ;;  %v14687_v20 = vpop.f32.mrf.mxu0  ;;  %v9899_v23 = vadd.f32 %v9456_v12, %v21052_v39 }
 0x69a   : > { %v12416_v55 = vrot.slane %v12414_v58, 3 }
 0x69b   : > { %v15129_v29 = vadd.f32 %v14684_v9, %v13546_v43  ;;  %18002 = vmatmul.msk.bf16.gmra.mxu1 %vm647_vm1, %v9088_v2  ;;  %18342 = vmatmul.msk.bf16.gmra.mxu2 %vm647_vm1, %v10670_v31  ;;  %v10672_v9 = vsel %vm9047_vm5, %v10669_v14, %v10671_v62  ;;  %v19504_v43 = vld [vmem:[%s20304_s11 + $0xd0] sm:$0xff] }
 0x69c   : > { %18682 = vmatmul.msk.bf16.gmra.mxu3 %vm647_vm1, %v12400_v28  ;;  %19022 = vmatmul.msk.bf16.gmra.mxu0 %vm647_vm1, %v14319_v22  ;;  %v12413_v22 = vrot.slane %v12411_v8, 2 }
 0x69d   : > { %v15541_v27 = vadd.f32 %v22121_v50, %v15129_v29  ;;  %v19640_v29 = vld [vmem:[%s20304_s11 + $0xd0] sm:$0xff] }
 0x69e   : > { %v11038_v17 = vpop.f32.mrf.mxu2 }
 0x69f   : > { %v19739_v63 = vpack.c.bf16 %v15541_v27, %v15540_v6  ;;  %v13104_v61 = vpop.f32.mrf.mxu3  ;;  %v11481_v40 = vadd.f32 %v11038_v17, %v9899_v23  ;;  %v9091_v6 = vrot.slane %v19436_v35, 2  ;;  %v10673_v27 = vrot.slane %v19504_v43, 2 }
 0x6a0   : > { %v9458_v51 = vpop.f32.mrf.mxu1  ;;  %v12417_v17 = vor.u32 %v12416_v55, %v12413_v22  ;;  %v19574_v22 = vld [vmem:[%s20304_s11 + $0xe0] sm:$0xff] }
 0x6a1   : > { %20035 = vst [vmem:[%s22137_s6 + $0x50] sm:$0xff] %v19739_v63   ;;  %v14689_v5 = vpop.f32.mrf.mxu0  ;;  %v13547_v19 = vadd.f32 %v13104_v61, %v11481_v40  ;;  %v9900_v59 = vadd.f32 %v9458_v51, %v21062_v0  ;;  %v14322_v63 = vrot.slane %v19640_v29, 3  ;;  %v9092_v37 = vsel %vm9047_vm5, %v9089_v49, %v9091_v6  ;;  %v22358_v55 = vld [vmem:[%s23232_s2] ss:$0 sm:$0xff] }
 0x6a2   : > { %v10674_v47 = vsel %vm9047_vm5, %v10671_v62, %v10673_v27  ;;  %v12418_v1 = vsel %vm12212_vm6, %v12408_v4, %v12417_v17 }
 0x6a3   : > { %v15130_v48 = vadd.f32 %v14687_v20, %v13547_v19  ;;  %v14323_v41 = vsel %vm14278_vm7, %v14320_v15, %v14322_v63  ;;  %v19573_v19 = vld [vmem:[%s20304_s11 + $0xd8] sm:$0xff] }
 0x6a4   : > { %v12423_v4 = vshll.u32 %v19573_v19, 16 }
 0x6a5   : > { %v15542_v3 = vadd.f32 %v22121_v50, %v15130_v48 }
 0x6a6   : > { %v11040_v38 = vpop.f32.mrf.mxu2 }
 0x6a7   : > { %v11482_v39 = vadd.f32 %v11040_v38, %v9900_v59  ;;  %v13106_v32 = vpop.f32.mrf.mxu3  ;;  %v12420_v59 = vshrl.u32 %v19573_v19, 16 }
 0x6a8   : > { %v9461_v11 = vpop.f32.mrf.mxu1 }
 0x6a9   : > { %v13548_v30 = vadd.f32 %v13106_v32, %v11482_v39  ;;  %v14692_v44 = vpop.f32.mrf.mxu0  ;;  %v9901_v12 = vadd.f32 %v9461_v11, %v21070_v42 }
 0x6ab   : > { %v15131_v0 = vadd.f32 %v14689_v5, %v13548_v30  ;;  %18003 = vmatmul.msk.bf16.gmra.mxu1 %vm647_vm1, %v9090_v24  ;;  %18343 = vmatmul.msk.bf16.gmra.mxu2 %vm647_vm1, %v10672_v9  ;;  %v19437_v24 = vld [vmem:[%s20304_s11 + $0xc8] sm:$0xff]  ;;  %v19505_v9 = vld [vmem:[%s20304_s11 + $0xd8] sm:$0xff] }
 0x6ac   : > { %18683 = vmatmul.msk.bf16.gmra.mxu3 %vm647_vm1, %v12409_v18  ;;  %19023 = vmatmul.msk.bf16.gmra.mxu0 %vm647_vm1, %v14321_v7  ;;  %v12425_v18 = vrot.slane %v12423_v4, 3  ;;  %v19641_v7 = vld [vmem:[%s20304_s11 + $0xd8] sm:$0xff]  ;;  %v9093_v26 = vrot.slane %v19437_v24, 2 }
 0x6ad   : > { %v15543_v14 = vadd.f32 %v22121_v50, %v15131_v0  ;;  %v10675_v0 = vrot.slane %v19505_v9, 2  ;;  %v14324_v8 = vrot.slane %v19641_v7, 3 }
 0x6ae   : > { %v11043_v52 = vpop.f32.mrf.mxu2 }
 0x6af   : > { %v19744_v46 = vpack.c.bf16 %v15543_v14, %v15542_v3  ;;  %v13109_v2 = vpop.f32.mrf.mxu3  ;;  %v11483_v20 = vadd.f32 %v11043_v52, %v9901_v12  ;;  %v9094_v12 = vsel %vm9047_vm5, %v9091_v6, %v9093_v26 }
 0x6b0   : > { %v9463_v31 = vpop.f32.mrf.mxu1 }
 0x6b1   : > { %20036 = vst [vmem:[%s22137_s6 + $0x58] sm:$0xff] %v19744_v46   ;;  %v14694_v28 = vpop.f32.mrf.mxu0  ;;  %v13549_v10 = vadd.f32 %v13109_v2, %v11483_v20  ;;  %v9902_v54 = vadd.f32 %v9463_v31, %v21080_v57  ;;  %v10676_v2 = vsel %vm9047_vm5, %v10673_v27, %v10675_v0  ;;  %v12429_v27 = vshrl.u32 %v19574_v22, 16 }
 0x6b3   : > { %v15132_v40 = vadd.f32 %v14692_v44, %v13549_v10  ;;  %v12422_v44 = vrot.slane %v12420_v59, 2  ;;  %v12432_v10 = vshll.u32 %v19574_v22, 16 }
 0x6b5   : > { %v15544_v49 = vadd.f32 %v22121_v50, %v15132_v40  ;;  %v12426_v14 = vor.u32 %v12425_v18, %v12422_v44  ;;  %v12431_v40 = vrot.slane %v12429_v27, 2 }
 0x6b6   : > { %v11045_v23 = vpop.f32.mrf.mxu2 }
 0x6b7   : > { %v11484_v42 = vadd.f32 %v11045_v23, %v9902_v54  ;;  %v13111_v61 = vpop.f32.mrf.mxu3  ;;  %v12427_v20 = vsel %vm12212_vm6, %v12417_v17, %v12426_v14 }
 0x6b8   : > { %v9466_v51 = vpop.f32.mrf.mxu1 }
 0x6b9   : > { %v13550_v5 = vadd.f32 %v13111_v61, %v11484_v42  ;;  %v14697_v13 = vpop.f32.mrf.mxu0  ;;  %v9903_v39 = vadd.f32 %v9466_v51, %v21088_v45  ;;  %v19438_v61 = vld [vmem:[%s20304_s11 + $0xd0] sm:$0xff]  ;;  %v19506_v51 = vld [vmem:[%s20304_s11 + $0xe0] sm:$0xff] }
 0x6bb   : > { %v15133_v57 = vadd.f32 %v14694_v28, %v13550_v5  ;;  %18004 = vmatmul.msk.bf16.gmra.mxu1 %vm647_vm1, %v9092_v37  ;;  %18344 = vmatmul.msk.bf16.gmra.mxu2 %vm647_vm1, %v10674_v47  ;;  %v14325_v28 = vsel %vm14278_vm7, %v14322_v63, %v14324_v8  ;;  %v12434_v5 = vrot.slane %v12432_v10, 3 }
 0x6bc   : > { %18684 = vmatmul.msk.bf16.gmra.mxu3 %vm647_vm1, %v12418_v1  ;;  %19024 = vmatmul.msk.bf16.gmra.mxu0 %vm647_vm1, %v14323_v41  ;;  %v9095_v1 = vrot.slane %v19438_v61, 2  ;;  %v10677_v41 = vrot.slane %v19506_v51, 2  ;;  %v19576_v51 = vld [vmem:[%s20304_s11 + $0xf0] sm:$0xff] }
 0x6bd   : > { %v15545_v62 = vadd.f32 %v22121_v50, %v15133_v57 }
 0x6be   : > { %v11048_v15 = vpop.f32.mrf.mxu2 }
 0x6bf   : > { %v19749_v38 = vpack.c.bf16 %v15545_v62, %v15544_v49  ;;  %v13114_v32 = vpop.f32.mrf.mxu3  ;;  %v11485_v48 = vadd.f32 %v11048_v15, %v9903_v39  ;;  %v12435_v49 = vor.u32 %v12434_v5, %v12431_v40  ;;  %v10678_v39 = vsel %vm9047_vm5, %v10675_v0, %v10677_v41 }
 0x6c0   : > { %v9468_v11 = vpop.f32.mrf.mxu1  ;;  %v12447_v40 = vshrl.u32 %v19576_v51, 16  ;;  %v12450_v5 = vshll.u32 %v19576_v51, 16  ;;  %v23541_v51 = vld [vmem:[#allocation8_spill] sm:$0xff] }
 0x6c1   : > { %20037 = vst [vmem:[%s22137_s6 + $0x60] sm:$0xff] %v19749_v38   ;;  %v14699_v30 = vpop.f32.mrf.mxu0  ;;  %v13551_v50 = vadd.f32 %v13114_v32, %v11485_v48  ;;  %v9904_v3 = vadd.f32 %v9468_v11, %v21098_v36  ;;  %v9096_v38 = vsel %vm9047_vm5, %v9093_v26, %v9095_v1  ;;  %v12436_v9 = vsel %vm12212_vm6, %v12426_v14, %v12435_v49 }
 0x6c3   : > { %v15134_v31 = vadd.f32 %v14697_v13, %v13551_v50  ;;  %v19642_v13 = vld [vmem:[%s20304_s11 + $0xe0] sm:$0xff] }
 0x6c4   : > { %v14326_v62 = vrot.slane %v19642_v13, 3 }
 0x6c5   : > { %v15546_v29 = vadd.f32 %v22358_v55, %v15134_v31  ;;  %v19643_v31 = vld [vmem:[%s20304_s11 + $0xe8] sm:$0xff] }
 0x6c6   : > { %v11050_v58 = vpop.f32.mrf.mxu2  ;;  %v14327_v48 = vsel %vm14278_vm7, %v14324_v8, %v14326_v62 }
 0x6c7   : > { %v11486_v45 = vadd.f32 %v11050_v58, %v9904_v3  ;;  %v13116_v52 = vpop.f32.mrf.mxu3  ;;  %v19439_v58 = vld [vmem:[%s20304_s11 + $0xd8] sm:$0xff] }
 0x6c8   : > { %v9471_v46 = vpop.f32.mrf.mxu1 }
 0x6c9   : > { %v13552_v35 = vadd.f32 %v13116_v52, %v11486_v45  ;;  %v14702_v43 = vpop.f32.mrf.mxu0  ;;  %v9905_v63 = vadd.f32 %v9471_v46, %v21106_v56  ;;  %v19507_v45 = vld [vmem:[%s20304_s11 + $0xe8] sm:$0xff] }
 0x6cb   : > { %v15135_v36 = vadd.f32 %v14699_v30, %v13552_v35  ;;  %18005 = vmatmul.msk.bf16.gmra.mxu1 %vm647_vm1, %v9094_v12  ;;  %18345 = vmatmul.msk.bf16.gmra.mxu2 %vm647_vm1, %v10676_v2  ;;  %v19575_v30 = vld [vmem:[%s20304_s11 + $0xe8] sm:$0xff]  ;;  %v9097_v35 = vrot.slane %v19439_v58, 2 }
 0x6cc   : > { %18685 = vmatmul.msk.bf16.gmra.mxu3 %vm647_vm1, %v12427_v20  ;;  %19025 = vmatmul.msk.bf16.gmra.mxu0 %vm647_vm1, %v14325_v28  ;;  %v12438_v7 = vshrl.u32 %v19575_v30, 16  ;;  %v12441_v26 = vshll.u32 %v19575_v30, 16 }
 0x6cd   : > { %v15547_v6 = vadd.f32 %v22358_v55, %v15135_v36  ;;  %v14328_v36 = vrot.slane %v19643_v31, 3  ;;  %v9098_v10 = vsel %vm9047_vm5, %v9095_v1, %v9097_v35 }
 0x6ce   : > { %v11053_v54 = vpop.f32.mrf.mxu2  ;;  %v12440_v12 = vrot.slane %v12438_v7, 2  ;;  %v12443_v2 = vrot.slane %v12441_v26, 3 }
 0x6cf   : > { %v19754_v17 = vpack.c.bf16 %v15547_v6, %v15546_v29  ;;  %v13119_v23 = vpop.f32.mrf.mxu3  ;;  %v11487_v37 = vadd.f32 %v11053_v54, %v9905_v63  ;;  %v14329_v61 = vsel %vm14278_vm7, %v14326_v62, %v14328_v36  ;;  %v19440_v62 = vld [vmem:[%s20304_s11 + $0xe0] sm:$0xff] }
 0x6d0   : > { %v9473_v42 = vpop.f32.mrf.mxu1  ;;  %v12444_v22 = vor.u32 %v12443_v2, %v12440_v12 }
 0x6d1   : > { %20038 = vst [vmem:[%s22137_s6 + $0x68] sm:$0xff] %v19754_v17   ;;  %v14704_v47 = vpop.f32.mrf.mxu0  ;;  %v13553_v19 = vadd.f32 %v13119_v23, %v11487_v37  ;;  %v9906_v57 = vadd.f32 %v9473_v42, %v21116_v33 }
 0x6d2   : > { %v12445_v42 = vsel %vm12212_vm6, %v12435_v49, %v12444_v22 }
 0x6d3   : > { %v15136_v32 = vadd.f32 %v14702_v43, %v13553_v19  ;;  %v10679_v43 = vrot.slane %v19507_v45, 2 }
 0x6d5   : > { %v15548_v44 = vadd.f32 %v22358_v55, %v15136_v32  ;;  %v10680_v54 = vsel %vm9047_vm5, %v10677_v41, %v10679_v43  ;;  %v23538_v41 = vld [vmem:[#allocation107_spill] sm:$0xff]  ;;  %v9099_v32 = vrot.slane %v19440_v62, 2 }
 0x6d6   : > { %v11055_v59 = vpop.f32.mrf.mxu2 }
 0x6d7   : > { %v11488_v56 = vadd.f32 %v11055_v59, %v9906_v57  ;;  %v13121_v4 = vpop.f32.mrf.mxu3  ;;  %v19508_v59 = vld [vmem:[%s20304_s11 + $0xf0] sm:$0xff] }
 0x6d8   : > { %v9476_v15 = vpop.f32.mrf.mxu1 }
 0x6d9   : > { %v13554_v11 = vadd.f32 %v13121_v4, %v11488_v56  ;;  %v14707_v24 = vpop.f32.mrf.mxu0  ;;  %v9907_v3 = vadd.f32 %v9476_v15, %v21124_v34  ;;  %v12449_v15 = vrot.slane %v12447_v40, 2 }
 0x6db   : > { %v15137_v33 = vadd.f32 %v14704_v47, %v13554_v11  ;;  %18006 = vmatmul.msk.bf16.gmra.mxu1 %vm647_vm1, %v9096_v38  ;;  %18346 = vmatmul.msk.bf16.gmra.mxu2 %vm647_vm1, %v10678_v39  ;;  %v12452_v38 = vrot.slane %v12450_v5, 3  ;;  %v19644_v39 = vld [vmem:[%s20304_s11 + $0xf0] sm:$0xff]  ;;  %v10681_v11 = vrot.slane %v19508_v59, 2 }
 0x6dc   : > { %18686 = vmatmul.msk.bf16.gmra.mxu3 %vm647_vm1, %v12436_v9  ;;  %19026 = vmatmul.msk.bf16.gmra.mxu0 %vm647_vm1, %v14327_v48  ;;  %v23539_v9 = vld [vmem:[#allocation108_spill] sm:$0xff] }
 0x6dd   : > { %v15549_v18 = vadd.f32 %v22358_v55, %v15137_v33  ;;  %v12453_v30 = vor.u32 %v12452_v38, %v12449_v15  ;;  %v14330_v33 = vrot.slane %v19644_v39, 3 }
 0x6de   : > { %v11058_v0 = vpop.f32.mrf.mxu2 }
 0x6df   : > { %v19759_v50 = vpack.c.bf16 %v15549_v18, %v15548_v44  ;;  %v13124_v14 = vpop.f32.mrf.mxu3  ;;  %v11489_v52 = vadd.f32 %v11058_v0, %v9907_v3  ;;  %v9100_v0 = vsel %vm9047_vm5, %v9097_v35, %v9099_v32  ;;  %v12454_v58 = vsel %vm12212_vm6, %v12444_v22, %v12453_v30 }
 0x6e0   : > { %v9478_v8 = vpop.f32.mrf.mxu1  ;;  %v14331_v45 = vsel %vm14278_vm7, %v14328_v36, %v14330_v33 }
 0x6e1   : > { %20039 = vst [vmem:[%s22137_s6 + $0x70] sm:$0xff] %v19759_v50   ;;  %v14709_v46 = vpop.f32.mrf.mxu0  ;;  %v13555_v20 = vadd.f32 %v13124_v14, %v11489_v52  ;;  %v9908_v28 = vadd.f32 %v9478_v8, %v21134_v53  ;;  %v10682_v50 = vsel %vm9047_vm5, %v10679_v43, %v10681_v11  ;;  %v19577_v52 = vld [vmem:[%s20304_s11 + $0xf8] sm:$0xff] }
 0x6e2   : > { %v12456_v31 = vshrl.u32 %v19577_v52, 16  ;;  %v12459_v35 = vshll.u32 %v19577_v52, 16  ;;  %v23543_v52 = vld [vmem:[#allocation14_spill] sm:$0xff] }
 0x6e3   : > { %v15138_v17 = vadd.f32 %v14707_v24, %v13555_v20 }
 0x6e5   : > { %v15550_v37 = vadd.f32 %v22358_v55, %v15138_v17  ;;  %v12461_v17 = vrot.slane %v12459_v35, 3 }
 0x6e6   : > { %v11060_v29 = vpop.f32.mrf.mxu2 }
 0x6e7   : > { %v11490_v34 = vadd.f32 %v11060_v29, %v9908_v28  ;;  %v13126_v6 = vpop.f32.mrf.mxu3  ;;  %v23540_v28 = vld [vmem:[#allocation109_spill] sm:$0xff] }
 0x6e8   : > { %v9481_v27 = vpop.f32.mrf.mxu1 }
 0x6e9   : > { %v13556_v63 = vadd.f32 %v13126_v6, %v11490_v34  ;;  %v14712_v23 = vpop.f32.mrf.mxu0  ;;  %v9909_v19 = vadd.f32 %v9481_v27, %v23538_v41  ;;  %v19441_v34 = vld [vmem:[%s20304_s11 + $0xe8] sm:$0xff]  ;;  %v19509_v6 = vld [vmem:[%s20304_s11 + $0xf8] sm:$0xff] }
 0x6eb   : > { %v15139_v53 = vadd.f32 %v14709_v46, %v13556_v63  ;;  %18007 = vmatmul.msk.bf16.gmra.mxu1 %vm647_vm1, %v9098_v10  ;;  %18347 = vmatmul.msk.bf16.gmra.mxu2 %vm647_vm1, %v10680_v54  ;;  %v12458_v54 = vrot.slane %v12456_v31, 2  ;;  %v19645_v63 = vld [vmem:[%s20304_s11 + $0xf8] sm:$0xff] }
 0x6ec   : > { %18687 = vmatmul.msk.bf16.gmra.mxu3 %vm647_vm1, %v12445_v42  ;;  %19027 = vmatmul.msk.bf16.gmra.mxu0 %vm647_vm1, %v14329_v61  ;;  %v10683_v42 = vrot.slane %v19509_v6, 2 }
 0x6ed   : > { %v15551_v47 = vadd.f32 %v22358_v55, %v15139_v53 }
 0x6ee   : > { %v11063_v13 = vpop.f32.mrf.mxu2 }
 0x6ef   : > { %v19764_v1 = vpack.c.bf16 %v15551_v47, %v15550_v37  ;;  %v13129_v57 = vpop.f32.mrf.mxu3  ;;  %v11491_v56 = vadd.f32 %v11063_v13, %v9909_v19  ;;  %v12462_v37 = vor.u32 %v12461_v17, %v12458_v54  ;;  %v14332_v47 = vrot.slane %v19645_v63, 3 }
 0x6f0   : > { %v9483_v49 = vpop.f32.mrf.mxu1  ;;  %v10684_v19 = vsel %vm9047_vm5, %v10681_v11, %v10683_v42 }
 0x6f1   : > { %20040 = vst [vmem:[%s22137_s6 + $0x78] sm:$0xff] %v19764_v1   ;;  %v14714_v4 = vpop.f32.mrf.mxu0  ;;  %v13557_v24 = vadd.f32 %v13129_v57, %v11491_v56  ;;  %v9910_v48 = vadd.f32 %v9483_v49, %v23539_v9  ;;  %v12463_v59 = vsel %vm12212_vm6, %v12453_v30, %v12462_v37  ;;  %v14333_v56 = vsel %vm14278_vm7, %v14330_v33, %v14332_v47 }
 0x6f3   : > { %v15140_v3 = vadd.f32 %v14712_v23, %v13557_v24  ;;  %v9101_v23 = vrot.slane %v19441_v34, 2 }
 0x6f5   : > { %v15552_v12 = vadd.f32 %v22358_v55, %v15140_v3  ;;  %v9102_v41 = vsel %vm9047_vm5, %v9099_v32, %v9101_v23 }
 0x6f6   : > { %v11065_v44 = vpop.f32.mrf.mxu2 }
 0x6f7   : > { %v11492_v18 = vadd.f32 %v11065_v44, %v9910_v48  ;;  %v13131_v7 = vpop.f32.mrf.mxu3  ;;  %v23542_v48 = vld [vmem:[#allocation11_spill] sm:$0xff] }
 0x6f8   : > { %v9486_v26 = vpop.f32.mrf.mxu1 }
 0x6f9   : > { %v13558_v14 = vadd.f32 %v13131_v7, %v11492_v18  ;;  %v14717_v8 = vpop.f32.mrf.mxu0  ;;  %v9911_v22 = vadd.f32 %v9486_v26, %v23540_v28  ;;  %v19442_v18 = vld [vmem:[%s20304_s11 + $0xf0] sm:$0xff]  ;;  %v19510_v7 = vld [vmem:[%s20304_s11 + $0x100] sm:$0xff] }
 0x6fb   : > { %v15141_v46 = vadd.f32 %v14714_v4, %v13558_v14  ;;  %18008 = vmatmul.msk.bf16.gmra.mxu1 %vm647_vm1, %v9100_v0  ;;  %18348 = vmatmul.msk.bf16.gmra.mxu2 %vm647_vm1, %v10682_v50  ;;  %v19578_v4 = vld [vmem:[%s20304_s11 + $0x100] sm:$0xff] }
 0x6fc   : > { %18688 = vmatmul.msk.bf16.gmra.mxu3 %vm647_vm1, %v12454_v58  ;;  %19028 = vmatmul.msk.bf16.gmra.mxu0 %vm647_vm1, %v14331_v45  ;;  %v12465_v32 = vshrl.u32 %v19578_v4, 16  ;;  %v12468_v11 = vshll.u32 %v19578_v4, 16  ;;  %v19646_v14 = vld [vmem:[%s20304_s11 + $0x100] sm:$0xff]  ;;  %v10685_v58 = vrot.slane %v19510_v7, 2  ;;  %v23545_v4 = vld [vmem:[#allocation20_spill] sm:$0xff] }
 0x6fd   : > { %v15553_v2 = vadd.f32 %v22358_v55, %v15141_v46 }
 0x6fe   : > { %v11068_v43 = vpop.f32.mrf.mxu2  ;;  %v12467_v50 = vrot.slane %v12465_v32, 2  ;;  %v12470_v3 = vrot.slane %v12468_v11, 3 }
 0x6ff   : > { %v19769_v20 = vpack.c.bf16 %v15553_v2, %v15552_v12  ;;  %v13134_v36 = vpop.f32.mrf.mxu3  ;;  %v11493_v27 = vadd.f32 %v11068_v43, %v9911_v22  ;;  %v14334_v2 = vrot.slane %v19646_v14, 3  ;;  %v10686_v22 = vsel %vm9047_vm5, %v10683_v42, %v10685_v58 }
 0x700   : > { %v9488_v29 = vpop.f32.mrf.mxu1  ;;  %v12471_v12 = vor.u32 %v12470_v3, %v12467_v50 }
 0x701   : > { %20041 = vst [vmem:[%s22137_s6 + $0x80] sm:$0xff] %v19769_v20   ;;  %v14719_v10 = vpop.f32.mrf.mxu0  ;;  %v13559_v61 = vadd.f32 %v13134_v36, %v11493_v27  ;;  %v9912_v53 = vadd.f32 %v9488_v29, %v23541_v51  ;;  %v14335_v27 = vsel %vm14278_vm7, %v14332_v47, %v14334_v2 }
 0x702   : > { %v12472_v6 = vsel %vm12212_vm6, %v12462_v37, %v12471_v12 }
 0x703   : > { %v15142_v57 = vadd.f32 %v14717_v8, %v13559_v61  ;;  %v9103_v8 = vrot.slane %v19442_v18, 2 }
 0x705   : > { %v15554_v38 = vadd.f32 %v22358_v55, %v15142_v57  ;;  %v9104_v28 = vsel %vm9047_vm5, %v9101_v23, %v9103_v8 }
 0x706   : > { %v11070_v40 = vpop.f32.mrf.mxu2 }
 0x707   : > { %v11494_v5 = vadd.f32 %v11070_v40, %v9912_v53  ;;  %v13136_v13 = vpop.f32.mrf.mxu3  ;;  %v23544_v53 = vld [vmem:[#allocation17_spill] sm:$0xff] }
 0x708   : > { %v9491_v1 = vpop.f32.mrf.mxu1 }
 0x709   : > { %v13560_v49 = vadd.f32 %v13136_v13, %v11494_v5  ;;  %v14722_v62 = vpop.f32.mrf.mxu0  ;;  %v9913_v30 = vadd.f32 %v9491_v1, %v23542_v48  ;;  %v19443_v5 = vld [vmem:[%s20304_s11 + $0xf8] sm:$0xff]  ;;  %v19511_v13 = vld [vmem:[%s20304_s11 + $0x108] sm:$0xff] }
 0x70b   : > { %v15143_v15 = vadd.f32 %v14719_v10, %v13560_v49  ;;  %18009 = vmatmul.msk.bf16.gmra.mxu1 %vm647_vm1, %v9102_v41  ;;  %18349 = vmatmul.msk.bf16.gmra.mxu2 %vm647_vm1, %v10684_v19  ;;  %v19579_v10 = vld [vmem:[%s20304_s11 + $0x108] sm:$0xff] }
 0x70c   : > { %18689 = vmatmul.msk.bf16.gmra.mxu3 %vm647_vm1, %v12463_v59  ;;  %19029 = vmatmul.msk.bf16.gmra.mxu0 %vm647_vm1, %v14333_v56  ;;  %v12474_v23 = vshrl.u32 %v19579_v10, 16  ;;  %v12477_v42 = vshll.u32 %v19579_v10, 16  ;;  %v19647_v49 = vld [vmem:[%s20304_s11 + $0x108] sm:$0xff]  ;;  %v10687_v59 = vrot.slane %v19511_v13, 2  ;;  %v23547_v10 = vld [vmem:[#allocation26_spill] sm:$0xff] }
 0x70d   : > { %v15555_v39 = vadd.f32 %v22358_v55, %v15143_v15 }
 0x70e   : > { %v11073_v24 = vpop.f32.mrf.mxu2  ;;  %v12476_v19 = vrot.slane %v12474_v23, 2  ;;  %v12479_v57 = vrot.slane %v12477_v42, 3 }
 0x70f   : > { %v19774_v9 = vpack.c.bf16 %v15555_v39, %v15554_v38  ;;  %v13139_v33 = vpop.f32.mrf.mxu3  ;;  %v11495_v26 = vadd.f32 %v11073_v24, %v9913_v30  ;;  %v14336_v39 = vrot.slane %v19647_v49, 3  ;;  %v10688_v30 = vsel %vm9047_vm5, %v10685_v58, %v10687_v59 }
 0x710   : > { %v9493_v44 = vpop.f32.mrf.mxu1  ;;  %v12480_v38 = vor.u32 %v12479_v57, %v12476_v19 }
 0x711   : > { %20042 = vst [vmem:[%s22137_s6 + $0x88] sm:$0xff] %v19774_v9   ;;  %v14724_v0 = vpop.f32.mrf.mxu0  ;;  %v13561_v45 = vadd.f32 %v13139_v33, %v11495_v26  ;;  %v9914_v46 = vadd.f32 %v9493_v44, %v23543_v52  ;;  %v14337_v26 = vsel %vm14278_vm7, %v14334_v2, %v14336_v39 }
 0x712   : > { %v12481_v7 = vsel %vm12212_vm6, %v12471_v12, %v12480_v38 }
 0x713   : > { %v15144_v36 = vadd.f32 %v14722_v62, %v13561_v45  ;;  %v9105_v62 = vrot.slane %v19443_v5, 2 }
 0x715   : > { %v15556_v17 = vadd.f32 %v22358_v55, %v15144_v36  ;;  %v9106_v48 = vsel %vm9047_vm5, %v9103_v8, %v9105_v62 }
 0x716   : > { %v11075_v31 = vpop.f32.mrf.mxu2 }
 0x717   : > { %v11496_v35 = vadd.f32 %v11075_v31, %v9914_v46  ;;  %v13141_v43 = vpop.f32.mrf.mxu3  ;;  %v23546_v46 = vld [vmem:[#allocation23_spill] sm:$0xff] }
 0x718   : > { %v9496_v20 = vpop.f32.mrf.mxu1 }
 0x719   : > { %v13562_v29 = vadd.f32 %v13141_v43, %v11496_v35  ;;  %v14727_v34 = vpop.f32.mrf.mxu0  ;;  %v9915_v37 = vadd.f32 %v9496_v20, %v23544_v53  ;;  %v19444_v35 = vld [vmem:[%s20304_s11 + $0x100] sm:$0xff]  ;;  %v19512_v43 = vld [vmem:[%s20304_s11 + $0x110] sm:$0xff] }
 0x71b   : > { %v15145_v54 = vadd.f32 %v14724_v0, %v13562_v29  ;;  %18010 = vmatmul.msk.bf16.gmra.mxu1 %vm647_vm1, %v9104_v28  ;;  %18350 = vmatmul.msk.bf16.gmra.mxu2 %vm647_vm1, %v10686_v22  ;;  %v19580_v0 = vld [vmem:[%s20304_s11 + $0x110] sm:$0xff] }
 0x71c   : > { %18690 = vmatmul.msk.bf16.gmra.mxu3 %vm647_vm1, %v12472_v6  ;;  %19030 = vmatmul.msk.bf16.gmra.mxu0 %vm647_vm1, %v14335_v27  ;;  %v12483_v8 = vshrl.u32 %v19580_v0, 16  ;;  %v12486_v58 = vshll.u32 %v19580_v0, 16  ;;  %v19648_v29 = vld [vmem:[%s20304_s11 + $0x110] sm:$0xff]  ;;  %v10689_v6 = vrot.slane %v19512_v43, 2 }
 0x71d   : > { %v15557_v63 = vadd.f32 %v22358_v55, %v15145_v54  ;;  %v23549_v0 = vld [vmem:[#allocation32_spill] sm:$0xff] }
 0x71e   : > { %v11078_v61 = vpop.f32.mrf.mxu2  ;;  %v12485_v22 = vrot.slane %v12483_v8, 2  ;;  %v12488_v36 = vrot.slane %v12486_v58, 3 }
 0x71f   : > { %v19779_v51 = vpack.c.bf16 %v15557_v63, %v15556_v17  ;;  %v13144_v47 = vpop.f32.mrf.mxu3  ;;  %v11497_v1 = vadd.f32 %v11078_v61, %v9915_v37  ;;  %v14338_v63 = vrot.slane %v19648_v29, 3  ;;  %v10690_v37 = vsel %vm9047_vm5, %v10687_v59, %v10689_v6 }
 0x720   : > { %v9498_v40 = vpop.f32.mrf.mxu1  ;;  %v12489_v17 = vor.u32 %v12488_v36, %v12485_v22 }
 0x721   : > { %20043 = vst [vmem:[%s22137_s6 + $0x90] sm:$0xff] %v19779_v51   ;;  %v14729_v41 = vpop.f32.mrf.mxu0  ;;  %v13563_v56 = vadd.f32 %v13144_v47, %v11497_v1  ;;  %v9916_v15 = vadd.f32 %v9498_v40, %v23545_v4  ;;  %v14339_v1 = vsel %vm14278_vm7, %v14336_v39, %v14338_v63 }
 0x722   : > { %v12490_v13 = vsel %vm12212_vm6, %v12480_v38, %v12489_v17 }
 0x723   : > { %v15146_v33 = vadd.f32 %v14727_v34, %v13563_v56  ;;  %v9107_v34 = vrot.slane %v19444_v35, 2 }
 0x725   : > { %v15558_v3 = vadd.f32 %v22358_v55, %v15146_v33  ;;  %v9108_v53 = vsel %vm9047_vm5, %v9105_v62, %v9107_v34 }
 0x726   : > { %v11080_v32 = vpop.f32.mrf.mxu2 }
 0x727   : > { %v11498_v11 = vadd.f32 %v11080_v32, %v9916_v15  ;;  %v13146_v24 = vpop.f32.mrf.mxu3  ;;  %v23548_v15 = vld [vmem:[#allocation29_spill] sm:$0xff] }
 0x728   : > { %v9501_v9 = vpop.f32.mrf.mxu1 }
 0x729   : > { %v13564_v44 = vadd.f32 %v13146_v24, %v11498_v11  ;;  %v14732_v18 = vpop.f32.mrf.mxu0  ;;  %v9917_v12 = vadd.f32 %v9501_v9, %v23546_v46  ;;  %v19445_v11 = vld [vmem:[%s20304_s11 + $0x108] sm:$0xff]  ;;  %v19513_v24 = vld [vmem:[%s20304_s11 + $0x118] sm:$0xff] }
 0x72b   : > { %v15147_v50 = vadd.f32 %v14729_v41, %v13564_v44  ;;  %18011 = vmatmul.msk.bf16.gmra.mxu1 %vm647_vm1, %v9106_v48  ;;  %18351 = vmatmul.msk.bf16.gmra.mxu2 %vm647_vm1, %v10688_v30  ;;  %v19581_v41 = vld [vmem:[%s20304_s11 + $0x118] sm:$0xff] }
 0x72c   : > { %18691 = vmatmul.msk.bf16.gmra.mxu3 %vm647_vm1, %v12481_v7  ;;  %19031 = vmatmul.msk.bf16.gmra.mxu0 %vm647_vm1, %v14337_v26  ;;  %v12492_v62 = vshrl.u32 %v19581_v41, 16  ;;  %v12495_v59 = vshll.u32 %v19581_v41, 16  ;;  %v19649_v44 = vld [vmem:[%s20304_s11 + $0x118] sm:$0xff]  ;;  %v10691_v7 = vrot.slane %v19513_v24, 2  ;;  %v23551_v41 = vld [vmem:[#allocation38_spill] sm:$0xff] }
 0x72d   : > { %v15559_v14 = vadd.f32 %v22358_v55, %v15147_v50 }
 0x72e   : > { %v11083_v45 = vpop.f32.mrf.mxu2  ;;  %v12494_v30 = vrot.slane %v12492_v62, 2  ;;  %v12497_v33 = vrot.slane %v12495_v59, 3 }
 0x72f   : > { %v19784_v52 = vpack.c.bf16 %v15559_v14, %v15558_v3  ;;  %v13149_v2 = vpop.f32.mrf.mxu3  ;;  %v11499_v20 = vadd.f32 %v11083_v45, %v9917_v12  ;;  %v14340_v14 = vrot.slane %v19649_v44, 3  ;;  %v10692_v12 = vsel %vm9047_vm5, %v10689_v6, %v10691_v7 }
 0x730   : > { %v9503_v31 = vpop.f32.mrf.mxu1  ;;  %v12498_v3 = vor.u32 %v12497_v33, %v12494_v30 }
 0x731   : > { %20044 = vst [vmem:[%s22137_s6 + $0x98] sm:$0xff] %v19784_v52   ;;  %v14734_v28 = vpop.f32.mrf.mxu0  ;;  %v13565_v27 = vadd.f32 %v13149_v2, %v11499_v20  ;;  %v9918_v54 = vadd.f32 %v9503_v31, %v23547_v10  ;;  %v14341_v20 = vsel %vm14278_vm7, %v14338_v63, %v14340_v14 }
 0x732   : > { %v12499_v43 = vsel %vm12212_vm6, %v12489_v17, %v12498_v3 }
 0x733   : > { %v15148_v47 = vadd.f32 %v14732_v18, %v13565_v27  ;;  %v9109_v18 = vrot.slane %v19445_v11, 2 }
 0x735   : > { %v15560_v57 = vadd.f32 %v22358_v55, %v15148_v47  ;;  %v9110_v46 = vsel %vm9047_vm5, %v9107_v34, %v9109_v18 }
 0x736   : > { %v11085_v23 = vpop.f32.mrf.mxu2 }
 0x737   : > { %v11500_v42 = vadd.f32 %v11085_v23, %v9918_v54  ;;  %v13151_v61 = vpop.f32.mrf.mxu3  ;;  %v23550_v54 = vld [vmem:[#allocation35_spill] sm:$0xff] }
 0x738   : > { %v9506_v51 = vpop.f32.mrf.mxu1 }
 0x739   : > { %v13566_v40 = vadd.f32 %v13151_v61, %v11500_v42  ;;  %v14737_v5 = vpop.f32.mrf.mxu0  ;;  %v9919_v38 = vadd.f32 %v9506_v51, %v23548_v15  ;;  %v19446_v42 = vld [vmem:[%s20304_s11 + $0x110] sm:$0xff]  ;;  %v19514_v61 = vld [vmem:[%s20304_s11 + $0x120] sm:$0xff] }
 0x73b   : > { %v15149_v19 = vadd.f32 %v14734_v28, %v13566_v40  ;;  %18012 = vmatmul.msk.bf16.gmra.mxu1 %vm647_vm1, %v9108_v53  ;;  %18352 = vmatmul.msk.bf16.gmra.mxu2 %vm647_vm1, %v10690_v37  ;;  %v19582_v28 = vld [vmem:[%s20304_s11 + $0x120] sm:$0xff] }
 0x73c   : > { %18692 = vmatmul.msk.bf16.gmra.mxu3 %vm647_vm1, %v12490_v13  ;;  %19032 = vmatmul.msk.bf16.gmra.mxu0 %vm647_vm1, %v14339_v1  ;;  %v12501_v34 = vshrl.u32 %v19582_v28, 16  ;;  %v12504_v6 = vshll.u32 %v19582_v28, 16  ;;  %v19650_v40 = vld [vmem:[%s20304_s11 + $0x120] sm:$0xff]  ;;  %v10693_v13 = vrot.slane %v19514_v61, 2  ;;  %v23553_v28 = vld [vmem:[#allocation44_spill] sm:$0xff] }
 0x73d   : > { %v15561_v49 = vadd.f32 %v22358_v55, %v15149_v19 }
 0x73e   : > { %v11088_v56 = vpop.f32.mrf.mxu2  ;;  %v12503_v37 = vrot.slane %v12501_v34, 2  ;;  %v12506_v47 = vrot.slane %v12504_v6, 3 }
 0x73f   : > { %v19789_v4 = vpack.c.bf16 %v15561_v49, %v15560_v57  ;;  %v13154_v39 = vpop.f32.mrf.mxu3  ;;  %v11501_v9 = vadd.f32 %v11088_v56, %v9919_v38  ;;  %v14342_v49 = vrot.slane %v19650_v40, 3  ;;  %v10694_v38 = vsel %vm9047_vm5, %v10691_v7, %v10693_v13 }
 0x740   : > { %v9508_v32 = vpop.f32.mrf.mxu1  ;;  %v12507_v57 = vor.u32 %v12506_v47, %v12503_v37 }
 0x741   : > { %20045 = vst [vmem:[%s22137_s6 + $0xa0] sm:$0xff] %v19789_v4   ;;  %v14739_v48 = vpop.f32.mrf.mxu0  ;;  %v13567_v26 = vadd.f32 %v13154_v39, %v11501_v9  ;;  %v9920_v50 = vadd.f32 %v9508_v32, %v23549_v0  ;;  %v14343_v9 = vsel %vm14278_vm7, %v14340_v14, %v14342_v49 }
 0x742   : > { %v12508_v24 = vsel %vm12212_vm6, %v12498_v3, %v12507_v57 }
 0x743   : > { %v15150_v2 = vadd.f32 %v14737_v5, %v13567_v26  ;;  %v9111_v5 = vrot.slane %v19446_v42, 2 }
 0x745   : > { %v15562_v36 = vadd.f32 %v22358_v55, %v15150_v2  ;;  %v9112_v15 = vsel %vm9047_vm5, %v9109_v18, %v9111_v5 }
 0x746   : > { %v11090_v8 = vpop.f32.mrf.mxu2 }
 0x747   : > { %v11502_v58 = vadd.f32 %v11090_v8, %v9920_v50  ;;  %v13156_v45 = vpop.f32.mrf.mxu3  ;;  %v23552_v50 = vld [vmem:[#allocation41_spill] sm:$0xff] }
 0x748   : > { %v9511_v52 = vpop.f32.mrf.mxu1 }
 0x749   : > { %v13568_v31 = vadd.f32 %v13156_v45, %v11502_v58  ;;  %v14742_v35 = vpop.f32.mrf.mxu0  ;;  %v9921_v17 = vadd.f32 %v9511_v52, %v23550_v54  ;;  %v19447_v58 = vld [vmem:[%s20304_s11 + $0x118] sm:$0xff]  ;;  %v19515_v45 = vld [vmem:[%s20304_s11 + $0x128] sm:$0xff] }
 0x74b   : > { %v15151_v22 = vadd.f32 %v14739_v48, %v13568_v31  ;;  %18013 = vmatmul.msk.bf16.gmra.mxu1 %vm647_vm1, %v9110_v46  ;;  %18353 = vmatmul.msk.bf16.gmra.mxu2 %vm647_vm1, %v10692_v12  ;;  %v19583_v48 = vld [vmem:[%s20304_s11 + $0x128] sm:$0xff] }
 0x74c   : > { %18693 = vmatmul.msk.bf16.gmra.mxu3 %vm647_vm1, %v12499_v43  ;;  %19033 = vmatmul.msk.bf16.gmra.mxu0 %vm647_vm1, %v14341_v20  ;;  %v12510_v18 = vshrl.u32 %v19583_v48, 16  ;;  %v12513_v7 = vshll.u32 %v19583_v48, 16  ;;  %v19651_v31 = vld [vmem:[%s20304_s11 + $0x128] sm:$0xff]  ;;  %v10695_v43 = vrot.slane %v19515_v45, 2  ;;  %v23555_v48 = vld [vmem:[#allocation50_spill] sm:$0xff] }
 0x74d   : > { %v15563_v29 = vadd.f32 %v22358_v55, %v15151_v22 }
 0x74e   : > { %v11093_v27 = vpop.f32.mrf.mxu2  ;;  %v12512_v12 = vrot.slane %v12510_v18, 2  ;;  %v12515_v2 = vrot.slane %v12513_v7, 3 }
 0x74f   : > { %v19794_v10 = vpack.c.bf16 %v15563_v29, %v15562_v36  ;;  %v13159_v63 = vpop.f32.mrf.mxu3  ;;  %v11503_v51 = vadd.f32 %v11093_v27, %v9921_v17  ;;  %v14344_v29 = vrot.slane %v19651_v31, 3  ;;  %v10696_v17 = vsel %vm9047_vm5, %v10693_v13, %v10695_v43 }
 0x750   : > { %v9513_v23 = vpop.f32.mrf.mxu1  ;;  %v12516_v36 = vor.u32 %v12515_v2, %v12512_v12 }
 0x751   : > { %20046 = vst [vmem:[%s22137_s6 + $0xa8] sm:$0xff] %v19794_v10   ;;  %v14744_v53 = vpop.f32.mrf.mxu0  ;;  %v13569_v1 = vadd.f32 %v13159_v63, %v11503_v51  ;;  %v9922_v19 = vadd.f32 %v9513_v23, %v23551_v41  ;;  %v14345_v51 = vsel %vm14278_vm7, %v14342_v49, %v14344_v29 }
 0x752   : > { %v12517_v61 = vsel %vm12212_vm6, %v12507_v57, %v12516_v36 }
 0x753   : > { %v15152_v39 = vadd.f32 %v14742_v35, %v13569_v1  ;;  %v9113_v35 = vrot.slane %v19447_v58, 2 }
 0x755   : > { %v15564_v33 = vadd.f32 %v22358_v55, %v15152_v39  ;;  %v9114_v54 = vsel %vm9047_vm5, %v9111_v5, %v9113_v35 }
 0x756   : > { %v11095_v62 = vpop.f32.mrf.mxu2 }
 0x757   : > { %v11504_v59 = vadd.f32 %v11095_v62, %v9922_v19  ;;  %v13161_v56 = vpop.f32.mrf.mxu3  ;;  %v23554_v19 = vld [vmem:[#allocation47_spill] sm:$0xff] }
 0x758   : > { %v9516_v4 = vpop.f32.mrf.mxu1 }
 0x759   : > { %v13570_v32 = vadd.f32 %v13161_v56, %v11504_v59  ;;  %v14747_v11 = vpop.f32.mrf.mxu0  ;;  %v9923_v3 = vadd.f32 %v9516_v4, %v23552_v50  ;;  %v19448_v59 = vld [vmem:[%s20304_s11 + $0x120] sm:$0xff]  ;;  %v19516_v56 = vld [vmem:[%s20304_s11 + $0x130] sm:$0xff] }
 0x75b   : > { %v15153_v30 = vadd.f32 %v14744_v53, %v13570_v32  ;;  %18014 = vmatmul.msk.bf16.gmra.mxu1 %vm647_vm1, %v9112_v15  ;;  %18354 = vmatmul.msk.bf16.gmra.mxu2 %vm647_vm1, %v10694_v38  ;;  %v19584_v53 = vld [vmem:[%s20304_s11 + $0x130] sm:$0xff] }
 0x75c   : > { %18694 = vmatmul.msk.bf16.gmra.mxu3 %vm647_vm1, %v12508_v24  ;;  %19034 = vmatmul.msk.bf16.gmra.mxu0 %vm647_vm1, %v14343_v9  ;;  %v12519_v5 = vshrl.u32 %v19584_v53, 16  ;;  %v12522_v13 = vshll.u32 %v19584_v53, 16  ;;  %v19652_v32 = vld [vmem:[%s20304_s11 + $0x130] sm:$0xff]  ;;  %v10697_v24 = vrot.slane %v19516_v56, 2 }
 0x75d   : > { %v15565_v44 = vadd.f32 %v22358_v55, %v15153_v30  ;;  %v23557_v53 = vld [vmem:[#allocation56_spill] sm:$0xff] }
 0x75e   : > { %v11098_v26 = vpop.f32.mrf.mxu2  ;;  %v12521_v38 = vrot.slane %v12519_v5, 2  ;;  %v12524_v39 = vrot.slane %v12522_v13, 3 }
 0x75f   : > { %v19799_v0 = vpack.c.bf16 %v15565_v44, %v15564_v33  ;;  %v13164_v14 = vpop.f32.mrf.mxu3  ;;  %v11505_v52 = vadd.f32 %v11098_v26, %v9923_v3  ;;  %v14346_v44 = vrot.slane %v19652_v32, 3  ;;  %v10698_v3 = vsel %vm9047_vm5, %v10695_v43, %v10697_v24 }
 0x760   : > { %v9518_v8 = vpop.f32.mrf.mxu1  ;;  %v12525_v33 = vor.u32 %v12524_v39, %v12521_v38 }
 0x761   : > { %20047 = vst [vmem:[%s22137_s6 + $0xb0] sm:$0xff] %v19799_v0   ;;  %v14749_v46 = vpop.f32.mrf.mxu0  ;;  %v13571_v20 = vadd.f32 %v13164_v14, %v11505_v52  ;;  %v9924_v22 = vadd.f32 %v9518_v8, %v23553_v28  ;;  %v14347_v52 = vsel %vm14278_vm7, %v14344_v29, %v14346_v44 }
 0x762   : > { %v12526_v45 = vsel %vm12212_vm6, %v12516_v36, %v12525_v33 }
 0x763   : > { %v15154_v63 = vadd.f32 %v14747_v11, %v13571_v20  ;;  %v9115_v11 = vrot.slane %v19448_v59, 2 }
 0x765   : > { %v15566_v47 = vadd.f32 %v22358_v55, %v15154_v63  ;;  %v9116_v50 = vsel %vm9047_vm5, %v9113_v35, %v9115_v11 }
 0x766   : > { %v11100_v34 = vpop.f32.mrf.mxu2 }
 0x767   : > { %v11506_v6 = vadd.f32 %v11100_v34, %v9924_v22  ;;  %v13166_v27 = vpop.f32.mrf.mxu3  ;;  %v23556_v22 = vld [vmem:[#allocation53_spill] sm:$0xff] }
 0x768   : > { %v9521_v10 = vpop.f32.mrf.mxu1 }
 0x769   : > { %v13572_v23 = vadd.f32 %v13166_v27, %v11506_v6  ;;  %v14752_v42 = vpop.f32.mrf.mxu0  ;;  %v9925_v57 = vadd.f32 %v9521_v10, %v23554_v19  ;;  %v19449_v6 = vld [vmem:[%s20304_s11 + $0x128] sm:$0xff]  ;;  %v19517_v27 = vld [vmem:[%s20304_s11 + $0x138] sm:$0xff] }
 0x76b   : > { %v15155_v37 = vadd.f32 %v14749_v46, %v13572_v23  ;;  %18015 = vmatmul.msk.bf16.gmra.mxu1 %vm647_vm1, %v9114_v54  ;;  %18355 = vmatmul.msk.bf16.gmra.mxu2 %vm647_vm1, %v10696_v17  ;;  %v19585_v46 = vld [vmem:[%s20304_s11 + $0x138] sm:$0xff] }
 0x76c   : > { %18695 = vmatmul.msk.bf16.gmra.mxu3 %vm647_vm1, %v12517_v61  ;;  %19035 = vmatmul.msk.bf16.gmra.mxu0 %vm647_vm1, %v14345_v51  ;;  %v12528_v35 = vshrl.u32 %v19585_v46, 16  ;;  %v12531_v43 = vshll.u32 %v19585_v46, 16  ;;  %v19653_v23 = vld [vmem:[%s20304_s11 + $0x138] sm:$0xff]  ;;  %v10699_v61 = vrot.slane %v19517_v27, 2 }
 0x76d   : > { %v15567_v40 = vadd.f32 %v22358_v55, %v15155_v37 }
 0x76e   : > { %v11103_v1 = vpop.f32.mrf.mxu2  ;;  %v12530_v17 = vrot.slane %v12528_v35, 2  ;;  %v12533_v63 = vrot.slane %v12531_v43, 3 }
 0x76f   : > { %v19804_v41 = vpack.c.bf16 %v15567_v40, %v15566_v47  ;;  %v13169_v49 = vpop.f32.mrf.mxu3  ;;  %v11507_v4 = vadd.f32 %v11103_v1, %v9925_v57  ;;  %v14348_v40 = vrot.slane %v19653_v23, 3  ;;  %v10700_v57 = vsel %vm9047_vm5, %v10697_v24, %v10699_v61 }
 0x770   : > { %v9523_v62 = vpop.f32.mrf.mxu1  ;;  %v12534_v47 = vor.u32 %v12533_v63, %v12530_v17  ;;  %v22584_v17 = vld [vmem:[%s23232_s2] ss:$0 sm:$0xff] }
 0x771   : > { %20048 = vst [vmem:[%s22137_s6 + $0xb8] sm:$0xff] %v19804_v41   ;;  %v14754_v15 = vpop.f32.mrf.mxu0  ;;  %v13573_v9 = vadd.f32 %v13169_v49, %v11507_v4  ;;  %v9926_v30 = vadd.f32 %v9523_v62, %v23555_v48  ;;  %v14349_v4 = vsel %vm14278_vm7, %v14346_v44, %v14348_v40 }
 0x772   : > { %v12535_v56 = vsel %vm12212_vm6, %v12525_v33, %v12534_v47 }
 0x773   : > { %v15156_v14 = vadd.f32 %v14752_v42, %v13573_v9  ;;  %v9117_v42 = vrot.slane %v19449_v6, 2 }
 0x775   : > { %v15568_v2 = vadd.f32 %v22358_v55, %v15156_v14  ;;  %v9118_v19 = vsel %vm9047_vm5, %v9115_v11, %v9117_v42 }
 0x776   : > { %v11105_v18 = vpop.f32.mrf.mxu2 }
 0x777   : > { %v11508_v7 = vadd.f32 %v11105_v18, %v9926_v30  ;;  %v13171_v26 = vpop.f32.mrf.mxu3  ;;  %v23558_v30 = vld [vmem:[#allocation59_spill] sm:$0xff] }
 0x778   : > { %v9526_v0 = vpop.f32.mrf.mxu1 }
 0x779   : > { %v13574_v8 = vadd.f32 %v13171_v26, %v11508_v7  ;;  %v14757_v58 = vpop.f32.mrf.mxu0  ;;  %v9927_v36 = vadd.f32 %v9526_v0, %v23556_v22  ;;  %v19450_v7 = vld [vmem:[%s20304_s11 + $0x130] sm:$0xff]  ;;  %v19518_v26 = vld [vmem:[%s20304_s11 + $0x140] sm:$0xff] }
 0x77b   : > { %v15157_v12 = vadd.f32 %v14754_v15, %v13574_v8  ;;  %18016 = vmatmul.msk.bf16.gmra.mxu1 %vm647_vm1, %v9116_v50  ;;  %18356 = vmatmul.msk.bf16.gmra.mxu2 %vm647_vm1, %v10698_v3  ;;  %v19586_v15 = vld [vmem:[%s20304_s11 + $0x140] sm:$0xff] }
 0x77c   : > { %18696 = vmatmul.msk.bf16.gmra.mxu3 %vm647_vm1, %v12526_v45  ;;  %19036 = vmatmul.msk.bf16.gmra.mxu0 %vm647_vm1, %v14347_v52  ;;  %v12537_v11 = vshrl.u32 %v19586_v15, 16  ;;  %v12540_v24 = vshll.u32 %v19586_v15, 16  ;;  %v19654_v8 = vld [vmem:[%s20304_s11 + $0x140] sm:$0xff]  ;;  %v10701_v45 = vrot.slane %v19518_v26, 2  ;;  %v23561_v15 = vld [vmem:[#allocation68_spill] sm:$0xff] }
 0x77d   : > { %v15569_v31 = vadd.f32 %v22358_v55, %v15157_v12  ;;  %v23559_v52 = vld [vmem:[#allocation62_spill] sm:$0xff] }
 0x77e   : > { %v11108_v20 = vpop.f32.mrf.mxu2  ;;  %v12539_v3 = vrot.slane %v12537_v11, 2  ;;  %v12542_v14 = vrot.slane %v12540_v24, 3  ;;  %v10702_v22 = vsel %vm9047_vm5, %v10699_v61, %v10701_v45 }
 0x77f   : > { %v19809_v28 = vpack.c.bf16 %v15569_v31, %v15568_v2  ;;  %v13174_v29 = vpop.f32.mrf.mxu3  ;;  %v11509_v10 = vadd.f32 %v11108_v20, %v9927_v36  ;;  %v14350_v2 = vrot.slane %v19654_v8, 3 }
 0x780   : > { %v9528_v34 = vpop.f32.mrf.mxu1  ;;  %v12543_v12 = vor.u32 %v12542_v14, %v12539_v3 }
 0x781   : > { %20049 = vst [vmem:[%s22137_s6 + $0xc0] sm:$0xff] %v19809_v28   ;;  %v14759_v54 = vpop.f32.mrf.mxu0  ;;  %v13575_v51 = vadd.f32 %v13174_v29, %v11509_v10  ;;  %v9928_v37 = vadd.f32 %v9528_v34, %v23557_v53  ;;  %v14351_v27 = vsel %vm14278_vm7, %v14348_v40, %v14350_v2  ;;  %v19587_v10 = vld [vmem:[%s20304_s11 + $0x148] sm:$0xff] }
 0x782   : > { %v12544_v6 = vsel %vm12212_vm6, %v12534_v47, %v12543_v12  ;;  %v12549_v61 = vshll.u32 %v19587_v10, 16 }
 0x783   : > { %v15158_v49 = vadd.f32 %v14757_v58, %v13575_v51  ;;  %v9119_v58 = vrot.slane %v19450_v7, 2 }
 0x785   : > { %v15570_v39 = vadd.f32 %v22358_v55, %v15158_v49  ;;  %v9120_v28 = vsel %vm9047_vm5, %v9117_v42, %v9119_v58  ;;  %v12546_v42 = vshrl.u32 %v19587_v10, 16  ;;  %v12551_v49 = vrot.slane %v12549_v61, 3  ;;  %v23563_v10 = vld [vmem:[#allocation74_spill] sm:$0xff] }
 0x786   : > { %v11110_v5 = vpop.f32.mrf.mxu2 }
 0x787   : > { %v11510_v13 = vadd.f32 %v11110_v5, %v9928_v37  ;;  %v13176_v1 = vpop.f32.mrf.mxu3  ;;  %v23560_v37 = vld [vmem:[#allocation65_spill] sm:$0xff] }
 0x788   : > { %v9531_v41 = vpop.f32.mrf.mxu1 }
 0x789   : > { %v13576_v62 = vadd.f32 %v13176_v1, %v11510_v13  ;;  %v14762_v59 = vpop.f32.mrf.mxu0  ;;  %v9929_v33 = vadd.f32 %v9531_v41, %v23558_v30  ;;  %v19451_v13 = vld [vmem:[%s20304_s11 + $0x138] sm:$0xff]  ;;  %v19519_v1 = vld [vmem:[%s20304_s11 + $0x148] sm:$0xff] }
 0x78b   : > { %v15159_v38 = vadd.f32 %v14759_v54, %v13576_v62  ;;  %18017 = vmatmul.msk.bf16.gmra.mxu1 %vm647_vm1, %v9118_v19  ;;  %18357 = vmatmul.msk.bf16.gmra.mxu2 %vm647_vm1, %v10700_v57  ;;  %v12548_v57 = vrot.slane %v12546_v42, 2  ;;  %v19655_v62 = vld [vmem:[%s20304_s11 + $0x148] sm:$0xff] }
 0x78c   : > { %18697 = vmatmul.msk.bf16.gmra.mxu3 %vm647_vm1, %v12535_v56  ;;  %19037 = vmatmul.msk.bf16.gmra.mxu0 %vm647_vm1, %v14349_v4  ;;  %v10703_v56 = vrot.slane %v19519_v1, 2 }
 0x78d   : > { %v15571_v32 = vadd.f32 %v22358_v55, %v15159_v38 }
 0x78e   : > { %v11113_v9 = vpop.f32.mrf.mxu2 }
 0x78f   : > { %v19814_v48 = vpack.c.bf16 %v15571_v32, %v15570_v39  ;;  %v13179_v44 = vpop.f32.mrf.mxu3  ;;  %v11511_v0 = vadd.f32 %v11113_v9, %v9929_v33  ;;  %v12552_v39 = vor.u32 %v12551_v49, %v12548_v57  ;;  %v14352_v32 = vrot.slane %v19655_v62, 3 }
 0x790   : > { %v9533_v18 = vpop.f32.mrf.mxu1  ;;  %v10704_v33 = vsel %vm9047_vm5, %v10701_v45, %v10703_v56 }
 0x791   : > { %20050 = vst [vmem:[%s22137_s6 + $0xc8] sm:$0xff] %v19814_v48   ;;  %v14764_v50 = vpop.f32.mrf.mxu0  ;;  %v13577_v55 = vadd.f32 %v13179_v44, %v11511_v0  ;;  %v9930_v46 = vadd.f32 %v9533_v18, %v23559_v52  ;;  %v12553_v26 = vsel %vm12212_vm6, %v12543_v12, %v12552_v39  ;;  %v14353_v0 = vsel %vm14278_vm7, %v14350_v2, %v14352_v32 }
 0x793   : > { %v15160_v36 = vadd.f32 %v14762_v59, %v13577_v55  ;;  %v9121_v59 = vrot.slane %v19451_v13, 2 }
 0x795   : > { %v15572_v63 = vadd.f32 %v22584_v17, %v15160_v36  ;;  %v9122_v30 = vsel %vm9047_vm5, %v9119_v58, %v9121_v59 }
 0x796   : > { %v11115_v31 = vpop.f32.mrf.mxu2 }
 0x797   : > { %v11512_v35 = vadd.f32 %v11115_v31, %v9930_v46  ;;  %v13181_v43 = vpop.f32.mrf.mxu3  ;;  %v23562_v46 = vld [vmem:[#allocation71_spill] sm:$0xff] }
 0x798   : > { %v9536_v20 = vpop.f32.mrf.mxu1 }
 0x799   : > { %v13578_v29 = vadd.f32 %v13181_v43, %v11512_v35  ;;  %v14767_v34 = vpop.f32.mrf.mxu0  ;;  %v9931_v47 = vadd.f32 %v9536_v20, %v23560_v37  ;;  %v19452_v35 = vld [vmem:[%s20304_s11 + $0x140] sm:$0xff]  ;;  %v19520_v43 = vld [vmem:[%s20304_s11 + $0x150] sm:$0xff] }
 0x79b   : > { %v15161_v54 = vadd.f32 %v14764_v50, %v13578_v29  ;;  %18018 = vmatmul.msk.bf16.gmra.mxu1 %vm647_vm1, %v9120_v28  ;;  %18358 = vmatmul.msk.bf16.gmra.mxu2 %vm647_vm1, %v10702_v22  ;;  %v19588_v50 = vld [vmem:[%s20304_s11 + $0x150] sm:$0xff] }
 0x79c   : > { %18698 = vmatmul.msk.bf16.gmra.mxu3 %vm647_vm1, %v12544_v6  ;;  %19038 = vmatmul.msk.bf16.gmra.mxu0 %vm647_vm1, %v14351_v27  ;;  %v12555_v58 = vshrl.u32 %v19588_v50, 16  ;;  %v12558_v45 = vshll.u32 %v19588_v50, 16  ;;  %v19656_v29 = vld [vmem:[%s20304_s11 + $0x150] sm:$0xff]  ;;  %v10705_v6 = vrot.slane %v19520_v43, 2 }
 0x79d   : > { %v15573_v23 = vadd.f32 %v22584_v17, %v15161_v54  ;;  %v23565_v50 = vld [vmem:[#allocation80_spill] sm:$0xff] }
 0x79e   : > { %v11118_v51 = vpop.f32.mrf.mxu2  ;;  %v12557_v22 = vrot.slane %v12555_v58, 2  ;;  %v12560_v36 = vrot.slane %v12558_v45, 3 }
 0x79f   : > { %v19819_v53 = vpack.c.bf16 %v15573_v23, %v15572_v63  ;;  %v13184_v40 = vpop.f32.mrf.mxu3  ;;  %v11513_v41 = vadd.f32 %v11118_v51, %v9931_v47  ;;  %v14354_v23 = vrot.slane %v19656_v29, 3  ;;  %v10706_v47 = vsel %vm9047_vm5, %v10703_v56, %v10705_v6 }
 0x7a0   : > { %v9538_v5 = vpop.f32.mrf.mxu1  ;;  %v12561_v63 = vor.u32 %v12560_v36, %v12557_v22 }
 0x7a1   : > { %20051 = vst [vmem:[%s22137_s6 + $0xd0] sm:$0xff] %v19819_v53   ;;  %v14769_v19 = vpop.f32.mrf.mxu0  ;;  %v13579_v4 = vadd.f32 %v13184_v40, %v11513_v41  ;;  %v9932_v38 = vadd.f32 %v9538_v5, %v23561_v15  ;;  %v14355_v41 = vsel %vm14278_vm7, %v14352_v32, %v14354_v23 }
 0x7a2   : > { %v12562_v1 = vsel %vm12212_vm6, %v12552_v39, %v12561_v63 }
 0x7a3   : > { %v15162_v44 = vadd.f32 %v14767_v34, %v13579_v4  ;;  %v9123_v34 = vrot.slane %v19452_v35, 2 }
 0x7a5   : > { %v15574_v14 = vadd.f32 %v22584_v17, %v15162_v44  ;;  %v9124_v37 = vsel %vm9047_vm5, %v9121_v59, %v9123_v34 }
 0x7a6   : > { %v11120_v11 = vpop.f32.mrf.mxu2 }
 0x7a7   : > { %v11514_v24 = vadd.f32 %v11120_v11, %v9932_v38  ;;  %v13186_v9 = vpop.f32.mrf.mxu3  ;;  %v23564_v38 = vld [vmem:[#allocation77_spill] sm:$0xff] }
 0x7a8   : > { %v9541_v48 = vpop.f32.mrf.mxu1 }
 0x7a9   : > { %v13580_v18 = vadd.f32 %v13186_v9, %v11514_v24  ;;  %v14772_v7 = vpop.f32.mrf.mxu0  ;;  %v9933_v12 = vadd.f32 %v9541_v48, %v23562_v46  ;;  %v19453_v24 = vld [vmem:[%s20304_s11 + $0x148] sm:$0xff]  ;;  %v19521_v9 = vld [vmem:[%s20304_s11 + $0x158] sm:$0xff] }
 0x7ab   : > { %v15163_v3 = vadd.f32 %v14769_v19, %v13580_v18  ;;  %18019 = vmatmul.msk.bf16.gmra.mxu1 %vm647_vm1, %v9122_v30  ;;  %18359 = vmatmul.msk.bf16.gmra.mxu2 %vm647_vm1, %v10704_v33  ;;  %v19589_v19 = vld [vmem:[%s20304_s11 + $0x158] sm:$0xff] }
 0x7ac   : > { %18699 = vmatmul.msk.bf16.gmra.mxu3 %vm647_vm1, %v12553_v26  ;;  %19039 = vmatmul.msk.bf16.gmra.mxu0 %vm647_vm1, %v14353_v0  ;;  %v12564_v59 = vshrl.u32 %v19589_v19, 16  ;;  %v12567_v56 = vshll.u32 %v19589_v19, 16  ;;  %v19657_v18 = vld [vmem:[%s20304_s11 + $0x158] sm:$0xff]  ;;  %v10707_v26 = vrot.slane %v19521_v9, 2  ;;  %v23567_v19 = vld [vmem:[#allocation86_spill] sm:$0xff] }
 0x7ad   : > { %v15575_v8 = vadd.f32 %v22584_v17, %v15163_v3 }
 0x7ae   : > { %v11123_v55 = vpop.f32.mrf.mxu2  ;;  %v12566_v33 = vrot.slane %v12564_v59, 2  ;;  %v12569_v44 = vrot.slane %v12567_v56, 3 }
 0x7af   : > { %v19824_v52 = vpack.c.bf16 %v15575_v8, %v15574_v14  ;;  %v13189_v2 = vpop.f32.mrf.mxu3  ;;  %v11515_v20 = vadd.f32 %v11123_v55, %v9933_v12  ;;  %v14356_v8 = vrot.slane %v19657_v18, 3  ;;  %v10708_v12 = vsel %vm9047_vm5, %v10705_v6, %v10707_v26 }
 0x7b0   : > { %v9543_v31 = vpop.f32.mrf.mxu1  ;;  %v12570_v14 = vor.u32 %v12569_v44, %v12566_v33 }
 0x7b1   : > { %20052 = vst [vmem:[%s22137_s6 + $0xd8] sm:$0xff] %v19824_v52   ;;  %v14774_v28 = vpop.f32.mrf.mxu0  ;;  %v13581_v27 = vadd.f32 %v13189_v2, %v11515_v20  ;;  %v9934_v54 = vadd.f32 %v9543_v31, %v23563_v10  ;;  %v14357_v20 = vsel %vm14278_vm7, %v14354_v23, %v14356_v8 }
 0x7b2   : > { %v12571_v43 = vsel %vm12212_vm6, %v12561_v63, %v12570_v14 }
 0x7b3   : > { %v15164_v40 = vadd.f32 %v14772_v7, %v13581_v27  ;;  %v9125_v7 = vrot.slane %v19453_v24, 2 }
 0x7b5   : > { %v15576_v49 = vadd.f32 %v22584_v17, %v15164_v40  ;;  %v9126_v46 = vsel %vm9047_vm5, %v9123_v34, %v9125_v7 }
 0x7b6   : > { %v11125_v42 = vpop.f32.mrf.mxu2 }
 0x7b7   : > { %v11516_v61 = vadd.f32 %v11125_v42, %v9934_v54  ;;  %v13191_v51 = vpop.f32.mrf.mxu3  ;;  %v23566_v54 = vld [vmem:[#allocation83_spill] sm:$0xff] }
 0x7b8   : > { %v9546_v53 = vpop.f32.mrf.mxu1 }
 0x7b9   : > { %v13582_v5 = vadd.f32 %v13191_v51, %v11516_v61  ;;  %v14777_v13 = vpop.f32.mrf.mxu0  ;;  %v9935_v39 = vadd.f32 %v9546_v53, %v23564_v38  ;;  %v19454_v61 = vld [vmem:[%s20304_s11 + $0x150] sm:$0xff]  ;;  %v19522_v51 = vld [vmem:[%s20304_s11 + $0x160] sm:$0xff] }
 0x7bb   : > { %v15165_v57 = vadd.f32 %v14774_v28, %v13582_v5  ;;  %18020 = vmatmul.msk.bf16.gmra.mxu1 %vm647_vm1, %v9124_v37  ;;  %18360 = vmatmul.msk.bf16.gmra.mxu2 %vm647_vm1, %v10706_v47  ;;  %v19590_v28 = vld [vmem:[%s20304_s11 + $0x160] sm:$0xff] }
 0x7bc   : > { %18700 = vmatmul.msk.bf16.gmra.mxu3 %vm647_vm1, %v12562_v1  ;;  %19040 = vmatmul.msk.bf16.gmra.mxu0 %vm647_vm1, %v14355_v41  ;;  %v12573_v34 = vshrl.u32 %v19590_v28, 16  ;;  %v12576_v6 = vshll.u32 %v19590_v28, 16  ;;  %v19658_v5 = vld [vmem:[%s20304_s11 + $0x160] sm:$0xff]  ;;  %v10709_v1 = vrot.slane %v19522_v51, 2  ;;  %v23569_v28 = vld [vmem:[#allocation92_spill] sm:$0xff] }
 0x7bd   : > { %v15577_v62 = vadd.f32 %v22584_v17, %v15165_v57 }
 0x7be   : > { %v11128_v4 = vpop.f32.mrf.mxu2  ;;  %v12575_v47 = vrot.slane %v12573_v34, 2  ;;  %v12578_v40 = vrot.slane %v12576_v6, 3 }
 0x7bf   : > { %v19829_v15 = vpack.c.bf16 %v15577_v62, %v15576_v49  ;;  %v13194_v32 = vpop.f32.mrf.mxu3  ;;  %v11517_v48 = vadd.f32 %v11128_v4, %v9935_v39  ;;  %v14358_v62 = vrot.slane %v19658_v5, 3  ;;  %v10710_v39 = vsel %vm9047_vm5, %v10707_v26, %v10709_v1 }
 0x7c0   : > { %v9548_v11 = vpop.f32.mrf.mxu1  ;;  %v12579_v49 = vor.u32 %v12578_v40, %v12575_v47 }
 0x7c1   : > { %20053 = vst [vmem:[%s22137_s6 + $0xe0] sm:$0xff] %v19829_v15   ;;  %v14779_v30 = vpop.f32.mrf.mxu0  ;;  %v13583_v0 = vadd.f32 %v13194_v32, %v11517_v48  ;;  %v9936_v3 = vadd.f32 %v9548_v11, %v23565_v50  ;;  %v14359_v48 = vsel %vm14278_vm7, %v14356_v8, %v14358_v62 }
 0x7c2   : > { %v12580_v9 = vsel %vm12212_vm6, %v12570_v14, %v12579_v49 }
 0x7c3   : > { %v15166_v2 = vadd.f32 %v14777_v13, %v13583_v0  ;;  %v9127_v13 = vrot.slane %v19454_v61, 2 }
 0x7c5   : > { %v15578_v36 = vadd.f32 %v22584_v17, %v15166_v2  ;;  %v9128_v38 = vsel %vm9047_vm5, %v9125_v7, %v9127_v13 }
 0x7c6   : > { %v11130_v58 = vpop.f32.mrf.mxu2 }
 0x7c7   : > { %v11518_v45 = vadd.f32 %v11130_v58, %v9936_v3  ;;  %v13196_v55 = vpop.f32.mrf.mxu3  ;;  %v23568_v3 = vld [vmem:[#allocation89_spill] sm:$0xff] }
 0x7c8   : > { %v9551_v52 = vpop.f32.mrf.mxu1 }
 0x7c9   : > { %v13584_v31 = vadd.f32 %v13196_v55, %v11518_v45  ;;  %v14782_v35 = vpop.f32.mrf.mxu0  ;;  %v9937_v63 = vadd.f32 %v9551_v52, %v23566_v54  ;;  %v19455_v45 = vld [vmem:[%s20304_s11 + $0x158] sm:$0xff]  ;;  %v19523_v55 = vld [vmem:[%s20304_s11 + $0x168] sm:$0xff] }
 0x7cb   : > { %v15167_v22 = vadd.f32 %v14779_v30, %v13584_v31  ;;  %18021 = vmatmul.msk.bf16.gmra.mxu1 %vm647_vm1, %v9126_v46  ;;  %18361 = vmatmul.msk.bf16.gmra.mxu2 %vm647_vm1, %v10708_v12  ;;  %v19591_v30 = vld [vmem:[%s20304_s11 + $0x168] sm:$0xff] }
 0x7cc   : > { %18701 = vmatmul.msk.bf16.gmra.mxu3 %vm647_vm1, %v12571_v43  ;;  %19041 = vmatmul.msk.bf16.gmra.mxu0 %vm647_vm1, %v14357_v20  ;;  %v12582_v7 = vshrl.u32 %v19591_v30, 16  ;;  %v12585_v26 = vshll.u32 %v19591_v30, 16  ;;  %v19659_v31 = vld [vmem:[%s20304_s11 + $0x168] sm:$0xff]  ;;  %v10711_v43 = vrot.slane %v19523_v55, 2  ;;  %v23571_v30 = vld [vmem:[#allocation98_spill] sm:$0xff] }
 0x7cd   : > { %v15579_v29 = vadd.f32 %v22584_v17, %v15167_v22 }
 0x7ce   : > { %v11133_v27 = vpop.f32.mrf.mxu2  ;;  %v12584_v12 = vrot.slane %v12582_v7, 2  ;;  %v12587_v2 = vrot.slane %v12585_v26, 3 }
 0x7cf   : > { %v19834_v10 = vpack.c.bf16 %v15579_v29, %v15578_v36  ;;  %v13199_v23 = vpop.f32.mrf.mxu3  ;;  %v11519_v53 = vadd.f32 %v11133_v27, %v9937_v63  ;;  %v14360_v29 = vrot.slane %v19659_v31, 3  ;;  %v10712_v63 = vsel %vm9047_vm5, %v10709_v1, %v10711_v43 }
 0x7d0   : > { %v9553_v42 = vpop.f32.mrf.mxu1  ;;  %v12588_v36 = vor.u32 %v12587_v2, %v12584_v12 }
 0x7d1   : > { %20054 = vst [vmem:[%s22137_s6 + $0xe8] sm:$0xff] %v19834_v10   ;;  %v14784_v37 = vpop.f32.mrf.mxu0  ;;  %v13585_v41 = vadd.f32 %v13199_v23, %v11519_v53  ;;  %v9938_v57 = vadd.f32 %v9553_v42, %v23567_v19  ;;  %v14361_v53 = vsel %vm14278_vm7, %v14358_v62, %v14360_v29 }
 0x7d2   : > { %v12589_v51 = vsel %vm12212_vm6, %v12579_v49, %v12588_v36 }
 0x7d3   : > { %v15168_v32 = vadd.f32 %v14782_v35, %v13585_v41  ;;  %v9129_v35 = vrot.slane %v19455_v45, 2 }
 0x7d5   : > { %v15580_v44 = vadd.f32 %v22584_v17, %v15168_v32  ;;  %v9130_v54 = vsel %vm9047_vm5, %v9127_v13, %v9129_v35 }
 0x7d6   : > { %v11135_v59 = vpop.f32.mrf.mxu2 }
 0x7d7   : > { %v11520_v56 = vadd.f32 %v11135_v59, %v9938_v57  ;;  %v13201_v4 = vpop.f32.mrf.mxu3  ;;  %v23570_v57 = vld [vmem:[#allocation95_spill] sm:$0xff] }
 0x7d8   : > { %v9556_v15 = vpop.f32.mrf.mxu1 }
 0x7d9   : > { %v13586_v11 = vadd.f32 %v13201_v4, %v11520_v56  ;;  %v14787_v24 = vpop.f32.mrf.mxu0  ;;  %v9939_v14 = vadd.f32 %v9556_v15, %v23568_v3  ;;  %v19456_v56 = vld [vmem:[%s20304_s11 + $0x160] sm:$0xff]  ;;  %v19524_v4 = vld [vmem:[%s20304_s11 + $0x170] sm:$0xff] }
 0x7db   : > { %v15169_v33 = vadd.f32 %v14784_v37, %v13586_v11  ;;  %18022 = vmatmul.msk.bf16.gmra.mxu1 %vm647_vm1, %v9128_v38  ;;  %18362 = vmatmul.msk.bf16.gmra.mxu2 %vm647_vm1, %v10710_v39  ;;  %v19592_v37 = vld [vmem:[%s20304_s11 + $0x170] sm:$0xff] }
 0x7dc   : > { %18702 = vmatmul.msk.bf16.gmra.mxu3 %vm647_vm1, %v12580_v9  ;;  %19042 = vmatmul.msk.bf16.gmra.mxu0 %vm647_vm1, %v14359_v48  ;;  %v12591_v13 = vshrl.u32 %v19592_v37, 16  ;;  %v12594_v1 = vshll.u32 %v19592_v37, 16  ;;  %v19660_v11 = vld [vmem:[%s20304_s11 + $0x170] sm:$0xff]  ;;  %v10713_v9 = vrot.slane %v19524_v4, 2 }
 0x7dd   : > { %v15581_v18 = vadd.f32 %v22584_v17, %v15169_v33  ;;  %v23573_v37 = vld [vmem:[#allocation104_spill] sm:$0xff] }
 0x7de   : > { %v11138_v0 = vpop.f32.mrf.mxu2  ;;  %v12593_v39 = vrot.slane %v12591_v13, 2  ;;  %v12596_v32 = vrot.slane %v12594_v1, 3 }
 0x7df   : > { %v19839_v50 = vpack.c.bf16 %v15581_v18, %v15580_v44  ;;  %v13204_v8 = vpop.f32.mrf.mxu3  ;;  %v11521_v52 = vadd.f32 %v11138_v0, %v9939_v14  ;;  %v14362_v18 = vrot.slane %v19660_v11, 3  ;;  %v10714_v14 = vsel %vm9047_vm5, %v10711_v43, %v10713_v9 }
 0x7e0   : > { %v9558_v58 = vpop.f32.mrf.mxu1  ;;  %v12597_v44 = vor.u32 %v12596_v32, %v12593_v39 }
 0x7e1   : > { %20055 = vst [vmem:[%s22137_s6 + $0xf0] sm:$0xff] %v19839_v50   ;;  %v14789_v46 = vpop.f32.mrf.mxu0  ;;  %v13587_v20 = vadd.f32 %v13204_v8, %v11521_v52  ;;  %v9940_v22 = vadd.f32 %v9558_v58, %v23569_v28  ;;  %v14363_v52 = vsel %vm14278_vm7, %v14360_v29, %v14362_v18 }
 0x7e2   : > { %v12598_v55 = vsel %vm12212_vm6, %v12588_v36, %v12597_v44 }
 0x7e3   : > { %v15170_v23 = vadd.f32 %v14787_v24, %v13587_v20  ;;  %v9131_v24 = vrot.slane %v19456_v56, 2 }
 0x7e5   : > { %v15582_v40 = vadd.f32 %v22584_v17, %v15170_v23  ;;  %v9132_v3 = vsel %vm9047_vm5, %v9129_v35, %v9131_v24 }
 0x7e6   : > { %v11140_v34 = vpop.f32.mrf.mxu2 }
 0x7e7   : > { %v11522_v6 = vadd.f32 %v11140_v34, %v9940_v22  ;;  %v13206_v27 = vpop.f32.mrf.mxu3  ;;  %v23572_v22 = vld [vmem:[#allocation101_spill] sm:$0xff] }
 0x7e8   : > { %v9561_v10 = vpop.f32.mrf.mxu1 }
 0x7e9   : > { %v13588_v42 = vadd.f32 %v13206_v27, %v11522_v6  ;;  %v14792_v61 = vpop.f32.mrf.mxu0  ;;  %v9941_v49 = vadd.f32 %v9561_v10, %v23570_v57  ;;  %v19457_v6 = vld [vmem:[%s20304_s11 + $0x168] sm:$0xff]  ;;  %v19525_v27 = vld [vmem:[%s20304_s11 + $0x178] sm:$0xff] }
 0x7eb   : > { %v15171_v47 = vadd.f32 %v14789_v46, %v13588_v42  ;;  %18023 = vmatmul.msk.bf16.gmra.mxu1 %vm647_vm1, %v9130_v54  ;;  %18363 = vmatmul.msk.bf16.gmra.mxu2 %vm647_vm1, %v10712_v63  ;;  %v19593_v46 = vld [vmem:[%s20304_s11 + $0x178] sm:$0xff] }
 0x7ec   : > { %18703 = vmatmul.msk.bf16.gmra.mxu3 %vm647_vm1, %v12589_v51  ;;  %19043 = vmatmul.msk.bf16.gmra.mxu0 %vm647_vm1, %v14361_v53  ;;  %v12600_v35 = vshrl.u32 %v19593_v46, 16  ;;  %v12603_v43 = vshll.u32 %v19593_v46, 16  ;;  %v19661_v42 = vld [vmem:[%s20304_s11 + $0x178] sm:$0xff]  ;;  %v10715_v51 = vrot.slane %v19525_v27, 2 }
 0x7ed   : > { %v15583_v5 = vadd.f32 %v22584_v17, %v15171_v47  ;;  %v23575_v46 = vld [vmem:[#allocation9_spill] sm:$0xff] }
 0x7ee   : > { %v11143_v41 = vpop.f32.mrf.mxu2  ;;  %v12602_v63 = vrot.slane %v12600_v35, 2  ;;  %v12605_v23 = vrot.slane %v12603_v43, 3 }
 0x7ef   : > { %v19844_v19 = vpack.c.bf16 %v15583_v5, %v15582_v40  ;;  %v13209_v62 = vpop.f32.mrf.mxu3  ;;  %v11523_v15 = vadd.f32 %v11143_v41, %v9941_v49  ;;  %v14364_v5 = vrot.slane %v19661_v42, 3  ;;  %v10716_v49 = vsel %vm9047_vm5, %v10713_v9, %v10715_v51 }
 0x7f0   : > { %v9563_v59 = vpop.f32.mrf.mxu1  ;;  %v12606_v40 = vor.u32 %v12605_v23, %v12602_v63 }
 0x7f1   : > { %20056 = vst [vmem:[%s22137_s6 + $0xf8] sm:$0xff] %v19844_v19   ;;  %v14794_v38 = vpop.f32.mrf.mxu0  ;;  %v13589_v48 = vadd.f32 %v13209_v62, %v11523_v15  ;;  %v9942_v33 = vadd.f32 %v9563_v59, %v23571_v30  ;;  %v14365_v15 = vsel %vm14278_vm7, %v14362_v18, %v14364_v5 }
 0x7f2   : > { %v12607_v4 = vsel %vm12212_vm6, %v12597_v44, %v12606_v40 }
 0x7f3   : > { %v15172_v8 = vadd.f32 %v14792_v61, %v13589_v48  ;;  %v9133_v61 = vrot.slane %v19457_v6, 2 }
 0x7f5   : > { %v15584_v2 = vadd.f32 %v22584_v17, %v15172_v8  ;;  %v9134_v57 = vsel %vm9047_vm5, %v9131_v24, %v9133_v61 }
 0x7f6   : > { %v11145_v7 = vpop.f32.mrf.mxu2 }
 0x7f7   : > { %v11524_v26 = vadd.f32 %v11145_v7, %v9942_v33  ;;  %v13211_v0 = vpop.f32.mrf.mxu3  ;;  %v23574_v33 = vld [vmem:[#allocation6_spill] sm:$0xff] }
 0x7f8   : > { %v9566_v50 = vpop.f32.mrf.mxu1 }
 0x7f9   : > { %v13590_v58 = vadd.f32 %v13211_v0, %v11524_v26  ;;  %v14797_v45 = vpop.f32.mrf.mxu0  ;;  %v9943_v36 = vadd.f32 %v9566_v50, %v23572_v22  ;;  %v19458_v26 = vld [vmem:[%s20304_s11 + $0x170] sm:$0xff]  ;;  %v19526_v0 = vld [vmem:[%s20304_s11 + $0x180] sm:$0xff] }
 0x7fb   : > { %v15173_v12 = vadd.f32 %v14794_v38, %v13590_v58  ;;  %18024 = vmatmul.msk.bf16.gmra.mxu1 %vm647_vm1, %v9132_v3  ;;  %18364 = vmatmul.msk.bf16.gmra.mxu2 %vm647_vm1, %v10714_v14  ;;  %v19594_v38 = vld [vmem:[%s20304_s11 + $0x180] sm:$0xff] }
 0x7fc   : > { %18704 = vmatmul.msk.bf16.gmra.mxu3 %vm647_vm1, %v12598_v55  ;;  %19044 = vmatmul.msk.bf16.gmra.mxu0 %vm647_vm1, %v14363_v52  ;;  %v12609_v24 = vshrl.u32 %v19594_v38, 16  ;;  %v12612_v9 = vshll.u32 %v19594_v38, 16  ;;  %v19662_v58 = vld [vmem:[%s20304_s11 + $0x180] sm:$0xff]  ;;  %v10717_v55 = vrot.slane %v19526_v0, 2  ;;  %v23577_v38 = vld [vmem:[#allocation15_spill] sm:$0xff] }
 0x7fd   : > { %v15585_v31 = vadd.f32 %v22584_v17, %v15173_v12 }
 0x7fe   : > { %v11148_v20 = vpop.f32.mrf.mxu2  ;;  %v12611_v14 = vrot.slane %v12609_v24, 2  ;;  %v12614_v8 = vrot.slane %v12612_v9, 3 }
 0x7ff   : > { %v19849_v28 = vpack.c.bf16 %v15585_v31, %v15584_v2  ;;  %v13214_v29 = vpop.f32.mrf.mxu3  ;;  %v11525_v10 = vadd.f32 %v11148_v20, %v9943_v36  ;;  %v14366_v31 = vrot.slane %v19662_v58, 3  ;;  %v10718_v36 = vsel %vm9047_vm5, %v10715_v51, %v10717_v55 }
 0x800   : > { %v9568_v34 = vpop.f32.mrf.mxu1  ;;  %v12615_v2 = vor.u32 %v12614_v8, %v12611_v14 }
 0x801   : > { %20057 = vst [vmem:[%s22137_s6 + $0x100] sm:$0xff] %v19849_v28   ;;  %v14799_v54 = vpop.f32.mrf.mxu0  ;;  %v13591_v53 = vadd.f32 %v13214_v29, %v11525_v10  ;;  %v9944_v47 = vadd.f32 %v9568_v34, %v23573_v37  ;;  %v14367_v10 = vsel %vm14278_vm7, %v14364_v5, %v14366_v31 }
 0x802   : > { %v12616_v27 = vsel %vm12212_vm6, %v12606_v40, %v12615_v2 }
 0x803   : > { %v15174_v62 = vadd.f32 %v14797_v45, %v13591_v53  ;;  %v9135_v45 = vrot.slane %v19458_v26, 2 }
 0x805   : > { %v15586_v32 = vadd.f32 %v22584_v17, %v15174_v62  ;;  %v9136_v22 = vsel %vm9047_vm5, %v9133_v61, %v9135_v45 }
 0x806   : > { %v11150_v13 = vpop.f32.mrf.mxu2 }
 0x807   : > { %v11526_v1 = vadd.f32 %v11150_v13, %v9944_v47  ;;  %v13216_v41 = vpop.f32.mrf.mxu3  ;;  %v23576_v47 = vld [vmem:[#allocation12_spill] sm:$0xff] }
 0x808   : > { %v9571_v19 = vpop.f32.mrf.mxu1 }
 0x809   : > { %v13592_v59 = vadd.f32 %v13216_v41, %v11526_v1  ;;  %v14802_v56 = vpop.f32.mrf.mxu0  ;;  %v9945_v44 = vadd.f32 %v9571_v19, %v23574_v33  ;;  %v19459_v1 = vld [vmem:[%s20304_s11 + $0x178] sm:$0xff]  ;;  %v19527_v41 = vld [vmem:[%s20304_s11 + $0x188] sm:$0xff] }
 0x80b   : > { %v15175_v39 = vadd.f32 %v14799_v54, %v13592_v59  ;;  %18025 = vmatmul.msk.bf16.gmra.mxu1 %vm647_vm1, %v9134_v57  ;;  %18365 = vmatmul.msk.bf16.gmra.mxu2 %vm647_vm1, %v10716_v49  ;;  %v19595_v54 = vld [vmem:[%s20304_s11 + $0x188] sm:$0xff] }
 0x80c   : > { %18705 = vmatmul.msk.bf16.gmra.mxu3 %vm647_vm1, %v12607_v4  ;;  %19045 = vmatmul.msk.bf16.gmra.mxu0 %vm647_vm1, %v14365_v15  ;;  %v12618_v61 = vshrl.u32 %v19595_v54, 16  ;;  %v12621_v51 = vshll.u32 %v19595_v54, 16  ;;  %v19663_v59 = vld [vmem:[%s20304_s11 + $0x188] sm:$0xff]  ;;  %v10719_v4 = vrot.slane %v19527_v41, 2  ;;  %v23579_v54 = vld [vmem:[#allocation21_spill] sm:$0xff] }
 0x80d   : > { %v15587_v11 = vadd.f32 %v22584_v17, %v15175_v39 }
 0x80e   : > { %v11153_v48 = vpop.f32.mrf.mxu2  ;;  %v12620_v49 = vrot.slane %v12618_v61, 2  ;;  %v12623_v62 = vrot.slane %v12621_v51, 3 }
 0x80f   : > { %v19854_v30 = vpack.c.bf16 %v15587_v11, %v15586_v32  ;;  %v13219_v18 = vpop.f32.mrf.mxu3  ;;  %v11527_v50 = vadd.f32 %v11153_v48, %v9945_v44  ;;  %v14368_v11 = vrot.slane %v19663_v59, 3  ;;  %v10720_v44 = vsel %vm9047_vm5, %v10717_v55, %v10719_v4 }
 0x810   : > { %v9573_v7 = vpop.f32.mrf.mxu1  ;;  %v12624_v32 = vor.u32 %v12623_v62, %v12620_v49 }
 0x811   : > { %20058 = vst [vmem:[%s22137_s6 + $0x108] sm:$0xff] %v19854_v30   ;;  %v14804_v3 = vpop.f32.mrf.mxu0  ;;  %v13593_v52 = vadd.f32 %v13219_v18, %v11527_v50  ;;  %v9946_v12 = vadd.f32 %v9573_v7, %v23575_v46  ;;  %v14369_v50 = vsel %vm14278_vm7, %v14366_v31, %v14368_v11 }
 0x812   : > { %v12625_v0 = vsel %vm12212_vm6, %v12615_v2, %v12624_v32 }
 0x813   : > { %v15176_v29 = vadd.f32 %v14802_v56, %v13593_v52  ;;  %v9137_v56 = vrot.slane %v19459_v1, 2 }
 0x815   : > { %v15588_v23 = vadd.f32 %v22584_v17, %v15176_v29  ;;  %v9138_v33 = vsel %vm9047_vm5, %v9135_v45, %v9137_v56 }
 0x816   : > { %v11155_v35 = vpop.f32.mrf.mxu2 }
 0x817   : > { %v11528_v43 = vadd.f32 %v11155_v35, %v9946_v12  ;;  %v13221_v20 = vpop.f32.mrf.mxu3  ;;  %v23578_v12 = vld [vmem:[#allocation18_spill] sm:$0xff] }
 0x818   : > { %v9576_v28 = vpop.f32.mrf.mxu1 }
 0x819   : > { %v13594_v34 = vadd.f32 %v13221_v20, %v11528_v43  ;;  %v14807_v6 = vpop.f32.mrf.mxu0  ;;  %v9947_v40 = vadd.f32 %v9576_v28, %v23576_v47  ;;  %v19460_v43 = vld [vmem:[%s20304_s11 + $0x180] sm:$0xff]  ;;  %v19528_v20 = vld [vmem:[%s20304_s11 + $0x190] sm:$0xff] }
 0x81b   : > { %v15177_v63 = vadd.f32 %v14804_v3, %v13594_v34  ;;  %18026 = vmatmul.msk.bf16.gmra.mxu1 %vm647_vm1, %v9136_v22  ;;  %18366 = vmatmul.msk.bf16.gmra.mxu2 %vm647_vm1, %v10718_v36  ;;  %v19596_v3 = vld [vmem:[%s20304_s11 + $0x190] sm:$0xff] }
 0x81c   : > { %18706 = vmatmul.msk.bf16.gmra.mxu3 %vm647_vm1, %v12616_v27  ;;  %19046 = vmatmul.msk.bf16.gmra.mxu0 %vm647_vm1, %v14367_v10  ;;  %v12627_v45 = vshrl.u32 %v19596_v3, 16  ;;  %v12630_v55 = vshll.u32 %v19596_v3, 16  ;;  %v19664_v34 = vld [vmem:[%s20304_s11 + $0x190] sm:$0xff]  ;;  %v10721_v27 = vrot.slane %v19528_v20, 2  ;;  %v23581_v3 = vld [vmem:[#allocation27_spill] sm:$0xff] }
 0x81d   : > { %v15589_v42 = vadd.f32 %v22584_v17, %v15177_v63 }
 0x81e   : > { %v11158_v53 = vpop.f32.mrf.mxu2  ;;  %v12629_v36 = vrot.slane %v12627_v45, 2  ;;  %v12632_v29 = vrot.slane %v12630_v55, 3 }
 0x81f   : > { %v19859_v37 = vpack.c.bf16 %v15589_v42, %v15588_v23  ;;  %v13224_v5 = vpop.f32.mrf.mxu3  ;;  %v11529_v19 = vadd.f32 %v11158_v53, %v9947_v40  ;;  %v14370_v42 = vrot.slane %v19664_v34, 3  ;;  %v10722_v40 = vsel %vm9047_vm5, %v10719_v4, %v10721_v27 }
 0x820   : > { %v9578_v13 = vpop.f32.mrf.mxu1  ;;  %v12633_v23 = vor.u32 %v12632_v29, %v12629_v36 }
 0x821   : > { %20059 = vst [vmem:[%s22137_s6 + $0x110] sm:$0xff] %v19859_v37   ;;  %v14809_v57 = vpop.f32.mrf.mxu0  ;;  %v13595_v15 = vadd.f32 %v13224_v5, %v11529_v19  ;;  %v9948_v39 = vadd.f32 %v9578_v13, %v23577_v38  ;;  %v14371_v19 = vsel %vm14278_vm7, %v14368_v11, %v14370_v42 }
 0x822   : > { %v12634_v41 = vsel %vm12212_vm6, %v12624_v32, %v12633_v23 }
 0x823   : > { %v15178_v18 = vadd.f32 %v14807_v6, %v13595_v15  ;;  %v9139_v6 = vrot.slane %v19460_v43, 2 }
 0x825   : > { %v15590_v8 = vadd.f32 %v22584_v17, %v15178_v18  ;;  %v9140_v47 = vsel %vm9047_vm5, %v9137_v56, %v9139_v6 }
 0x826   : > { %v11160_v24 = vpop.f32.mrf.mxu2 }
 0x827   : > { %v11530_v9 = vadd.f32 %v11160_v24, %v9948_v39  ;;  %v13226_v48 = vpop.f32.mrf.mxu3  ;;  %v23580_v39 = vld [vmem:[#allocation24_spill] sm:$0xff] }
 0x828   : > { %v9581_v30 = vpop.f32.mrf.mxu1 }
 0x829   : > { %v13596_v7 = vadd.f32 %v13226_v48, %v11530_v9  ;;  %v14812_v26 = vpop.f32.mrf.mxu0  ;;  %v9949_v2 = vadd.f32 %v9581_v30, %v23578_v12  ;;  %v19461_v9 = vld [vmem:[%s20304_s11 + $0x188] sm:$0xff]  ;;  %v19529_v48 = vld [vmem:[%s20304_s11 + $0x198] sm:$0xff] }
 0x82b   : > { %v15179_v14 = vadd.f32 %v14809_v57, %v13596_v7  ;;  %18027 = vmatmul.msk.bf16.gmra.mxu1 %vm647_vm1, %v9138_v33  ;;  %18367 = vmatmul.msk.bf16.gmra.mxu2 %vm647_vm1, %v10720_v44  ;;  %v19597_v57 = vld [vmem:[%s20304_s11 + $0x198] sm:$0xff] }
 0x82c   : > { %18707 = vmatmul.msk.bf16.gmra.mxu3 %vm647_vm1, %v12625_v0  ;;  %19047 = vmatmul.msk.bf16.gmra.mxu0 %vm647_vm1, %v14369_v50  ;;  %v12636_v56 = vshrl.u32 %v19597_v57, 16  ;;  %v12639_v4 = vshll.u32 %v19597_v57, 16  ;;  %v19665_v7 = vld [vmem:[%s20304_s11 + $0x198] sm:$0xff]  ;;  %v10723_v0 = vrot.slane %v19529_v48, 2 }
 0x82d   : > { %v15591_v58 = vadd.f32 %v22584_v17, %v15179_v14  ;;  %v23583_v57 = vld [vmem:[#allocation33_spill] sm:$0xff] }
 0x82e   : > { %v11163_v52 = vpop.f32.mrf.mxu2  ;;  %v12638_v44 = vrot.slane %v12636_v56, 2  ;;  %v12641_v18 = vrot.slane %v12639_v4, 3 }
 0x82f   : > { %v19864_v46 = vpack.c.bf16 %v15591_v58, %v15590_v8  ;;  %v13229_v31 = vpop.f32.mrf.mxu3  ;;  %v11531_v28 = vadd.f32 %v11163_v52, %v9949_v2  ;;  %v14372_v58 = vrot.slane %v19665_v7, 3  ;;  %v10724_v2 = vsel %vm9047_vm5, %v10721_v27, %v10723_v0 }
 0x830   : > { %v9583_v35 = vpop.f32.mrf.mxu1  ;;  %v12642_v8 = vor.u32 %v12641_v18, %v12638_v44 }
 0x831   : > { %20060 = vst [vmem:[%s22137_s6 + $0x118] sm:$0xff] %v19864_v46   ;;  %v14814_v22 = vpop.f32.mrf.mxu0  ;;  %v13597_v10 = vadd.f32 %v13229_v31, %v11531_v28  ;;  %v9950_v63 = vadd.f32 %v9583_v35, %v23579_v54  ;;  %v14373_v28 = vsel %vm14278_vm7, %v14370_v42, %v14372_v58 }
 0x832   : > { %v12643_v20 = vsel %vm12212_vm6, %v12633_v23, %v12642_v8 }
 0x833   : > { %v15180_v5 = vadd.f32 %v14812_v26, %v13597_v10  ;;  %v9141_v26 = vrot.slane %v19461_v9, 2 }
 0x835   : > { %v15592_v62 = vadd.f32 %v22584_v17, %v15180_v5  ;;  %v9142_v12 = vsel %vm9047_vm5, %v9139_v6, %v9141_v26 }
 0x836   : > { %v11165_v61 = vpop.f32.mrf.mxu2 }
 0x837   : > { %v11532_v51 = vadd.f32 %v11165_v61, %v9950_v63  ;;  %v13231_v53 = vpop.f32.mrf.mxu3  ;;  %v23582_v63 = vld [vmem:[#allocation30_spill] sm:$0xff] }
 0x838   : > { %v9586_v37 = vpop.f32.mrf.mxu1 }
 0x839   : > { %v13598_v13 = vadd.f32 %v13231_v53, %v11532_v51  ;;  %v14817_v1 = vpop.f32.mrf.mxu0  ;;  %v9951_v32 = vadd.f32 %v9586_v37, %v23580_v39  ;;  %v19462_v51 = vld [vmem:[%s20304_s11 + $0x190] sm:$0xff]  ;;  %v19530_v53 = vld [vmem:[%s20304_s11 + $0x1a0] sm:$0xff] }
 0x83b   : > { %v15181_v49 = vadd.f32 %v14814_v22, %v13598_v13  ;;  %18028 = vmatmul.msk.bf16.gmra.mxu1 %vm647_vm1, %v9140_v47  ;;  %18368 = vmatmul.msk.bf16.gmra.mxu2 %vm647_vm1, %v10722_v40  ;;  %v19598_v22 = vld [vmem:[%s20304_s11 + $0x1a0] sm:$0xff] }
 0x83c   : > { %18708 = vmatmul.msk.bf16.gmra.mxu3 %vm647_vm1, %v12634_v41  ;;  %19048 = vmatmul.msk.bf16.gmra.mxu0 %vm647_vm1, %v14371_v19  ;;  %v12645_v6 = vshrl.u32 %v19598_v22, 16  ;;  %v12648_v27 = vshll.u32 %v19598_v22, 16  ;;  %v19666_v13 = vld [vmem:[%s20304_s11 + $0x1a0] sm:$0xff]  ;;  %v10725_v41 = vrot.slane %v19530_v53, 2 }
 0x83d   : > { %v15593_v59 = vadd.f32 %v22584_v17, %v15181_v49 }
 0x83e   : > { %v11168_v15 = vpop.f32.mrf.mxu2  ;;  %v12647_v40 = vrot.slane %v12645_v6, 2  ;;  %v12650_v5 = vrot.slane %v12648_v27, 3 }
 0x83f   : > { %v19869_v38 = vpack.c.bf16 %v15593_v59, %v15592_v62  ;;  %v13234_v11 = vpop.f32.mrf.mxu3  ;;  %v11533_v30 = vadd.f32 %v11168_v15, %v9951_v32  ;;  %v14374_v59 = vrot.slane %v19666_v13, 3  ;;  %v10726_v32 = vsel %vm9047_vm5, %v10723_v0, %v10725_v41 }
 0x840   : > { %v9588_v24 = vpop.f32.mrf.mxu1  ;;  %v12651_v62 = vor.u32 %v12650_v5, %v12647_v40  ;;  %v22810_v40 = vld [vmem:[%s23232_s2] ss:$0 sm:$0xff] }
 0x841   : > { %20061 = vst [vmem:[%s22137_s6 + $0x120] sm:$0xff] %v19869_v38   ;;  %v14819_v33 = vpop.f32.mrf.mxu0  ;;  %v13599_v50 = vadd.f32 %v13234_v11, %v11533_v30  ;;  %v9952_v14 = vadd.f32 %v9588_v24, %v23581_v3  ;;  %v14375_v30 = vsel %vm14278_vm7, %v14372_v58, %v14374_v59 }
 0x842   : > { %v12652_v48 = vsel %vm12212_vm6, %v12642_v8, %v12651_v62 }
 0x843   : > { %v15182_v31 = vadd.f32 %v14817_v1, %v13599_v50  ;;  %v9143_v1 = vrot.slane %v19462_v51, 2 }
 0x845   : > { %v15594_v29 = vadd.f32 %v22584_v17, %v15182_v31  ;;  %v9144_v39 = vsel %vm9047_vm5, %v9141_v26, %v9143_v1 }
 0x846   : > { %v11170_v45 = vpop.f32.mrf.mxu2 }
 0x847   : > { %v11534_v55 = vadd.f32 %v11170_v45, %v9952_v14  ;;  %v13236_v52 = vpop.f32.mrf.mxu3  ;;  %v23584_v14 = vld [vmem:[#allocation36_spill] sm:$0xff] }
 0x848   : > { %v9591_v46 = vpop.f32.mrf.mxu1 }
 0x849   : > { %v13600_v35 = vadd.f32 %v13236_v52, %v11534_v55  ;;  %v14822_v43 = vpop.f32.mrf.mxu0  ;;  %v9953_v23 = vadd.f32 %v9591_v46, %v23582_v63  ;;  %v19463_v55 = vld [vmem:[%s20304_s11 + $0x198] sm:$0xff]  ;;  %v19531_v52 = vld [vmem:[%s20304_s11 + $0x1a8] sm:$0xff] }
 0x84b   : > { %v15183_v36 = vadd.f32 %v14819_v33, %v13600_v35  ;;  %18029 = vmatmul.msk.bf16.gmra.mxu1 %vm647_vm1, %v9142_v12  ;;  %18369 = vmatmul.msk.bf16.gmra.mxu2 %vm647_vm1, %v10724_v2  ;;  %v19599_v33 = vld [vmem:[%s20304_s11 + $0x1a8] sm:$0xff] }
 0x84c   : > { %18709 = vmatmul.msk.bf16.gmra.mxu3 %vm647_vm1, %v12643_v20  ;;  %19049 = vmatmul.msk.bf16.gmra.mxu0 %vm647_vm1, %v14373_v28  ;;  %v12654_v26 = vshrl.u32 %v19599_v33, 16  ;;  %v12657_v0 = vshll.u32 %v19599_v33, 16  ;;  %v19667_v35 = vld [vmem:[%s20304_s11 + $0x1a8] sm:$0xff]  ;;  %v10727_v20 = vrot.slane %v19531_v52, 2  ;;  %v23587_v33 = vld [vmem:[#allocation45_spill] sm:$0xff] }
 0x84d   : > { %v15595_v34 = vadd.f32 %v22584_v17, %v15183_v36  ;;  %v23585_v28 = vld [vmem:[#allocation39_spill] sm:$0xff] }
 0x84e   : > { %v11173_v10 = vpop.f32.mrf.mxu2  ;;  %v12656_v2 = vrot.slane %v12654_v26, 2  ;;  %v12659_v31 = vrot.slane %v12657_v0, 3  ;;  %v10728_v63 = vsel %vm9047_vm5, %v10725_v41, %v10727_v20 }
 0x84f   : > { %v19874_v54 = vpack.c.bf16 %v15595_v34, %v15594_v29  ;;  %v13239_v42 = vpop.f32.mrf.mxu3  ;;  %v11535_v37 = vadd.f32 %v11173_v10, %v9953_v23  ;;  %v14376_v29 = vrot.slane %v19667_v35, 3 }
 0x850   : > { %v9593_v61 = vpop.f32.mrf.mxu1  ;;  %v12660_v36 = vor.u32 %v12659_v31, %v12656_v2 }
 0x851   : > { %20062 = vst [vmem:[%s22137_s6 + $0x128] sm:$0xff] %v19874_v54   ;;  %v14824_v47 = vpop.f32.mrf.mxu0  ;;  %v13601_v19 = vadd.f32 %v13239_v42, %v11535_v37  ;;  %v9954_v49 = vadd.f32 %v9593_v61, %v23583_v57  ;;  %v14377_v53 = vsel %vm14278_vm7, %v14374_v59, %v14376_v29  ;;  %v19600_v37 = vld [vmem:[%s20304_s11 + $0x1b0] sm:$0xff] }
 0x852   : > { %v12661_v51 = vsel %vm12212_vm6, %v12651_v62, %v12660_v36  ;;  %v12666_v41 = vshll.u32 %v19600_v37, 16 }
 0x853   : > { %v15184_v11 = vadd.f32 %v14822_v43, %v13601_v19  ;;  %v9145_v43 = vrot.slane %v19463_v55, 2 }
 0x855   : > { %v15596_v18 = vadd.f32 %v22584_v17, %v15184_v11  ;;  %v9146_v54 = vsel %vm9047_vm5, %v9143_v1, %v9145_v43  ;;  %v12663_v1 = vshrl.u32 %v19600_v37, 16  ;;  %v12668_v11 = vrot.slane %v12666_v41, 3  ;;  %v23589_v37 = vld [vmem:[#allocation51_spill] sm:$0xff] }
 0x856   : > { %v11175_v56 = vpop.f32.mrf.mxu2 }
 0x857   : > { %v11536_v4 = vadd.f32 %v11175_v56, %v9954_v49  ;;  %v13241_v15 = vpop.f32.mrf.mxu3  ;;  %v23586_v49 = vld [vmem:[#allocation42_spill] sm:$0xff] }
 0x858   : > { %v9596_v38 = vpop.f32.mrf.mxu1 }
 0x859   : > { %v13602_v24 = vadd.f32 %v13241_v15, %v11536_v4  ;;  %v14827_v9 = vpop.f32.mrf.mxu0  ;;  %v9955_v8 = vadd.f32 %v9596_v38, %v23584_v14  ;;  %v19464_v4 = vld [vmem:[%s20304_s11 + $0x1a0] sm:$0xff]  ;;  %v19532_v15 = vld [vmem:[%s20304_s11 + $0x1b0] sm:$0xff] }
 0x85b   : > { %v15185_v44 = vadd.f32 %v14824_v47, %v13602_v24  ;;  %18030 = vmatmul.msk.bf16.gmra.mxu1 %vm647_vm1, %v9144_v39  ;;  %18370 = vmatmul.msk.bf16.gmra.mxu2 %vm647_vm1, %v10726_v32  ;;  %v12665_v32 = vrot.slane %v12663_v1, 2  ;;  %v19668_v24 = vld [vmem:[%s20304_s11 + $0x1b0] sm:$0xff] }
 0x85c   : > { %18710 = vmatmul.msk.bf16.gmra.mxu3 %vm647_vm1, %v12652_v48  ;;  %19050 = vmatmul.msk.bf16.gmra.mxu0 %vm647_vm1, %v14375_v30  ;;  %v10729_v48 = vrot.slane %v19532_v15, 2 }
 0x85d   : > { %v15597_v7 = vadd.f32 %v22584_v17, %v15185_v44 }
 0x85e   : > { %v11178_v50 = vpop.f32.mrf.mxu2 }
 0x85f   : > { %v19879_v3 = vpack.c.bf16 %v15597_v7, %v15596_v18  ;;  %v13244_v58 = vpop.f32.mrf.mxu3  ;;  %v11537_v46 = vadd.f32 %v11178_v50, %v9955_v8  ;;  %v12669_v18 = vor.u32 %v12668_v11, %v12665_v32  ;;  %v14378_v7 = vrot.slane %v19668_v24, 3 }
 0x860   : > { %v9598_v45 = vpop.f32.mrf.mxu1  ;;  %v10730_v8 = vsel %vm9047_vm5, %v10727_v20, %v10729_v48 }
 0x861   : > { %20063 = vst [vmem:[%s22137_s6 + $0x130] sm:$0xff] %v19879_v3   ;;  %v14829_v12 = vpop.f32.mrf.mxu0  ;;  %v13603_v17 = vadd.f32 %v13244_v58, %v11537_v46  ;;  %v9956_v22 = vadd.f32 %v9598_v45, %v23585_v28  ;;  %v12670_v52 = vsel %vm12212_vm6, %v12660_v36, %v12669_v18  ;;  %v14379_v46 = vsel %vm14278_vm7, %v14376_v29, %v14378_v7 }
 0x863   : > { %v15186_v23 = vadd.f32 %v14827_v9, %v13603_v17  ;;  %v9147_v9 = vrot.slane %v19464_v4, 2 }
 0x865   : > { %v15598_v5 = vadd.f32 %v22810_v40, %v15186_v23  ;;  %v9148_v14 = vsel %vm9047_vm5, %v9145_v43, %v9147_v9 }
 0x866   : > { %v11180_v34 = vpop.f32.mrf.mxu2 }
 0x867   : > { %v11538_v6 = vadd.f32 %v11180_v34, %v9956_v22  ;;  %v13246_v27 = vpop.f32.mrf.mxu3  ;;  %v23588_v22 = vld [vmem:[#allocation48_spill] sm:$0xff] }
 0x868   : > { %v9601_v10 = vpop.f32.mrf.mxu1 }
 0x869   : > { %v13604_v42 = vadd.f32 %v13246_v27, %v11538_v6  ;;  %v14832_v61 = vpop.f32.mrf.mxu0  ;;  %v9957_v62 = vadd.f32 %v9601_v10, %v23586_v49  ;;  %v19465_v6 = vld [vmem:[%s20304_s11 + $0x1a8] sm:$0xff]  ;;  %v19533_v27 = vld [vmem:[%s20304_s11 + $0x1b8] sm:$0xff] }
 0x86b   : > { %v15187_v47 = vadd.f32 %v14829_v12, %v13604_v42  ;;  %18031 = vmatmul.msk.bf16.gmra.mxu1 %vm647_vm1, %v9146_v54  ;;  %18371 = vmatmul.msk.bf16.gmra.mxu2 %vm647_vm1, %v10728_v63  ;;  %v19601_v12 = vld [vmem:[%s20304_s11 + $0x1b8] sm:$0xff] }
 0x86c   : > { %18711 = vmatmul.msk.bf16.gmra.mxu3 %vm647_vm1, %v12661_v51  ;;  %19051 = vmatmul.msk.bf16.gmra.mxu0 %vm647_vm1, %v14377_v53  ;;  %v12672_v43 = vshrl.u32 %v19601_v12, 16  ;;  %v12675_v20 = vshll.u32 %v19601_v12, 16  ;;  %v19669_v42 = vld [vmem:[%s20304_s11 + $0x1b8] sm:$0xff]  ;;  %v10731_v51 = vrot.slane %v19533_v27, 2 }
 0x86d   : > { %v15599_v13 = vadd.f32 %v22810_v40, %v15187_v47  ;;  %v23591_v12 = vld [vmem:[#allocation57_spill] sm:$0xff] }
 0x86e   : > { %v11183_v19 = vpop.f32.mrf.mxu2  ;;  %v12674_v63 = vrot.slane %v12672_v43, 2  ;;  %v12677_v23 = vrot.slane %v12675_v20, 3 }
 0x86f   : > { %v19884_v57 = vpack.c.bf16 %v15599_v13, %v15598_v5  ;;  %v13249_v59 = vpop.f32.mrf.mxu3  ;;  %v11539_v38 = vadd.f32 %v11183_v19, %v9957_v62  ;;  %v14380_v13 = vrot.slane %v19669_v42, 3  ;;  %v10732_v62 = vsel %vm9047_vm5, %v10729_v48, %v10731_v51 }
 0x870   : > { %v9603_v56 = vpop.f32.mrf.mxu1  ;;  %v12678_v5 = vor.u32 %v12677_v23, %v12674_v63 }
 0x871   : > { %20064 = vst [vmem:[%s22137_s6 + $0x138] sm:$0xff] %v19884_v57   ;;  %v14834_v39 = vpop.f32.mrf.mxu0  ;;  %v13605_v30 = vadd.f32 %v13249_v59, %v11539_v38  ;;  %v9958_v44 = vadd.f32 %v9603_v56, %v23587_v33  ;;  %v14381_v38 = vsel %vm14278_vm7, %v14378_v7, %v14380_v13 }
 0x872   : > { %v12679_v15 = vsel %vm12212_vm6, %v12669_v18, %v12678_v5 }
 0x873   : > { %v15188_v58 = vadd.f32 %v14832_v61, %v13605_v30  ;;  %v9149_v61 = vrot.slane %v19465_v6, 2 }
 0x875   : > { %v15600_v31 = vadd.f32 %v22810_v40, %v15188_v58  ;;  %v9150_v49 = vsel %vm9047_vm5, %v9147_v9, %v9149_v61 }
 0x876   : > { %v11185_v26 = vpop.f32.mrf.mxu2 }
 0x877   : > { %v11540_v0 = vadd.f32 %v11185_v26, %v9958_v44  ;;  %v13251_v50 = vpop.f32.mrf.mxu3  ;;  %v23590_v44 = vld [vmem:[#allocation54_spill] sm:$0xff] }
 0x878   : > { %v9606_v3 = vpop.f32.mrf.mxu1 }
 0x879   : > { %v13606_v45 = vadd.f32 %v13251_v50, %v11540_v0  ;;  %v14837_v55 = vpop.f32.mrf.mxu0  ;;  %v9959_v36 = vadd.f32 %v9606_v3, %v23588_v22  ;;  %v19466_v0 = vld [vmem:[%s20304_s11 + $0x1b0] sm:$0xff]  ;;  %v19534_v50 = vld [vmem:[%s20304_s11 + $0x1c0] sm:$0xff] }
 0x87b   : > { %v15189_v2 = vadd.f32 %v14834_v39, %v13606_v45  ;;  %18032 = vmatmul.msk.bf16.gmra.mxu1 %vm647_vm1, %v9148_v14  ;;  %18372 = vmatmul.msk.bf16.gmra.mxu2 %vm647_vm1, %v10730_v8  ;;  %v19602_v39 = vld [vmem:[%s20304_s11 + $0x1c0] sm:$0xff] }
 0x87c   : > { %18712 = vmatmul.msk.bf16.gmra.mxu3 %vm647_vm1, %v12670_v52  ;;  %19052 = vmatmul.msk.bf16.gmra.mxu0 %vm647_vm1, %v14379_v46  ;;  %v12681_v9 = vshrl.u32 %v19602_v39, 16  ;;  %v12684_v48 = vshll.u32 %v19602_v39, 16  ;;  %v19670_v45 = vld [vmem:[%s20304_s11 + $0x1c0] sm:$0xff]  ;;  %v10733_v52 = vrot.slane %v19534_v50, 2  ;;  %v23593_v39 = vld [vmem:[#allocation63_spill] sm:$0xff] }
 0x87d   : > { %v15601_v35 = vadd.f32 %v22810_v40, %v15189_v2 }
 0x87e   : > { %v11188_v17 = vpop.f32.mrf.mxu2  ;;  %v12683_v8 = vrot.slane %v12681_v9, 2  ;;  %v12686_v58 = vrot.slane %v12684_v48, 3 }
 0x87f   : > { %v19889_v28 = vpack.c.bf16 %v15601_v35, %v15600_v31  ;;  %v13254_v29 = vpop.f32.mrf.mxu3  ;;  %v11541_v10 = vadd.f32 %v11188_v17, %v9959_v36  ;;  %v14382_v35 = vrot.slane %v19670_v45, 3  ;;  %v10734_v36 = vsel %vm9047_vm5, %v10731_v51, %v10733_v52 }
 0x880   : > { %v9608_v34 = vpop.f32.mrf.mxu1  ;;  %v12687_v31 = vor.u32 %v12686_v58, %v12683_v8 }
 0x881   : > { %20065 = vst [vmem:[%s22137_s6 + $0x140] sm:$0xff] %v19889_v28   ;;  %v14839_v54 = vpop.f32.mrf.mxu0  ;;  %v13607_v53 = vadd.f32 %v13254_v29, %v11541_v10  ;;  %v9960_v47 = vadd.f32 %v9608_v34, %v23589_v37  ;;  %v14383_v10 = vsel %vm14278_vm7, %v14380_v13, %v14382_v35 }
 0x882   : > { %v12688_v27 = vsel %vm12212_vm6, %v12678_v5, %v12687_v31 }
 0x883   : > { %v15190_v59 = vadd.f32 %v14837_v55, %v13607_v53  ;;  %v9151_v55 = vrot.slane %v19466_v0, 2 }
 0x885   : > { %v15602_v11 = vadd.f32 %v22810_v40, %v15190_v59  ;;  %v9152_v22 = vsel %vm9047_vm5, %v9149_v61, %v9151_v55 }
 0x886   : > { %v11190_v1 = vpop.f32.mrf.mxu2 }
 0x887   : > { %v11542_v41 = vadd.f32 %v11190_v1, %v9960_v47  ;;  %v13256_v19 = vpop.f32.mrf.mxu3  ;;  %v23592_v47 = vld [vmem:[#allocation60_spill] sm:$0xff] }
 0x888   : > { %v9611_v57 = vpop.f32.mrf.mxu1 }
 0x889   : > { %v13608_v56 = vadd.f32 %v13256_v19, %v11542_v41  ;;  %v14842_v4 = vpop.f32.mrf.mxu0  ;;  %v9961_v18 = vadd.f32 %v9611_v57, %v23590_v44  ;;  %v19467_v41 = vld [vmem:[%s20304_s11 + $0x1b8] sm:$0xff]  ;;  %v19535_v19 = vld [vmem:[%s20304_s11 + $0x1c8] sm:$0xff] }
 0x88b   : > { %v15191_v32 = vadd.f32 %v14839_v54, %v13608_v56  ;;  %18033 = vmatmul.msk.bf16.gmra.mxu1 %vm647_vm1, %v9150_v49  ;;  %18373 = vmatmul.msk.bf16.gmra.mxu2 %vm647_vm1, %v10732_v62  ;;  %v19603_v54 = vld [vmem:[%s20304_s11 + $0x1c8] sm:$0xff] }
 0x88c   : > { %18713 = vmatmul.msk.bf16.gmra.mxu3 %vm647_vm1, %v12679_v15  ;;  %19053 = vmatmul.msk.bf16.gmra.mxu0 %vm647_vm1, %v14381_v38  ;;  %v12690_v61 = vshrl.u32 %v19603_v54, 16  ;;  %v12693_v51 = vshll.u32 %v19603_v54, 16  ;;  %v19671_v56 = vld [vmem:[%s20304_s11 + $0x1c8] sm:$0xff]  ;;  %v10735_v15 = vrot.slane %v19535_v19, 2  ;;  %v23595_v54 = vld [vmem:[#allocation69_spill] sm:$0xff] }
 0x88d   : > { %v15603_v24 = vadd.f32 %v22810_v40, %v15191_v32 }
 0x88e   : > { %v11193_v30 = vpop.f32.mrf.mxu2  ;;  %v12692_v62 = vrot.slane %v12690_v61, 2  ;;  %v12695_v59 = vrot.slane %v12693_v51, 3 }
 0x88f   : > { %v19894_v33 = vpack.c.bf16 %v15603_v24, %v15602_v11  ;;  %v13259_v7 = vpop.f32.mrf.mxu3  ;;  %v11543_v3 = vadd.f32 %v11193_v30, %v9961_v18  ;;  %v14384_v24 = vrot.slane %v19671_v56, 3  ;;  %v10736_v18 = vsel %vm9047_vm5, %v10733_v52, %v10735_v15 }
 0x890   : > { %v9613_v26 = vpop.f32.mrf.mxu1  ;;  %v12696_v11 = vor.u32 %v12695_v59, %v12692_v62 }
 0x891   : > { %20066 = vst [vmem:[%s22137_s6 + $0x148] sm:$0xff] %v19894_v33   ;;  %v14844_v14 = vpop.f32.mrf.mxu0  ;;  %v13609_v46 = vadd.f32 %v13259_v7, %v11543_v3  ;;  %v9962_v2 = vadd.f32 %v9613_v26, %v23591_v12  ;;  %v14385_v3 = vsel %vm14278_vm7, %v14382_v35, %v14384_v24 }
 0x892   : > { %v12697_v50 = vsel %vm12212_vm6, %v12687_v31, %v12696_v11 }
 0x893   : > { %v15192_v29 = vadd.f32 %v14842_v4, %v13609_v46  ;;  %v9153_v4 = vrot.slane %v19467_v41, 2 }
 0x895   : > { %v15604_v23 = vadd.f32 %v22810_v40, %v15192_v29  ;;  %v9154_v44 = vsel %vm9047_vm5, %v9151_v55, %v9153_v4 }
 0x896   : > { %v11195_v43 = vpop.f32.mrf.mxu2 }
 0x897   : > { %v11544_v20 = vadd.f32 %v11195_v43, %v9962_v2  ;;  %v13261_v17 = vpop.f32.mrf.mxu3  ;;  %v23594_v2 = vld [vmem:[#allocation66_spill] sm:$0xff] }
 0x898   : > { %v9616_v28 = vpop.f32.mrf.mxu1 }
 0x899   : > { %v13610_v34 = vadd.f32 %v13261_v17, %v11544_v20  ;;  %v14847_v6 = vpop.f32.mrf.mxu0  ;;  %v9963_v5 = vadd.f32 %v9616_v28, %v23592_v47  ;;  %v19468_v20 = vld [vmem:[%s20304_s11 + $0x1c0] sm:$0xff]  ;;  %v19536_v17 = vld [vmem:[%s20304_s11 + $0x1d0] sm:$0xff] }
 0x89b   : > { %v15193_v63 = vadd.f32 %v14844_v14, %v13610_v34  ;;  %18034 = vmatmul.msk.bf16.gmra.mxu1 %vm647_vm1, %v9152_v22  ;;  %18374 = vmatmul.msk.bf16.gmra.mxu2 %vm647_vm1, %v10734_v36  ;;  %v19604_v14 = vld [vmem:[%s20304_s11 + $0x1d0] sm:$0xff] }
 0x89c   : > { %18714 = vmatmul.msk.bf16.gmra.mxu3 %vm647_vm1, %v12688_v27  ;;  %19054 = vmatmul.msk.bf16.gmra.mxu0 %vm647_vm1, %v14383_v10  ;;  %v12699_v55 = vshrl.u32 %v19604_v14, 16  ;;  %v12702_v52 = vshll.u32 %v19604_v14, 16  ;;  %v19672_v34 = vld [vmem:[%s20304_s11 + $0x1d0] sm:$0xff]  ;;  %v10737_v27 = vrot.slane %v19536_v17, 2  ;;  %v23597_v14 = vld [vmem:[#allocation75_spill] sm:$0xff] }
 0x89d   : > { %v15605_v42 = vadd.f32 %v22810_v40, %v15193_v63 }
 0x89e   : > { %v11198_v53 = vpop.f32.mrf.mxu2  ;;  %v12701_v36 = vrot.slane %v12699_v55, 2  ;;  %v12704_v29 = vrot.slane %v12702_v52, 3 }
 0x89f   : > { %v19899_v37 = vpack.c.bf16 %v15605_v42, %v15604_v23  ;;  %v13264_v13 = vpop.f32.mrf.mxu3  ;;  %v11545_v57 = vadd.f32 %v11198_v53, %v9963_v5  ;;  %v14386_v42 = vrot.slane %v19672_v34, 3  ;;  %v10738_v5 = vsel %vm9047_vm5, %v10735_v15, %v10737_v27 }
 0x8a0   : > { %v9618_v1 = vpop.f32.mrf.mxu1  ;;  %v12705_v23 = vor.u32 %v12704_v29, %v12701_v36 }
 0x8a1   : > { %20067 = vst [vmem:[%s22137_s6 + $0x150] sm:$0xff] %v19899_v37   ;;  %v14849_v49 = vpop.f32.mrf.mxu0  ;;  %v13611_v38 = vadd.f32 %v13264_v13, %v11545_v57  ;;  %v9964_v32 = vadd.f32 %v9618_v1, %v23593_v39  ;;  %v14387_v57 = vsel %vm14278_vm7, %v14384_v24, %v14386_v42 }
 0x8a2   : > { %v12706_v19 = vsel %vm12212_vm6, %v12696_v11, %v12705_v23 }
 0x8a3   : > { %v15194_v7 = vadd.f32 %v14847_v6, %v13611_v38  ;;  %v9155_v6 = vrot.slane %v19468_v20, 2 }
 0x8a5   : > { %v15606_v58 = vadd.f32 %v22810_v40, %v15194_v7  ;;  %v9156_v47 = vsel %vm9047_vm5, %v9153_v4, %v9155_v6 }
 0x8a6   : > { %v11200_v9 = vpop.f32.mrf.mxu2 }
 0x8a7   : > { %v11546_v48 = vadd.f32 %v11200_v9, %v9964_v32  ;;  %v13266_v30 = vpop.f32.mrf.mxu3  ;;  %v23596_v32 = vld [vmem:[#allocation72_spill] sm:$0xff] }
 0x8a8   : > { %v9621_v33 = vpop.f32.mrf.mxu1 }
 0x8a9   : > { %v13612_v26 = vadd.f32 %v13266_v30, %v11546_v48  ;;  %v14852_v0 = vpop.f32.mrf.mxu0  ;;  %v9965_v31 = vadd.f32 %v9621_v33, %v23594_v2  ;;  %v19469_v48 = vld [vmem:[%s20304_s11 + $0x1c8] sm:$0xff]  ;;  %v19537_v30 = vld [vmem:[%s20304_s11 + $0x1d8] sm:$0xff] }
 0x8ab   : > { %v15195_v8 = vadd.f32 %v14849_v49, %v13612_v26  ;;  %18035 = vmatmul.msk.bf16.gmra.mxu1 %vm647_vm1, %v9154_v44  ;;  %18375 = vmatmul.msk.bf16.gmra.mxu2 %vm647_vm1, %v10736_v18  ;;  %v19605_v49 = vld [vmem:[%s20304_s11 + $0x1d8] sm:$0xff] }
 0x8ac   : > { %18715 = vmatmul.msk.bf16.gmra.mxu3 %vm647_vm1, %v12697_v50  ;;  %19055 = vmatmul.msk.bf16.gmra.mxu0 %vm647_vm1, %v14385_v3  ;;  %v12708_v4 = vshrl.u32 %v19605_v49, 16  ;;  %v12711_v15 = vshll.u32 %v19605_v49, 16  ;;  %v19673_v26 = vld [vmem:[%s20304_s11 + $0x1d8] sm:$0xff]  ;;  %v10739_v50 = vrot.slane %v19537_v30, 2 }
 0x8ad   : > { %v15607_v45 = vadd.f32 %v22810_v40, %v15195_v8  ;;  %v23599_v49 = vld [vmem:[#allocation81_spill] sm:$0xff] }
 0x8ae   : > { %v11203_v46 = vpop.f32.mrf.mxu2  ;;  %v12710_v18 = vrot.slane %v12708_v4, 2  ;;  %v12713_v7 = vrot.slane %v12711_v15, 3 }
 0x8af   : > { %v19904_v12 = vpack.c.bf16 %v15607_v45, %v15606_v58  ;;  %v13269_v35 = vpop.f32.mrf.mxu3  ;;  %v11547_v28 = vadd.f32 %v11203_v46, %v9965_v31  ;;  %v14388_v45 = vrot.slane %v19673_v26, 3  ;;  %v10740_v31 = vsel %vm9047_vm5, %v10737_v27, %v10739_v50 }
 0x8b0   : > { %v9623_v43 = vpop.f32.mrf.mxu1  ;;  %v12714_v58 = vor.u32 %v12713_v7, %v12710_v18 }
 0x8b1   : > { %20068 = vst [vmem:[%s22137_s6 + $0x158] sm:$0xff] %v19904_v12   ;;  %v14854_v22 = vpop.f32.mrf.mxu0  ;;  %v13613_v10 = vadd.f32 %v13269_v35, %v11547_v28  ;;  %v9966_v63 = vadd.f32 %v9623_v43, %v23595_v54  ;;  %v14389_v28 = vsel %vm14278_vm7, %v14386_v42, %v14388_v45 }
 0x8b2   : > { %v12715_v17 = vsel %vm12212_vm6, %v12705_v23, %v12714_v58 }
 0x8b3   : > { %v15196_v13 = vadd.f32 %v14852_v0, %v13613_v10  ;;  %v9157_v0 = vrot.slane %v19469_v48, 2 }
 0x8b5   : > { %v15608_v59 = vadd.f32 %v22810_v40, %v15196_v13  ;;  %v9158_v2 = vsel %vm9047_vm5, %v9155_v6, %v9157_v0 }
 0x8b6   : > { %v11205_v61 = vpop.f32.mrf.mxu2 }
 0x8b7   : > { %v11548_v51 = vadd.f32 %v11205_v61, %v9966_v63  ;;  %v13271_v53 = vpop.f32.mrf.mxu3  ;;  %v23598_v63 = vld [vmem:[#allocation78_spill] sm:$0xff] }
 0x8b8   : > { %v9626_v37 = vpop.f32.mrf.mxu1 }
 0x8b9   : > { %v13614_v1 = vadd.f32 %v13271_v53, %v11548_v51  ;;  %v14857_v41 = vpop.f32.mrf.mxu0  ;;  %v9967_v11 = vadd.f32 %v9626_v37, %v23596_v32  ;;  %v19470_v51 = vld [vmem:[%s20304_s11 + $0x1d0] sm:$0xff]  ;;  %v19538_v53 = vld [vmem:[%s20304_s11 + $0x1e0] sm:$0xff] }
 0x8bb   : > { %v15197_v62 = vadd.f32 %v14854_v22, %v13614_v1  ;;  %18036 = vmatmul.msk.bf16.gmra.mxu1 %vm647_vm1, %v9156_v47  ;;  %18376 = vmatmul.msk.bf16.gmra.mxu2 %vm647_vm1, %v10738_v5  ;;  %v19606_v22 = vld [vmem:[%s20304_s11 + $0x1e0] sm:$0xff] }
 0x8bc   : > { %18716 = vmatmul.msk.bf16.gmra.mxu3 %vm647_vm1, %v12706_v19  ;;  %19056 = vmatmul.msk.bf16.gmra.mxu0 %vm647_vm1, %v14387_v57  ;;  %v12717_v6 = vshrl.u32 %v19606_v22, 16  ;;  %v12720_v27 = vshll.u32 %v19606_v22, 16  ;;  %v19674_v1 = vld [vmem:[%s20304_s11 + $0x1e0] sm:$0xff]  ;;  %v10741_v19 = vrot.slane %v19538_v53, 2  ;;  %v23601_v22 = vld [vmem:[#allocation87_spill] sm:$0xff] }
 0x8bd   : > { %v15609_v56 = vadd.f32 %v22810_v40, %v15197_v62 }
 0x8be   : > { %v11208_v38 = vpop.f32.mrf.mxu2  ;;  %v12719_v5 = vrot.slane %v12717_v6, 2  ;;  %v12722_v13 = vrot.slane %v12720_v27, 3 }
 0x8bf   : > { %v19909_v39 = vpack.c.bf16 %v15609_v56, %v15608_v59  ;;  %v13274_v24 = vpop.f32.mrf.mxu3  ;;  %v11549_v33 = vadd.f32 %v11208_v38, %v9967_v11  ;;  %v14390_v56 = vrot.slane %v19674_v1, 3  ;;  %v10742_v11 = vsel %vm9047_vm5, %v10739_v50, %v10741_v19 }
 0x8c0   : > { %v9628_v9 = vpop.f32.mrf.mxu1  ;;  %v12723_v59 = vor.u32 %v12722_v13, %v12719_v5 }
 0x8c1   : > { %20069 = vst [vmem:[%s22137_s6 + $0x160] sm:$0xff] %v19909_v39   ;;  %v14859_v44 = vpop.f32.mrf.mxu0  ;;  %v13615_v3 = vadd.f32 %v13274_v24, %v11549_v33  ;;  %v9968_v8 = vadd.f32 %v9628_v9, %v23597_v14  ;;  %v14391_v33 = vsel %vm14278_vm7, %v14388_v45, %v14390_v56 }
 0x8c2   : > { %v12724_v30 = vsel %vm12212_vm6, %v12714_v58, %v12723_v59 }
 0x8c3   : > { %v15198_v35 = vadd.f32 %v14857_v41, %v13615_v3  ;;  %v9159_v41 = vrot.slane %v19470_v51, 2 }
 0x8c5   : > { %v15610_v29 = vadd.f32 %v22810_v40, %v15198_v35  ;;  %v9160_v32 = vsel %vm9047_vm5, %v9157_v0, %v9159_v41 }
 0x8c6   : > { %v11210_v55 = vpop.f32.mrf.mxu2 }
 0x8c7   : > { %v11550_v52 = vadd.f32 %v11210_v55, %v9968_v8  ;;  %v13276_v46 = vpop.f32.mrf.mxu3  ;;  %v23600_v8 = vld [vmem:[#allocation84_spill] sm:$0xff] }
 0x8c8   : > { %v9631_v12 = vpop.f32.mrf.mxu1 }
 0x8c9   : > { %v13616_v43 = vadd.f32 %v13276_v46, %v11550_v52  ;;  %v14862_v20 = vpop.f32.mrf.mxu0  ;;  %v9969_v23 = vadd.f32 %v9631_v12, %v23598_v63  ;;  %v19471_v52 = vld [vmem:[%s20304_s11 + $0x1d8] sm:$0xff]  ;;  %v19539_v46 = vld [vmem:[%s20304_s11 + $0x1e8] sm:$0xff] }
 0x8cb   : > { %v15199_v36 = vadd.f32 %v14859_v44, %v13616_v43  ;;  %18037 = vmatmul.msk.bf16.gmra.mxu1 %vm647_vm1, %v9158_v2  ;;  %18377 = vmatmul.msk.bf16.gmra.mxu2 %vm647_vm1, %v10740_v31  ;;  %v19607_v44 = vld [vmem:[%s20304_s11 + $0x1e8] sm:$0xff] }
 0x8cc   : > { %18717 = vmatmul.msk.bf16.gmra.mxu3 %vm647_vm1, %v12715_v17  ;;  %19057 = vmatmul.msk.bf16.gmra.mxu0 %vm647_vm1, %v14389_v28  ;;  %v12726_v0 = vshrl.u32 %v19607_v44, 16  ;;  %v12729_v50 = vshll.u32 %v19607_v44, 16  ;;  %v19675_v43 = vld [vmem:[%s20304_s11 + $0x1e8] sm:$0xff]  ;;  %v10743_v17 = vrot.slane %v19539_v46, 2  ;;  %v23603_v44 = vld [vmem:[#allocation93_spill] sm:$0xff] }
 0x8cd   : > { %v15611_v34 = vadd.f32 %v22810_v40, %v15199_v36 }
 0x8ce   : > { %v11213_v10 = vpop.f32.mrf.mxu2  ;;  %v12728_v31 = vrot.slane %v12726_v0, 2  ;;  %v12731_v35 = vrot.slane %v12729_v50, 3 }
 0x8cf   : > { %v19914_v54 = vpack.c.bf16 %v15611_v34, %v15610_v29  ;;  %v13279_v42 = vpop.f32.mrf.mxu3  ;;  %v11551_v37 = vadd.f32 %v11213_v10, %v9969_v23  ;;  %v14392_v34 = vrot.slane %v19675_v43, 3  ;;  %v10744_v23 = vsel %vm9047_vm5, %v10741_v19, %v10743_v17 }
 0x8d0   : > { %v9633_v61 = vpop.f32.mrf.mxu1  ;;  %v12732_v29 = vor.u32 %v12731_v35, %v12728_v31 }
 0x8d1   : > { %20070 = vst [vmem:[%s22137_s6 + $0x168] sm:$0xff] %v19914_v54   ;;  %v14864_v47 = vpop.f32.mrf.mxu0  ;;  %v13617_v57 = vadd.f32 %v13279_v42, %v11551_v37  ;;  %v9970_v62 = vadd.f32 %v9633_v61, %v23599_v49  ;;  %v14393_v37 = vsel %vm14278_vm7, %v14390_v56, %v14392_v34 }
 0x8d2   : > { %v12733_v53 = vsel %vm12212_vm6, %v12723_v59, %v12732_v29 }
 0x8d3   : > { %v15200_v24 = vadd.f32 %v14862_v20, %v13617_v57  ;;  %v9161_v20 = vrot.slane %v19471_v52, 2 }
 0x8d5   : > { %v15612_v7 = vadd.f32 %v22810_v40, %v15200_v24  ;;  %v9162_v63 = vsel %vm9047_vm5, %v9159_v41, %v9161_v20 }
 0x8d6   : > { %v11215_v4 = vpop.f32.mrf.mxu2 }
 0x8d7   : > { %v11552_v15 = vadd.f32 %v11215_v4, %v9970_v62  ;;  %v13281_v38 = vpop.f32.mrf.mxu3  ;;  %v23602_v62 = vld [vmem:[#allocation90_spill] sm:$0xff] }
 0x8d8   : > { %v9636_v39 = vpop.f32.mrf.mxu1 }
 0x8d9   : > { %v13618_v9 = vadd.f32 %v13281_v38, %v11552_v15  ;;  %v14867_v48 = vpop.f32.mrf.mxu0  ;;  %v9971_v58 = vadd.f32 %v9636_v39, %v23600_v8  ;;  %v19472_v15 = vld [vmem:[%s20304_s11 + $0x1e0] sm:$0xff]  ;;  %v19540_v38 = vld [vmem:[%s20304_s11 + $0x1f0] sm:$0xff] }
 0x8db   : > { %v15201_v18 = vadd.f32 %v14864_v47, %v13618_v9  ;;  %18038 = vmatmul.msk.bf16.gmra.mxu1 %vm647_vm1, %v9160_v32  ;;  %18378 = vmatmul.msk.bf16.gmra.mxu2 %vm647_vm1, %v10742_v11  ;;  %v19608_v47 = vld [vmem:[%s20304_s11 + $0x1f0] sm:$0xff] }
 0x8dc   : > { %18718 = vmatmul.msk.bf16.gmra.mxu3 %vm647_vm1, %v12724_v30  ;;  %19058 = vmatmul.msk.bf16.gmra.mxu0 %vm647_vm1, %v14391_v33  ;;  %v12735_v41 = vshrl.u32 %v19608_v47, 16  ;;  %v12738_v19 = vshll.u32 %v19608_v47, 16  ;;  %v19676_v9 = vld [vmem:[%s20304_s11 + $0x1f0] sm:$0xff]  ;;  %v10745_v30 = vrot.slane %v19540_v38, 2  ;;  %v23605_v47 = vld [vmem:[#allocation99_spill] sm:$0xff] }
 0x8dd   : > { %v15613_v26 = vadd.f32 %v22810_v40, %v15201_v18 }
 0x8de   : > { %v11218_v3 = vpop.f32.mrf.mxu2  ;;  %v12737_v11 = vrot.slane %v12735_v41, 2  ;;  %v12740_v24 = vrot.slane %v12738_v19, 3 }
 0x8df   : > { %v19919_v14 = vpack.c.bf16 %v15613_v26, %v15612_v7  ;;  %v13284_v45 = vpop.f32.mrf.mxu3  ;;  %v11553_v12 = vadd.f32 %v11218_v3, %v9971_v58  ;;  %v14394_v26 = vrot.slane %v19676_v9, 3  ;;  %v10746_v58 = vsel %vm9047_vm5, %v10743_v17, %v10745_v30 }
 0x8e0   : > { %v9638_v55 = vpop.f32.mrf.mxu1  ;;  %v12741_v7 = vor.u32 %v12740_v24, %v12737_v11 }
 0x8e1   : > { %20071 = vst [vmem:[%s22137_s6 + $0x170] sm:$0xff] %v19919_v14   ;;  %v14869_v2 = vpop.f32.mrf.mxu0  ;;  %v13619_v28 = vadd.f32 %v13284_v45, %v11553_v12  ;;  %v9972_v36 = vadd.f32 %v9638_v55, %v23601_v22  ;;  %v14395_v12 = vsel %vm14278_vm7, %v14392_v34, %v14394_v26 }
 0x8e2   : > { %v12742_v46 = vsel %vm12212_vm6, %v12732_v29, %v12741_v7 }
 0x8e3   : > { %v15202_v42 = vadd.f32 %v14867_v48, %v13619_v28  ;;  %v9163_v48 = vrot.slane %v19472_v15, 2 }
 0x8e5   : > { %v15614_v13 = vadd.f32 %v22810_v40, %v15202_v42  ;;  %v9164_v8 = vsel %vm9047_vm5, %v9161_v20, %v9163_v48 }
 0x8e6   : > { %v11220_v6 = vpop.f32.mrf.mxu2 }
 0x8e7   : > { %v11554_v27 = vadd.f32 %v11220_v6, %v9972_v36  ;;  %v13286_v10 = vpop.f32.mrf.mxu3  ;;  %v23604_v36 = vld [vmem:[#allocation96_spill] sm:$0xff] }
 0x8e8   : > { %v9641_v54 = vpop.f32.mrf.mxu1 }
 0x8e9   : > { %v13620_v61 = vadd.f32 %v13286_v10, %v11554_v27  ;;  %v14872_v51 = vpop.f32.mrf.mxu0  ;;  %v9973_v59 = vadd.f32 %v9641_v54, %v23602_v62  ;;  %v19473_v27 = vld [vmem:[%s20304_s11 + $0x1e8] sm:$0xff]  ;;  %v19541_v10 = vld [vmem:[%s20304_s11 + $0x1f8] sm:$0xff] }
 0x8eb   : > { %v15203_v5 = vadd.f32 %v14869_v2, %v13620_v61  ;;  %18039 = vmatmul.msk.bf16.gmra.mxu1 %vm647_vm1, %v9162_v63  ;;  %18379 = vmatmul.msk.bf16.gmra.mxu2 %vm647_vm1, %v10744_v23  ;;  %v19609_v2 = vld [vmem:[%s20304_s11 + $0x1f8] sm:$0xff] }
 0x8ec   : > { %18719 = vmatmul.msk.bf16.gmra.mxu3 %vm647_vm1, %v12733_v53  ;;  %19059 = vmatmul.msk.bf16.gmra.mxu0 %vm647_vm1, %v14393_v37  ;;  %v12744_v20 = vshrl.u32 %v19609_v2, 16  ;;  %v12747_v17 = vshll.u32 %v19609_v2, 16  ;;  %v19677_v61 = vld [vmem:[%s20304_s11 + $0x1f8] sm:$0xff]  ;;  %v10747_v53 = vrot.slane %v19541_v10, 2 }
 0x8ed   : > { %v15615_v1 = vadd.f32 %v22810_v40, %v15203_v5  ;;  %v23607_v2 = vld [vmem:[#allocation105_spill] sm:$0xff] }
 0x8ee   : > { %v11223_v57 = vpop.f32.mrf.mxu2  ;;  %v12746_v23 = vrot.slane %v12744_v20, 2  ;;  %v12749_v42 = vrot.slane %v12747_v17, 3 }
 0x8ef   : > { %v19924_v49 = vpack.c.bf16 %v15615_v1, %v15614_v13  ;;  %v13289_v56 = vpop.f32.mrf.mxu3  ;;  %v11555_v39 = vadd.f32 %v11223_v57, %v9973_v59  ;;  %v14396_v1 = vrot.slane %v19677_v61, 3  ;;  %v10748_v59 = vsel %vm9047_vm5, %v10745_v30, %v10747_v53 }
 0x8f0   : > { %v9643_v4 = vpop.f32.mrf.mxu1  ;;  %v12750_v13 = vor.u32 %v12749_v42, %v12746_v23 }
 0x8f1   : > { %20072 = vst [vmem:[%s22137_s6 + $0x178] sm:$0xff] %v19924_v49   ;;  %v14874_v32 = vpop.f32.mrf.mxu0  ;;  %v13621_v33 = vadd.f32 %v13289_v56, %v11555_v39  ;;  %v9974_v18 = vadd.f32 %v9643_v4, %v23603_v44  ;;  %v14397_v39 = vsel %vm14278_vm7, %v14394_v26, %v14396_v1 }
 0x8f2   : > { %v12751_v38 = vsel %vm12212_vm6, %v12741_v7, %v12750_v13 }
 0x8f3   : > { %v15204_v45 = vadd.f32 %v14872_v51, %v13621_v33  ;;  %v9165_v51 = vrot.slane %v19473_v27, 2 }
 0x8f5   : > { %v15616_v35 = vadd.f32 %v22810_v40, %v15204_v45  ;;  %v9166_v62 = vsel %vm9047_vm5, %v9163_v48, %v9165_v51 }
 0x8f6   : > { %v11225_v0 = vpop.f32.mrf.mxu2 }
 0x8f7   : > { %v11556_v50 = vadd.f32 %v11225_v0, %v9974_v18  ;;  %v13291_v3 = vpop.f32.mrf.mxu3  ;;  %v23606_v18 = vld [vmem:[#allocation102_spill] sm:$0xff] }
 0x8f8   : > { %v9646_v14 = vpop.f32.mrf.mxu1 }
 0x8f9   : > { %v13622_v55 = vadd.f32 %v13291_v3, %v11556_v50  ;;  %v14877_v52 = vpop.f32.mrf.mxu0  ;;  %v9975_v29 = vadd.f32 %v9646_v14, %v23604_v36  ;;  %v19474_v50 = vld [vmem:[%s20304_s11 + $0x1f0] sm:$0xff]  ;;  %v19542_v3 = vld [vmem:[%s20304_s11 + $0x200] sm:$0xff] }
 0x8fb   : > { %v15205_v31 = vadd.f32 %v14874_v32, %v13622_v55  ;;  %18040 = vmatmul.msk.bf16.gmra.mxu1 %vm647_vm1, %v9164_v8  ;;  %18380 = vmatmul.msk.bf16.gmra.mxu2 %vm647_vm1, %v10746_v58  ;;  %v19610_v32 = vld [vmem:[%s20304_s11 + $0x200] sm:$0xff] }
 0x8fc   : > { %18720 = vmatmul.msk.bf16.gmra.mxu3 %vm647_vm1, %v12742_v46  ;;  %19060 = vmatmul.msk.bf16.gmra.mxu0 %vm647_vm1, %v14395_v12  ;;  %v12753_v48 = vshrl.u32 %v19610_v32, 16  ;;  %v12756_v30 = vshll.u32 %v19610_v32, 16  ;;  %v19678_v55 = vld [vmem:[%s20304_s11 + $0x200] sm:$0xff]  ;;  %v10749_v46 = vrot.slane %v19542_v3, 2 }
 0x8fd   : > { %v15617_v43 = vadd.f32 %v22810_v40, %v15205_v31  ;;  %v23609_v32 = vld [vmem:[#allocation10_spill] sm:$0xff] }
 0x8fe   : > { %v11228_v28 = vpop.f32.mrf.mxu2  ;;  %v12755_v58 = vrot.slane %v12753_v48, 2  ;;  %v12758_v45 = vrot.slane %v12756_v30, 3 }
 0x8ff   : > { %v19929_v22 = vpack.c.bf16 %v15617_v43, %v15616_v35  ;;  %v13294_v34 = vpop.f32.mrf.mxu3  ;;  %v11557_v54 = vadd.f32 %v11228_v28, %v9975_v29  ;;  %v14398_v43 = vrot.slane %v19678_v55, 3  ;;  %v10750_v29 = vsel %vm9047_vm5, %v10747_v53, %v10749_v46 }
 0x900   : > { %v9648_v6 = vpop.f32.mrf.mxu1  ;;  %v12759_v35 = vor.u32 %v12758_v45, %v12755_v58 }
 0x901   : > { %20073 = vst [vmem:[%s22137_s6 + $0x180] sm:$0xff] %v19929_v22   ;;  %v14879_v63 = vpop.f32.mrf.mxu0  ;;  %v13623_v37 = vadd.f32 %v13294_v34, %v11557_v54  ;;  %v9976_v5 = vadd.f32 %v9648_v6, %v23605_v47  ;;  %v14399_v54 = vsel %vm14278_vm7, %v14396_v1, %v14398_v43 }
 0x902   : > { %v12760_v10 = vsel %vm12212_vm6, %v12750_v13, %v12759_v35 }
 0x903   : > { %v15206_v56 = vadd.f32 %v14877_v52, %v13623_v37  ;;  %v9167_v52 = vrot.slane %v19474_v50, 2 }
 0x905   : > { %v15618_v24 = vadd.f32 %v22810_v40, %v15206_v56  ;;  %v9168_v36 = vsel %vm9047_vm5, %v9165_v51, %v9167_v52 }
 0x906   : > { %v11230_v41 = vpop.f32.mrf.mxu2 }
 0x907   : > { %v11558_v19 = vadd.f32 %v11230_v41, %v9976_v5  ;;  %v13296_v57 = vpop.f32.mrf.mxu3  ;;  %v23608_v5 = vld [vmem:[#allocation7_spill] sm:$0xff] }
 0x908   : > { %v9651_v49 = vpop.f32.mrf.mxu1 }
 0x909   : > { %v13624_v4 = vadd.f32 %v13296_v57, %v11558_v19  ;;  %v14882_v15 = vpop.f32.mrf.mxu0  ;;  %v9977_v7 = vadd.f32 %v9651_v49, %v23606_v18  ;;  %v19475_v19 = vld [vmem:[%s20304_s11 + $0x1f8] sm:$0xff]  ;;  %v19543_v57 = vld [vmem:[%s20304_s11 + $0x208] sm:$0xff] }
 0x90b   : > { %v15207_v11 = vadd.f32 %v14879_v63, %v13624_v4  ;;  %18041 = vmatmul.msk.bf16.gmra.mxu1 %vm647_vm1, %v9166_v62  ;;  %18381 = vmatmul.msk.bf16.gmra.mxu2 %vm647_vm1, %v10748_v59  ;;  %v19611_v63 = vld [vmem:[%s20304_s11 + $0x208] sm:$0xff] }
 0x90c   : > { %18721 = vmatmul.msk.bf16.gmra.mxu3 %vm647_vm1, %v12751_v38  ;;  %19061 = vmatmul.msk.bf16.gmra.mxu0 %vm647_vm1, %v14397_v39  ;;  %v12762_v51 = vshrl.u32 %v19611_v63, 16  ;;  %v12765_v53 = vshll.u32 %v19611_v63, 16  ;;  %v19679_v4 = vld [vmem:[%s20304_s11 + $0x208] sm:$0xff]  ;;  %v10751_v38 = vrot.slane %v19543_v57, 2 }
 0x90d   : > { %v15619_v9 = vadd.f32 %v22810_v40, %v15207_v11 }
 0x90e   : > { %v11233_v33 = vpop.f32.mrf.mxu2  ;;  %v12764_v59 = vrot.slane %v12762_v51, 2  ;;  %v12767_v56 = vrot.slane %v12765_v53, 3 }
 0x90f   : > { %v19934_v44 = vpack.c.bf16 %v15619_v9, %v15618_v24  ;;  %v13299_v26 = vpop.f32.mrf.mxu3  ;;  %v11559_v14 = vadd.f32 %v11233_v33, %v9977_v7  ;;  %v14400_v9 = vrot.slane %v19679_v4, 3  ;;  %v10752_v7 = vsel %vm9047_vm5, %v10749_v46, %v10751_v38 }
 0x910   : > { %v9653_v0 = vpop.f32.mrf.mxu1  ;;  %v12768_v24 = vor.u32 %v12767_v56, %v12764_v59  ;;  %v23036_v59 = vld [vmem:[%s23232_s2] ss:$0 sm:$0xff] }
 0x911   : > { %20074 = vst [vmem:[%s22137_s6 + $0x188] sm:$0xff] %v19934_v44   ;;  %v14884_v8 = vpop.f32.mrf.mxu0  ;;  %v13625_v12 = vadd.f32 %v13299_v26, %v11559_v14  ;;  %v9978_v31 = vadd.f32 %v9653_v0, %v23607_v2  ;;  %v14401_v14 = vsel %vm14278_vm7, %v14398_v43, %v14400_v9 }
 0x912   : > { %v12769_v3 = vsel %vm12212_vm6, %v12759_v35, %v12768_v24 }
 0x913   : > { %v15208_v34 = vadd.f32 %v14882_v15, %v13625_v12  ;;  %v9169_v15 = vrot.slane %v19475_v19, 2 }
 0x915   : > { %v15620_v42 = vadd.f32 %v22810_v40, %v15208_v34  ;;  %v9170_v18 = vsel %vm9047_vm5, %v9167_v52, %v9169_v15 }
 0x916   : > { %v11235_v20 = vpop.f32.mrf.mxu2 }
 0x917   : > { %v11560_v17 = vadd.f32 %v11235_v20, %v9978_v31  ;;  %v13301_v28 = vpop.f32.mrf.mxu3  ;;  %v23610_v31 = vld [vmem:[#allocation13_spill] sm:$0xff] }
 0x918   : > { %v9656_v22 = vpop.f32.mrf.mxu1 }
 0x919   : > { %v13626_v6 = vadd.f32 %v13301_v28, %v11560_v17  ;;  %v14887_v27 = vpop.f32.mrf.mxu0  ;;  %v9979_v13 = vadd.f32 %v9656_v22, %v23608_v5  ;;  %v19476_v17 = vld [vmem:[%s20304_s11 + $0x200] sm:$0xff]  ;;  %v19544_v28 = vld [vmem:[%s20304_s11 + $0x210] sm:$0xff] }
 0x91b   : > { %v15209_v23 = vadd.f32 %v14884_v8, %v13626_v6  ;;  %18042 = vmatmul.msk.bf16.gmra.mxu1 %vm647_vm1, %v9168_v36  ;;  %18382 = vmatmul.msk.bf16.gmra.mxu2 %vm647_vm1, %v10750_v29  ;;  %v19612_v8 = vld [vmem:[%s20304_s11 + $0x210] sm:$0xff] }
 0x91c   : > { %18722 = vmatmul.msk.bf16.gmra.mxu3 %vm647_vm1, %v12760_v10  ;;  %19062 = vmatmul.msk.bf16.gmra.mxu0 %vm647_vm1, %v14399_v54  ;;  %v12771_v52 = vshrl.u32 %v19612_v8, 16  ;;  %v12774_v46 = vshll.u32 %v19612_v8, 16  ;;  %v19680_v6 = vld [vmem:[%s20304_s11 + $0x210] sm:$0xff]  ;;  %v10753_v10 = vrot.slane %v19544_v28, 2  ;;  %v23613_v8 = vld [vmem:[#allocation22_spill] sm:$0xff] }
 0x91d   : > { %v15621_v61 = vadd.f32 %v22810_v40, %v15209_v23  ;;  %v23611_v54 = vld [vmem:[#allocation16_spill] sm:$0xff] }
 0x91e   : > { %v11238_v37 = vpop.f32.mrf.mxu2  ;;  %v12773_v29 = vrot.slane %v12771_v52, 2  ;;  %v12776_v34 = vrot.slane %v12774_v46, 3  ;;  %v10754_v5 = vsel %vm9047_vm5, %v10751_v38, %v10753_v10 }
 0x91f   : > { %v19939_v47 = vpack.c.bf16 %v15621_v61, %v15620_v42  ;;  %v13304_v1 = vpop.f32.mrf.mxu3  ;;  %v11561_v49 = vadd.f32 %v11238_v37, %v9979_v13  ;;  %v14402_v42 = vrot.slane %v19680_v6, 3 }
 0x920   : > { %v9658_v41 = vpop.f32.mrf.mxu1  ;;  %v12777_v23 = vor.u32 %v12776_v34, %v12773_v29 }
 0x921   : > { %20075 = vst [vmem:[%s22137_s6 + $0x190] sm:$0xff] %v19939_v47   ;;  %v14889_v62 = vpop.f32.mrf.mxu0  ;;  %v13627_v39 = vadd.f32 %v13304_v1, %v11561_v49  ;;  %v9980_v11 = vadd.f32 %v9658_v41, %v23609_v32  ;;  %v14403_v57 = vsel %vm14278_vm7, %v14400_v9, %v14402_v42  ;;  %v19613_v49 = vld [vmem:[%s20304_s11 + $0x218] sm:$0xff] }
 0x922   : > { %v12778_v19 = vsel %vm12212_vm6, %v12768_v24, %v12777_v23  ;;  %v12783_v38 = vshll.u32 %v19613_v49, 16 }
 0x923   : > { %v15210_v26 = vadd.f32 %v14887_v27, %v13627_v39  ;;  %v9171_v27 = vrot.slane %v19476_v17, 2 }
 0x925   : > { %v15622_v45 = vadd.f32 %v22810_v40, %v15210_v26  ;;  %v9172_v47 = vsel %vm9047_vm5, %v9169_v15, %v9171_v27  ;;  %v12780_v15 = vshrl.u32 %v19613_v49, 16  ;;  %v12785_v26 = vrot.slane %v12783_v38, 3  ;;  %v23615_v49 = vld [vmem:[#allocation28_spill] sm:$0xff] }
 0x926   : > { %v11240_v48 = vpop.f32.mrf.mxu2 }
 0x927   : > { %v11562_v30 = vadd.f32 %v11240_v48, %v9980_v11  ;;  %v13306_v33 = vpop.f32.mrf.mxu3  ;;  %v23612_v11 = vld [vmem:[#allocation19_spill] sm:$0xff] }
 0x928   : > { %v9661_v44 = vpop.f32.mrf.mxu1 }
 0x929   : > { %v13628_v0 = vadd.f32 %v13306_v33, %v11562_v30  ;;  %v14892_v50 = vpop.f32.mrf.mxu0  ;;  %v9981_v35 = vadd.f32 %v9661_v44, %v23610_v31  ;;  %v19477_v30 = vld [vmem:[%s20304_s11 + $0x208] sm:$0xff]  ;;  %v19545_v33 = vld [vmem:[%s20304_s11 + $0x218] sm:$0xff] }
 0x92b   : > { %v15211_v58 = vadd.f32 %v14889_v62, %v13628_v0  ;;  %18043 = vmatmul.msk.bf16.gmra.mxu1 %vm647_vm1, %v9170_v18  ;;  %18383 = vmatmul.msk.bf16.gmra.mxu2 %vm647_vm1, %v10752_v7  ;;  %v12782_v7 = vrot.slane %v12780_v15, 2  ;;  %v19681_v0 = vld [vmem:[%s20304_s11 + $0x218] sm:$0xff] }
 0x92c   : > { %18723 = vmatmul.msk.bf16.gmra.mxu3 %vm647_vm1, %v12769_v3  ;;  %19063 = vmatmul.msk.bf16.gmra.mxu0 %vm647_vm1, %v14401_v14  ;;  %v10755_v3 = vrot.slane %v19545_v33, 2 }
 0x92d   : > { %v15623_v55 = vadd.f32 %v22810_v40, %v15211_v58 }
 0x92e   : > { %v11243_v12 = vpop.f32.mrf.mxu2 }
 0x92f   : > { %v19944_v2 = vpack.c.bf16 %v15623_v55, %v15622_v45  ;;  %v13309_v43 = vpop.f32.mrf.mxu3  ;;  %v11563_v22 = vadd.f32 %v11243_v12, %v9981_v35  ;;  %v12786_v45 = vor.u32 %v12785_v26, %v12782_v7  ;;  %v14404_v55 = vrot.slane %v19681_v0, 3 }
 0x930   : > { %v9663_v20 = vpop.f32.mrf.mxu1  ;;  %v10756_v35 = vsel %vm9047_vm5, %v10753_v10, %v10755_v3 }
 0x931   : > { %20076 = vst [vmem:[%s22137_s6 + $0x198] sm:$0xff] %v19944_v2   ;;  %v14894_v36 = vpop.f32.mrf.mxu0  ;;  %v13629_v40 = vadd.f32 %v13309_v43, %v11563_v22  ;;  %v9982_v63 = vadd.f32 %v9663_v20, %v23611_v54  ;;  %v12787_v28 = vsel %vm12212_vm6, %v12777_v23, %v12786_v45  ;;  %v14405_v22 = vsel %vm14278_vm7, %v14402_v42, %v14404_v55 }
 0x933   : > { %v15212_v13 = vadd.f32 %v14892_v50, %v13629_v40  ;;  %v9173_v50 = vrot.slane %v19477_v30, 2 }
 0x935   : > { %v15624_v56 = vadd.f32 %v23036_v59, %v15212_v13  ;;  %v9174_v31 = vsel %vm9047_vm5, %v9171_v27, %v9173_v50 }
 0x936   : > { %v11245_v61 = vpop.f32.mrf.mxu2 }
 0x937   : > { %v11564_v51 = vadd.f32 %v11245_v61, %v9982_v63  ;;  %v13311_v53 = vpop.f32.mrf.mxu3  ;;  %v23614_v63 = vld [vmem:[#allocation25_spill] sm:$0xff] }
 0x938   : > { %v9666_v37 = vpop.f32.mrf.mxu1 }
 0x939   : > { %v13630_v1 = vadd.f32 %v13311_v53, %v11564_v51  ;;  %v14897_v41 = vpop.f32.mrf.mxu0  ;;  %v9983_v24 = vadd.f32 %v9666_v37, %v23612_v11  ;;  %v19478_v51 = vld [vmem:[%s20304_s11 + $0x210] sm:$0xff]  ;;  %v19546_v53 = vld [vmem:[%s20304_s11 + $0x220] sm:$0xff] }
 0x93b   : > { %v15213_v62 = vadd.f32 %v14894_v36, %v13630_v1  ;;  %18044 = vmatmul.msk.bf16.gmra.mxu1 %vm647_vm1, %v9172_v47  ;;  %18384 = vmatmul.msk.bf16.gmra.mxu2 %vm647_vm1, %v10754_v5  ;;  %v19614_v36 = vld [vmem:[%s20304_s11 + $0x220] sm:$0xff] }
 0x93c   : > { %18724 = vmatmul.msk.bf16.gmra.mxu3 %vm647_vm1, %v12778_v19  ;;  %19064 = vmatmul.msk.bf16.gmra.mxu0 %vm647_vm1, %v14403_v57  ;;  %v12789_v27 = vshrl.u32 %v19614_v36, 16  ;;  %v12792_v10 = vshll.u32 %v19614_v36, 16  ;;  %v19682_v1 = vld [vmem:[%s20304_s11 + $0x220] sm:$0xff]  ;;  %v10757_v19 = vrot.slane %v19546_v53, 2 }
 0x93d   : > { %v15625_v4 = vadd.f32 %v23036_v59, %v15213_v62  ;;  %v23617_v36 = vld [vmem:[#allocation34_spill] sm:$0xff] }
 0x93e   : > { %v11248_v39 = vpop.f32.mrf.mxu2  ;;  %v12791_v5 = vrot.slane %v12789_v27, 2  ;;  %v12794_v13 = vrot.slane %v12792_v10, 3 }
 0x93f   : > { %v19949_v32 = vpack.c.bf16 %v15625_v4, %v15624_v56  ;;  %v13314_v9 = vpop.f32.mrf.mxu3  ;;  %v11565_v44 = vadd.f32 %v11248_v39, %v9983_v24  ;;  %v14406_v4 = vrot.slane %v19682_v1, 3  ;;  %v10758_v24 = vsel %vm9047_vm5, %v10755_v3, %v10757_v19 }
 0x940   : > { %v9668_v48 = vpop.f32.mrf.mxu1  ;;  %v12795_v56 = vor.u32 %v12794_v13, %v12791_v5 }
 0x941   : > { %20077 = vst [vmem:[%s22137_s6 + $0x1a0] sm:$0xff] %v19949_v32   ;;  %v14899_v18 = vpop.f32.mrf.mxu0  ;;  %v13631_v14 = vadd.f32 %v13314_v9, %v11565_v44  ;;  %v9984_v58 = vadd.f32 %v9668_v48, %v23613_v8  ;;  %v14407_v44 = vsel %vm14278_vm7, %v14404_v55, %v14406_v4 }
 0x942   : > { %v12796_v33 = vsel %vm12212_vm6, %v12786_v45, %v12795_v56 }
 0x943   : > { %v15214_v43 = vadd.f32 %v14897_v41, %v13631_v14  ;;  %v9175_v41 = vrot.slane %v19478_v51, 2 }
 0x945   : > { %v15626_v34 = vadd.f32 %v23036_v59, %v15214_v43  ;;  %v9176_v11 = vsel %vm9047_vm5, %v9173_v50, %v9175_v41 }
 0x946   : > { %v11250_v52 = vpop.f32.mrf.mxu2 }
 0x947   : > { %v11566_v46 = vadd.f32 %v11250_v52, %v9984_v58  ;;  %v13316_v12 = vpop.f32.mrf.mxu3  ;;  %v23616_v58 = vld [vmem:[#allocation31_spill] sm:$0xff] }
 0x948   : > { %v9671_v2 = vpop.f32.mrf.mxu1 }
 0x949   : > { %v13632_v20 = vadd.f32 %v13316_v12, %v11566_v46  ;;  %v14902_v17 = vpop.f32.mrf.mxu0  ;;  %v9985_v23 = vadd.f32 %v9671_v2, %v23614_v63  ;;  %v19479_v46 = vld [vmem:[%s20304_s11 + $0x218] sm:$0xff]  ;;  %v19547_v12 = vld [vmem:[%s20304_s11 + $0x228] sm:$0xff] }
 0x94b   : > { %v15215_v29 = vadd.f32 %v14899_v18, %v13632_v20  ;;  %18045 = vmatmul.msk.bf16.gmra.mxu1 %vm647_vm1, %v9174_v31  ;;  %18385 = vmatmul.msk.bf16.gmra.mxu2 %vm647_vm1, %v10756_v35  ;;  %v19615_v18 = vld [vmem:[%s20304_s11 + $0x228] sm:$0xff] }
 0x94c   : > { %18725 = vmatmul.msk.bf16.gmra.mxu3 %vm647_vm1, %v12787_v28  ;;  %19065 = vmatmul.msk.bf16.gmra.mxu0 %vm647_vm1, %v14405_v22  ;;  %v12798_v50 = vshrl.u32 %v19615_v18, 16  ;;  %v12801_v3 = vshll.u32 %v19615_v18, 16  ;;  %v19683_v20 = vld [vmem:[%s20304_s11 + $0x228] sm:$0xff]  ;;  %v10759_v28 = vrot.slane %v19547_v12, 2  ;;  %v23619_v18 = vld [vmem:[#allocation40_spill] sm:$0xff] }
 0x94d   : > { %v15627_v6 = vadd.f32 %v23036_v59, %v15215_v29 }
 0x94e   : > { %v11253_v40 = vpop.f32.mrf.mxu2  ;;  %v12800_v35 = vrot.slane %v12798_v50, 2  ;;  %v12803_v43 = vrot.slane %v12801_v3, 3 }
 0x94f   : > { %v19954_v54 = vpack.c.bf16 %v15627_v6, %v15626_v34  ;;  %v13319_v42 = vpop.f32.mrf.mxu3  ;;  %v11567_v37 = vadd.f32 %v11253_v40, %v9985_v23  ;;  %v14408_v6 = vrot.slane %v19683_v20, 3  ;;  %v10760_v23 = vsel %vm9047_vm5, %v10757_v19, %v10759_v28 }
 0x950   : > { %v9673_v61 = vpop.f32.mrf.mxu1  ;;  %v12804_v34 = vor.u32 %v12803_v43, %v12800_v35 }
 0x951   : > { %20078 = vst [vmem:[%s22137_s6 + $0x1a8] sm:$0xff] %v19954_v54   ;;  %v14904_v47 = vpop.f32.mrf.mxu0  ;;  %v13633_v57 = vadd.f32 %v13319_v42, %v11567_v37  ;;  %v9986_v62 = vadd.f32 %v9673_v61, %v23615_v49  ;;  %v14409_v37 = vsel %vm14278_vm7, %v14406_v4, %v14408_v6 }
 0x952   : > { %v12805_v53 = vsel %vm12212_vm6, %v12795_v56, %v12804_v34 }
 0x953   : > { %v15216_v9 = vadd.f32 %v14902_v17, %v13633_v57  ;;  %v9177_v17 = vrot.slane %v19479_v46, 2 }
 0x955   : > { %v15628_v26 = vadd.f32 %v23036_v59, %v15216_v9  ;;  %v9178_v63 = vsel %vm9047_vm5, %v9175_v41, %v9177_v17 }
 0x956   : > { %v11255_v15 = vpop.f32.mrf.mxu2 }
 0x957   : > { %v11568_v38 = vadd.f32 %v11255_v15, %v9986_v62  ;;  %v13321_v39 = vpop.f32.mrf.mxu3  ;;  %v23618_v62 = vld [vmem:[#allocation37_spill] sm:$0xff] }
 0x958   : > { %v9676_v32 = vpop.f32.mrf.mxu1 }
 0x959   : > { %v13634_v48 = vadd.f32 %v13321_v39, %v11568_v38  ;;  %v14907_v30 = vpop.f32.mrf.mxu0  ;;  %v9987_v45 = vadd.f32 %v9676_v32, %v23616_v58  ;;  %v19480_v38 = vld [vmem:[%s20304_s11 + $0x220] sm:$0xff]  ;;  %v19548_v39 = vld [vmem:[%s20304_s11 + $0x230] sm:$0xff] }
 0x95b   : > { %v15217_v7 = vadd.f32 %v14904_v47, %v13634_v48  ;;  %18046 = vmatmul.msk.bf16.gmra.mxu1 %vm647_vm1, %v9176_v11  ;;  %18386 = vmatmul.msk.bf16.gmra.mxu2 %vm647_vm1, %v10758_v24  ;;  %v19616_v47 = vld [vmem:[%s20304_s11 + $0x230] sm:$0xff] }
 0x95c   : > { %18726 = vmatmul.msk.bf16.gmra.mxu3 %vm647_vm1, %v12796_v33  ;;  %19066 = vmatmul.msk.bf16.gmra.mxu0 %vm647_vm1, %v14407_v44  ;;  %v12807_v41 = vshrl.u32 %v19616_v47, 16  ;;  %v12810_v19 = vshll.u32 %v19616_v47, 16  ;;  %v19684_v48 = vld [vmem:[%s20304_s11 + $0x230] sm:$0xff]  ;;  %v10761_v33 = vrot.slane %v19548_v39, 2 }
 0x95d   : > { %v15629_v0 = vadd.f32 %v23036_v59, %v15217_v7 }
 0x95e   : > { %v11258_v14 = vpop.f32.mrf.mxu2  ;;  %v12809_v24 = vrot.slane %v12807_v41, 2  ;;  %v12812_v9 = vrot.slane %v12810_v19, 3 }
 0x95f   : > { %v19959_v8 = vpack.c.bf16 %v15629_v0, %v15628_v26  ;;  %v13324_v55 = vpop.f32.mrf.mxu3  ;;  %v11569_v2 = vadd.f32 %v11258_v14, %v9987_v45  ;;  %v14410_v0 = vrot.slane %v19684_v48, 3  ;;  %v10762_v45 = vsel %vm9047_vm5, %v10759_v28, %v10761_v33  ;;  %v8702_v48 = vld [vmem:[%s20304_s11 + $0x230] sm:$0x3] }
 0x960   : > { %v9678_v52 = vpop.f32.mrf.mxu1  ;;  %v12813_v26 = vor.u32 %v12812_v9, %v12809_v24 }
 0x961   : > { %20079 = vst [vmem:[%s22137_s6 + $0x1b0] sm:$0xff] %v19959_v8   ;;  %v14909_v31 = vpop.f32.mrf.mxu0  ;;  %v13635_v22 = vadd.f32 %v13324_v55, %v11569_v2  ;;  %v9988_v29 = vadd.f32 %v9678_v52, %v23617_v36  ;;  %v14411_v2 = vsel %vm14278_vm7, %v14408_v6, %v14410_v0 }
 0x962   : > { %v12814_v12 = vsel %vm12212_vm6, %v12804_v34, %v12813_v26 }
 0x963   : > { %v15218_v42 = vadd.f32 %v14907_v30, %v13635_v22  ;;  %v9179_v30 = vrot.slane %v19480_v38, 2 }
 0x965   : > { %v15630_v13 = vadd.f32 %v23036_v59, %v15218_v42  ;;  %v9180_v58 = vsel %vm9047_vm5, %v9177_v17, %v9179_v30 }
 0x966   : > { %v11260_v27 = vpop.f32.mrf.mxu2 }
 0x967   : > { %v11570_v10 = vadd.f32 %v11260_v27, %v9988_v29  ;;  %v13326_v40 = vpop.f32.mrf.mxu3  ;;  %v23620_v29 = vld [vmem:[#allocation43_spill] sm:$0xff] }
 0x968   : > { %v9681_v54 = vpop.f32.mrf.mxu1 }
 0x969   : > { %v13636_v61 = vadd.f32 %v13326_v40, %v11570_v10  ;;  %v14912_v51 = vpop.f32.mrf.mxu0  ;;  %v9989_v56 = vadd.f32 %v9681_v54, %v23618_v62  ;;  %v23110_v10 = vld [vmem:[%s20304_s11 + $0x228] sm:$0xff]  ;;  %v23113_v40 = vld [vmem:[%s20304_s11 + $0x238] sm:$0xff] }
 0x96b   : > { %v15219_v5 = vadd.f32 %v14909_v31, %v13636_v61  ;;  %18047 = vmatmul.msk.bf16.gmra.mxu1 %vm647_vm1, %v9178_v63  ;;  %18387 = vmatmul.msk.bf16.gmra.mxu2 %vm647_vm1, %v10760_v23  ;;  %v19617_v31 = vld [vmem:[%s20304_s11 + $0x238] sm:$0xff] }
 0x96c   : > { %18727 = vmatmul.msk.bf16.gmra.mxu3 %vm647_vm1, %v12805_v53  ;;  %19067 = vmatmul.msk.bf16.gmra.mxu0 %vm647_vm1, %v14409_v37  ;;  %v12816_v17 = vshrl.u32 %v19617_v31, 16  ;;  %v12819_v28 = vshll.u32 %v19617_v31, 16  ;;  %v23117_v61 = vld [vmem:[%s20304_s11 + $0x238] sm:$0xff]  ;;  %v9181_v53 = vrot.slane %v23110_v10, 2  ;;  %v10763_v37 = vrot.slane %v23113_v40, 2 }
 0x96d   : > { %v15631_v1 = vadd.f32 %v23036_v59, %v15219_v5  ;;  %v14412_v19 = vrot.slane %v23117_v61, 3 }
 0x96e   : > { %v11263_v57 = vpop.f32.mrf.mxu2  ;;  %v12818_v23 = vrot.slane %v12816_v17, 2  ;;  %v12821_v42 = vrot.slane %v12819_v28, 3 }
 0x96f   : > { %v19964_v49 = vpack.c.bf16 %v15631_v1, %v15630_v13  ;;  %v13329_v4 = vpop.f32.mrf.mxu3  ;;  %v11571_v32 = vadd.f32 %v11263_v57, %v9989_v56  ;;  %v23621_v13 = vld [vmem:[#allocation46_spill] sm:$0xff]  ;;  %v14413_v9 = vsel %vm14278_vm7, %v14410_v0, %v14412_v19 }
 0x970   : > { %v9683_v15 = vpop.f32.mrf.mxu1  ;;  %v12822_v41 = vor.u32 %v12821_v42, %v12818_v23 }
 0x971   : > { %20080 = vst [vmem:[%s22137_s6 + $0x1b8] sm:$0xff] %v19964_v49   ;;  %v14914_v11 = vpop.f32.mrf.mxu0  ;;  %v13637_v44 = vadd.f32 %v13329_v4, %v11571_v32  ;;  %v9990_v7 = vadd.f32 %v9683_v15, %v23619_v18  ;;  %v9182_v4 = vsel %vm9047_vm5, %v9179_v30, %v9181_v53  ;;  %v10764_v15 = vsel %vm9047_vm5, %v10761_v33, %v10763_v37  ;;  %v13933_v18 = vld [vmem:[%s20304_s11 + $0x240] sm:$0x7] }
 0x972   : > { %v12823_v24 = vsel %vm12212_vm6, %v12813_v26, %v12822_v41  ;;  %v8977_v30 = vunpack.c.l.b16 %v8702_v48 }
 0x973   : > { %v15220_v55 = vadd.f32 %v14912_v51, %v13637_v44  ;;  %v11867_v51 = vld [vmem:[%s20304_s11 + $0x240] sm:$0x7] }
 0x974   : > { %v12142_v47 = vunpack.c.l.b16 %v11867_v51  ;;  %v10285_v44 = vld [vmem:[%s20304_s11 + $0x240] sm:$0x3]  ;;  %s20098_s11 = smul.u32 544, %s20252_s16  ;;  %s15929_s16 = scalar_lea.sflag [#allocation4], %s161_s29 }
 0x975   : > { %v15632_v43 = vadd.f32 %v23036_v59, %v15220_v55  ;;  %v10560_v33 = vunpack.c.l.b16 %v10285_v44 }
 0x976   : > { %v11265_v50 = vpop.f32.mrf.mxu2  ;;  %v12211_v38 = vpack.c.b16 %v12142_v47, %v12142_v47  ;;  %s15940_s27 = scalar_lea.hbm %s23233_s3, %s20098_s11 }
 0x977   : > { %v11572_v3 = vadd.f32 %v11265_v50, %v9990_v7  ;;  %v13331_v14 = vpop.f32.mrf.mxu3  ;;  %s15943_s30 = sshll.u32 %s15940_s27, 4  ;;  %s15944_s30 = int_to_ptr.hbm [resolvable:$true] %s15943_s30 }
 0x978   : > { %v9686_v8 = vpop.f32.mrf.mxu1  ;;  %v12825_v50 = vshrl.u32 %v12211_v38, 16  ;;  %s20159_s4 = sshra.s32 %s15944_s30, 4  ;;  %s20160_s4 = int_to_ptr.hbm [resolvable:$true] %s20159_s4 }
 0x979   : > { %v13638_v52 = vadd.f32 %v13331_v14, %v11572_v3  ;;  %v14917_v46 = vpop.f32.mrf.mxu0  ;;  %v9991_v34 = vadd.f32 %v9686_v8, %v23620_v29  ;;  %v12828_v3 = vshll.u32 %v12211_v38, 16  ;;  %v14208_v14 = vunpack.c.l.b16 %v13933_v18  ;;  %s20161_s5 = scalar_lea.hbm %s20160_s4, 544  ;;  %p20166_p0 = scmp.lt.s32.totalorder %s20160_s4, %s23233_s3 }
 0x97a   : > { %p20162_p11 = scmp.ne.s32.totalorder %s20160_s4, %s20161_s5  ;;  %p20167_p1 = scmp.lt.s32.totalorder %s20165_s9, %s20161_s5 }
 0x97b   : > { %v15221_v35 = vadd.f32 %v14914_v11, %v13638_v52  ;;  %18048 = vmatmul.msk.bf16.gmra.mxu1 %vm647_vm1, %v9180_v58  ;;  %18388 = vmatmul.msk.bf16.gmra.mxu2 %vm647_vm1, %v10762_v45 }
 0x97c   : > { %18728 = vmatmul.msk.bf16.gmra.mxu3 %vm647_vm1, %v12814_v12  ;;  %19068 = vmatmul.msk.bf16.gmra.mxu0 %vm647_vm1, %v14411_v2  ;;  %v10629_v12 = vpack.c.b16 %v10560_v33, %v10560_v33  ;;  %p20163_p12 = pnand %p20162_p11, %p20269_p5  ;;  %p20168_p2 = por %p20167_p1, %p20166_p0 }
 0x97d   : > { %v15633_v20 = vadd.f32 %v23036_v59, %v15221_v35  ;;  %v12827_v35 = vrot.slane %v12825_v50, 2 }
 0x97e   : > { %v11268_v22 = vpop.f32.mrf.mxu2  ;;  %v10765_v28 = vrot.slane %v10629_v12, 2  ;;  %p20164_p13 = pneg %p20163_p12 }
 0x97f   : > { %v19969_v36 = vpack.c.bf16 %v15633_v20, %v15632_v43  ;;  %v13334_v6 = vpop.f32.mrf.mxu3  ;;  %v11573_v54 = vadd.f32 %v11268_v22, %v9991_v34  ;;  %v12830_v43 = vrot.slane %v12828_v3, 3  ;;  %v14277_v20 = vpack.c.b16 %v14208_v14, %v14208_v14  ;;  %v23624_v14 = vld [vmem:[#allocation55_spill] sm:$0xff] }
 0x980   : > { %v9688_v27 = vpop.f32.mrf.mxu1  ;;  %p20169_p3 = pnand %p20168_p2, %p20164_p13 }
 0x981   : > { %20081 = vst [vmem:[%s22137_s6 + $0x1c0] sm:$0xff] %v19969_v36   ;;  %v14919_v63 = vpop.f32.mrf.mxu0  ;;  %v13639_v5 = vadd.f32 %v13334_v6, %v11573_v54  ;;  %v9992_v1 = vadd.f32 %v9688_v27, %v23621_v13  ;;  %v23622_v36 = vld [vmem:[#allocation49_spill] sm:$0xff]  ;;  %v12831_v34 = vor.u32 %v12830_v43, %v12827_v35  ;;  %v14414_v6 = vrot.slane %v14277_v20, 3 }
 0x983   : > { %v15222_v39 = vadd.f32 %v14917_v46, %v13639_v5  ;;  %v9046_v46 = vpack.c.b16 %v8977_v30, %v8977_v30  ;;  %v12832_v51 = vsel %vm12212_vm6, %v12822_v41, %v12831_v34  ;;  %v14415_v47 = vsel %vm14278_vm7, %v14412_v19, %v14414_v6  ;;  %v23623_v30 = vld [vmem:[#allocation52_spill] sm:$0xff] }
 0x985   : > { %v15634_v26 = vadd.f32 %v23036_v59, %v15222_v39  ;;  %v9183_v17 = vrot.slane %v9046_v46, 2 }
 0x986   : > { %v11270_v57 = vpop.f32.mrf.mxu2 }
 0x987   : > { %v11574_v49 = vadd.f32 %v11270_v57, %v9992_v1  ;;  %v13336_v62 = vpop.f32.mrf.mxu3  ;;  %v9184_v54 = vsel %vm9047_vm5, %v9181_v53, %v9183_v17 }
 0x988   : > { %v9691_v56 = vpop.f32.mrf.mxu1 }
 0x989   : > { %v13640_v32 = vadd.f32 %v13336_v62, %v11574_v49  ;;  %v14922_v11 = vpop.f32.mrf.mxu0  ;;  %v9993_v45 = vadd.f32 %v9691_v56, %v21911_v16 }
 0x98b   : > { %v15223_v7 = vadd.f32 %v14919_v63, %v13640_v32  ;;  %18049 = vmatmul.msk.bf16.gmra.mxu1 %vm647_vm1, %v9182_v4  ;;  %18389 = vmatmul.msk.bf16.gmra.mxu2 %vm647_vm1, %v10764_v15  ;;  %v10766_v63 = vsel %vm9047_vm5, %v10763_v37, %v10765_v28  ;;  %v23625_v28 = vld [vmem:[#allocation58_spill] sm:$0xff] }
 0x98c   : > { %18729 = vmatmul.msk.bf16.gmra.mxu3 %vm647_vm1, %v12823_v24  ;;  %19069 = vmatmul.msk.bf16.gmra.mxu0 %vm647_vm1, %v14413_v9 }
 0x98d   : > { %v15635_v0 = vadd.f32 %v23036_v59, %v15223_v7 }
 0x98e   : > { %v11273_v8 = vpop.f32.mrf.mxu2 }
 0x98f   : > { %v19974_v58 = vpack.c.bf16 %v15635_v0, %v15634_v26  ;;  %v13339_v55 = vpop.f32.mrf.mxu3  ;;  %v11575_v2 = vadd.f32 %v11273_v8, %v9993_v45 }
 0x990   : > { %v9693_v52 = vpop.f32.mrf.mxu1 }
 0x991   : > { %20082 = vst [vmem:[%s22137_s6 + $0x1c8] sm:$0xff] %v19974_v58   ;;  %v14924_v31 = vpop.f32.mrf.mxu0  ;;  %v13641_v22 = vadd.f32 %v13339_v55, %v11575_v2  ;;  %v9994_v29 = vadd.f32 %v9693_v52, %v23622_v36 }
 0x993   : > { %v15224_v23 = vadd.f32 %v14922_v11, %v13641_v22 }
 0x995   : > { %v15636_v53 = vadd.f32 %v23036_v59, %v15224_v23 }
 0x996   : > { %v11275_v27 = vpop.f32.mrf.mxu2 }
 0x997   : > { %v11576_v10 = vadd.f32 %v11275_v27, %v9994_v29  ;;  %v13341_v16 = vpop.f32.mrf.mxu3 }
 0x998   : > { %v9696_v40 = vpop.f32.mrf.mxu1 }
 0x999   : > { %v13642_v42 = vadd.f32 %v13341_v16, %v11576_v10  ;;  %v14927_v61 = vpop.f32.mrf.mxu0  ;;  %v9995_v57 = vadd.f32 %v9696_v40, %v21941_v60  ;;  %v23626_v10 = vld [vmem:[#allocation61_spill] sm:$0xff] }
 0x99b   : > { %v15225_v5 = vadd.f32 %v14924_v31, %v13642_v42  ;;  %18050 = vmatmul.msk.bf16.gmra.mxu1 %vm647_vm1, %v9184_v54  ;;  %18390 = vmatmul.msk.bf16.gmra.mxu2 %vm647_vm1, %v10766_v63 }
 0x99c   : > { %18730 = vmatmul.msk.bf16.gmra.mxu3 %vm647_vm1, %v12832_v51  ;;  %19070 = vmatmul.msk.bf16.gmra.mxu0 %vm647_vm1, %v14415_v47 }
 0x99d   : > { %v15637_v37 = vadd.f32 %v23036_v59, %v15225_v5 }
 0x99e   : > { %v11278_v13 = vpop.f32.mrf.mxu2 }
 0x99f   : > { %v19979_v1 = vpack.c.bf16 %v15637_v37, %v15636_v53  ;;  %v13344_v41 = vpop.f32.mrf.mxu3  ;;  %v11577_v19 = vadd.f32 %v11278_v13, %v9995_v57 }
 0x9a0   : > { %v9698_v49 = vpop.f32.mrf.mxu1 }
 0x9a1   : > { %20083 = vst [vmem:[%s22137_s6 + $0x1d0] sm:$0xff] %v19979_v1   ;;  %v14929_v62 = vpop.f32.mrf.mxu0  ;;  %v13643_v56 = vadd.f32 %v13344_v41, %v11577_v19  ;;  %v9996_v4 = vadd.f32 %v9698_v49, %v21953_v25  ;;  %v23627_v1 = vld [vmem:[#allocation64_spill] sm:$0xff] }
 0x9a3   : > { %v15226_v11 = vadd.f32 %v14927_v61, %v13643_v56 }
 0x9a5   : > { %v15638_v44 = vadd.f32 %v23036_v59, %v15226_v11 }
 0x9a6   : > { %v11280_v15 = vpop.f32.mrf.mxu2 }
 0x9a7   : > { %v11578_v38 = vadd.f32 %v11280_v15, %v9996_v4  ;;  %v13346_v39 = vpop.f32.mrf.mxu3  ;;  %v23628_v4 = vld [vmem:[#allocation67_spill] sm:$0xff] }
 0x9a8   : > { %v9701_v32 = vpop.f32.mrf.mxu1 }
 0x9a9   : > { %v13644_v24 = vadd.f32 %v13346_v39, %v11578_v38  ;;  %v14932_v9 = vpop.f32.mrf.mxu0  ;;  %v9997_v33 = vadd.f32 %v9701_v32, %v23623_v30 }
 0x9ab   : > { %v15227_v48 = vadd.f32 %v14929_v62, %v13644_v24 }
 0x9ad   : > { %v15639_v60 = vadd.f32 %v23036_v59, %v15227_v48 }
 0x9ae   : > { %v11283_v18 = vpop.f32.mrf.mxu2 }
 0x9af   : > { %v19984_v7 = vpack.c.bf16 %v15639_v60, %v15638_v44  ;;  %v13349_v50 = vpop.f32.mrf.mxu3  ;;  %v11579_v25 = vadd.f32 %v11283_v18, %v9997_v33  ;;  %v23629_v33 = vld [vmem:[#allocation70_spill] sm:$0xff] }
 0x9b0   : > { %v9703_v26 = vpop.f32.mrf.mxu1 }
 0x9b1   : > { %20084 = vst [vmem:[%s22137_s6 + $0x1d8] sm:$0xff] %v19984_v7   ;;  %v14934_v0 = vpop.f32.mrf.mxu0  ;;  %v13645_v3 = vadd.f32 %v13349_v50, %v11579_v25  ;;  %v9998_v8 = vadd.f32 %v9703_v26, %v23624_v14 }
 0x9b3   : > { %v15228_v46 = vadd.f32 %v14932_v9, %v13645_v3 }
 0x9b5   : > { %v15640_v35 = vadd.f32 %v23036_v59, %v15228_v46 }
 0x9b6   : > { %v11285_v58 = vpop.f32.mrf.mxu2 }
 0x9b7   : > { %v11580_v45 = vadd.f32 %v11285_v58, %v9998_v8  ;;  %v13351_v55 = vpop.f32.mrf.mxu3  ;;  %v23630_v8 = vld [vmem:[#allocation73_spill] sm:$0xff] }
 0x9b8   : > { %v9706_v52 = vpop.f32.mrf.mxu1 }
 0x9b9   : > { %v13646_v12 = vadd.f32 %v13351_v55, %v11580_v45  ;;  %v14937_v2 = vpop.f32.mrf.mxu0  ;;  %v9999_v22 = vadd.f32 %v9706_v52, %v23625_v28 }
 0x9bb   : > { %v15229_v31 = vadd.f32 %v14934_v0, %v13646_v12 }
 0x9bd   : > { %v15641_v43 = vadd.f32 %v23036_v59, %v15229_v31 }
 0x9be   : > { %v11288_v20 = vpop.f32.mrf.mxu2 }
 0x9bf   : > { %v19989_v17 = vpack.c.bf16 %v15641_v43, %v15640_v35  ;;  %v13354_v36 = vpop.f32.mrf.mxu3  ;;  %v11581_v34 = vadd.f32 %v11288_v20, %v9999_v22  ;;  %v23631_v22 = vld [vmem:[#allocation76_spill] sm:$0xff] }
 0x9c0   : > { %v9708_v29 = vpop.f32.mrf.mxu1 }
 0x9c1   : > { %20085 = vst [vmem:[%s22137_s6 + $0x1e0] sm:$0xff] %v19989_v17   ;;  %v14939_v6 = vpop.f32.mrf.mxu0  ;;  %v13647_v27 = vadd.f32 %v13354_v36, %v11581_v34  ;;  %v10000_v16 = vadd.f32 %v9708_v29, %v23626_v10 }
 0x9c3   : > { %v15230_v42 = vadd.f32 %v14937_v2, %v13647_v27 }
 0x9c5   : > { %v15642_v5 = vadd.f32 %v23036_v59, %v15230_v42 }
 0x9c6   : > { %v11290_v40 = vpop.f32.mrf.mxu2 }
 0x9c7   : > { %v11582_v54 = vadd.f32 %v11290_v40, %v10000_v16  ;;  %v13356_v63 = vpop.f32.mrf.mxu3  ;;  %v23632_v16 = vld [vmem:[#allocation79_spill] sm:$0xff] }
 0x9c8   : > { %v9711_v23 = vpop.f32.mrf.mxu1 }
 0x9c9   : > { %v13648_v61 = vadd.f32 %v13356_v63, %v11582_v54  ;;  %v14942_v51 = vpop.f32.mrf.mxu0  ;;  %v10001_v57 = vadd.f32 %v9711_v23, %v23627_v1 }
 0x9cb   : > { %v15231_v47 = vadd.f32 %v14939_v6, %v13648_v61 }
 0x9cd   : > { %v15643_v53 = vadd.f32 %v23036_v59, %v15231_v47 }
 0x9ce   : > { %v11293_v37 = vpop.f32.mrf.mxu2 }
 0x9cf   : > { %v19994_v13 = vpack.c.bf16 %v15643_v53, %v15642_v5  ;;  %v13359_v41 = vpop.f32.mrf.mxu3  ;;  %v11583_v19 = vadd.f32 %v11293_v37, %v10001_v57  ;;  %v23633_v57 = vld [vmem:[#allocation82_spill] sm:$0xff] }
 0x9d0   : > { %v9713_v49 = vpop.f32.mrf.mxu1 }
 0x9d1   : > { %20086 = vst [vmem:[%s22137_s6 + $0x1e8] sm:$0xff] %v19994_v13   ;;  %v14944_v62 = vpop.f32.mrf.mxu0  ;;  %v13649_v56 = vadd.f32 %v13359_v41, %v11583_v19  ;;  %v10002_v15 = vadd.f32 %v9713_v49, %v23628_v4 }
 0x9d3   : > { %v15232_v24 = vadd.f32 %v14942_v51, %v13649_v56 }
 0x9d5   : > { %v15644_v60 = vadd.f32 %v23036_v59, %v15232_v24 }
 0x9d6   : > { %v11295_v38 = vpop.f32.mrf.mxu2 }
 0x9d7   : > { %v11584_v39 = vadd.f32 %v11295_v38, %v10002_v15  ;;  %v13361_v32 = vpop.f32.mrf.mxu3  ;;  %v23634_v15 = vld [vmem:[#allocation85_spill] sm:$0xff] }
 0x9d8   : > { %v9716_v11 = vpop.f32.mrf.mxu1 }
 0x9d9   : > { %v13650_v9 = vadd.f32 %v13361_v32, %v11584_v39  ;;  %v14947_v48 = vpop.f32.mrf.mxu0  ;;  %v10003_v50 = vadd.f32 %v9716_v11, %v23629_v33 }
 0x9db   : > { %v15233_v44 = vadd.f32 %v14944_v62, %v13650_v9 }
 0x9dd   : > { %v15645_v18 = vadd.f32 %v23036_v59, %v15233_v44 }
 0x9de   : > { %v11298_v7 = vpop.f32.mrf.mxu2 }
 0x9df   : > { %v19999_v30 = vpack.c.bf16 %v15645_v18, %v15644_v60  ;;  %v13364_v26 = vpop.f32.mrf.mxu3  ;;  %v11585_v0 = vadd.f32 %v11298_v7, %v10003_v50  ;;  %v23635_v50 = vld [vmem:[#allocation88_spill] sm:$0xff] }
 0x9e0   : > { %v9718_v25 = vpop.f32.mrf.mxu1 }
 0x9e1   : > { %20087 = vst [vmem:[%s22137_s6 + $0x1f0] sm:$0xff] %v19999_v30   ;;  %v14949_v3 = vpop.f32.mrf.mxu0  ;;  %v13651_v14 = vadd.f32 %v13364_v26, %v11585_v0  ;;  %v10004_v58 = vadd.f32 %v9718_v25, %v23630_v8  ;;  %v23636_v8 = vld [vmem:[#allocation91_spill] sm:$0xff] }
 0x9e3   : > { %v15234_v12 = vadd.f32 %v14947_v48, %v13651_v14 }
 0x9e5   : > { %v15646_v43 = vadd.f32 %v23036_v59, %v15234_v12 }
 0x9e6   : > { %v11300_v45 = vpop.f32.mrf.mxu2 }
 0x9e7   : > { %v11586_v55 = vadd.f32 %v11300_v45, %v10004_v58  ;;  %v13366_v52 = vpop.f32.mrf.mxu3 }
 0x9e8   : > { %v9721_v46 = vpop.f32.mrf.mxu1 }
 0x9e9   : > { %v13652_v2 = vadd.f32 %v13366_v52, %v11586_v55  ;;  %v14952_v31 = vpop.f32.mrf.mxu0  ;;  %v10005_v36 = vadd.f32 %v9721_v46, %v23631_v22 }
 0x9eb   : > { %v15235_v35 = vadd.f32 %v14949_v3, %v13652_v2 }
 0x9ed   : > { %v15647_v20 = vadd.f32 %v23036_v59, %v15235_v35 }
 0x9ee   : > { %v11303_v17 = vpop.f32.mrf.mxu2 }
 0x9ef   : > { %v20004_v28 = vpack.c.bf16 %v15647_v20, %v15646_v43  ;;  %v13369_v29 = vpop.f32.mrf.mxu3  ;;  %v11587_v6 = vadd.f32 %v11303_v17, %v10005_v36 }
 0x9f0   : > { %v9723_v34 = vpop.f32.mrf.mxu1 }
 0x9f1   : > { %20088 = vst [vmem:[%s22137_s6 + $0x1f8] sm:$0xff] %v20004_v28   ;;  %v14954_v27 = vpop.f32.mrf.mxu0  ;;  %v13653_v10 = vadd.f32 %v13369_v29, %v11587_v6  ;;  %v10006_v40 = vadd.f32 %v9723_v34, %v23632_v16 }
 0x9f3   : > { %v15236_v61 = vadd.f32 %v14952_v31, %v13653_v10  ;;  %v23637_v10 = vld [vmem:[#allocation94_spill] sm:$0xff] }
 0x9f5   : > { %v15648_v53 = vadd.f32 %v23036_v59, %v15236_v61 }
 0x9f6   : > { %v11305_v54 = vpop.f32.mrf.mxu2 }
 0x9f7   : > { %v11588_v63 = vadd.f32 %v11305_v54, %v10006_v40  ;;  %v13371_v23 = vpop.f32.mrf.mxu3 }
 0x9f8   : > { %v9726_v42 = vpop.f32.mrf.mxu1 }
 0x9f9   : > { %v13654_v51 = vadd.f32 %v13371_v23, %v11588_v63  ;;  %v14957_v47 = vpop.f32.mrf.mxu0  ;;  %v10007_v41 = vadd.f32 %v9726_v42, %v23633_v57 }
 0x9fb   : > { %v15237_v5 = vadd.f32 %v14954_v27, %v13654_v51 }
 0x9fd   : > { %v15649_v37 = vadd.f32 %v23036_v59, %v15237_v5 }
 0x9fe   : > { %v11308_v13 = vpop.f32.mrf.mxu2 }
 0x9ff   : > { %v20009_v1 = vpack.c.bf16 %v15649_v37, %v15648_v53  ;;  %v13374_v49 = vpop.f32.mrf.mxu3  ;;  %v11589_v62 = vadd.f32 %v11308_v13, %v10007_v41 }
 0xa00   : > { %v9728_v19 = vpop.f32.mrf.mxu1 }
 0xa01   : > { %20089 = vst [vmem:[%s22137_s6 + $0x200] sm:$0xff] %v20009_v1   ;;  %v14959_v56 = vpop.f32.mrf.mxu0  ;;  %v13655_v4 = vadd.f32 %v13374_v49, %v11589_v62  ;;  %v10008_v38 = vadd.f32 %v9728_v19, %v23634_v15 }
 0xa03   : > { %v15238_v9 = vadd.f32 %v14957_v47, %v13655_v4 }
 0xa05   : > { %v15650_v18 = vadd.f32 %v23036_v59, %v15238_v9 }
 0xa06   : > { %v11310_v39 = vpop.f32.mrf.mxu2 }
 0xa07   : > { %v11590_v32 = vadd.f32 %v11310_v39, %v10008_v38  ;;  %v13376_v11 = vpop.f32.mrf.mxu3 }
 0xa08   : > { %v9731_v24 = vpop.f32.mrf.mxu1 }
 0xa09   : > { %v13656_v48 = vadd.f32 %v13376_v11, %v11590_v32  ;;  %v14962_v60 = vpop.f32.mrf.mxu0  ;;  %v10009_v26 = vadd.f32 %v9731_v24, %v23635_v50 }
 0xa0b   : > { %v15239_v44 = vadd.f32 %v14959_v56, %v13656_v48 }
 0xa0d   : > { %v15651_v7 = vadd.f32 %v23036_v59, %v15239_v44 }
 0xa0e   : > { %v11313_v30 = vpop.f32.mrf.mxu2 }
 0xa0f   : > { %v20014_v33 = vpack.c.bf16 %v15651_v7, %v15650_v18  ;;  %v13379_v25 = vpop.f32.mrf.mxu3  ;;  %v11591_v3 = vadd.f32 %v11313_v30, %v10009_v26 }
 0xa10   : > { %v9733_v0 = vpop.f32.mrf.mxu1 }
 0xa11   : > { %20090 = vst [vmem:[%s22137_s6 + $0x208] sm:$0xff] %v20014_v33   ;;  %v13657_v14 = vadd.f32 %v13379_v25, %v11591_v3  ;;  %v10010_v58 = vadd.f32 %v9733_v0, %v23636_v8  ;;  %v14964_v45 = vpop.f32.mrf.mxu0 }
 0xa13   : > { %v15240_v2 = vadd.f32 %v14962_v60, %v13657_v14 }
 0xa15   : > { %v15652_v43 = vadd.f32 %v23036_v59, %v15240_v2 }
 0xa16   : > { %v11315_v55 = vpop.f32.mrf.mxu2 }
 0xa17   : > { %v11592_v52 = vadd.f32 %v11315_v55, %v10010_v58  ;;  %v13381_v46 = vpop.f32.mrf.mxu3 }
 0xa18   : > { %v9736_v12 = vpop.f32.mrf.mxu1 }
 0xa19   : > { %v13658_v31 = vadd.f32 %v13381_v46, %v11592_v52  ;;  %v10011_v22 = vadd.f32 %v9736_v12, %v22087_v21  ;;  %v14967_v29 = vpop.f32.mrf.mxu0 }
 0xa1b   : > { %v15241_v35 = vadd.f32 %v14964_v45, %v13658_v31 }
 0xa1d   : > { %v15653_v20 = vadd.f32 %v23036_v59, %v15241_v35 }
 0xa1e   : > { %v11318_v17 = vpop.f32.mrf.mxu2 }
 0xa1f   : > { %v20019_v28 = vpack.c.bf16 %v15653_v20, %v15652_v43  ;;  %v13384_v36 = vpop.f32.mrf.mxu3  ;;  %v11593_v34 = vadd.f32 %v11318_v17, %v10011_v22 }
 0xa20   : > { %v9738_v6 = vpop.f32.mrf.mxu1 }
 0xa21   : > { %20091 = vst [vmem:[%s22137_s6 + $0x210] sm:$0xff] %v20019_v28   ;;  %v13659_v27 = vadd.f32 %v13384_v36, %v11593_v34  ;;  %v10012_v16 = vadd.f32 %v9738_v6, %v23637_v10  ;;  %v14969_v42 = vpop.f32.mrf.mxu0 }
 0xa23   : > { %v15242_v21 = vadd.f32 %v14967_v29, %v13659_v27 }
 0xa25   : > { %v15654_v51 = vadd.f32 %v23036_v59, %v15242_v21 }
 0xa26   : > { %v11320_v40 = vpop.f32.mrf.mxu2 }
 0xa27   : > { %v11594_v54 = vadd.f32 %v11320_v40, %v10012_v16  ;;  %v13386_v63 = vpop.f32.mrf.mxu3 }
 0xa29   : > { %v13660_v23 = vadd.f32 %v13386_v63, %v11594_v54 }
 0xa2b   : > { %v15243_v61 = vadd.f32 %v14969_v42, %v13660_v23 }
 0xa2d   : > { %v15655_v47 = vadd.f32 %v23036_v59, %v15243_v61 }
 0xa2f   : > { %v20024_v5 = vpack.c.bf16 %v15655_v47, %v15654_v51 }
 0xa31   : > { %20092 = vst [vmem:[%s22137_s6 + $0x218] sm:$0xff] %v20024_v5  }
 0xa32   : > { %20172 = shalt.err (!%p20169_p3)
}
 0xa33   : > { %s20209_s29 = smov 64   ;;  %s20210_s6 = smov 4  }
 0xa34   : > { %20099 = dma.vmem_to_hbm [thread:$0]  (%p20269_p5), %s15942_s28, 8704, %s15944_s30, %s15929_s16, %s20209_s29, %s20209_s29, %s20210_s6  }
 0xa35 PF: > { %p20105_p4 = scmp.ge.s32.totalorder %s20207_s15, 2  ;;  %s15958_s19 = sand.u32 1, %s20195_s12  }
 0xa36   : > { %s15959_s20 = scalar_lea.sflag [#allocation4], %s15958_s19 }
 0xa37   : > { %p20102_p7 = pnand %p20105_p4, %p20273_p6 }
 0xa39   : > { %p20103_p8 = pneg %p20102_p7 }
 0xa3b   : > { %20190 = dma.done.wait (%p20103_p8), %s15959_s20, 8704  }
 0xa3c   : > { %20192 = vsyncadd (%p20103_p8), %s15959_s20, 4294958592  ;;  %p13_p9 = scmp.ge.s32.totalorder %s20256_s18, 4   ;;  %s23638_s12 = smov %s20199_s13 }
 0xa3d   : > { %s23639_s13 = smov %s20203_s14  ;;  %s23640_s14 = smov %s20267_s21 }
 0xa3e   : > { %s23641_s15 = smov %s20256_s18  ;;  %15 = sbr.rel (!%p13_p9) target bundleno = 3 (0x3), region = 67 }
 0xa43   :  { %15965 = vsyncpa [#allocation4], 1 }
 0xa44   :  { %15967 = vsyncpa [#allocation4 + $0x1], 1 }

</bundles_post_ra>
